<compile_context>
chip_gen: v5e
topology: v5e:2x2
jax: 0.10.0
libtpu: 0.0.40
codegen_flags: <defaults>
</compile_context>

<pallas_src>
import jax
import jax.numpy as jnp
from jax import lax
from jax.experimental import pallas as pl
from jax.experimental.pallas import tpu as pltpu

NOISE_DIM = 100
NOISE_PAD = 128            # lane-aligned K for the first matmul
H1, H2, H3 = 256, 512, 1024
OUT_DIM = 28 * 28          # 784
OUT_PAD = 896              # 7 * 128, lane-dense output width
BN_EPS = 0.8
LRELU_SLOPE = 0.2


def _leaky_relu(h):
    return jnp.where(h > 0, h, LRELU_SLOPE * h)


def _batchnorm_train(h, gamma, beta):
    # training-mode BatchNorm1d: batch mean + biased variance over axis 0
    mean = jnp.mean(h, axis=0, keepdims=True)
    var = jnp.mean((h - mean) * (h - mean), axis=0, keepdims=True)
    inv = lax.rsqrt(var + BN_EPS)
    return (h - mean) * inv * gamma + beta


def generator_kernel(
    x_ref,
    w1_ref, b1_ref,
    w2_ref, b2_ref, g2_ref, be2_ref,
    w3_hbm, b3_ref, g3_ref, be3_ref,
    w4_hbm, b4_ref,
    o_ref,
    w3_vmem, w4_vmem, dma_sem,
):
    # Kick off prefetch of the two big weight matrices so their HBM->VMEM DMA
    # overlaps with block-1/2 compute.
    w3_cp = pltpu.make_async_copy(w3_hbm, w3_vmem, dma_sem.at[0])
    w4_cp = pltpu.make_async_copy(w4_hbm, w4_vmem, dma_sem.at[1])
    w3_cp.start()
    w4_cp.start()

    x = x_ref[...]  # bf16, (B, 128) zero-padded noise

    # block 1: Linear(100->128,256) + LeakyReLU (no norm)
    h = jnp.dot(x, w1_ref[...], preferred_element_type=jnp.float32) + b1_ref[...]
    h = _leaky_relu(h)

    # block 2: Linear(256,512) + BatchNorm1d(512, eps=0.8) + LeakyReLU
    h = jnp.dot(h.astype(jnp.bfloat16), w2_ref[...],
                preferred_element_type=jnp.float32) + b2_ref[...]
    h = _batchnorm_train(h, g2_ref[...], be2_ref[...])
    h = _leaky_relu(h)

    # block 3: Linear(512,1024) + BatchNorm1d(1024, eps=0.8) + LeakyReLU
    w3_cp.wait()
    h = jnp.dot(h.astype(jnp.bfloat16), w3_vmem[...],
                preferred_element_type=jnp.float32) + b3_ref[...]
    h = _batchnorm_train(h, g3_ref[...], be3_ref[...])
    h = _leaky_relu(h)

    # head: Linear(1024,784->896) + Tanh
    w4_cp.wait()
    h = jnp.dot(h.astype(jnp.bfloat16), w4_vmem[...],
                preferred_element_type=jnp.float32) + b4_ref[...]
    o_ref[...] = jnp.tanh(h).astype(o_ref.dtype)


def init_params(key):
    """Deterministic PyTorch-style init: U(-1/sqrt(fan_in), 1/sqrt(fan_in))."""
    dims = [(NOISE_DIM, H1), (H1, H2), (H2, H3), (H3, OUT_DIM)]
    params = {}
    keys = jax.random.split(key, 2 * len(dims))
    for i, (fin, fout) in enumerate(dims):
        bound = 1.0 / jnp.sqrt(fin)
        params[f"w{i+1}"] = jax.random.uniform(
            keys[2 * i], (fin, fout), jnp.float32, -bound, bound)
        params[f"b{i+1}"] = jax.random.uniform(
            keys[2 * i + 1], (1, fout), jnp.float32, -bound, bound)
    # BatchNorm affine params: weight=1, bias=0 (PyTorch default)
    params["g2"] = jnp.ones((1, H2), jnp.float32)
    params["be2"] = jnp.zeros((1, H2), jnp.float32)
    params["g3"] = jnp.ones((1, H3), jnp.float32)
    params["be3"] = jnp.zeros((1, H3), jnp.float32)
    return params


def pack_params(params):
    """Pad ragged dims to lane multiples and cast weights to bf16."""
    p = dict(params)
    w1 = jnp.pad(params["w1"], ((0, NOISE_PAD - NOISE_DIM), (0, 0)))
    w4 = jnp.pad(params["w4"], ((0, 0), (0, OUT_PAD - OUT_DIM)))
    b4 = jnp.pad(params["b4"], ((0, 0), (0, OUT_PAD - OUT_DIM)))
    p["w1"] = w1.astype(jnp.bfloat16)
    p["w2"] = params["w2"].astype(jnp.bfloat16)
    p["w3"] = params["w3"].astype(jnp.bfloat16)
    p["w4"] = w4.astype(jnp.bfloat16)
    p["b4"] = b4
    return p


def generator_forward(x, packed):
    B = x.shape[0]
    # zero-pad noise 100 -> 128 (zeros contribute nothing to the matmul)
    x_pad = jnp.pad(x, ((0, 0), (0, NOISE_PAD - NOISE_DIM))).astype(jnp.bfloat16)

    args = (
        x_pad,
        packed["w1"], packed["b1"],
        packed["w2"], packed["b2"], packed["g2"], packed["be2"],
        packed["w3"], packed["b3"], packed["g3"], packed["be3"],
        packed["w4"], packed["b4"],
    )

    vmem = pl.BlockSpec(memory_space=pltpu.MemorySpace.VMEM)
    hbm = pl.BlockSpec(memory_space=pl.ANY)   # manually prefetched in kernel
    in_specs = [
        vmem,                      # x
        vmem, vmem,                # w1, b1
        vmem, vmem, vmem, vmem,    # w2, b2, g2, be2
        hbm, vmem, vmem, vmem,     # w3 (HBM, prefetched), b3, g3, be3
        hbm, vmem,                 # w4 (HBM, prefetched), b4
    ]

    flat = pl.pallas_call(
        generator_kernel,
        out_shape=jax.ShapeDtypeStruct((B, OUT_PAD), jnp.float32),
        in_specs=in_specs,
        out_specs=vmem,
        scratch_shapes=[
            pltpu.VMEM((H2, H3), jnp.bfloat16),       # w3 staging
            pltpu.VMEM((H3, OUT_PAD), jnp.bfloat16),  # w4 staging
            pltpu.SemaphoreType.DMA((2,)),
        ],
        compiler_params=pltpu.CompilerParams(vmem_limit_bytes=32 << 20),
    )(*args)

    # drop the lane padding, then match PyTorch: imgs.view(-1, 1, 28, 28)
    return flat[:, :OUT_DIM].reshape(B, 1, 28, 28)


if __name__ == "__main__":
    key = jax.random.PRNGKey(0)
    pkey, xkey = jax.random.split(key)
    params = init_params(pkey)
    packed = pack_params(params)

    batch = 8
    x = jax.random.normal(xkey, (batch, NOISE_DIM), jnp.float32)

    imgs = generator_forward(x, packed)
    jax.block_until_ready(imgs)
    assert imgs.shape == (batch, 1, 28, 28), imgs.shape
    print("KERNEL_OK")
</pallas_src>

<mosaic_0001>
module attributes {stable_mosaic.version = 11 : i64} {
  func.func @generator_kernel(%arg0: memref<8x128xbf16, #tpu.memory_space<vmem>>, %arg1: memref<128x256xbf16, #tpu.memory_space<vmem>>, %arg2: memref<1x256xf32, #tpu.memory_space<vmem>>, %arg3: memref<256x512xbf16, #tpu.memory_space<vmem>>, %arg4: memref<1x512xf32, #tpu.memory_space<vmem>>, %arg5: memref<1x512xf32, #tpu.memory_space<vmem>>, %arg6: memref<1x512xf32, #tpu.memory_space<vmem>>, %arg7: memref<512x1024xbf16, #tpu.memory_space<any>>, %arg8: memref<1x1024xf32, #tpu.memory_space<vmem>>, %arg9: memref<1x1024xf32, #tpu.memory_space<vmem>>, %arg10: memref<1x1024xf32, #tpu.memory_space<vmem>>, %arg11: memref<1024x896xbf16, #tpu.memory_space<any>>, %arg12: memref<1x896xf32, #tpu.memory_space<vmem>>, %arg13: memref<8x896xf32, #tpu.memory_space<vmem>>, %arg14: memref<512x1024xbf16, #tpu.memory_space<vmem>>, %arg15: memref<1024x896xbf16, #tpu.memory_space<vmem>>, %arg16: memref<2x!tpu.dma_semaphore, #tpu.memory_space<semaphore_mem>>) attributes {dimension_semantics = [], scalar_prefetch = 0 : i64, scratch_operands = 3 : i64, tpu.core_type = #tpu.core_type<tc>} {
    %c0_i32 = arith.constant 0 : i32
    %0 = tpu.memref_slice %arg16[%c0_i32] : memref<2x!tpu.dma_semaphore, #tpu.memory_space<semaphore_mem>> -> memref<1x!tpu.dma_semaphore, #tpu.memory_space<semaphore_mem>>
    %1 = tpu.memref_squeeze %0 : memref<1x!tpu.dma_semaphore, #tpu.memory_space<semaphore_mem>> -> memref<!tpu.dma_semaphore, #tpu.memory_space<semaphore_mem>>
    tpu.enqueue_dma source(%arg7 : memref<512x1024xbf16, #tpu.memory_space<any>>) target(%arg14 : memref<512x1024xbf16, #tpu.memory_space<vmem>>) target_semaphore(%1 : memref<!tpu.dma_semaphore, #tpu.memory_space<semaphore_mem>>)
    %c1_i32 = arith.constant 1 : i32
    %2 = tpu.memref_slice %arg16[%c1_i32] : memref<2x!tpu.dma_semaphore, #tpu.memory_space<semaphore_mem>> -> memref<1x!tpu.dma_semaphore, #tpu.memory_space<semaphore_mem>>
    %3 = tpu.memref_squeeze %2 : memref<1x!tpu.dma_semaphore, #tpu.memory_space<semaphore_mem>> -> memref<!tpu.dma_semaphore, #tpu.memory_space<semaphore_mem>>
    tpu.enqueue_dma source(%arg11 : memref<1024x896xbf16, #tpu.memory_space<any>>) target(%arg15 : memref<1024x896xbf16, #tpu.memory_space<vmem>>) target_semaphore(%3 : memref<!tpu.dma_semaphore, #tpu.memory_space<semaphore_mem>>)
    %c0 = arith.constant 0 : index
    %c0_0 = arith.constant 0 : index
    %4 = vector.load %arg0[%c0, %c0_0] : memref<8x128xbf16, #tpu.memory_space<vmem>>, vector<8x128xbf16>
    %c0_1 = arith.constant 0 : index
    %c0_2 = arith.constant 0 : index
    %5 = vector.load %arg1[%c0_1, %c0_2] : memref<128x256xbf16, #tpu.memory_space<vmem>>, vector<128x256xbf16>
    %cst = arith.constant dense<0.000000e+00> : vector<8x256xf32>
    %6 = tpu.matmul %4, %5, %cst {dimension_numbers = #tpu.dot_dimension_numbers<[1], [0], [0], [1], [0, 0, 1, 1], [], []>} : vector<8x128xbf16>, vector<128x256xbf16>, vector<8x256xf32> -> vector<8x256xf32>
    %c0_3 = arith.constant 0 : index
    %c0_4 = arith.constant 0 : index
    %7 = vector.load %arg2[%c0_3, %c0_4] : memref<1x256xf32, #tpu.memory_space<vmem>>, vector<1x256xf32>
    %8 = vector.broadcast %7 : vector<1x256xf32> to vector<8x256xf32>
    %9 = arith.addf %6, %8 : vector<8x256xf32>
    %cst_5 = arith.constant 0.000000e+00 : f32
    %10 = vector.broadcast %cst_5 : f32 to vector<8x256xf32>
    %11 = arith.cmpf ogt, %9, %10 : vector<8x256xf32>
    %cst_6 = arith.constant 2.000000e-01 : f32
    %12 = vector.broadcast %cst_6 : f32 to vector<8x256xf32>
    %13 = arith.mulf %12, %9 : vector<8x256xf32>
    %14 = arith.select %11, %9, %13 : vector<8x256xi1>, vector<8x256xf32>
    %15 = arith.truncf %14 : vector<8x256xf32> to vector<8x256xbf16>
    %c0_7 = arith.constant 0 : index
    %c0_8 = arith.constant 0 : index
    %16 = vector.load %arg3[%c0_7, %c0_8] : memref<256x512xbf16, #tpu.memory_space<vmem>>, vector<256x512xbf16>
    %cst_9 = arith.constant dense<0.000000e+00> : vector<8x512xf32>
    %17 = tpu.matmul %15, %16, %cst_9 {dimension_numbers = #tpu.dot_dimension_numbers<[1], [0], [0], [1], [0, 0, 1, 1], [], []>} : vector<8x256xbf16>, vector<256x512xbf16>, vector<8x512xf32> -> vector<8x512xf32>
    %c0_10 = arith.constant 0 : index
    %c0_11 = arith.constant 0 : index
    %18 = vector.load %arg4[%c0_10, %c0_11] : memref<1x512xf32, #tpu.memory_space<vmem>>, vector<1x512xf32>
    %19 = vector.broadcast %18 : vector<1x512xf32> to vector<8x512xf32>
    %20 = arith.addf %17, %19 : vector<8x512xf32>
    %c0_12 = arith.constant 0 : index
    %c0_13 = arith.constant 0 : index
    %21 = vector.load %arg5[%c0_12, %c0_13] : memref<1x512xf32, #tpu.memory_space<vmem>>, vector<1x512xf32>
    %c0_14 = arith.constant 0 : index
    %c0_15 = arith.constant 0 : index
    %22 = vector.load %arg6[%c0_14, %c0_15] : memref<1x512xf32, #tpu.memory_space<vmem>>, vector<1x512xf32>
    %cst_16 = arith.constant dense<0.000000e+00> : vector<512xf32>
    %23 = vector.multi_reduction <add>, %20, %cst_16 [0] : vector<8x512xf32> to vector<512xf32>
    %24 = vector.shape_cast %23 : vector<512xf32> to vector<1x512xf32>
    %cst_17 = arith.constant 8.000000e+00 : f32
    %25 = vector.broadcast %cst_17 : f32 to vector<1x512xf32>
    %26 = arith.divf %24, %25 : vector<1x512xf32>
    %27 = vector.broadcast %26 : vector<1x512xf32> to vector<8x512xf32>
    %28 = arith.subf %20, %27 : vector<8x512xf32>
    %29 = vector.broadcast %26 : vector<1x512xf32> to vector<8x512xf32>
    %30 = arith.subf %20, %29 : vector<8x512xf32>
    %31 = arith.mulf %28, %30 : vector<8x512xf32>
    %cst_18 = arith.constant dense<0.000000e+00> : vector<512xf32>
    %32 = vector.multi_reduction <add>, %31, %cst_18 [0] : vector<8x512xf32> to vector<512xf32>
    %33 = vector.shape_cast %32 : vector<512xf32> to vector<1x512xf32>
    %cst_19 = arith.constant 8.000000e+00 : f32
    %34 = vector.broadcast %cst_19 : f32 to vector<1x512xf32>
    %35 = arith.divf %33, %34 : vector<1x512xf32>
    %cst_20 = arith.constant 8.000000e-01 : f32
    %36 = vector.broadcast %cst_20 : f32 to vector<1x512xf32>
    %37 = arith.addf %35, %36 : vector<1x512xf32>
    %38 = math.rsqrt %37 : vector<1x512xf32>
    %39 = vector.broadcast %26 : vector<1x512xf32> to vector<8x512xf32>
    %40 = arith.subf %20, %39 : vector<8x512xf32>
    %41 = vector.broadcast %38 : vector<1x512xf32> to vector<8x512xf32>
    %42 = arith.mulf %40, %41 : vector<8x512xf32>
    %43 = vector.broadcast %21 : vector<1x512xf32> to vector<8x512xf32>
    %44 = arith.mulf %42, %43 : vector<8x512xf32>
    %45 = vector.broadcast %22 : vector<1x512xf32> to vector<8x512xf32>
    %46 = arith.addf %44, %45 : vector<8x512xf32>
    %cst_21 = arith.constant 0.000000e+00 : f32
    %47 = vector.broadcast %cst_21 : f32 to vector<8x512xf32>
    %48 = arith.cmpf ogt, %46, %47 : vector<8x512xf32>
    %cst_22 = arith.constant 2.000000e-01 : f32
    %49 = vector.broadcast %cst_22 : f32 to vector<8x512xf32>
    %50 = arith.mulf %49, %46 : vector<8x512xf32>
    %51 = arith.select %48, %46, %50 : vector<8x512xi1>, vector<8x512xf32>
    %c0_i32_23 = arith.constant 0 : i32
    %52 = tpu.memref_slice %arg16[%c0_i32_23] : memref<2x!tpu.dma_semaphore, #tpu.memory_space<semaphore_mem>> -> memref<1x!tpu.dma_semaphore, #tpu.memory_space<semaphore_mem>>
    %53 = tpu.memref_squeeze %52 : memref<1x!tpu.dma_semaphore, #tpu.memory_space<semaphore_mem>> -> memref<!tpu.dma_semaphore, #tpu.memory_space<semaphore_mem>>
    tpu.wait_dma2 semaphore(%53 : memref<!tpu.dma_semaphore, #tpu.memory_space<semaphore_mem>>) src(%arg7 : memref<512x1024xbf16, #tpu.memory_space<any>>) dst(%arg14 : memref<512x1024xbf16, #tpu.memory_space<vmem>>)
    %54 = arith.truncf %51 : vector<8x512xf32> to vector<8x512xbf16>
    %c0_24 = arith.constant 0 : index
    %c0_25 = arith.constant 0 : index
    %55 = vector.load %arg14[%c0_24, %c0_25] : memref<512x1024xbf16, #tpu.memory_space<vmem>>, vector<512x1024xbf16>
    %cst_26 = arith.constant dense<0.000000e+00> : vector<8x1024xf32>
    %56 = tpu.matmul %54, %55, %cst_26 {dimension_numbers = #tpu.dot_dimension_numbers<[1], [0], [0], [1], [0, 0, 1, 1], [], []>} : vector<8x512xbf16>, vector<512x1024xbf16>, vector<8x1024xf32> -> vector<8x1024xf32>
    %c0_27 = arith.constant 0 : index
    %c0_28 = arith.constant 0 : index
    %57 = vector.load %arg8[%c0_27, %c0_28] : memref<1x1024xf32, #tpu.memory_space<vmem>>, vector<1x1024xf32>
    %58 = vector.broadcast %57 : vector<1x1024xf32> to vector<8x1024xf32>
    %59 = arith.addf %56, %58 : vector<8x1024xf32>
    %c0_29 = arith.constant 0 : index
    %c0_30 = arith.constant 0 : index
    %60 = vector.load %arg9[%c0_29, %c0_30] : memref<1x1024xf32, #tpu.memory_space<vmem>>, vector<1x1024xf32>
    %c0_31 = arith.constant 0 : index
    %c0_32 = arith.constant 0 : index
    %61 = vector.load %arg10[%c0_31, %c0_32] : memref<1x1024xf32, #tpu.memory_space<vmem>>, vector<1x1024xf32>
    %cst_33 = arith.constant dense<0.000000e+00> : vector<1024xf32>
    %62 = vector.multi_reduction <add>, %59, %cst_33 [0] : vector<8x1024xf32> to vector<1024xf32>
    %63 = vector.shape_cast %62 : vector<1024xf32> to vector<1x1024xf32>
    %cst_34 = arith.constant 8.000000e+00 : f32
    %64 = vector.broadcast %cst_34 : f32 to vector<1x1024xf32>
    %65 = arith.divf %63, %64 : vector<1x1024xf32>
    %66 = vector.broadcast %65 : vector<1x1024xf32> to vector<8x1024xf32>
    %67 = arith.subf %59, %66 : vector<8x1024xf32>
    %68 = vector.broadcast %65 : vector<1x1024xf32> to vector<8x1024xf32>
    %69 = arith.subf %59, %68 : vector<8x1024xf32>
    %70 = arith.mulf %67, %69 : vector<8x1024xf32>
    %cst_35 = arith.constant dense<0.000000e+00> : vector<1024xf32>
    %71 = vector.multi_reduction <add>, %70, %cst_35 [0] : vector<8x1024xf32> to vector<1024xf32>
    %72 = vector.shape_cast %71 : vector<1024xf32> to vector<1x1024xf32>
    %cst_36 = arith.constant 8.000000e+00 : f32
    %73 = vector.broadcast %cst_36 : f32 to vector<1x1024xf32>
    %74 = arith.divf %72, %73 : vector<1x1024xf32>
    %cst_37 = arith.constant 8.000000e-01 : f32
    %75 = vector.broadcast %cst_37 : f32 to vector<1x1024xf32>
    %76 = arith.addf %74, %75 : vector<1x1024xf32>
    %77 = math.rsqrt %76 : vector<1x1024xf32>
    %78 = vector.broadcast %65 : vector<1x1024xf32> to vector<8x1024xf32>
    %79 = arith.subf %59, %78 : vector<8x1024xf32>
    %80 = vector.broadcast %77 : vector<1x1024xf32> to vector<8x1024xf32>
    %81 = arith.mulf %79, %80 : vector<8x1024xf32>
    %82 = vector.broadcast %60 : vector<1x1024xf32> to vector<8x1024xf32>
    %83 = arith.mulf %81, %82 : vector<8x1024xf32>
    %84 = vector.broadcast %61 : vector<1x1024xf32> to vector<8x1024xf32>
    %85 = arith.addf %83, %84 : vector<8x1024xf32>
    %cst_38 = arith.constant 0.000000e+00 : f32
    %86 = vector.broadcast %cst_38 : f32 to vector<8x1024xf32>
    %87 = arith.cmpf ogt, %85, %86 : vector<8x1024xf32>
    %cst_39 = arith.constant 2.000000e-01 : f32
    %88 = vector.broadcast %cst_39 : f32 to vector<8x1024xf32>
    %89 = arith.mulf %88, %85 : vector<8x1024xf32>
    %90 = arith.select %87, %85, %89 : vector<8x1024xi1>, vector<8x1024xf32>
    %c1_i32_40 = arith.constant 1 : i32
    %91 = tpu.memref_slice %arg16[%c1_i32_40] : memref<2x!tpu.dma_semaphore, #tpu.memory_space<semaphore_mem>> -> memref<1x!tpu.dma_semaphore, #tpu.memory_space<semaphore_mem>>
    %92 = tpu.memref_squeeze %91 : memref<1x!tpu.dma_semaphore, #tpu.memory_space<semaphore_mem>> -> memref<!tpu.dma_semaphore, #tpu.memory_space<semaphore_mem>>
    tpu.wait_dma2 semaphore(%92 : memref<!tpu.dma_semaphore, #tpu.memory_space<semaphore_mem>>) src(%arg11 : memref<1024x896xbf16, #tpu.memory_space<any>>) dst(%arg15 : memref<1024x896xbf16, #tpu.memory_space<vmem>>)
    %93 = arith.truncf %90 : vector<8x1024xf32> to vector<8x1024xbf16>
    %c0_41 = arith.constant 0 : index
    %c0_42 = arith.constant 0 : index
    %94 = vector.load %arg15[%c0_41, %c0_42] : memref<1024x896xbf16, #tpu.memory_space<vmem>>, vector<1024x896xbf16>
    %cst_43 = arith.constant dense<0.000000e+00> : vector<8x896xf32>
    %95 = tpu.matmul %93, %94, %cst_43 {dimension_numbers = #tpu.dot_dimension_numbers<[1], [0], [0], [1], [0, 0, 1, 1], [], []>} : vector<8x1024xbf16>, vector<1024x896xbf16>, vector<8x896xf32> -> vector<8x896xf32>
    %c0_44 = arith.constant 0 : index
    %c0_45 = arith.constant 0 : index
    %96 = vector.load %arg12[%c0_44, %c0_45] : memref<1x896xf32, #tpu.memory_space<vmem>>, vector<1x896xf32>
    %97 = vector.broadcast %96 : vector<1x896xf32> to vector<8x896xf32>
    %98 = arith.addf %95, %97 : vector<8x896xf32>
    %99 = math.tanh %98 : vector<8x896xf32>
    %c0_46 = arith.constant 0 : index
    %c0_47 = arith.constant 0 : index
    %100 = vector.load %arg13[%c0_46, %c0_47] : memref<8x896xf32, #tpu.memory_space<vmem>>, vector<8x896xf32>
    tpu.vector_store %arg13[%c0_46, %c0_47], %99 {strides = array<i32>} : memref<8x896xf32, #tpu.memory_space<vmem>>, vector<8x896xf32>,
    return
  }
}

</mosaic_0001>

<bundles_post_ra>
// kernel: tpu_custom_call.1
= control target key start
LH: loop header
LB: loop body
LE: loop exit
PB: predicated region body
PF: predicated region fallthrough
CT: control target
= control target key end

     0   :  { %18 = vsyncpa [#allocation6], 0  ;;  %s11756_s0 = inlined_call_operand.hbm [shape: bf16[8,128], index: 0, kind: input, shape index: {}]   ;;  %s11757_s1 = inlined_call_operand.hbm [shape: bf16[128,256], index: 1, kind: input, shape index: {}]   ;;  %s11758_s2 = inlined_call_operand.hbm [shape: f32[1,256], index: 2, kind: input, shape index: {}]   ;;  %s11759_s3 = inlined_call_operand.hbm [shape: bf16[256,512], index: 3, kind: input, shape index: {}]   ;;  %s11760_s4 = inlined_call_operand.hbm [shape: f32[1,512], index: 4, kind: input, shape index: {}]   ;;  %s11761_s5 = inlined_call_operand.hbm [shape: f32[1,512], index: 5, kind: input, shape index: {}]   ;;  %s11762_s6 = inlined_call_operand.hbm [shape: f32[1,512], index: 6, kind: input, shape index: {}]   ;;  %s11763_s7 = inlined_call_operand.hbm [shape: bf16[512,1024], index: 7, kind: input, shape index: {}]   ;;  %s11764_s8 = inlined_call_operand.hbm [shape: f32[1,1024], index: 8, kind: input, shape index: {}]   ;;  %s11765_s9 = inlined_call_operand.hbm [shape: f32[1,1024], index: 9, kind: input, shape index: {}]   ;;  %s11766_s10 = inlined_call_operand.hbm [shape: f32[1,1024], index: 10, kind: input, shape index: {}]   ;;  %s11767_s11 = inlined_call_operand.hbm [shape: bf16[1024,896], index: 11, kind: input, shape index: {}]   ;;  %s11768_s12 = inlined_call_operand.hbm [shape: f32[1,896], index: 12, kind: input, shape index: {}]   ;;  %s11769_s13 = inlined_call_operand.hbm [shape: f32[8,896], index: 13, kind: output, shape index: {}]  }
   0x1   :  { %19 = vsyncpa [#allocation9], 0 }
   0x2   :  { %20 = vsyncpa [#allocation12], 0 }
   0x3   :  { %21 = vsyncpa [#allocation15], 0 }
   0x4   :  { %22 = vsyncpa [#allocation18], 0 }
   0x5   :  { %23 = vsyncpa [#allocation21], 0  ;;  %s40_s27 = sshll.u32 %s11757_s1, 4  ;;  %s41_s27 = int_to_ptr.hbm [resolvable:$true] %s40_s27 }
   0x6   :  { %24 = vsyncpa [#allocation7], 0  ;;  %s11252_s28 = smov [#allocation8]   ;;  %s64_s15 = sshll.u32 %s11759_s3, 4  ;;  %s65_s15 = int_to_ptr.hbm [resolvable:$true] %s64_s15 }
   0x7   :  { %s42_s29 = sshll.u32 %s11252_s28, 4  ;;  %s11253_s16 = smov 128   ;;  %s43_s29 = int_to_ptr.vmem [resolvable:$true] %s42_s29 }
   0x8   :  { %s11254_s17 = smov 8   ;;  %s11255_s18 = smov [#allocation11]  }
   0x9   :  { %48 = dma.hbm_to_vmem [thread:$0]  %s41_s27, 2048, %s43_s29, [#allocation9], %s11253_s16, %s11253_s16, %s11254_s17  }
   0xa   :  { %s66_s19 = sshll.u32 %s11255_s18, 4  ;;  %s11256_s20 = smov 256   ;;  %s67_s19 = int_to_ptr.vmem [resolvable:$true] %s66_s19 }
   0xb   :  { %s11257_s21 = smov 16   ;;  %s89_s23 = sshll.u32 %s11761_s5, 4  ;;  %s90_s23 = int_to_ptr.hbm [resolvable:$true] %s89_s23 }
   0xc   :  { %72 = dma.hbm_to_vmem [thread:$0]  %s65_s15, 8192, %s67_s19, [#allocation12], %s11256_s20, %s11256_s20, %s11257_s21  }
   0xd   :  { %s11258_s24 = smov [#allocation14]   ;;  %s111_s28 = sshll.u32 %s11764_s8, 4  ;;  %s112_s28 = int_to_ptr.hbm [resolvable:$true] %s111_s28 }
   0xe   :  { %s91_s25 = sshll.u32 %s11258_s24, 4  ;;  %s11259_s27 = smov [#allocation17]   ;;  %s92_s25 = int_to_ptr.vmem [resolvable:$true] %s91_s25 }
   0xf   :  { %94 = dma.hbm_to_vmem [thread:$0]  %s90_s23, 64, %s92_s25, [#allocation15]  }
  0x10   :  { %s113_s29 = sshll.u32 %s11259_s27, 4  ;;  %s133_s15 = sshll.u32 %s11766_s10, 4  ;;  %s114_s29 = int_to_ptr.vmem [resolvable:$true] %s113_s29  ;;  %s134_s15 = int_to_ptr.hbm [resolvable:$true] %s133_s15 }
  0x11   :  { %116 = dma.hbm_to_vmem [thread:$0]  %s112_s28, 128, %s114_s29, [#allocation18]  }
  0x12   :  { %s30_s17 = sshll.u32 %s11756_s0, 4  ;;  %s11260_s18 = smov [#allocation20]   ;;  %s31_s17 = int_to_ptr.hbm [resolvable:$true] %s30_s17 }
  0x13   :  { %s135_s19 = sshll.u32 %s11260_s18, 4  ;;  %s11261_s8 = smov [#allocation5]   ;;  %s136_s19 = int_to_ptr.vmem [resolvable:$true] %s135_s19 }
  0x14   :  { %138 = dma.hbm_to_vmem [thread:$0]  %s134_s15, 128, %s136_s19, [#allocation21]  }
  0x15   :  { %s32_s20 = sshll.u32 %s11261_s8, 4  ;;  %s54_s22 = sshll.u32 %s11758_s2, 4  ;;  %s33_s20 = int_to_ptr.vmem [resolvable:$true] %s32_s20  ;;  %s55_s22 = int_to_ptr.hbm [resolvable:$true] %s54_s22 }
  0x16   :  { %35 = dma.hbm_to_vmem [thread:$0]  %s31_s17, 64, %s33_s20, [#allocation6]  }
  0x17   :  { %s78_s24 = sshll.u32 %s11760_s4, 4  ;;  %s11262_s25 = smov [#allocation10]   ;;  %s79_s24 = int_to_ptr.hbm [resolvable:$true] %s78_s24 }
  0x18   :  { %s56_s0 = sshll.u32 %s11262_s25, 4  ;;  %s11263_s26 = smov [#allocation13]   ;;  %s57_s0 = int_to_ptr.vmem [resolvable:$true] %s56_s0 }
  0x19   :  { %59 = dma.hbm_to_vmem [thread:$0]  %s55_s22, 32, %s57_s0, [#allocation9]  }
  0x1a   :  { %s80_s3 = sshll.u32 %s11263_s26, 4  ;;  %s100_s29 = sshll.u32 %s11762_s6, 4  ;;  %s81_s3 = int_to_ptr.vmem [resolvable:$true] %s80_s3  ;;  %s101_s29 = int_to_ptr.hbm [resolvable:$true] %s100_s29 }
  0x1b   :  { %83 = dma.hbm_to_vmem [thread:$0]  %s79_s24, 64, %s81_s3, [#allocation12]  }
  0x1c   :  { %s122_s14 = sshll.u32 %s11765_s9, 4  ;;  %s11264_s15 = smov [#allocation16]   ;;  %s123_s14 = int_to_ptr.hbm [resolvable:$true] %s122_s14 }
  0x1d   :  { %s102_s4 = sshll.u32 %s11264_s15, 4  ;;  %s11265_s5 = smov [#allocation19]   ;;  %s103_s4 = int_to_ptr.vmem [resolvable:$true] %s102_s4 }
  0x1e   :  { %105 = dma.hbm_to_vmem [thread:$0]  %s101_s29, 64, %s103_s4, [#allocation15]  }
  0x1f   :  { %s124_s16 = sshll.u32 %s11265_s5, 4  ;;  %s144_s19 = sshll.u32 %s11768_s12, 4  ;;  %s125_s16 = int_to_ptr.vmem [resolvable:$true] %s124_s16  ;;  %s145_s19 = int_to_ptr.hbm [resolvable:$true] %s144_s19 }
  0x20   :  { %127 = dma.hbm_to_vmem [thread:$0]  %s123_s14, 128, %s125_s16, [#allocation18]  }
  0x21   :  { %s11266_s6 = smov [#allocation22]  }
  0x22   :  { %s146_s8 = sshll.u32 %s11266_s6, 4  ;;  %s147_s8 = int_to_ptr.vmem [resolvable:$true] %s146_s8 }
  0x23   :  { %149 = dma.hbm_to_vmem [thread:$0]  %s145_s19, 112, %s147_s8, [#allocation21]  }
  0x24   :  { %11234 = dma.done.wait [#allocation6], 64  }
  0x25   :  { %11235 = vsyncadd [#allocation6], 4294967232 }
  0x26   :  { %11236 = dma.done.wait [#allocation9], 2080  }
  0x27   :  { %11237 = vsyncadd [#allocation9], 4294965216 }
  0x28   :  { %11238 = dma.done.wait [#allocation12], 8256  }
  0x29   :  { %11239 = vsyncadd [#allocation12], 4294959040 }
  0x2a   :  { %11240 = dma.done.wait [#allocation15], 128  }
  0x2b   :  { %11241 = vsyncadd [#allocation15], 4294967168 }
  0x2c   :  { %11242 = dma.done.wait [#allocation18], 256  }
  0x2d   :  { %11243 = vsyncadd [#allocation18], 4294967040 }
  0x2e   :  { %11244 = dma.done.wait [#allocation21], 240  }
  0x2f   :  { %11245 = vsyncadd [#allocation21], 4294967056  ;;  %v6972_v0 = vld [vmem:[#allocation8 + $0x70] sm:$0xf]  ;;  %v10067_v1 = vld [vmem:[#allocation8 + $0x74] sm:$0xf0] }
  0x30   :  { %v10066_v2 = vld [vmem:[#allocation8 + $0x74] sm:$0xf]  ;;  %v6973_v3 = vor.u32 %v10067_v1, %v6972_v0  ;;  %v6974_v4 = vld [vmem:[#allocation8 + $0x78] sm:$0xf0]  ;;  %v6964_v5 = vld [vmem:[#allocation8 + $0x60] sm:$0xf] }
  0x31   :  { %v10065_v6 = vld [vmem:[#allocation8 + $0x64] sm:$0xf0]  ;;  %v6977_v7 = vor.u32 %v10066_v2, %v6974_v4  ;;  %v10064_v8 = vld [vmem:[#allocation8 + $0x64] sm:$0xf]  ;;  %v6966_v9 = vld [vmem:[#allocation8 + $0x68] sm:$0xf0] }
  0x32   :  { %324 = vmatpush.bf16.msra.mxu0 %v6973_v3  ;;  %v6965_v10 = vor.u32 %v10065_v6, %v6964_v5  ;;  %v6969_v11 = vor.u32 %v10064_v8, %v6966_v9  ;;  %v6956_v12 = vld [vmem:[#allocation8 + $0x50] sm:$0xf]  ;;  %v10063_v13 = vld [vmem:[#allocation8 + $0x54] sm:$0xf0]  ;;  %v10062_v14 = vld [vmem:[#allocation8 + $0x54] sm:$0xf] }
  0x33   :  { %337 = vmatpush.bf16.msra.mxu1 %v6977_v7  ;;  %v6958_v15 = vld [vmem:[#allocation8 + $0x58] sm:$0xf0]  ;;  %v6957_v16 = vor.u32 %v10063_v13, %v6956_v12  ;;  %v6948_v18 = vld [vmem:[#allocation8 + $0x40] sm:$0xf]  ;;  %v10061_v19 = vld [vmem:[#allocation8 + $0x44] sm:$0xf0] }
  0x34   :  { %v6961_v17 = vor.u32 %v10062_v14, %v6958_v15  ;;  %v10060_v20 = vld [vmem:[#allocation8 + $0x44] sm:$0xf]  ;;  %v6950_v21 = vld [vmem:[#allocation8 + $0x48] sm:$0xf0]  ;;  %v6949_v22 = vor.u32 %v10061_v19, %v6948_v18  ;;  %v10098_v24 = vld [vmem:[#allocation11 + $0xec] sm:$0xf0] }
  0x35   :  { %v7092_v23 = vld [vmem:[#allocation11 + $0xe0] sm:$0xf]  ;;  %v6953_v26 = vor.u32 %v10060_v20, %v6950_v21  ;;  %v6940_v27 = vld [vmem:[#allocation8 + $0x30] sm:$0xf]  ;;  %v10059_v28 = vld [vmem:[#allocation8 + $0x34] sm:$0xf0] }
  0x36   :  { %325 = vmatpush.bf16.msra.mxu0 %v6965_v10  ;;  %v7220_v25 = vld [vmem:[#allocation11 + $0x1e0] sm:$0xf]  ;;  %v7093_v29 = vor.u32 %v10098_v24, %v7092_v23  ;;  %v10130_v30 = vld [vmem:[#allocation11 + $0x1ec] sm:$0xf0]  ;;  %v6942_v32 = vld [vmem:[#allocation8 + $0x38] sm:$0xf0]  ;;  %v6941_v38 = vor.u32 %v10059_v28, %v6940_v27 }
  0x37   :  { %338 = vmatpush.bf16.msra.mxu1 %v6969_v11  ;;  %v10058_v31 = vld [vmem:[#allocation8 + $0x34] sm:$0xf]  ;;  %v7221_v33 = vor.u32 %v10130_v30, %v7220_v25  ;;  %v7076_v34 = vld [vmem:[#allocation11 + $0xc0] sm:$0xf]  ;;  %v10057_v40 = vld [vmem:[#allocation8 + $0x24] sm:$0xf0] }
  0x38   :  { %752 = vmatpush.bf16.msra.mxu2 %v7093_v29  ;;  %v10094_v35 = vld [vmem:[#allocation11 + $0xcc] sm:$0xf0]  ;;  %v7204_v36 = vld [vmem:[#allocation11 + $0x1c0] sm:$0xf]  ;;  %v6945_v43 = vor.u32 %v10058_v31, %v6942_v32  ;;  %v6934_v47 = vld [vmem:[#allocation8 + $0x28] sm:$0xf0] }
  0x39   :  { %v10126_v37 = vld [vmem:[#allocation11 + $0x1cc] sm:$0xf0]  ;;  %v6932_v39 = vld [vmem:[#allocation8 + $0x20] sm:$0xf]  ;;  %765 = vmatpush.bf16.msra.mxu3 %v7221_v33  ;;  %v7077_v41 = vor.u32 %v10094_v35, %v7076_v34  ;;  %v10056_v44 = vld [vmem:[#allocation8 + $0x24] sm:$0xf] }
  0x3a   :  { %326 = vmatpush.bf16.msra.mxu0 %v6957_v16  ;;  %v7205_v42 = vor.u32 %v10126_v37, %v7204_v36  ;;  %v7060_v45 = vld [vmem:[#allocation11 + $0xa0] sm:$0xf]  ;;  %v10090_v46 = vld [vmem:[#allocation11 + $0xac] sm:$0xf0]  ;;  %v6933_v51 = vor.u32 %v10057_v40, %v6932_v39  ;;  %v6937_v56 = vor.u32 %v10056_v44, %v6934_v47  ;;  %v10055_v57 = vld [vmem:[#allocation8 + $0x14] sm:$0xf0] }
  0x3b   :  { %339 = vmatpush.bf16.msra.mxu1 %v6961_v17  ;;  %v7188_v48 = vld [vmem:[#allocation11 + $0x1a0] sm:$0xf]  ;;  %v10122_v49 = vld [vmem:[#allocation11 + $0x1ac] sm:$0xf0]  ;;  %v7061_v50 = vor.u32 %v10090_v46, %v7060_v45  ;;  %v6926_v61 = vld [vmem:[#allocation8 + $0x18] sm:$0xf0] }
  0x3c   :  { %753 = vmatpush.bf16.msra.mxu2 %v7077_v41  ;;  %v6924_v52 = vld [vmem:[#allocation8 + $0x10] sm:$0xf]  ;;  %v7189_v53 = vor.u32 %v10122_v49, %v7188_v48  ;;  %v7044_v54 = vld [vmem:[#allocation11 + $0x80] sm:$0xf]  ;;  %v10054_v60 = vld [vmem:[#allocation8 + $0x14] sm:$0xf] }
  0x3d   :  { %766 = vmatpush.bf16.msra.mxu3 %v7205_v42  ;;  %v10086_v55 = vld [vmem:[#allocation11 + $0x8c] sm:$0xf0]  ;;  %v7172_v58 = vld [vmem:[#allocation11 + $0x180] sm:$0xf]  ;;  %v6925_v0 = vor.u32 %v10055_v57, %v6924_v52  ;;  %v10053_v1 = vld [vmem:[#allocation8 + $0x4] sm:$0xf0]  ;;  %v6929_v5 = vor.u32 %v10054_v60, %v6926_v61 }
  0x3e   :  { %327 = vmatpush.bf16.msra.mxu0 %v6949_v22  ;;  %v10118_v59 = vld [vmem:[#allocation11 + $0x18c] sm:$0xf0]  ;;  %v6916_v62 = vld [vmem:[#allocation8] sm:$0xf]  ;;  %v7045_v63 = vor.u32 %v10086_v55, %v7044_v54  ;;  %v10052_v6 = vld [vmem:[#allocation8 + $0x4] sm:$0xf] }
  0x3f   :  { %340 = vmatpush.bf16.msra.mxu1 %v6953_v26  ;;  %v7173_v2 = vor.u32 %v10118_v59, %v7172_v58  ;;  %v7028_v3 = vld [vmem:[#allocation11 + $0x60] sm:$0xf]  ;;  %v10082_v4 = vld [vmem:[#allocation11 + $0x6c] sm:$0xf0]  ;;  %v6918_v9 = vld [vmem:[#allocation8 + $0x8] sm:$0xf0]  ;;  %v6917_v15 = vor.u32 %v10053_v1, %v6916_v62 }
  0x40   :  { %754 = vmatpush.bf16.msra.mxu2 %v7061_v50  ;;  %v7156_v7 = vld [vmem:[#allocation11 + $0x160] sm:$0xf]  ;;  %v10114_v8 = vld [vmem:[#allocation11 + $0x16c] sm:$0xf0]  ;;  %v10096_v10 = vld [vmem:[#allocation11 + $0xe4] sm:$0xf]  ;;  %v7029_v14 = vor.u32 %v10082_v4, %v7028_v3  ;;  %v6921_v19 = vor.u32 %v10052_v6, %v6918_v9 }
  0x41   :  { %767 = vmatpush.bf16.msra.mxu3 %v7189_v53  ;;  %v7094_v11 = vld [vmem:[#allocation11 + $0xf0] sm:$0xf0]  ;;  %v10128_v12 = vld [vmem:[#allocation11 + $0x1e4] sm:$0xf]  ;;  %v7157_v16 = vor.u32 %v10114_v8, %v7156_v7  ;;  %v7012_v17 = vld [vmem:[#allocation11 + $0x40] sm:$0xf] }
  0x42   :  { %328 = vmatpush.bf16.msra.mxu0 %v6941_v38  ;;  %v7222_v13 = vld [vmem:[#allocation11 + $0x1f0] sm:$0xf0]  ;;  %v10078_v18 = vld [vmem:[#allocation11 + $0x4c] sm:$0xf0]  ;;  %v7097_v20 = vor.u32 %v10096_v10, %v7094_v11  ;;  %v7140_v21 = vld [vmem:[#allocation11 + $0x140] sm:$0xf] }
  0x43   :  { %341 = vmatpush.bf16.msra.mxu1 %v6945_v43  ;;  %v10110_v22 = vld [vmem:[#allocation11 + $0x14c] sm:$0xf0]  ;;  %v7225_v23 = vor.u32 %v10128_v12, %v7222_v13  ;;  %v10092_v24 = vld [vmem:[#allocation11 + $0xc4] sm:$0xf]  ;;  %v7078_v25 = vld [vmem:[#allocation11 + $0xd0] sm:$0xf0]  ;;  %v7013_v28 = vor.u32 %v10078_v18, %v7012_v17 }
  0x44   :  { %755 = vmatpush.bf16.msra.mxu2 %v7045_v63  ;;  %v10124_v26 = vld [vmem:[#allocation11 + $0x1c4] sm:$0xf]  ;;  %v7206_v27 = vld [vmem:[#allocation11 + $0x1d0] sm:$0xf0]  ;;  %v221_v29 = vld [vmem:[#allocation5] sm:$0xf]  ;;  %v7141_v30 = vor.u32 %v10110_v22, %v7140_v21  ;;  %v7081_v33 = vor.u32 %v10092_v24, %v7078_v25 }
  0x45   :  { %768 = vmatpush.bf16.msra.mxu3 %v7173_v2  ;;  %v6996_v31 = vld [vmem:[#allocation11 + $0x20] sm:$0xf]  ;;  %v10074_v32 = vld [vmem:[#allocation11 + $0x2c] sm:$0xf0]  ;;  %v7209_v36 = vor.u32 %v10124_v26, %v7206_v27  ;;  %v10088_v37 = vld [vmem:[#allocation11 + $0xa4] sm:$0xf] }
  0x46   :  { %329 = vmatpush.bf16.msra.mxu0 %v6933_v51  ;;  %v7124_v34 = vld [vmem:[#allocation11 + $0x120] sm:$0xf]  ;;  %v10106_v35 = vld [vmem:[#allocation11 + $0x12c] sm:$0xf0]  ;;  %v7062_v38 = vld [vmem:[#allocation11 + $0xb0] sm:$0xf0]  ;;  %v6997_v41 = vor.u32 %v10074_v32, %v6996_v31 }
  0x47   :  { %342 = vmatpush.bf16.msra.mxu1 %v6937_v56  ;;  %v10120_v39 = vld [vmem:[#allocation11 + $0x1a4] sm:$0xf]  ;;  %v7190_v40 = vld [vmem:[#allocation11 + $0x1b0] sm:$0xf0]  ;;  %v7125_v43 = vor.u32 %v10106_v35, %v7124_v34  ;;  %v6980_v44 = vld [vmem:[#allocation11] sm:$0xf]  ;;  %v7065_v47 = vor.u32 %v10088_v37, %v7062_v38 }
  0x48   :  { %756 = vmatpush.bf16.msra.mxu2 %v7029_v14  ;;  %v10084_v42 = vld [vmem:[#allocation11 + $0x84] sm:$0xf]  ;;  %v10070_v45 = vld [vmem:[#allocation11 + $0xc] sm:$0xf0]  ;;  %v7108_v46 = vld [vmem:[#allocation11 + $0x100] sm:$0xf]  ;;  %v7193_v51 = vor.u32 %v10120_v39, %v7190_v40 }
  0x49   :  { %769 = vmatpush.bf16.msra.mxu3 %v7157_v16  ;;  %v10102_v48 = vld [vmem:[#allocation11 + $0x10c] sm:$0xf0]  ;;  %v7100_v49 = vld [vmem:[#allocation11 + $0xe8] sm:$0xf]  ;;  %v10099_v50 = vld [vmem:[#allocation11 + $0xf4] sm:$0xf0]  ;;  %v6981_v57 = vor.u32 %v10070_v45, %v6980_v44 }
  0x4a   :  { %330 = vmatpush.bf16.msra.mxu0 %v6925_v0  ;;  %v7046_v52 = vld [vmem:[#allocation11 + $0x90] sm:$0xf0]  ;;  %v7228_v53 = vld [vmem:[#allocation11 + $0x1e8] sm:$0xf]  ;;  %v10131_v54 = vld [vmem:[#allocation11 + $0x1f4] sm:$0xf0]  ;;  %v7109_v58 = vor.u32 %v10102_v48, %v7108_v46  ;;  %v7101_v59 = vor.u32 %v10099_v50, %v7100_v49 }
  0x4b   :  { %343 = vmatpush.bf16.msra.mxu1 %v6929_v5  ;;  %v10116_v55 = vld [vmem:[#allocation11 + $0x184] sm:$0xf]  ;;  %v7174_v56 = vld [vmem:[#allocation11 + $0x190] sm:$0xf0]  ;;  %v7049_v60 = vor.u32 %v10084_v42, %v7046_v52  ;;  %v7229_v62 = vor.u32 %v10131_v54, %v7228_v53  ;;  %v7084_v63 = vld [vmem:[#allocation11 + $0xc8] sm:$0xf] }
  0x4c   :  { %757 = vmatpush.bf16.msra.mxu2 %v7013_v28  ;;  %v10080_v61 = vld [vmem:[#allocation11 + $0x64] sm:$0xf]  ;;  %v10095_v0 = vld [vmem:[#allocation11 + $0xd4] sm:$0xf0]  ;;  %v7177_v1 = vor.u32 %v10116_v55, %v7174_v56  ;;  %v7030_v2 = vld [vmem:[#allocation11 + $0x70] sm:$0xf0] }
  0x4d   :  { %770 = vmatpush.bf16.msra.mxu3 %v7141_v30  ;;  %v7212_v3 = vld [vmem:[#allocation11 + $0x1c8] sm:$0xf]  ;;  %v10127_v4 = vld [vmem:[#allocation11 + $0x1d4] sm:$0xf0]  ;;  %v10112_v5 = vld [vmem:[#allocation11 + $0x164] sm:$0xf]  ;;  %v7085_v7 = vor.u32 %v10095_v0, %v7084_v63  ;;  %v7033_v8 = vor.u32 %v10080_v61, %v7030_v2 }
  0x4e   :  { %331 = vmatpush.bf16.msra.mxu0 %v6917_v15  ;;  %v7158_v6 = vld [vmem:[#allocation11 + $0x170] sm:$0xf0]  ;;  %v7213_v9 = vor.u32 %v10127_v4, %v7212_v3  ;;  %v10076_v11 = vld [vmem:[#allocation11 + $0x44] sm:$0xf]  ;;  %v10097_v27 = vld [vmem:[#allocation11 + $0xec] sm:$0xf] }
  0x4f   :  { %344 = vmatpush.bf16.msra.mxu1 %v6921_v19  ;;  %v7161_v10 = vor.u32 %v10112_v5, %v7158_v6  ;;  %v7014_v12 = vld [vmem:[#allocation11 + $0x50] sm:$0xf0]  ;;  %v10108_v13 = vld [vmem:[#allocation11 + $0x144] sm:$0xf]  ;;  %v7102_v28 = vld [vmem:[#allocation11 + $0xf8] sm:$0xf0] }
  0x50   :  { %758 = vmatpush.bf16.msra.mxu2 %v6997_v41  ;;  %v7142_v14 = vld [vmem:[#allocation11 + $0x150] sm:$0xf0]  ;;  %v7017_v15 = vor.u32 %v10076_v11, %v7014_v12  ;;  %v10072_v17 = vld [vmem:[#allocation11 + $0x24] sm:$0xf]  ;;  %v7230_v30 = vld [vmem:[#allocation11 + $0x1f8] sm:$0xf0] }
  0x51   :  { %332 = vmatmul.bf16.vlgmr.msra.gmra.mxu0 %v221_v29  ;;  %771 = vmatpush.bf16.msra.mxu3 %v7125_v43  ;;  %v7145_v16 = vor.u32 %v10108_v13, %v7142_v14  ;;  %v6998_v18 = vld [vmem:[#allocation11 + $0x30] sm:$0xf0]  ;;  %v10104_v19 = vld [vmem:[#allocation11 + $0x124] sm:$0xf]  ;;  %v10093_v35 = vld [vmem:[#allocation11 + $0xcc] sm:$0xf] }
  0x52   :  { %778 = vmatpush.bf16.msrb.mxu0 %v7097_v20  ;;  %345 = vmatmul.bf16.vlgmr.msra.gmra.mxu1 %v221_v29  ;;  %v7126_v20 = vld [vmem:[#allocation11 + $0x130] sm:$0xf0]  ;;  %v7001_v21 = vor.u32 %v10072_v17, %v6998_v18  ;;  %v10100_v25 = vld [vmem:[#allocation11 + $0x104] sm:$0xf]  ;;  %v10129_v29 = vld [vmem:[#allocation11 + $0x1ec] sm:$0xf] }
  0x53   :  { %791 = vmatpush.bf16.msrb.mxu1 %v7225_v23  ;;  %v7129_v22 = vor.u32 %v10104_v19, %v7126_v20  ;;  %v10068_v23 = vld [vmem:[#allocation11 + $0x4] sm:$0xf]  ;;  %v6982_v24 = vld [vmem:[#allocation11 + $0x10] sm:$0xf0]  ;;  %v7233_v34 = vor.u32 %v10129_v29, %v7230_v30  ;;  %v10125_v37 = vld [vmem:[#allocation11 + $0x1cc] sm:$0xf] }
  0x54   :  { %759 = vmatpush.bf16.msra.mxu2 %v6981_v57  ;;  %v7110_v26 = vld [vmem:[#allocation11 + $0x110] sm:$0xf0]  ;;  %v6985_v31 = vor.u32 %v10068_v23, %v6982_v24  ;;  %v7214_v38 = vld [vmem:[#allocation11 + $0x1d8] sm:$0xf0]  ;;  %v7068_v41 = vld [vmem:[#allocation11 + $0xa8] sm:$0xf] }
  0x55   :  { %772 = vmatpush.bf16.msra.mxu3 %v7109_v58  ;;  %v7113_v32 = vor.u32 %v10100_v25, %v7110_v26  ;;  %v7217_v40 = vor.u32 %v10125_v37, %v7214_v38  ;;  %v10091_v42 = vld [vmem:[#allocation11 + $0xb4] sm:$0xf0]  ;;  %v7196_v43 = vld [vmem:[#allocation11 + $0x1a8] sm:$0xf]  ;;  %v10089_v46 = vld [vmem:[#allocation11 + $0xac] sm:$0xf] }
  0x56   :  { %779 = vmatpush.bf16.msrb.mxu0 %v7081_v33  ;;  %v7105_v33 = vor.u32 %v10097_v27, %v7102_v28  ;;  %v7069_v44 = vor.u32 %v10091_v42, %v7068_v41  ;;  %v10123_v45 = vld [vmem:[#allocation11 + $0x1b4] sm:$0xf0]  ;;  %v7070_v48 = vld [vmem:[#allocation11 + $0xb8] sm:$0xf0]  ;;  %v10121_v49 = vld [vmem:[#allocation11 + $0x1ac] sm:$0xf] }
  0x57   :  { %792 = vmatpush.bf16.msrb.mxu1 %v7209_v36  ;;  %v7086_v36 = vld [vmem:[#allocation11 + $0xd8] sm:$0xf0]  ;;  %v7052_v53 = vld [vmem:[#allocation11 + $0x88] sm:$0xf]  ;;  %v10087_v54 = vld [vmem:[#allocation11 + $0x94] sm:$0xf0] }
  0x58   :  { %804 = vmatpush.bf16.msrb.mxu2 %v7101_v59  ;;  %v7089_v39 = vor.u32 %v10093_v35, %v7086_v36  ;;  %v7198_v50 = vld [vmem:[#allocation11 + $0x1b8] sm:$0xf0]  ;;  %v7180_v55 = vld [vmem:[#allocation11 + $0x188] sm:$0xf]  ;;  %v7053_v56 = vor.u32 %v10087_v54, %v7052_v53  ;;  %v10119_v57 = vld [vmem:[#allocation11 + $0x194] sm:$0xf0] }
  0x59   :  { %817 = vmatpush.bf16.msrb.mxu3 %v7229_v62  ;;  %v7201_v52 = vor.u32 %v10121_v49, %v7198_v50  ;;  %v10085_v58 = vld [vmem:[#allocation11 + $0x8c] sm:$0xf]  ;;  %v7054_v59 = vld [vmem:[#allocation11 + $0x98] sm:$0xf0]  ;;  %v10083_v2 = vld [vmem:[#allocation11 + $0x74] sm:$0xf0] }
  0x5a   :  { %780 = vmatpush.bf16.msrb.mxu0 %v7065_v47  ;;  %v7197_v47 = vor.u32 %v10123_v45, %v7196_v43  ;;  %v7057_v61 = vor.u32 %v10085_v58, %v7054_v59  ;;  %v10117_v62 = vld [vmem:[#allocation11 + $0x18c] sm:$0xf]  ;;  %v7182_v63 = vld [vmem:[#allocation11 + $0x198] sm:$0xf0]  ;;  %v7164_v3 = vld [vmem:[#allocation11 + $0x168] sm:$0xf] }
  0x5b   :  { %793 = vmatpush.bf16.msrb.mxu1 %v7193_v51  ;;  %v7073_v51 = vor.u32 %v10089_v46, %v7070_v48  ;;  %v7185_v0 = vor.u32 %v10117_v62, %v7182_v63  ;;  %v10115_v5 = vld [vmem:[#allocation11 + $0x174] sm:$0xf0]  ;;  %v10081_v6 = vld [vmem:[#allocation11 + $0x6c] sm:$0xf]  ;;  %v7166_v11 = vld [vmem:[#allocation11 + $0x178] sm:$0xf0] }
  0x5c   :  { %805 = vmatpush.bf16.msrb.mxu2 %v7085_v7  ;;  %v7038_v7 = vld [vmem:[#allocation11 + $0x78] sm:$0xf0]  ;;  %v7020_v12 = vld [vmem:[#allocation11 + $0x48] sm:$0xf]  ;;  %v10079_v14 = vld [vmem:[#allocation11 + $0x54] sm:$0xf0] }
  0x5d   :  { %818 = vmatpush.bf16.msrb.mxu3 %v7213_v9  ;;  %v7041_v9 = vor.u32 %v10081_v6, %v7038_v7  ;;  %v7021_v17 = vor.u32 %v10079_v14, %v7020_v12  ;;  %v10077_v19 = vld [vmem:[#allocation11 + $0x4c] sm:$0xf]  ;;  %v7022_v20 = vld [vmem:[#allocation11 + $0x58] sm:$0xf0]  ;;  %v7004_v24 = vld [vmem:[#allocation11 + $0x28] sm:$0xf] }
  0x5e   :  { %781 = vmatpush.bf16.msrb.mxu0 %v7049_v60  ;;  %v7181_v60 = vor.u32 %v10119_v57, %v7180_v55  ;;  %v7150_v23 = vld [vmem:[#allocation11 + $0x158] sm:$0xf0]  ;;  %v10075_v25 = vld [vmem:[#allocation11 + $0x34] sm:$0xf0]  ;;  %v7132_v27 = vld [vmem:[#allocation11 + $0x128] sm:$0xf] }
  0x5f   :  { %794 = vmatpush.bf16.msrb.mxu1 %v7177_v1  ;;  %v7036_v1 = vld [vmem:[#allocation11 + $0x68] sm:$0xf]  ;;  %v10107_v28 = vld [vmem:[#allocation11 + $0x134] sm:$0xf0]  ;;  %v10073_v29 = vld [vmem:[#allocation11 + $0x2c] sm:$0xf]  ;;  %v7005_v30 = vor.u32 %v10075_v25, %v7004_v24 }
  0x60   :  { %806 = vmatpush.bf16.msrb.mxu2 %v7069_v44  ;;  %v7037_v4 = vor.u32 %v10083_v2, %v7036_v1  ;;  %v6988_v35 = vld [vmem:[#allocation11 + $0x8] sm:$0xf]  ;;  %v10071_v36 = vld [vmem:[#allocation11 + $0x14] sm:$0xf0]  ;;  %v10069_v41 = vld [vmem:[#allocation11 + $0xc] sm:$0xf] }
  0x61   :  { %819 = vmatpush.bf16.msrb.mxu3 %v7197_v47  ;;  %v6990_v42 = vld [vmem:[#allocation11 + $0x18] sm:$0xf0]  ;;  %v10101_v43 = vld [vmem:[#allocation11 + $0x10c] sm:$0xf]  ;;  %v6989_v45 = vor.u32 %v10071_v36, %v6988_v35  ;;  %s201_s20 = sshll.u32 %s11763_s7, 4  ;;  %s11267_s21 = smov [#allocation2]   ;;  %s202_s20 = int_to_ptr.hbm [resolvable:$true] %s201_s20 }
  0x62   :  { %782 = vmatpush.bf16.msrb.mxu0 %v7033_v8  ;;  %v7165_v8 = vor.u32 %v10115_v5, %v7164_v3  ;;  %v7118_v44 = vld [vmem:[#allocation11 + $0x118] sm:$0xf0]  ;;  %v6993_v47 = vor.u32 %v10069_v41, %v6990_v42  ;;  %s203_s1 = sshll.u32 %s11267_s21, 4  ;;  %s215_s23 = sshll.u32 %s11767_s11, 4  ;;  %v422_v1 = vld [vmem:[#allocation13] sm:$0xf]  ;;  %s204_s1 = int_to_ptr.vmem [resolvable:$true] %s203_s1  ;;  %s216_s23 = int_to_ptr.hbm [resolvable:$true] %s215_s23 }
  0x63   :  { %795 = vmatpush.bf16.msrb.mxu1 %v7161_v10  ;;  %v10113_v10 = vld [vmem:[#allocation11 + $0x16c] sm:$0xf]  ;;  %v7121_v48 = vor.u32 %v10101_v43, %v7118_v44  ;;  %v238_v49 = vld [vmem:[#allocation10] sm:$0x3]  ;;  %206 = dma.hbm_to_vmem [thread:$0]  %s202_s20, 32768, %s204_s1, [#allocation4] }
  0x64   :  { %807 = vmatpush.bf16.msrb.mxu2 %v7053_v56  ;;  %v7169_v13 = vor.u32 %v10113_v10, %v7166_v11  ;;  %v240_v50 = vperm.slane %v238_v49, 0  ;;  %s11268_s24 = smov [#allocation3]   ;;  %v425_v3 = vperm.slane %v422_v1, 1  ;;  %v424_v10 = vperm.slane %v422_v1, 0 }
  0x65   :  { %820 = vmatpush.bf16.msrb.mxu3 %v7181_v60  ;;  %s217_s25 = sshll.u32 %s11268_s24, 4  ;;  %s218_s25 = int_to_ptr.vmem [resolvable:$true] %s217_s25 }
  0x66   :  { %783 = vmatpush.bf16.msrb.mxu0 %v7017_v15  ;;  %v7148_v15 = vld [vmem:[#allocation11 + $0x148] sm:$0xf]  ;;  %220 = dma.hbm_to_vmem [thread:$0]  %s216_s23, 57344, %s218_s25, [#allocation4 + $0x1] }
  0x67   :  { %796 = vmatpush.bf16.msrb.mxu1 %v7145_v16  ;;  %v10111_v16 = vld [vmem:[#allocation11 + $0x154] sm:$0xf0] }
  0x68   :  { %808 = vmatpush.bf16.msrb.mxu2 %v7037_v4  ;;  %v7149_v18 = vor.u32 %v10111_v16, %v7148_v15 }
  0x69   :  { %821 = vmatpush.bf16.msrb.mxu3 %v7165_v8 }
  0x6a   :  { %784 = vmatpush.bf16.msrb.mxu0 %v7001_v21  ;;  %v10109_v21 = vld [vmem:[#allocation11 + $0x14c] sm:$0xf] }
  0x6b   :  { %797 = vmatpush.bf16.msrb.mxu1 %v7129_v22  ;;  %v7025_v22 = vor.u32 %v10077_v19, %v7022_v20  ;;  %v7153_v26 = vor.u32 %v10109_v21, %v7150_v23 }
  0x6c   :  { %809 = vmatpush.bf16.msrb.mxu2 %v7021_v17 }
  0x6d   :  { %822 = vmatpush.bf16.msrb.mxu3 %v7149_v18 }
  0x6e   :  { %785 = vmatpush.bf16.msrb.mxu0 %v6985_v31  ;;  %v7006_v31 = vld [vmem:[#allocation11 + $0x38] sm:$0xf0] }
  0x6f   :  { %798 = vmatpush.bf16.msrb.mxu1 %v7113_v32  ;;  %v10105_v32 = vld [vmem:[#allocation11 + $0x12c] sm:$0xf]  ;;  %v7009_v37 = vor.u32 %v10073_v29, %v7006_v31 }
  0x70   :  { %810 = vmatpush.bf16.msrb.mxu2 %v7005_v30 }
  0x72   :  { %830 = vmatpush.bf16.msra.mxu0 %v7105_v33  ;;  %v7134_v33 = vld [vmem:[#allocation11 + $0x138] sm:$0xf0] }
  0x73   :  { %843 = vmatpush.bf16.msra.mxu1 %v7233_v34  ;;  %v7133_v34 = vor.u32 %v10107_v28, %v7132_v27  ;;  %v7137_v38 = vor.u32 %v10105_v32, %v7134_v33 }
  0x74   :  { %811 = vmatpush.bf16.msrb.mxu2 %v6989_v45 }
  0x75   :  { %823 = vmatpush.bf16.msrb.mxu3 %v7133_v34 }
  0x76   :  { %831 = vmatpush.bf16.msra.mxu0 %v7089_v39  ;;  %v7116_v39 = vld [vmem:[#allocation11 + $0x108] sm:$0xf] }
  0x77   :  { %844 = vmatpush.bf16.msra.mxu1 %v7217_v40  ;;  %v10103_v40 = vld [vmem:[#allocation11 + $0x114] sm:$0xf0] }
  0x78   :  { %v7117_v46 = vor.u32 %v10103_v40, %v7116_v39  ;;  %v426_v40 = vperm.slane %v422_v1, 2 }
  0x7a   :  { %832 = vmatpush.bf16.msra.mxu0 %v7073_v51  ;;  %824 = vmatpush.bf16.msrb.mxu3 %v7117_v46  ;;  %v241_v51 = vperm.slane %v238_v49, 1 }
  0x7b   :  { %845 = vmatpush.bf16.msra.mxu1 %v7201_v52 }
  0x7e   :  { %833 = vmatpush.bf16.msra.mxu0 %v7057_v61 }
  0x7f   :  { %846 = vmatpush.bf16.msra.mxu1 %v7185_v0  ;;  %v11269_v0 = vmov 8.0  }
  0x80   :  { %10855 = vrcp.f32 %v11269_v0 }
  0x82   :  { %834 = vmatpush.bf16.msra.mxu0 %v7041_v9 }
  0x83   :  { %847 = vmatpush.bf16.msra.mxu1 %v7169_v13 }
  0x86   :  { %835 = vmatpush.bf16.msra.mxu0 %v7025_v22  ;;  %v10856_v2 = vpop.eup %10855 }
  0x87   :  { %848 = vmatpush.bf16.msra.mxu1 %v7153_v26  ;;  %v883_v4 = vmul.f32 8.0, %v10856_v2  ;;  %vm887_vm2 = vweird.f32 %v10856_v2  ;;  %v427_v26 = vperm.slane %v422_v1, 3 }
  0x89   :  { %v884_v8 = vsub.f32 1.0, %v883_v4 }
  0x8a   :  { %836 = vmatpush.bf16.msra.mxu0 %v7009_v37 }
  0x8b   :  { %849 = vmatpush.bf16.msra.mxu1 %v7137_v38  ;;  %v885_v12 = vmul.f32 %v10856_v2, %v884_v8 }
  0x8d   :  { %v886_v21 = vadd.f32 %v10856_v2, %v885_v12 }
  0x8e   :  { %837 = vmatpush.bf16.msra.mxu0 %v6993_v47 }
  0x8f   :  { %850 = vmatpush.bf16.msra.mxu1 %v7121_v48  ;;  %v11380_v27 = vsel %vm887_vm2, %v10856_v2, %v886_v21 }
  0xce   :  { %v333_v52 = vpop.f32.mrf.mxu0 }
  0xcf   :  { %v334_v53 = vadd.f32 %v333_v52, %v240_v50  ;;  %v346_v54 = vpop.f32.mrf.mxu1 }
  0xd0   :  { %v347_v55 = vadd.f32 %v346_v54, %v241_v51 }
  0xd1   :  { %vm350_vm0 = vcmp.gt.f32.partialorder %v334_v53, 0.0  ;;  %v352_v56 = vmul.f32 0.2, %v334_v53 }
  0xd2   :  { %vm351_vm1 = vcmp.gt.f32.partialorder %v347_v55, 0.0  ;;  %v353_v57 = vmul.f32 0.2, %v347_v55 }
  0xd3   :  { %v354_v58 = vsel %vm350_vm0, %v334_v53, %v352_v56 }
  0xd4   :  { %v356_v59 = vpack.c.bf16 %v354_v58, %v354_v58  ;;  %v355_v60 = vsel %vm351_vm1, %v347_v55, %v353_v57 }
  0xd5   :  { %v357_v61 = vpack.c.bf16 %v355_v60, %v355_v60 }
  0xd6   :  { %v335_v62 = vpop.f32.mrf.mxu0  ;;  %760 = vmatmul.bf16.vlgmr.msra.gmra.mxu2 %v356_v59  ;;  %786 = vmatmul.bf16.vlgmr.msrb.gmra.mxu0 %v356_v59 }
  0xd7   :  { %v348_v63 = vpop.f32.mrf.mxu1  ;;  %773 = vmatmul.bf16.vlgmr.msra.gmra.mxu3 %v357_v61  ;;  %799 = vmatmul.bf16.vlgmr.msrb.gmra.mxu1 %v357_v61 }
  0xe6   :  { %812 = vmatmul.bf16.vlgmr.msrb.gmra.mxu2 %v356_v59  ;;  %838 = vmatmul.bf16.vlgmr.msra.gmra.mxu0 %v356_v59 }
  0xe7   :  { %825 = vmatmul.bf16.vlgmr.msrb.gmra.mxu3 %v357_v61  ;;  %851 = vmatmul.bf16.vlgmr.msra.gmra.mxu1 %v357_v61 }
 0x153   :  { %v787_v5 = vpop.f32.mrf.mxu0 }
 0x154   :  { %v788_v6 = vadd.f32 %v787_v5, %v425_v3  ;;  %v800_v7 = vpop.f32.mrf.mxu1 }
 0x156   :  { %v801_v9 = vadd.f32 %v800_v7, %v788_v6 }
 0x158   :  { %v864_v11 = vrot.slane %v801_v9, 4 }
 0x159   :  { %v761_v13 = vpop.f32.mrf.mxu2 }
 0x15a   :  { %v865_v14 = vadd.f32 %v864_v11, %v801_v9  ;;  %v762_v15 = vadd.f32 %v761_v13, %v424_v10  ;;  %v774_v16 = vpop.f32.mrf.mxu3 }
 0x15b   :  { %v789_v17 = vpop.f32.mrf.mxu0 }
 0x15c   :  { %v866_v18 = vrot.slane %v865_v14, 2  ;;  %v775_v19 = vadd.f32 %v774_v16, %v762_v15  ;;  %v802_v20 = vpop.f32.mrf.mxu1 }
 0x15e   :  { %v867_v22 = vadd.f32 %v866_v18, %v865_v14  ;;  %v858_v23 = vrot.slane %v775_v19, 4 }
 0x160   :  { %v868_v24 = vrot.slane %v867_v22, 1  ;;  %v859_v25 = vadd.f32 %v858_v23, %v775_v19 }
 0x161   :  { %v763_v28 = vpop.f32.mrf.mxu2 }
 0x162   :  { %v869_v29 = vadd.f32 %v868_v24, %v867_v22  ;;  %v860_v30 = vrot.slane %v859_v25, 2  ;;  %v776_v31 = vpop.f32.mrf.mxu3 }
 0x163   :  { %v839_v32 = vpop.f32.mrf.mxu0 }
 0x164   :  { %v890_v33 = vmul.f32 %v11380_v27, %v869_v29  ;;  %v861_v34 = vadd.f32 %v860_v30, %v859_v25  ;;  %v840_v35 = vadd.f32 %v839_v32, %v427_v26  ;;  %v852_v36 = vpop.f32.mrf.mxu1 }
 0x166   :  { %v11383_v37 = vsub.f32 %v801_v9, %v890_v33  ;;  %v862_v38 = vrot.slane %v861_v34, 1  ;;  %v853_v39 = vadd.f32 %v852_v36, %v840_v35 }
 0x168   :  { %v898_v41 = vmul.f32 %v11383_v37, %v11383_v37  ;;  %v863_v42 = vadd.f32 %v862_v38, %v861_v34  ;;  %v876_v43 = vrot.slane %v853_v39, 4 }
 0x169   :  { %v813_v44 = vpop.f32.mrf.mxu2 }
 0x16a   :  { %v907_v45 = vrot.slane %v898_v41, 4  ;;  %v889_v46 = vmul.f32 %v11380_v27, %v863_v42  ;;  %v877_v47 = vadd.f32 %v876_v43, %v853_v39  ;;  %v814_v48 = vadd.f32 %v813_v44, %v426_v40  ;;  %v826_v49 = vpop.f32.mrf.mxu3 }
 0x16b   :  { %v841_v50 = vpop.f32.mrf.mxu0 }
 0x16c   :  { %v908_v51 = vadd.f32 %v907_v45, %v898_v41  ;;  %v11388_v52 = vsub.f32 %v775_v19, %v889_v46  ;;  %v878_v53 = vrot.slane %v877_v47, 2  ;;  %v854_v54 = vpop.f32.mrf.mxu1  ;;  %v827_v55 = vadd.f32 %v826_v49, %v814_v48  ;;  %v11405_v41 = vld [vmem:[#allocation14] sm:$0xf]  ;;  %v11407_v46 = vld [vmem:[#allocation16] sm:$0xf] }
 0x16d   :  { %v979_v50 = vperm.slane %v11405_v41, 1 }
 0x16e   :  { %v909_v56 = vrot.slane %v908_v51, 2  ;;  %v897_v57 = vmul.f32 %v11388_v52, %v11388_v52  ;;  %v879_v58 = vadd.f32 %v878_v53, %v877_v47  ;;  %v870_v59 = vrot.slane %v827_v55, 4 }
 0x170   :  { %v910_v60 = vadd.f32 %v909_v56, %v908_v51  ;;  %v901_v61 = vrot.slane %v897_v57, 4  ;;  %v880_v62 = vrot.slane %v879_v58, 1  ;;  %v871_v63 = vadd.f32 %v870_v59, %v827_v55 }
 0x171   :  { %v815_v0 = vpop.f32.mrf.mxu2  ;;  %v992_v56 = vperm.slane %v11407_v46, 1 }
 0x172   :  { %v911_v1 = vrot.slane %v910_v60, 1  ;;  %v902_v2 = vadd.f32 %v901_v61, %v897_v57  ;;  %v881_v3 = vadd.f32 %v880_v62, %v879_v58  ;;  %v828_v4 = vpop.f32.mrf.mxu3  ;;  %v872_v5 = vrot.slane %v871_v63, 2 }
 0x173   :  { %v978_v0 = vperm.slane %v11405_v41, 0  ;;  %v991_v4 = vperm.slane %v11407_v46, 0 }
 0x174   :  { %v912_v6 = vadd.f32 %v911_v1, %v910_v60  ;;  %v903_v7 = vrot.slane %v902_v2, 2  ;;  %v892_v8 = vmul.f32 %v11380_v27, %v881_v3  ;;  %v873_v9 = vadd.f32 %v872_v5, %v871_v63 }
 0x176   :  { %v926_v10 = vmul.f32 %v912_v6, %v11380_v27  ;;  %v904_v11 = vadd.f32 %v903_v7, %v902_v2  ;;  %v11394_v12 = vsub.f32 %v853_v39, %v892_v8  ;;  %v874_v13 = vrot.slane %v873_v9, 1 }
 0x178   :  { %v930_v14 = vadd.f32 0.8, %v926_v10  ;;  %v905_v15 = vrot.slane %v904_v11, 1  ;;  %v900_v16 = vmul.f32 %v11394_v12, %v11394_v12  ;;  %v875_v17 = vadd.f32 %v874_v13, %v873_v9 }
 0x17a   :  { %10857 = vrsqrt.f32 %v930_v14  ;;  %v906_v18 = vadd.f32 %v905_v15, %v904_v11  ;;  %v919_v19 = vrot.slane %v900_v16, 4  ;;  %v891_v20 = vmul.f32 %v11380_v27, %v875_v17 }
 0x17b   :  { %vm949_vm4 = vweird.f32 %v930_v14 }
 0x17c   :  { %v925_v21 = vmul.f32 %v906_v18, %v11380_v27  ;;  %v920_v22 = vadd.f32 %v919_v19, %v900_v16  ;;  %v11400_v23 = vsub.f32 %v827_v55, %v891_v20  ;;  %v994_v20 = vperm.slane %v11407_v46, 3 }
 0x17e   :  { %v929_v24 = vadd.f32 0.8, %v925_v21  ;;  %v921_v25 = vrot.slane %v920_v22, 2  ;;  %v899_v26 = vmul.f32 %v11400_v23, %v11400_v23 }
 0x180   :  { %v10858_v28 = vpop.eup %10857  ;;  %10859 = vrsqrt.f32 %v929_v24  ;;  %v922_v29 = vadd.f32 %v921_v25, %v920_v22  ;;  %v913_v31 = vrot.slane %v899_v26, 4  ;;  %vm939_vm7 = vweird.f32 %v929_v24 }
 0x181   :  { %v944_v30 = vmul.f32 %v10858_v28, %v930_v14  ;;  %vm950_vm3 = vweird.f32 %v10858_v28 }
 0x182   :  { %v923_v32 = vrot.slane %v922_v29, 1  ;;  %v914_v34 = vadd.f32 %v913_v31, %v899_v26  ;;  %vm951_vm5 = vmor %vm949_vm4, %vm950_vm3 }
 0x183   :  { %v945_v33 = vmul.f32 %v10858_v28, %v944_v30 }
 0x184   :  { %v924_v35 = vadd.f32 %v923_v32, %v922_v29  ;;  %v915_v38 = vrot.slane %v914_v34, 2  ;;  %v993_v32 = vperm.slane %v11407_v46, 2 }
 0x185   :  { %v946_v36 = vmul.f32 0.5, %v945_v33 }
 0x186   :  { %v10860_v39 = vpop.eup %10859  ;;  %v928_v40 = vmul.f32 %v924_v35, %v11380_v27  ;;  %v916_v44 = vadd.f32 %v915_v38, %v914_v34 }
 0x187   :  { %v947_v42 = vsub.f32 1.5, %v946_v36  ;;  %v934_v43 = vmul.f32 %v10860_v39, %v929_v24  ;;  %vm940_vm6 = vweird.f32 %v10860_v39 }
 0x188   :  { %v932_v45 = vadd.f32 0.8, %v928_v40  ;;  %v917_v49 = vrot.slane %v916_v44, 1  ;;  %vm941_vm8 = vmor %vm939_vm7, %vm940_vm6 }
 0x189   :  { %v948_v47 = vmul.f32 %v10858_v28, %v947_v42  ;;  %v935_v48 = vmul.f32 %v10860_v39, %v934_v43 }
 0x18a   :  { %10861 = vrsqrt.f32 %v932_v45  ;;  %v918_v54 = vadd.f32 %v917_v49, %v916_v44  ;;  %vm969_vm12 = vweird.f32 %v932_v45 }
 0x18b   :  { %v952_v51 = vsel %vm951_vm5, %v10858_v28, %v948_v47  ;;  %v936_v53 = vmul.f32 0.5, %v935_v48  ;;  %v980_v28 = vperm.slane %v11405_v41, 2 }
 0x18c   :  { %v974_v55 = vmul.f32 %v952_v51, %v11383_v37  ;;  %v927_v58 = vmul.f32 %v918_v54, %v11380_v27 }
 0x18d   :  { %v937_v57 = vsub.f32 1.5, %v936_v53 }
 0x18e   :  { %v987_v59 = vmul.f32 %v979_v50, %v974_v55  ;;  %v931_v61 = vadd.f32 0.8, %v927_v58 }
 0x18f   :  { %v938_v60 = vmul.f32 %v10860_v39, %v937_v57 }
 0x190   :  { %v10862_v62 = vpop.eup %10861  ;;  %v1000_v63 = vadd.f32 %v992_v56, %v987_v59  ;;  %10863 = vrsqrt.f32 %v931_v61  ;;  %vm959_vm15 = vweird.f32 %v931_v61 }
 0x191   :  { %v942_v1 = vsel %vm941_vm8, %v10860_v39, %v938_v60  ;;  %v964_v2 = vmul.f32 %v10862_v62, %v932_v45  ;;  %vm970_vm10 = vweird.f32 %v10862_v62 }
 0x192   :  { %vm1004_vm9 = vcmp.gt.f32.partialorder %v1000_v63, 0.0  ;;  %v1008_v37 = vmul.f32 0.2, %v1000_v63  ;;  %v973_v3 = vmul.f32 %v942_v1, %v11388_v52  ;;  %vm971_vm13 = vmor %vm969_vm12, %vm970_vm10  ;;  %v981_v52 = vperm.slane %v11405_v41, 3 }
 0x193   :  { %v965_v5 = vmul.f32 %v10862_v62, %v964_v2 }
 0x194   :  { %v11416_v6 = vsel %vm1004_vm9, %v1000_v63, %v1008_v37  ;;  %v986_v7 = vmul.f32 %v978_v0, %v973_v3 }
 0x195   :  { %v966_v8 = vmul.f32 0.5, %v965_v5 }
 0x196   :  { %v999_v9 = vadd.f32 %v991_v4, %v986_v7  ;;  %v10864_v10 = vpop.eup %10863 }
 0x197   :  { %v967_v11 = vsub.f32 1.5, %v966_v8  ;;  %v954_v14 = vmul.f32 %v10864_v10, %v931_v61  ;;  %vm960_vm14 = vweird.f32 %v10864_v10 }
 0x198   :  { %vm1003_vm11 = vcmp.gt.f32.partialorder %v999_v9, 0.0  ;;  %v1007_v13 = vmul.f32 0.2, %v999_v9  ;;  %vm961_vm0 = vmor %vm959_vm15, %vm960_vm14 }
 0x199   :  { %v968_v15 = vmul.f32 %v10862_v62, %v967_v11  ;;  %v955_v17 = vmul.f32 %v10864_v10, %v954_v14 }
 0x19a   :  { %v11418_v16 = vsel %vm1003_vm11, %v999_v9, %v1007_v13 }
 0x19b   :  { %v972_v18 = vsel %vm971_vm13, %v10862_v62, %v968_v15  ;;  %v956_v21 = vmul.f32 0.5, %v955_v17 }
 0x19c   :  { %v976_v19 = vmul.f32 %v972_v18, %v11394_v12 }
 0x19d   :  { %v957_v24 = vsub.f32 1.5, %v956_v21 }
 0x19e   :  { %v989_v22 = vmul.f32 %v981_v52, %v976_v19 }
 0x19f   :  { %v958_v26 = vmul.f32 %v10864_v10, %v957_v24 }
 0x1a0   :  { %v1002_v25 = vadd.f32 %v994_v20, %v989_v22 }
 0x1a1   :  { %v962_v30 = vsel %vm961_vm0, %v10864_v10, %v958_v26 }
 0x1a2   :  { %vm1006_vm1 = vcmp.gt.f32.partialorder %v1002_v25, 0.0  ;;  %v1010_v29 = vmul.f32 0.2, %v1002_v25  ;;  %v975_v31 = vmul.f32 %v962_v30, %v11400_v23 }
 0x1a4   :  { %v11426_v12 = vsel %vm1006_vm1, %v1002_v25, %v1010_v29  ;;  %v988_v33 = vmul.f32 %v980_v28, %v975_v31 }
 0x1a6   :  { %v1001_v34 = vadd.f32 %v993_v32, %v988_v33 }
 0x1a8   :  { %vm1005_vm2 = vcmp.gt.f32.partialorder %v1001_v34, 0.0  ;;  %v1009_v35 = vmul.f32 0.2, %v1001_v34 }
 0x1aa   :  { %v11428_v36 = vsel %vm1005_vm2, %v1001_v34, %v1009_v35 }
 0x1ab   :  { %11246 = dma.done.wait [#allocation4], 32768 }
 0x1ac   :  { %11247 = vsyncadd [#allocation4], 4294934528  ;;  %v7460_v38 = vld [vmem:[#allocation2 + $0x1c0] sm:$0xf] }
 0x1ad   :  { %v10192_v39 = vld [vmem:[#allocation2 + $0x1dc] sm:$0xf0] }
 0x1ae   :  { %v7716_v40 = vld [vmem:[#allocation2 + $0x3c0] sm:$0xf]  ;;  %v7461_v41 = vor.u32 %v10192_v39, %v7460_v38 }
 0x1af   :  { %v10256_v42 = vld [vmem:[#allocation2 + $0x3dc] sm:$0xf0] }
 0x1b0   :  { %v7972_v43 = vld [vmem:[#allocation2 + $0x5c0] sm:$0xf]  ;;  %v7717_v23 = vor.u32 %v10256_v42, %v7716_v40  ;;  %2577 = vmatpush.bf16.msra.mxu2 %v7461_v41 }
 0x1b1   :  { %v10320_v44 = vld [vmem:[#allocation2 + $0x5dc] sm:$0xf0] }
 0x1b2   :  { %v7973_v45 = vor.u32 %v10320_v44, %v7972_v43  ;;  %v7428_v46 = vld [vmem:[#allocation2 + $0x180] sm:$0xf]  ;;  %2590 = vmatpush.bf16.msra.mxu3 %v7717_v23 }
 0x1b3   :  { %v10184_v47 = vld [vmem:[#allocation2 + $0x19c] sm:$0xf0] }
 0x1b4   :  { %v7684_v48 = vld [vmem:[#allocation2 + $0x380] sm:$0xf]  ;;  %v7429_v49 = vor.u32 %v10184_v47, %v7428_v46  ;;  %2603 = vmatpush.bf16.msrb.mxu0 %v7973_v45 }
 0x1b5   :  { %v10248_v50 = vld [vmem:[#allocation2 + $0x39c] sm:$0xf0] }
 0x1b6   :  { %v8228_v51 = vld [vmem:[#allocation2 + $0x7c0] sm:$0xf]  ;;  %v7685_v54 = vor.u32 %v10248_v50, %v7684_v48  ;;  %2578 = vmatpush.bf16.msra.mxu2 %v7429_v49 }
 0x1b7   :  { %v10384_v53 = vld [vmem:[#allocation2 + $0x7dc] sm:$0xf0] }
 0x1b8   :  { %v8229_v55 = vor.u32 %v10384_v53, %v8228_v51  ;;  %v7940_v56 = vld [vmem:[#allocation2 + $0x580] sm:$0xf]  ;;  %2591 = vmatpush.bf16.msra.mxu3 %v7685_v54 }
 0x1b9   :  { %v10312_v57 = vld [vmem:[#allocation2 + $0x59c] sm:$0xf0] }
 0x1ba   :  { %v7396_v58 = vld [vmem:[#allocation2 + $0x140] sm:$0xf]  ;;  %v7941_v59 = vor.u32 %v10312_v57, %v7940_v56  ;;  %2616 = vmatpush.bf16.msrb.mxu1 %v8229_v55 }
 0x1bb   :  { %v10176_v60 = vld [vmem:[#allocation2 + $0x15c] sm:$0xf0] }
 0x1bc   :  { %v7652_v61 = vld [vmem:[#allocation2 + $0x340] sm:$0xf]  ;;  %v7397_v2 = vor.u32 %v10176_v60, %v7396_v58  ;;  %2604 = vmatpush.bf16.msrb.mxu0 %v7941_v59 }
 0x1bd   :  { %v10240_v62 = vld [vmem:[#allocation2 + $0x35c] sm:$0xf0] }
 0x1be   :  { %v8196_v63 = vld [vmem:[#allocation2 + $0x780] sm:$0xf]  ;;  %v7653_v7 = vor.u32 %v10240_v62, %v7652_v61  ;;  %2579 = vmatpush.bf16.msra.mxu2 %v7397_v2  ;;  %v10188_v2 = vld [vmem:[#allocation2 + $0x1c4] sm:$0xf] }
 0x1bf   :  { %v10376_v0 = vld [vmem:[#allocation2 + $0x79c] sm:$0xf0] }
 0x1c0   :  { %v7908_v1 = vld [vmem:[#allocation2 + $0x540] sm:$0xf]  ;;  %v8197_v37 = vor.u32 %v10376_v0, %v8196_v63  ;;  %2592 = vmatpush.bf16.msra.mxu3 %v7653_v7 }
 0x1c1   :  { %v10304_v3 = vld [vmem:[#allocation2 + $0x55c] sm:$0xf0] }
 0x1c2   :  { %v7364_v4 = vld [vmem:[#allocation2 + $0x100] sm:$0xf]  ;;  %v7909_v8 = vor.u32 %v10304_v3, %v7908_v1  ;;  %2617 = vmatpush.bf16.msrb.mxu1 %v8197_v37  ;;  %v7462_v37 = vld [vmem:[#allocation2 + $0x1e0] sm:$0xf0] }
 0x1c3   :  { %v10168_v5 = vld [vmem:[#allocation2 + $0x11c] sm:$0xf0]  ;;  %v10252_v3 = vld [vmem:[#allocation2 + $0x3c4] sm:$0xf] }
 0x1c4   :  { %v7620_v9 = vld [vmem:[#allocation2 + $0x300] sm:$0xf]  ;;  %v7365_v17 = vor.u32 %v10168_v5, %v7364_v4  ;;  %2605 = vmatpush.bf16.msrb.mxu0 %v7909_v8  ;;  %v7718_v5 = vld [vmem:[#allocation2 + $0x3e0] sm:$0xf0] }
 0x1c5   :  { %v10232_v10 = vld [vmem:[#allocation2 + $0x31c] sm:$0xf0] }
 0x1c6   :  { %v8164_v11 = vld [vmem:[#allocation2 + $0x740] sm:$0xf]  ;;  %v7621_v20 = vor.u32 %v10232_v10, %v7620_v9  ;;  %2580 = vmatpush.bf16.msra.mxu2 %v7365_v17  ;;  %v10316_v10 = vld [vmem:[#allocation2 + $0x5c4] sm:$0xf] }
 0x1c7   :  { %v10368_v13 = vld [vmem:[#allocation2 + $0x75c] sm:$0xf0]  ;;  %v10180_v17 = vld [vmem:[#allocation2 + $0x184] sm:$0xf] }
 0x1c8   :  { %v7876_v14 = vld [vmem:[#allocation2 + $0x500] sm:$0xf]  ;;  %v8165_v52 = vor.u32 %v10368_v13, %v8164_v11  ;;  %2593 = vmatpush.bf16.msra.mxu3 %v7621_v20  ;;  %v7974_v11 = vld [vmem:[#allocation2 + $0x5e0] sm:$0xf0] }
 0x1c9   :  { %v10296_v15 = vld [vmem:[#allocation2 + $0x51c] sm:$0xf0]  ;;  %v7430_v20 = vld [vmem:[#allocation2 + $0x1a0] sm:$0xf0] }
 0x1ca   :  { %v8132_v18 = vld [vmem:[#allocation2 + $0x700] sm:$0xf]  ;;  %v7877_v21 = vor.u32 %v10296_v15, %v7876_v14  ;;  %2618 = vmatpush.bf16.msrb.mxu1 %v8165_v52  ;;  %v7465_v14 = vor.u32 %v10188_v2, %v7462_v37  ;;  %v7590_v2 = vld [vmem:[#allocation2 + $0x2e0] sm:$0xf0] }
 0x1cb   :  { %v10360_v19 = vld [vmem:[#allocation2 + $0x71c] sm:$0xf0]  ;;  %v10284_v37 = vld [vmem:[#allocation2 + $0x4c4] sm:$0xf] }
 0x1cc   :  { %v7332_v22 = vld [vmem:[#allocation2 + $0xc0] sm:$0xf]  ;;  %v8133_v30 = vor.u32 %v10360_v19, %v8132_v18  ;;  %2606 = vmatpush.bf16.msrb.mxu0 %v7877_v21  ;;  %v7721_v18 = vor.u32 %v10252_v3, %v7718_v5  ;;  %v10380_v21 = vld [vmem:[#allocation2 + $0x7c4] sm:$0xf] }
 0x1cd   :  { %v10160_v24 = vld [vmem:[#allocation2 + $0xdc] sm:$0xf0]  ;;  %v7846_v3 = vld [vmem:[#allocation2 + $0x4e0] sm:$0xf0] }
 0x1ce   :  { %v7588_v25 = vld [vmem:[#allocation2 + $0x2c0] sm:$0xf]  ;;  %v7333_v31 = vor.u32 %v10160_v24, %v7332_v22  ;;  %2619 = vmatpush.bf16.msrb.mxu1 %v8133_v30  ;;  %v8230_v22 = vld [vmem:[#allocation2 + $0x7e0] sm:$0xf0]  ;;  %v11432_v24 = vpack.c.bf16 %v11418_v16, %v11418_v16  ;;  %v11436_v30 = vpack.c.bf16 %v11416_v6, %v11416_v6 }
 0x1cf   :  { %v10224_v26 = vld [vmem:[#allocation2 + $0x2dc] sm:$0xf0] }
 0x1d0   :  { %v7844_v28 = vld [vmem:[#allocation2 + $0x4c0] sm:$0xf]  ;;  %v7589_v34 = vor.u32 %v10224_v26, %v7588_v25  ;;  %2581 = vmatpush.bf16.msra.mxu2 %v7333_v31  ;;  %v7977_v25 = vor.u32 %v10316_v10, %v7974_v11  ;;  %v10244_v26 = vld [vmem:[#allocation2 + $0x384] sm:$0xf] }
 0x1d1   :  { %v10288_v29 = vld [vmem:[#allocation2 + $0x4dc] sm:$0xf0]  ;;  %v10308_v31 = vld [vmem:[#allocation2 + $0x584] sm:$0xf] }
 0x1d2   :  { %v8100_v32 = vld [vmem:[#allocation2 + $0x6c0] sm:$0xf]  ;;  %v7845_v35 = vor.u32 %v10288_v29, %v7844_v28  ;;  %2594 = vmatpush.bf16.msra.mxu3 %v7589_v34  ;;  %v7686_v28 = vld [vmem:[#allocation2 + $0x3a0] sm:$0xf0]  ;;  %v8233_v34 = vor.u32 %v10380_v21, %v8230_v22 }
 0x1d3   :  { %v10352_v33 = vld [vmem:[#allocation2 + $0x6dc] sm:$0xf0]  ;;  %v7689_v16 = vor.u32 %v10244_v26, %v7686_v28  ;;  %v10348_v10 = vld [vmem:[#allocation2 + $0x6c4] sm:$0xf] }
 0x1d4   :  { %v7300_v38 = vld [vmem:[#allocation2 + $0x80] sm:$0xf]  ;;  %v8101_v44 = vor.u32 %v10352_v33, %v8100_v32  ;;  %2607 = vmatpush.bf16.msrb.mxu0 %v7845_v35  ;;  %v7942_v32 = vld [vmem:[#allocation2 + $0x5a0] sm:$0xf0]  ;;  %v7433_v33 = vor.u32 %v10180_v17, %v7430_v20 }
 0x1d5   :  { %v10152_v39 = vld [vmem:[#allocation2 + $0x9c] sm:$0xf0]  ;;  %v10172_v35 = vld [vmem:[#allocation2 + $0x144] sm:$0xf]  ;;  %v7945_v6 = vor.u32 %v10308_v31, %v7942_v32 }
 0x1d6   :  { %v7556_v40 = vld [vmem:[#allocation2 + $0x280] sm:$0xf]  ;;  %v7301_v23 = vor.u32 %v10152_v39, %v7300_v38  ;;  %2620 = vmatpush.bf16.msrb.mxu1 %v8101_v44  ;;  %v7398_v38 = vld [vmem:[#allocation2 + $0x160] sm:$0xf0]  ;;  %v11445_v44 = vpack.c.bf16 %v11426_v12, %v11426_v12 }
 0x1d7   :  { %v10216_v41 = vld [vmem:[#allocation2 + $0x29c] sm:$0xf0]  ;;  %v10372_v39 = vld [vmem:[#allocation2 + $0x784] sm:$0xf] }
 0x1d8   :  { %v7812_v42 = vld [vmem:[#allocation2 + $0x480] sm:$0xf]  ;;  %v7557_v47 = vor.u32 %v10216_v41, %v7556_v40  ;;  %2582 = vmatpush.bf16.msra.mxu2 %v7301_v23  ;;  %v8198_v40 = vld [vmem:[#allocation2 + $0x7a0] sm:$0xf0]  ;;  %v11440_v41 = vpack.c.bf16 %v11428_v36, %v11428_v36 }
 0x1d9   :  { %v10280_v43 = vld [vmem:[#allocation2 + $0x49c] sm:$0xf0]  ;;  %v10300_v23 = vld [vmem:[#allocation2 + $0x544] sm:$0xf]  ;;  %v8201_v36 = vor.u32 %v10372_v39, %v8198_v40 }
 0x1da   :  { %v8068_v45 = vld [vmem:[#allocation2 + $0x680] sm:$0xf]  ;;  %v7813_v48 = vor.u32 %v10280_v43, %v7812_v42  ;;  %2595 = vmatpush.bf16.msra.mxu3 %v7557_v47  ;;  %v10236_v42 = vld [vmem:[#allocation2 + $0x344] sm:$0xf] }
 0x1db   :  { %v10344_v46 = vld [vmem:[#allocation2 + $0x69c] sm:$0xf0]  ;;  %v7654_v43 = vld [vmem:[#allocation2 + $0x360] sm:$0xf0] }
 0x1dc   :  { %v7268_v49 = vld [vmem:[#allocation2 + $0x40] sm:$0xf]  ;;  %v8069_v56 = vor.u32 %v10344_v46, %v8068_v45  ;;  %2608 = vmatpush.bf16.msrb.mxu0 %v7813_v48  ;;  %v7910_v45 = vld [vmem:[#allocation2 + $0x560] sm:$0xf0]  ;;  %v7401_v46 = vor.u32 %v10172_v35, %v7398_v38  ;;  %v7657_v48 = vor.u32 %v10236_v42, %v7654_v43 }
 0x1dd   :  { %v10144_v50 = vld [vmem:[#allocation2 + $0x5c] sm:$0xf0]  ;;  %v10164_v47 = vld [vmem:[#allocation2 + $0x104] sm:$0xf]  ;;  %v7913_v12 = vor.u32 %v10300_v23, %v7910_v45  ;;  %v7468_v45 = vld [vmem:[#allocation2 + $0x1c8] sm:$0xf] }
 0x1de   :  { %v7524_v51 = vld [vmem:[#allocation2 + $0x240] sm:$0xf]  ;;  %v7269_v57 = vor.u32 %v10144_v50, %v7268_v49  ;;  %2621 = vmatpush.bf16.msrb.mxu1 %v8069_v56  ;;  %v7366_v49 = vld [vmem:[#allocation2 + $0x120] sm:$0xf0] }
 0x1df   :  { %v10208_v53 = vld [vmem:[#allocation2 + $0x25c] sm:$0xf0]  ;;  %v10364_v50 = vld [vmem:[#allocation2 + $0x744] sm:$0xf] }
 0x1e0   :  { %v7780_v54 = vld [vmem:[#allocation2 + $0x440] sm:$0xf]  ;;  %v7525_v61 = vor.u32 %v10208_v53, %v7524_v51  ;;  %2583 = vmatpush.bf16.msra.mxu2 %v7269_v57  ;;  %v8166_v51 = vld [vmem:[#allocation2 + $0x760] sm:$0xf0]  ;;  %v7369_v57 = vor.u32 %v10164_v47, %v7366_v49  ;;  %v10257_v47 = vld [vmem:[#allocation2 + $0x3e4] sm:$0xf0] }
 0x1e1   :  { %v10272_v55 = vld [vmem:[#allocation2 + $0x45c] sm:$0xf0]  ;;  %v10228_v53 = vld [vmem:[#allocation2 + $0x304] sm:$0xf] }
 0x1e2   :  { %v7236_v58 = vld [vmem:[#allocation2] sm:$0xf]  ;;  %v7781_v62 = vor.u32 %v10272_v55, %v7780_v54  ;;  %2596 = vmatpush.bf16.msra.mxu3 %v7525_v61  ;;  %v7622_v54 = vld [vmem:[#allocation2 + $0x320] sm:$0xf0] }
 0x1e3   :  { %v8036_v59 = vld [vmem:[#allocation2 + $0x640] sm:$0xf]  ;;  %v10292_v55 = vld [vmem:[#allocation2 + $0x504] sm:$0xf] }
 0x1e4   :  { %v10336_v60 = vld [vmem:[#allocation2 + $0x65c] sm:$0xf0]  ;;  %2609 = vmatpush.bf16.msrb.mxu0 %v7781_v62  ;;  %v7878_v56 = vld [vmem:[#allocation2 + $0x520] sm:$0xf0] }
 0x1e5   :  { %v10136_v63 = vld [vmem:[#allocation2 + $0x1c] sm:$0xf0]  ;;  %v8037_v4 = vor.u32 %v10336_v60, %v8036_v59  ;;  %v10156_v59 = vld [vmem:[#allocation2 + $0xc4] sm:$0xf]  ;;  %v7625_v60 = vor.u32 %v10228_v53, %v7622_v54  ;;  %v10321_v53 = vld [vmem:[#allocation2 + $0x5e4] sm:$0xf0] }
 0x1e6   :  { %v7492_v0 = vld [vmem:[#allocation2 + $0x200] sm:$0xf]  ;;  %v7237_v9 = vor.u32 %v10136_v63, %v7236_v58  ;;  %v8169_v58 = vor.u32 %v10364_v50, %v8166_v51  ;;  %v7334_v61 = vld [vmem:[#allocation2 + $0xe0] sm:$0xf0] }
 0x1e7   :  { %v10200_v1 = vld [vmem:[#allocation2 + $0x21c] sm:$0xf0]  ;;  %2622 = vmatpush.bf16.msrb.mxu1 %v8037_v4  ;;  %v10356_v62 = vld [vmem:[#allocation2 + $0x704] sm:$0xf]  ;;  %v7337_v4 = vor.u32 %v10156_v59, %v7334_v61  ;;  %v10185_v61 = vld [vmem:[#allocation2 + $0x1a4] sm:$0xf0] }
 0x1e8   :  { %v7748_v7 = vld [vmem:[#allocation2 + $0x400] sm:$0xf]  ;;  %v7493_v13 = vor.u32 %v10200_v1, %v7492_v0  ;;  %2584 = vmatpush.bf16.msra.mxu2 %v7237_v9  ;;  %v8134_v63 = vld [vmem:[#allocation2 + $0x720] sm:$0xf0]  ;;  %v7881_v0 = vor.u32 %v10292_v55, %v7878_v56 }
 0x1e9   :  { %v10264_v8 = vld [vmem:[#allocation2 + $0x41c] sm:$0xf0]  ;;  %v10220_v1 = vld [vmem:[#allocation2 + $0x2c4] sm:$0xf]  ;;  %v8137_v5 = vor.u32 %v10356_v62, %v8134_v63  ;;  %v8236_v62 = vld [vmem:[#allocation2 + $0x7c8] sm:$0xf] }
 0x1ea   :  { %v8004_v15 = vld [vmem:[#allocation2 + $0x600] sm:$0xf]  ;;  %v7749_v19 = vor.u32 %v10264_v8, %v7748_v7  ;;  %2597 = vmatpush.bf16.msra.mxu3 %v7493_v13  ;;  %v10148_v7 = vld [vmem:[#allocation2 + $0x84] sm:$0xf]  ;;  %v7593_v8 = vor.u32 %v10220_v1, %v7590_v2  ;;  %v7849_v13 = vor.u32 %v10284_v37, %v7846_v3  ;;  %v10385_v63 = vld [vmem:[#allocation2 + $0x7e4] sm:$0xf0] }
 0x1eb   :  { %v10328_v52 = vld [vmem:[#allocation2 + $0x61c] sm:$0xf0]  ;;  %2585 = vmatmul.bf16.vlgmr.msra.gmra.mxu2 %v11432_v24  ;;  %v7302_v9 = vld [vmem:[#allocation2 + $0xa0] sm:$0xf0]  ;;  %v7692_v1 = vld [vmem:[#allocation2 + $0x388] sm:$0xf] }
 0x1ec   :  { %v8005_v29 = vor.u32 %v10328_v52, %v8004_v15  ;;  %2629 = vmatpush.bf16.msrb.mxu2 %v7465_v14  ;;  %2610 = vmatpush.bf16.msrb.mxu0 %v7749_v19  ;;  %v8102_v11 = vld [vmem:[#allocation2 + $0x6e0] sm:$0xf0]  ;;  %v10249_v2 = vld [vmem:[#allocation2 + $0x3a4] sm:$0xf0] }
 0x1ed   :  { %2598 = vmatmul.bf16.vlgmr.msra.gmra.mxu3 %v11436_v30  ;;  %v10212_v14 = vld [vmem:[#allocation2 + $0x284] sm:$0xf]  ;;  %v8105_v19 = vor.u32 %v10348_v10, %v8102_v11  ;;  %v7948_v3 = vld [vmem:[#allocation2 + $0x588] sm:$0xf] }
 0x1ee   :  { %2642 = vmatpush.bf16.msrb.mxu3 %v7721_v18  ;;  %2623 = vmatpush.bf16.msrb.mxu1 %v8005_v29  ;;  %v7558_v15 = vld [vmem:[#allocation2 + $0x2a0] sm:$0xf0]  ;;  %v7305_v18 = vor.u32 %v10148_v7, %v7302_v9  ;;  %v8237_v7 = vor.u32 %v10385_v63, %v8236_v62  ;;  %v7693_v9 = vor.u32 %v10249_v2, %v7692_v1  ;;  %v10177_v10 = vld [vmem:[#allocation2 + $0x164] sm:$0xf0] }
 0x1ef   :  { %2611 = vmatmul.bf16.vlgmr.msrb.gmra.mxu0 %v11440_v41  ;;  %v10276_v52 = vld [vmem:[#allocation2 + $0x484] sm:$0xf]  ;;  %v7561_v21 = vor.u32 %v10212_v14, %v7558_v15  ;;  %v8204_v11 = vld [vmem:[#allocation2 + $0x788] sm:$0xf] }
 0x1f0   :  { %2655 = vmatpush.bf16.msra.mxu0 %v7977_v25  ;;  %2630 = vmatpush.bf16.msrb.mxu2 %v7433_v33  ;;  %v7814_v17 = vld [vmem:[#allocation2 + $0x4a0] sm:$0xf0]  ;;  %v7660_v15 = vld [vmem:[#allocation2 + $0x348] sm:$0xf] }
 0x1f1   :  { %2624 = vmatmul.bf16.vlgmr.msrb.gmra.mxu1 %v11445_v44  ;;  %v10140_v20 = vld [vmem:[#allocation2 + $0x44] sm:$0xf]  ;;  %v7817_v28 = vor.u32 %v10276_v52, %v7814_v17  ;;  %v10241_v52 = vld [vmem:[#allocation2 + $0x364] sm:$0xf0] }
 0x1f2   :  { %2668 = vmatpush.bf16.msra.mxu1 %v8233_v34  ;;  %2643 = vmatpush.bf16.msrb.mxu3 %v7689_v16  ;;  %v7270_v22 = vld [vmem:[#allocation2 + $0x60] sm:$0xf0]  ;;  %v7916_v17 = vld [vmem:[#allocation2 + $0x548] sm:$0xf] }
 0x1f3   :  { %v10340_v25 = vld [vmem:[#allocation2 + $0x684] sm:$0xf]  ;;  %v7273_v34 = vor.u32 %v10140_v20, %v7270_v22  ;;  %v7661_v22 = vor.u32 %v10241_v52, %v7660_v15  ;;  %v10145_v63 = vld [vmem:[#allocation2 + $0x64] sm:$0xf0] }
 0x1f4   :  { %2656 = vmatpush.bf16.msra.mxu0 %v7945_v6  ;;  %2631 = vmatpush.bf16.msrb.mxu2 %v7401_v46  ;;  %v8070_v26 = vld [vmem:[#allocation2 + $0x6a0] sm:$0xf0]  ;;  %v10193_v46 = vld [vmem:[#allocation2 + $0x1e4] sm:$0xf0] }
 0x1f5   :  { %v10204_v29 = vld [vmem:[#allocation2 + $0x244] sm:$0xf]  ;;  %v8073_v35 = vor.u32 %v10340_v25, %v8070_v26  ;;  %v7469_v55 = vor.u32 %v10193_v46, %v7468_v45  ;;  %v10169_v25 = vld [vmem:[#allocation2 + $0x124] sm:$0xf0] }
 0x1f6   :  { %2669 = vmatpush.bf16.msra.mxu1 %v8201_v36  ;;  %2644 = vmatpush.bf16.msrb.mxu3 %v7657_v48  ;;  %v7526_v31 = vld [vmem:[#allocation2 + $0x260] sm:$0xf0]  ;;  %v7724_v36 = vld [vmem:[#allocation2 + $0x3c8] sm:$0xf] }
 0x1f7   :  { %v10268_v32 = vld [vmem:[#allocation2 + $0x444] sm:$0xf]  ;;  %v7529_v40 = vor.u32 %v10204_v29, %v7526_v31  ;;  %v7725_v59 = vor.u32 %v10257_v47, %v7724_v36  ;;  %v8172_v26 = vld [vmem:[#allocation2 + $0x748] sm:$0xf] }
 0x1f8   :  { %2657 = vmatpush.bf16.msra.mxu0 %v7913_v12  ;;  %2632 = vmatpush.bf16.msrb.mxu2 %v7369_v57  ;;  %v7782_v33 = vld [vmem:[#allocation2 + $0x460] sm:$0xf0]  ;;  %v7980_v12 = vld [vmem:[#allocation2 + $0x5c8] sm:$0xf] }
 0x1f9   :  { %v10132_v16 = vld [vmem:[#allocation2 + $0x4] sm:$0xf]  ;;  %v7785_v23 = vor.u32 %v10268_v32, %v7782_v33  ;;  %v7628_v31 = vld [vmem:[#allocation2 + $0x308] sm:$0xf] }
 0x1fa   :  { %2670 = vmatpush.bf16.msra.mxu1 %v8169_v58  ;;  %2645 = vmatpush.bf16.msrb.mxu3 %v7625_v60  ;;  %v7238_v38 = vld [vmem:[#allocation2 + $0x20] sm:$0xf0]  ;;  %v7436_v58 = vld [vmem:[#allocation2 + $0x188] sm:$0xf] }
 0x1fb   :  { %v10196_v39 = vld [vmem:[#allocation2 + $0x204] sm:$0xf]  ;;  %v7241_v50 = vor.u32 %v10132_v16, %v7238_v38  ;;  %v10233_v32 = vld [vmem:[#allocation2 + $0x324] sm:$0xf0] }
 0x1fc   :  { %2658 = vmatpush.bf16.msra.mxu0 %v7881_v0  ;;  %2633 = vmatpush.bf16.msrb.mxu2 %v7337_v4  ;;  %v7494_v6 = vld [vmem:[#allocation2 + $0x220] sm:$0xf0]  ;;  %v7981_v0 = vor.u32 %v10321_v53, %v7980_v12  ;;  %v10313_v4 = vld [vmem:[#allocation2 + $0x5a4] sm:$0xf0] }
 0x1fd   :  { %v10332_v42 = vld [vmem:[#allocation2 + $0x644] sm:$0xf]  ;;  %v7497_v54 = vor.u32 %v10196_v39, %v7494_v6  ;;  %v7949_v14 = vor.u32 %v10313_v4, %v7948_v3  ;;  %v7884_v33 = vld [vmem:[#allocation2 + $0x508] sm:$0xf]  ;;  %v7629_v39 = vor.u32 %v10233_v32, %v7628_v31  ;;  %v7982_v31 = vld [vmem:[#allocation2 + $0x5e8] sm:$0xf0] }
 0x1fe   :  { %2671 = vmatpush.bf16.msra.mxu1 %v8137_v5  ;;  %2646 = vmatpush.bf16.msrb.mxu3 %v7593_v8  ;;  %v8038_v43 = vld [vmem:[#allocation2 + $0x660] sm:$0xf0]  ;;  %v7437_v5 = vor.u32 %v10185_v61, %v7436_v58  ;;  %v7404_v8 = vld [vmem:[#allocation2 + $0x148] sm:$0xf] }
 0x1ff   :  { %v10260_v48 = vld [vmem:[#allocation2 + $0x404] sm:$0xf]  ;;  %v8041_v51 = vor.u32 %v10332_v42, %v8038_v43  ;;  %v7340_v38 = vld [vmem:[#allocation2 + $0xc8] sm:$0xf] }
 0x200   :  { %2659 = vmatpush.bf16.msra.mxu0 %v7849_v13  ;;  %2634 = vmatpush.bf16.msrb.mxu2 %v7305_v18  ;;  %v7750_v49 = vld [vmem:[#allocation2 + $0x420] sm:$0xf0]  ;;  %v10377_v13 = vld [vmem:[#allocation2 + $0x7a4] sm:$0xf0] }
 0x201   :  { %v10324_v56 = vld [vmem:[#allocation2 + $0x604] sm:$0xf]  ;;  %v7753_v60 = vor.u32 %v10260_v48, %v7750_v49  ;;  %v10305_v18 = vld [vmem:[#allocation2 + $0x564] sm:$0xf0]  ;;  %v8205_v20 = vor.u32 %v10377_v13, %v8204_v11 }
 0x202   :  { %2672 = vmatpush.bf16.msra.mxu1 %v8105_v19  ;;  %2647 = vmatpush.bf16.msrb.mxu3 %v7561_v21  ;;  %v8006_v57 = vld [vmem:[#allocation2 + $0x620] sm:$0xf0]  ;;  %v7405_v19 = vor.u32 %v10177_v10, %v7404_v8  ;;  %v7372_v21 = vld [vmem:[#allocation2 + $0x108] sm:$0xf]  ;;  %v7917_v29 = vor.u32 %v10305_v18, %v7916_v17  ;;  %v10189_v18 = vld [vmem:[#allocation2 + $0x1cc] sm:$0xf] }
 0x203   :  { %v8009_v37 = vor.u32 %v10324_v56, %v8006_v57  ;;  %v8140_v6 = vld [vmem:[#allocation2 + $0x708] sm:$0xf] }
 0x204   :  { %2660 = vmatpush.bf16.msra.mxu0 %v7817_v28  ;;  %2635 = vmatpush.bf16.msrb.mxu2 %v7273_v34  ;;  %v10369_v28 = vld [vmem:[#allocation2 + $0x764] sm:$0xf0] }
 0x205   :  { %v10297_v34 = vld [vmem:[#allocation2 + $0x524] sm:$0xf0]  ;;  %v8173_v16 = vor.u32 %v10369_v28, %v8172_v26 }
 0x206   :  { %2673 = vmatpush.bf16.msra.mxu1 %v8073_v35  ;;  %2648 = vmatpush.bf16.msrb.mxu3 %v7529_v40  ;;  %v7373_v35 = vor.u32 %v10169_v25, %v7372_v21  ;;  %v10161_v40 = vld [vmem:[#allocation2 + $0xe4] sm:$0xf0]  ;;  %v7885_v43 = vor.u32 %v10297_v34, %v7884_v33  ;;  %v7726_v21 = vld [vmem:[#allocation2 + $0x3e8] sm:$0xf0] }
 0x207   :  { %v10361_v42 = vld [vmem:[#allocation2 + $0x724] sm:$0xf0]  ;;  %v7341_v47 = vor.u32 %v10161_v40, %v7340_v38  ;;  %v7438_v40 = vld [vmem:[#allocation2 + $0x1a8] sm:$0xf0] }
 0x208   :  { %2661 = vmatpush.bf16.msra.mxu0 %v7785_v23  ;;  %2636 = vmatpush.bf16.msrb.mxu2 %v7241_v50  ;;  %v7596_v23 = vld [vmem:[#allocation2 + $0x2c8] sm:$0xf]  ;;  %v8141_v48 = vor.u32 %v10361_v42, %v8140_v6  ;;  %v10381_v6 = vld [vmem:[#allocation2 + $0x7cc] sm:$0xf] }
 0x209   :  { %v10225_v45 = vld [vmem:[#allocation2 + $0x2e4] sm:$0xf0]  ;;  %v8238_v42 = vld [vmem:[#allocation2 + $0x7e8] sm:$0xf0] }
 0x20a   :  { %2674 = vmatpush.bf16.msra.mxu1 %v8041_v51  ;;  %2649 = vmatpush.bf16.msrb.mxu3 %v7497_v54  ;;  %v7852_v46 = vld [vmem:[#allocation2 + $0x4c8] sm:$0xf]  ;;  %v7597_v50 = vor.u32 %v10225_v45, %v7596_v23  ;;  %v10245_v23 = vld [vmem:[#allocation2 + $0x38c] sm:$0xf] }
 0x20b   :  { %2637 = vmatmul.bf16.vlgmr.msrb.gmra.mxu2 %v11432_v24  ;;  %v10289_v36 = vld [vmem:[#allocation2 + $0x4e4] sm:$0xf0]  ;;  %v7694_v45 = vld [vmem:[#allocation2 + $0x3a8] sm:$0xf0] }
 0x20c   :  { %2681 = vmatpush.bf16.msra.mxu2 %v7469_v55  ;;  %2662 = vmatpush.bf16.msra.mxu0 %v7753_v60  ;;  %v7308_v49 = vld [vmem:[#allocation2 + $0x88] sm:$0xf]  ;;  %v7853_v54 = vor.u32 %v10289_v36, %v7852_v46  ;;  %v10309_v36 = vld [vmem:[#allocation2 + $0x58c] sm:$0xf] }
 0x20d   :  { %2650 = vmatmul.bf16.vlgmr.msrb.gmra.mxu3 %v11436_v30  ;;  %v10153_v51 = vld [vmem:[#allocation2 + $0xa4] sm:$0xf0] }
 0x20e   :  { %2694 = vmatpush.bf16.msra.mxu3 %v7725_v59  ;;  %2675 = vmatpush.bf16.msra.mxu1 %v8009_v37  ;;  %v8108_v12 = vld [vmem:[#allocation2 + $0x6c8] sm:$0xf]  ;;  %v7309_v59 = vor.u32 %v10153_v51, %v7308_v49  ;;  %v8241_v49 = vor.u32 %v10381_v6, %v8238_v42  ;;  %v7697_v51 = vor.u32 %v10245_v23, %v7694_v45  ;;  %v7278_v42 = vld [vmem:[#allocation2 + $0x68] sm:$0xf0] }
 0x20f   :  { %2663 = vmatmul.bf16.vlgmr.msra.gmra.mxu0 %v11440_v41  ;;  %v10353_v53 = vld [vmem:[#allocation2 + $0x6e4] sm:$0xf0]  ;;  %v8078_v23 = vld [vmem:[#allocation2 + $0x6a8] sm:$0xf0] }
 0x210   :  { %2707 = vmatpush.bf16.msrb.mxu0 %v7981_v0  ;;  %2682 = vmatpush.bf16.msra.mxu2 %v7437_v5  ;;  %v7564_v55 = vld [vmem:[#allocation2 + $0x288] sm:$0xf]  ;;  %v8109_v60 = vor.u32 %v10353_v53, %v8108_v12  ;;  %v7406_v12 = vld [vmem:[#allocation2 + $0x168] sm:$0xf0] }
 0x211   :  { %2676 = vmatmul.bf16.vlgmr.msra.gmra.mxu1 %v11445_v44  ;;  %v10217_v56 = vld [vmem:[#allocation2 + $0x2a4] sm:$0xf0]  ;;  %v10373_v53 = vld [vmem:[#allocation2 + $0x78c] sm:$0xf] }
 0x212   :  { %2720 = vmatpush.bf16.msrb.mxu1 %v8237_v7  ;;  %2695 = vmatpush.bf16.msra.mxu3 %v7693_v9  ;;  %v7820_v57 = vld [vmem:[#allocation2 + $0x488] sm:$0xf]  ;;  %v7565_v62 = vor.u32 %v10217_v56, %v7564_v55  ;;  %v10237_v56 = vld [vmem:[#allocation2 + $0x34c] sm:$0xf] }
 0x213   :  { %v10281_v58 = vld [vmem:[#allocation2 + $0x4a4] sm:$0xf0] }
 0x214   :  { %2708 = vmatpush.bf16.msrb.mxu0 %v7949_v14  ;;  %2683 = vmatpush.bf16.msra.mxu2 %v7405_v19  ;;  %v7276_v61 = vld [vmem:[#allocation2 + $0x48] sm:$0xf]  ;;  %v7821_v2 = vor.u32 %v10281_v58, %v7820_v57  ;;  %v7470_v19 = vld [vmem:[#allocation2 + $0x1e8] sm:$0xf0] }
 0x215   :  { %v8076_v0 = vld [vmem:[#allocation2 + $0x688] sm:$0xf]  ;;  %v7277_v7 = vor.u32 %v10145_v63, %v7276_v61  ;;  %v7473_v33 = vor.u32 %v10189_v18, %v7470_v19  ;;  %v7662_v57 = vld [vmem:[#allocation2 + $0x368] sm:$0xf0] }
 0x216   :  { %2721 = vmatpush.bf16.msrb.mxu1 %v8205_v20  ;;  %2696 = vmatpush.bf16.msra.mxu3 %v7661_v22  ;;  %v10345_v1 = vld [vmem:[#allocation2 + $0x6a4] sm:$0xf0]  ;;  %v10253_v20 = vld [vmem:[#allocation2 + $0x3cc] sm:$0xf]  ;;  %v7665_v63 = vor.u32 %v10237_v56, %v7662_v57 }
 0x217   :  { %v7532_v37 = vld [vmem:[#allocation2 + $0x248] sm:$0xf]  ;;  %v8077_v8 = vor.u32 %v10345_v1, %v8076_v0  ;;  %v7729_v38 = vor.u32 %v10253_v20, %v7726_v21  ;;  %v10301_v58 = vld [vmem:[#allocation2 + $0x54c] sm:$0xf] }
 0x218   :  { %2709 = vmatpush.bf16.msrb.mxu0 %v7917_v29  ;;  %2684 = vmatpush.bf16.msra.mxu2 %v7373_v35  ;;  %v10209_v3 = vld [vmem:[#allocation2 + $0x264] sm:$0xf0]  ;;  %v10317_v29 = vld [vmem:[#allocation2 + $0x5cc] sm:$0xf] }
 0x219   :  { %v7788_v4 = vld [vmem:[#allocation2 + $0x448] sm:$0xf]  ;;  %v7533_v13 = vor.u32 %v10209_v3, %v7532_v37  ;;  %v7374_v0 = vld [vmem:[#allocation2 + $0x128] sm:$0xf0] }
 0x21a   :  { %2722 = vmatpush.bf16.msrb.mxu1 %v8173_v16  ;;  %2697 = vmatpush.bf16.msra.mxu3 %v7629_v39  ;;  %v10273_v5 = vld [vmem:[#allocation2 + $0x464] sm:$0xf0]  ;;  %v10181_v16 = vld [vmem:[#allocation2 + $0x18c] sm:$0xf] }
 0x21b   :  { %v7244_v9 = vld [vmem:[#allocation2 + $0x8] sm:$0xf]  ;;  %v7789_v17 = vor.u32 %v10273_v5, %v7788_v4  ;;  %v10365_v1 = vld [vmem:[#allocation2 + $0x74c] sm:$0xf] }
 0x21c   :  { %2710 = vmatpush.bf16.msrb.mxu0 %v7885_v43  ;;  %2685 = vmatpush.bf16.msra.mxu2 %v7341_v47  ;;  %v10137_v10 = vld [vmem:[#allocation2 + $0x24] sm:$0xf0]  ;;  %v7985_v43 = vor.u32 %v10317_v29, %v7982_v31  ;;  %v7950_v47 = vld [vmem:[#allocation2 + $0x5a8] sm:$0xf0] }
 0x21d   :  { %v7500_v11 = vld [vmem:[#allocation2 + $0x208] sm:$0xf]  ;;  %v7245_v26 = vor.u32 %v10137_v10, %v7244_v9  ;;  %v7953_v55 = vor.u32 %v10309_v36, %v7950_v47  ;;  %v10229_v3 = vld [vmem:[#allocation2 + $0x30c] sm:$0xf] }
 0x21e   :  { %2723 = vmatpush.bf16.msrb.mxu1 %v8141_v48  ;;  %2698 = vmatpush.bf16.msra.mxu3 %v7597_v50  ;;  %v10201_v14 = vld [vmem:[#allocation2 + $0x224] sm:$0xf0]  ;;  %v7441_v48 = vor.u32 %v10181_v16, %v7438_v40  ;;  %v10173_v50 = vld [vmem:[#allocation2 + $0x14c] sm:$0xf] }
 0x21f   :  { %v8044_v15 = vld [vmem:[#allocation2 + $0x648] sm:$0xf]  ;;  %v7501_v32 = vor.u32 %v10201_v14, %v7500_v11  ;;  %v7630_v4 = vld [vmem:[#allocation2 + $0x328] sm:$0xf0] }
 0x220   :  { %2711 = vmatpush.bf16.msrb.mxu0 %v7853_v54  ;;  %2686 = vmatpush.bf16.msra.mxu2 %v7309_v59  ;;  %v10337_v52 = vld [vmem:[#allocation2 + $0x664] sm:$0xf0]  ;;  %v8206_v54 = vld [vmem:[#allocation2 + $0x7a8] sm:$0xf0]  ;;  %v7633_v11 = vor.u32 %v10229_v3, %v7630_v4  ;;  %v10322_v3 = vld [vmem:[#allocation2 + $0x5ec] sm:$0xf0] }
 0x221   :  { %v7756_v22 = vld [vmem:[#allocation2 + $0x408] sm:$0xf]  ;;  %v8045_v28 = vor.u32 %v10337_v52, %v8044_v15  ;;  %v7918_v59 = vld [vmem:[#allocation2 + $0x568] sm:$0xf0]  ;;  %v8209_v61 = vor.u32 %v10373_v53, %v8206_v54 }
 0x222   :  { %2724 = vmatpush.bf16.msrb.mxu1 %v8109_v60  ;;  %2699 = vmatpush.bf16.msra.mxu3 %v7565_v62  ;;  %v10265_v25 = vld [vmem:[#allocation2 + $0x424] sm:$0xf0]  ;;  %v7409_v60 = vor.u32 %v10173_v50, %v7406_v12  ;;  %v10165_v62 = vld [vmem:[#allocation2 + $0x10c] sm:$0xf]  ;;  %v7921_v37 = vor.u32 %v10301_v58, %v7918_v59  ;;  %v7476_v59 = vld [vmem:[#allocation2 + $0x1d0] sm:$0xf] }
 0x223   :  { %v8012_v34 = vld [vmem:[#allocation2 + $0x608] sm:$0xf]  ;;  %v7757_v39 = vor.u32 %v10265_v25, %v7756_v22  ;;  %v10293_v5 = vld [vmem:[#allocation2 + $0x50c] sm:$0xf] }
 0x224   :  { %2712 = vmatpush.bf16.msrb.mxu0 %v7821_v2  ;;  %2687 = vmatpush.bf16.msra.mxu2 %v7277_v7  ;;  %v10329_v35 = vld [vmem:[#allocation2 + $0x624] sm:$0xf0]  ;;  %v8174_v2 = vld [vmem:[#allocation2 + $0x768] sm:$0xf0] }
 0x225   :  { %v8013_v46 = vor.u32 %v10329_v35, %v8012_v34  ;;  %v7886_v7 = vld [vmem:[#allocation2 + $0x528] sm:$0xf0]  ;;  %v8177_v9 = vor.u32 %v10365_v1, %v8174_v2 }
 0x226   :  { %2725 = vmatpush.bf16.msrb.mxu1 %v8077_v8  ;;  %2700 = vmatpush.bf16.msra.mxu3 %v7533_v13  ;;  %v7377_v8 = vor.u32 %v10165_v62, %v7374_v0  ;;  %v10157_v10 = vld [vmem:[#allocation2 + $0xcc] sm:$0xf]  ;;  %v7889_v52 = vor.u32 %v10293_v5, %v7886_v7  ;;  %v10258_v62 = vld [vmem:[#allocation2 + $0x3ec] sm:$0xf0] }
 0x227   :  { %v7342_v13 = vld [vmem:[#allocation2 + $0xe8] sm:$0xf0] }
 0x228   :  { %2713 = vmatpush.bf16.msrb.mxu0 %v7789_v17  ;;  %2688 = vmatpush.bf16.msra.mxu2 %v7245_v26  ;;  %v10357_v14 = vld [vmem:[#allocation2 + $0x70c] sm:$0xf]  ;;  %v7345_v21 = vor.u32 %v10157_v10, %v7342_v13  ;;  %v10186_v13 = vld [vmem:[#allocation2 + $0x1ac] sm:$0xf0] }
 0x229   :  { %v8142_v15 = vld [vmem:[#allocation2 + $0x728] sm:$0xf0] }
 0x22a   :  { %2726 = vmatpush.bf16.msrb.mxu1 %v8045_v28  ;;  %2701 = vmatpush.bf16.msra.mxu3 %v7501_v32  ;;  %v10221_v17 = vld [vmem:[#allocation2 + $0x2cc] sm:$0xf]  ;;  %v8145_v22 = vor.u32 %v10357_v14, %v8142_v15  ;;  %v8244_v14 = vld [vmem:[#allocation2 + $0x7d0] sm:$0xf] }
 0x22b   :  { %2689 = vmatmul.bf16.vlgmr.msra.gmra.mxu2 %v11432_v24  ;;  %v7598_v18 = vld [vmem:[#allocation2 + $0x2e8] sm:$0xf0]  ;;  %v10386_v15 = vld [vmem:[#allocation2 + $0x7ec] sm:$0xf0] }
 0x22c   :  { %2733 = vmatpush.bf16.msrb.mxu2 %v7473_v33  ;;  %2714 = vmatpush.bf16.msrb.mxu0 %v7757_v39  ;;  %v10285_v19 = vld [vmem:[#allocation2 + $0x4cc] sm:$0xf]  ;;  %v7601_v26 = vor.u32 %v10221_v17, %v7598_v18  ;;  %v7700_v17 = vld [vmem:[#allocation2 + $0x390] sm:$0xf] }
 0x22d   :  { %2702 = vmatmul.bf16.vlgmr.msra.gmra.mxu3 %v11436_v30  ;;  %v7854_v20 = vld [vmem:[#allocation2 + $0x4e8] sm:$0xf0]  ;;  %v10250_v18 = vld [vmem:[#allocation2 + $0x3ac] sm:$0xf0] }
 0x22e   :  { %2746 = vmatpush.bf16.msrb.mxu3 %v7729_v38  ;;  %2727 = vmatpush.bf16.msrb.mxu1 %v8013_v46  ;;  %v10149_v25 = vld [vmem:[#allocation2 + $0x8c] sm:$0xf]  ;;  %v7857_v32 = vor.u32 %v10285_v19, %v7854_v20  ;;  %v7956_v20 = vld [vmem:[#allocation2 + $0x590] sm:$0xf] }
 0x22f   :  { %2715 = vmatmul.bf16.vlgmr.msrb.gmra.mxu0 %v11440_v41  ;;  %v7310_v28 = vld [vmem:[#allocation2 + $0xa8] sm:$0xf0] }
 0x230   :  { %2759 = vmatpush.bf16.msra.mxu0 %v7985_v43  ;;  %2734 = vmatpush.bf16.msrb.mxu2 %v7441_v48  ;;  %v10349_v29 = vld [vmem:[#allocation2 + $0x6cc] sm:$0xf]  ;;  %v7313_v38 = vor.u32 %v10149_v25, %v7310_v28  ;;  %v8245_v25 = vor.u32 %v10386_v15, %v8244_v14  ;;  %v7701_v28 = vor.u32 %v10250_v18, %v7700_v17  ;;  %v10146_v15 = vld [vmem:[#allocation2 + $0x6c] sm:$0xf0] }
 0x231   :  { %2728 = vmatmul.bf16.vlgmr.msrb.gmra.mxu1 %v11445_v44  ;;  %v8110_v31 = vld [vmem:[#allocation2 + $0x6e8] sm:$0xf0]  ;;  %v10346_v17 = vld [vmem:[#allocation2 + $0x6ac] sm:$0xf0] }
 0x232   :  { %2772 = vmatpush.bf16.msra.mxu1 %v8241_v49  ;;  %2747 = vmatpush.bf16.msrb.mxu3 %v7697_v51  ;;  %v10213_v33 = vld [vmem:[#allocation2 + $0x28c] sm:$0xf]  ;;  %v8113_v39 = vor.u32 %v10349_v29, %v8110_v31  ;;  %v10178_v29 = vld [vmem:[#allocation2 + $0x16c] sm:$0xf0] }
 0x233   :  { %v7566_v34 = vld [vmem:[#allocation2 + $0x2a8] sm:$0xf0]  ;;  %v8212_v31 = vld [vmem:[#allocation2 + $0x790] sm:$0xf] }
 0x234   :  { %2760 = vmatpush.bf16.msra.mxu0 %v7953_v55  ;;  %2735 = vmatpush.bf16.msrb.mxu2 %v7409_v60  ;;  %v10277_v35 = vld [vmem:[#allocation2 + $0x48c] sm:$0xf]  ;;  %v7569_v6 = vor.u32 %v10213_v33, %v7566_v34  ;;  %v10194_v60 = vld [vmem:[#allocation2 + $0x1ec] sm:$0xf0] }
 0x235   :  { %v7822_v16 = vld [vmem:[#allocation2 + $0x4a8] sm:$0xf0]  ;;  %v7477_v5 = vor.u32 %v10194_v60, %v7476_v59  ;;  %v7668_v34 = vld [vmem:[#allocation2 + $0x350] sm:$0xf] }
 0x236   :  { %2773 = vmatpush.bf16.msra.mxu1 %v8209_v61  ;;  %2748 = vmatpush.bf16.msrb.mxu3 %v7665_v63  ;;  %v10141_v40 = vld [vmem:[#allocation2 + $0x4c] sm:$0xf]  ;;  %v7825_v45 = vor.u32 %v10277_v35, %v7822_v16  ;;  %v7732_v61 = vld [vmem:[#allocation2 + $0x3d0] sm:$0xf] }
 0x237   :  { %v10341_v43 = vld [vmem:[#allocation2 + $0x68c] sm:$0xf]  ;;  %v7281_v49 = vor.u32 %v10141_v40, %v7278_v42  ;;  %v7733_v10 = vor.u32 %v10258_v62, %v7732_v61  ;;  %v10242_v35 = vld [vmem:[#allocation2 + $0x36c] sm:$0xf0] }
 0x238   :  { %2761 = vmatpush.bf16.msra.mxu0 %v7921_v37  ;;  %2736 = vmatpush.bf16.msrb.mxu2 %v7377_v8  ;;  %v10205_v46 = vld [vmem:[#allocation2 + $0x24c] sm:$0xf]  ;;  %v8081_v50 = vor.u32 %v10341_v43, %v8078_v23  ;;  %v7988_v37 = vld [vmem:[#allocation2 + $0x5d0] sm:$0xf]  ;;  %v7669_v42 = vor.u32 %v10242_v35, %v7668_v34 }
 0x239   :  { %v7534_v36 = vld [vmem:[#allocation2 + $0x268] sm:$0xf0]  ;;  %v7924_v16 = vld [vmem:[#allocation2 + $0x550] sm:$0xf] }
 0x23a   :  { %2774 = vmatpush.bf16.msra.mxu1 %v8177_v9  ;;  %2749 = vmatpush.bf16.msrb.mxu3 %v7633_v11  ;;  %v10269_v47 = vld [vmem:[#allocation2 + $0x44c] sm:$0xf]  ;;  %v7537_v54 = vor.u32 %v10205_v46, %v7534_v36  ;;  %v7444_v9 = vld [vmem:[#allocation2 + $0x190] sm:$0xf] }
 0x23b   :  { %v7790_v48 = vld [vmem:[#allocation2 + $0x468] sm:$0xf0]  ;;  %v10170_v43 = vld [vmem:[#allocation2 + $0x12c] sm:$0xf0] }
 0x23c   :  { %2762 = vmatpush.bf16.msra.mxu0 %v7889_v52  ;;  %2737 = vmatpush.bf16.msrb.mxu2 %v7345_v21  ;;  %v10133_v51 = vld [vmem:[#allocation2 + $0xc] sm:$0xf]  ;;  %v7793_v58 = vor.u32 %v10269_v47, %v7790_v48  ;;  %v7989_v52 = vor.u32 %v10322_v3, %v7988_v37  ;;  %v10314_v21 = vld [vmem:[#allocation2 + $0x5ac] sm:$0xf0] }
 0x23d   :  { %v7246_v12 = vld [vmem:[#allocation2 + $0x28] sm:$0xf0]  ;;  %v7957_v33 = vor.u32 %v10314_v21, %v7956_v20  ;;  %v8180_v23 = vld [vmem:[#allocation2 + $0x750] sm:$0xf] }
 0x23e   :  { %2775 = vmatpush.bf16.msra.mxu1 %v8145_v22  ;;  %2750 = vmatpush.bf16.msrb.mxu3 %v7601_v26  ;;  %v10197_v53 = vld [vmem:[#allocation2 + $0x20c] sm:$0xf]  ;;  %v7249_v1 = vor.u32 %v10133_v51, %v7246_v12  ;;  %v7445_v22 = vor.u32 %v10186_v13, %v7444_v9  ;;  %v7412_v26 = vld [vmem:[#allocation2 + $0x150] sm:$0xf] }
 0x23f   :  { %v7502_v55 = vld [vmem:[#allocation2 + $0x228] sm:$0xf0]  ;;  %v7636_v36 = vld [vmem:[#allocation2 + $0x310] sm:$0xf] }
 0x240   :  { %2763 = vmatpush.bf16.msra.mxu0 %v7857_v32  ;;  %2738 = vmatpush.bf16.msrb.mxu2 %v7313_v38  ;;  %v10333_v56 = vld [vmem:[#allocation2 + $0x64c] sm:$0xf]  ;;  %v7505_v4 = vor.u32 %v10197_v53, %v7502_v55  ;;  %v10378_v32 = vld [vmem:[#allocation2 + $0x7ac] sm:$0xf0] }
 0x241   :  { %v8046_v57 = vld [vmem:[#allocation2 + $0x668] sm:$0xf0]  ;;  %v10306_v38 = vld [vmem:[#allocation2 + $0x56c] sm:$0xf0]  ;;  %v8213_v40 = vor.u32 %v10378_v32, %v8212_v31 }
 0x242   :  { %2776 = vmatpush.bf16.msra.mxu1 %v8113_v39  ;;  %2751 = vmatpush.bf16.msrb.mxu3 %v7569_v6  ;;  %v10261_v63 = vld [vmem:[#allocation2 + $0x40c] sm:$0xf]  ;;  %v8049_v2 = vor.u32 %v10333_v56, %v8046_v57  ;;  %v7413_v39 = vor.u32 %v10178_v29, %v7412_v26  ;;  %v7380_v6 = vld [vmem:[#allocation2 + $0x110] sm:$0xf]  ;;  %v7925_v46 = vor.u32 %v10306_v38, %v7924_v16  ;;  %v10190_v38 = vld [vmem:[#allocation2 + $0x1d4] sm:$0xf] }
 0x243   :  { %v7758_v0 = vld [vmem:[#allocation2 + $0x428] sm:$0xf0]  ;;  %v10234_v47 = vld [vmem:[#allocation2 + $0x32c] sm:$0xf0] }
 0x244   :  { %2764 = vmatpush.bf16.msra.mxu0 %v7825_v45  ;;  %2739 = vmatpush.bf16.msrb.mxu2 %v7281_v49  ;;  %v10325_v7 = vld [vmem:[#allocation2 + $0x60c] sm:$0xf]  ;;  %v7761_v11 = vor.u32 %v10261_v63, %v7758_v0  ;;  %v10370_v45 = vld [vmem:[#allocation2 + $0x76c] sm:$0xf0]  ;;  %v7637_v53 = vor.u32 %v10234_v47, %v7636_v36  ;;  %v7990_v36 = vld [vmem:[#allocation2 + $0x5f0] sm:$0xf0] }
 0x245   :  { %v8014_v8 = vld [vmem:[#allocation2 + $0x628] sm:$0xf0]  ;;  %v7892_v48 = vld [vmem:[#allocation2 + $0x510] sm:$0xf]  ;;  %v8181_v51 = vor.u32 %v10370_v45, %v8180_v23 }
 0x246   :  { %2777 = vmatpush.bf16.msra.mxu1 %v8081_v50  ;;  %2752 = vmatpush.bf16.msrb.mxu3 %v7537_v54  ;;  %v8017_v19 = vor.u32 %v10325_v7, %v8014_v8  ;;  %v10298_v49 = vld [vmem:[#allocation2 + $0x52c] sm:$0xf0]  ;;  %v7381_v50 = vor.u32 %v10170_v43, %v7380_v6  ;;  %v7734_v6 = vld [vmem:[#allocation2 + $0x3f0] sm:$0xf0] }
 0x247   :  { %v7348_v12 = vld [vmem:[#allocation2 + $0xd0] sm:$0xf]  ;;  %v7893_v57 = vor.u32 %v10298_v49, %v7892_v48 }
 0x248   :  { %2765 = vmatpush.bf16.msra.mxu0 %v7793_v58  ;;  %2740 = vmatpush.bf16.msrb.mxu2 %v7249_v1  ;;  %v10162_v54 = vld [vmem:[#allocation2 + $0xec] sm:$0xf0] }
 0x249   :  { %v8148_v55 = vld [vmem:[#allocation2 + $0x710] sm:$0xf]  ;;  %v7349_v62 = vor.u32 %v10162_v54, %v7348_v12  ;;  %v7446_v54 = vld [vmem:[#allocation2 + $0x1b0] sm:$0xf0] }
 0x24a   :  { %2778 = vmatpush.bf16.msra.mxu1 %v8049_v2  ;;  %2753 = vmatpush.bf16.msrb.mxu3 %v7505_v4  ;;  %v10362_v56 = vld [vmem:[#allocation2 + $0x72c] sm:$0xf0] }
 0x24b   :  { %2741 = vmatmul.bf16.vlgmr.msrb.gmra.mxu2 %v11432_v24  ;;  %v7604_v58 = vld [vmem:[#allocation2 + $0x2d0] sm:$0xf]  ;;  %v8149_v63 = vor.u32 %v10362_v56, %v8148_v55  ;;  %v10382_v55 = vld [vmem:[#allocation2 + $0x7d4] sm:$0xf] }
 0x24c   :  { %2785 = vmatpush.bf16.msra.mxu2 %v7477_v5  ;;  %2766 = vmatpush.bf16.msra.mxu0 %v7761_v11  ;;  %v10226_v59 = vld [vmem:[#allocation2 + $0x2ec] sm:$0xf0]  ;;  %v8246_v56 = vld [vmem:[#allocation2 + $0x7f0] sm:$0xf0] }
 0x24d   :  { %2754 = vmatmul.bf16.vlgmr.msrb.gmra.mxu3 %v11436_v30  ;;  %v7860_v60 = vld [vmem:[#allocation2 + $0x4d0] sm:$0xf]  ;;  %v7605_v1 = vor.u32 %v10226_v59, %v7604_v58  ;;  %v10246_v58 = vld [vmem:[#allocation2 + $0x394] sm:$0xf] }
 0x24e   :  { %2798 = vmatpush.bf16.msra.mxu3 %v7733_v10  ;;  %2779 = vmatpush.bf16.msra.mxu1 %v8017_v19  ;;  %v10290_v61 = vld [vmem:[#allocation2 + $0x4ec] sm:$0xf0]  ;;  %v7702_v59 = vld [vmem:[#allocation2 + $0x3b0] sm:$0xf0] }
 0x24f   :  { %2767 = vmatmul.bf16.vlgmr.msra.gmra.mxu0 %v11440_v41  ;;  %v7316_v0 = vld [vmem:[#allocation2 + $0x90] sm:$0xf]  ;;  %v7861_v4 = vor.u32 %v10290_v61, %v7860_v60  ;;  %v10310_v61 = vld [vmem:[#allocation2 + $0x594] sm:$0xf] }
 0x250   :  { %2811 = vmatpush.bf16.msrb.mxu0 %v7989_v52  ;;  %2786 = vmatpush.bf16.msra.mxu2 %v7445_v22  ;;  %v10154_v2 = vld [vmem:[#allocation2 + $0xac] sm:$0xf0] }
 0x251   :  { %2780 = vmatmul.bf16.vlgmr.msra.gmra.mxu1 %v11445_v44  ;;  %v8116_v37 = vld [vmem:[#allocation2 + $0x6d0] sm:$0xf]  ;;  %v7317_v10 = vor.u32 %v10154_v2, %v7316_v0  ;;  %v8249_v0 = vor.u32 %v10382_v55, %v8246_v56  ;;  %v7705_v2 = vor.u32 %v10246_v58, %v7702_v59  ;;  %v10142_v58 = vld [vmem:[#allocation2 + $0x54] sm:$0xf] }
 0x252   :  { %2824 = vmatpush.bf16.msrb.mxu1 %v8245_v25  ;;  %2799 = vmatpush.bf16.msra.mxu3 %v7701_v28  ;;  %v10354_v3 = vld [vmem:[#allocation2 + $0x6ec] sm:$0xf0] }
 0x253   :  { %v7572_v5 = vld [vmem:[#allocation2 + $0x290] sm:$0xf]  ;;  %v8117_v11 = vor.u32 %v10354_v3, %v8116_v37  ;;  %v7414_v37 = vld [vmem:[#allocation2 + $0x170] sm:$0xf0] }
 0x254   :  { %2812 = vmatpush.bf16.msrb.mxu0 %v7957_v33  ;;  %2787 = vmatpush.bf16.msra.mxu2 %v7413_v39  ;;  %v10218_v7 = vld [vmem:[#allocation2 + $0x2ac] sm:$0xf0]  ;;  %v7478_v39 = vld [vmem:[#allocation2 + $0x1f0] sm:$0xf0] }
 0x255   :  { %v7828_v8 = vld [vmem:[#allocation2 + $0x490] sm:$0xf]  ;;  %v7573_v14 = vor.u32 %v10218_v7, %v7572_v5  ;;  %v7481_v48 = vor.u32 %v10190_v38, %v7478_v39  ;;  %v10374_v3 = vld [vmem:[#allocation2 + $0x794] sm:$0xf] }
 0x256   :  { %2825 = vmatpush.bf16.msrb.mxu1 %v8213_v40  ;;  %2800 = vmatpush.bf16.msra.mxu3 %v7669_v42  ;;  %v10282_v9 = vld [vmem:[#allocation2 + $0x4ac] sm:$0xf0]  ;;  %v10254_v40 = vld [vmem:[#allocation2 + $0x3d4] sm:$0xf] }
 0x257   :  { %v7284_v13 = vld [vmem:[#allocation2 + $0x50] sm:$0xf]  ;;  %v7829_v18 = vor.u32 %v10282_v9, %v7828_v8  ;;  %v7737_v12 = vor.u32 %v10254_v40, %v7734_v6  ;;  %v10238_v7 = vld [vmem:[#allocation2 + $0x354] sm:$0xf] }
 0x258   :  { %2813 = vmatpush.bf16.msrb.mxu0 %v7925_v46  ;;  %2788 = vmatpush.bf16.msra.mxu2 %v7381_v50  ;;  %v8084_v52 = vld [vmem:[#allocation2 + $0x690] sm:$0xf]  ;;  %v7285_v25 = vor.u32 %v10146_v15, %v7284_v13  ;;  %v10318_v46 = vld [vmem:[#allocation2 + $0x5d4] sm:$0xf] }
 0x259   :  { %v7540_v19 = vld [vmem:[#allocation2 + $0x250] sm:$0xf]  ;;  %v8085_v26 = vor.u32 %v10346_v17, %v8084_v52  ;;  %v7670_v8 = vld [vmem:[#allocation2 + $0x370] sm:$0xf0] }
 0x25a   :  { %2826 = vmatpush.bf16.msrb.mxu1 %v8181_v51  ;;  %2801 = vmatpush.bf16.msra.mxu3 %v7637_v53  ;;  %v10210_v20 = vld [vmem:[#allocation2 + $0x26c] sm:$0xf0]  ;;  %v10182_v51 = vld [vmem:[#allocation2 + $0x194] sm:$0xf]  ;;  %v7673_v15 = vor.u32 %v10238_v7, %v7670_v8 }
 0x25b   :  { %v7796_v21 = vld [vmem:[#allocation2 + $0x450] sm:$0xf]  ;;  %v7541_v32 = vor.u32 %v10210_v20, %v7540_v19  ;;  %v10302_v9 = vld [vmem:[#allocation2 + $0x554] sm:$0xf] }
 0x25c   :  { %2814 = vmatpush.bf16.msrb.mxu0 %v7893_v57  ;;  %2789 = vmatpush.bf16.msra.mxu2 %v7349_v62  ;;  %v10274_v22 = vld [vmem:[#allocation2 + $0x46c] sm:$0xf0]  ;;  %v7993_v57 = vor.u32 %v10318_v46, %v7990_v36  ;;  %v7958_v62 = vld [vmem:[#allocation2 + $0x5b0] sm:$0xf0] }
 0x25d   :  { %v7252_v28 = vld [vmem:[#allocation2 + $0x10] sm:$0xf]  ;;  %v7797_v16 = vor.u32 %v10274_v22, %v7796_v21  ;;  %v7961_v5 = vor.u32 %v10310_v61, %v7958_v62  ;;  %v7382_v52 = vld [vmem:[#allocation2 + $0x130] sm:$0xf0] }
 0x25e   :  { %2827 = vmatpush.bf16.msrb.mxu1 %v8149_v63  ;;  %2802 = vmatpush.bf16.msra.mxu3 %v7605_v1  ;;  %v10138_v29 = vld [vmem:[#allocation2 + $0x2c] sm:$0xf0]  ;;  %v7449_v63 = vor.u32 %v10182_v51, %v7446_v54  ;;  %v10174_v1 = vld [vmem:[#allocation2 + $0x154] sm:$0xf] }
 0x25f   :  { %v7508_v31 = vld [vmem:[#allocation2 + $0x210] sm:$0xf]  ;;  %v7253_v23 = vor.u32 %v10138_v29, %v7252_v28  ;;  %v10366_v17 = vld [vmem:[#allocation2 + $0x754] sm:$0xf] }
 0x260   :  { %2815 = vmatpush.bf16.msrb.mxu0 %v7861_v4  ;;  %2790 = vmatpush.bf16.msra.mxu2 %v7317_v10  ;;  %v10202_v33 = vld [vmem:[#allocation2 + $0x22c] sm:$0xf0]  ;;  %v8214_v4 = vld [vmem:[#allocation2 + $0x7b0] sm:$0xf0] }
 0x261   :  { %v8052_v34 = vld [vmem:[#allocation2 + $0x650] sm:$0xf]  ;;  %v7509_v47 = vor.u32 %v10202_v33, %v7508_v31  ;;  %v7926_v10 = vld [vmem:[#allocation2 + $0x570] sm:$0xf0]  ;;  %v8217_v13 = vor.u32 %v10374_v3, %v8214_v4 }
 0x262   :  { %2828 = vmatpush.bf16.msrb.mxu1 %v8117_v11  ;;  %2803 = vmatpush.bf16.msra.mxu3 %v7573_v14  ;;  %v10338_v35 = vld [vmem:[#allocation2 + $0x66c] sm:$0xf0]  ;;  %v7417_v11 = vor.u32 %v10174_v1, %v7414_v37  ;;  %v10166_v14 = vld [vmem:[#allocation2 + $0x114] sm:$0xf]  ;;  %v7929_v19 = vor.u32 %v10302_v9, %v7926_v10 }
 0x263   :  { %v7764_v42 = vld [vmem:[#allocation2 + $0x410] sm:$0xf]  ;;  %v8053_v45 = vor.u32 %v10338_v35, %v8052_v34  ;;  %v10230_v20 = vld [vmem:[#allocation2 + $0x314] sm:$0xf] }
 0x264   :  { %2816 = vmatpush.bf16.msrb.mxu0 %v7829_v18  ;;  %v10266_v43 = vld [vmem:[#allocation2 + $0x42c] sm:$0xf0]  ;;  %2791 = vmatpush.bf16.msra.mxu2 %v7285_v25  ;;  %v8182_v18 = vld [vmem:[#allocation2 + $0x770] sm:$0xf0] }
 0x265   :  { %v8020_v49 = vld [vmem:[#allocation2 + $0x610] sm:$0xf]  ;;  %v7765_v53 = vor.u32 %v10266_v43, %v7764_v42  ;;  %v7638_v21 = vld [vmem:[#allocation2 + $0x330] sm:$0xf0]  ;;  %v8185_v28 = vor.u32 %v10366_v17, %v8182_v18 }
 0x266   :  { %2829 = vmatpush.bf16.msrb.mxu1 %v8085_v26  ;;  %2804 = vmatpush.bf16.msra.mxu3 %v7541_v32  ;;  %v10330_v50 = vld [vmem:[#allocation2 + $0x62c] sm:$0xf0]  ;;  %v10294_v22 = vld [vmem:[#allocation2 + $0x514] sm:$0xf]  ;;  %v7385_v26 = vor.u32 %v10166_v14, %v7382_v52  ;;  %v7641_v31 = vor.u32 %v10230_v20, %v7638_v21  ;;  %v7484_v20 = vld [vmem:[#allocation2 + $0x1d8] sm:$0xf] }
 0x267   :  { %v8021_v60 = vor.u32 %v10330_v50, %v8020_v49  ;;  %v7894_v25 = vld [vmem:[#allocation2 + $0x530] sm:$0xf0]  ;;  %v10195_v21 = vld [vmem:[#allocation2 + $0x1f4] sm:$0xf0] }
 0x268   :  { %2817 = vmatpush.bf16.msrb.mxu0 %v7797_v16  ;;  %2792 = vmatpush.bf16.msra.mxu2 %v7253_v23  ;;  %v10158_v29 = vld [vmem:[#allocation2 + $0xd4] sm:$0xf]  ;;  %v7897_v35 = vor.u32 %v10294_v22, %v7894_v25  ;;  %v7740_v22 = vld [vmem:[#allocation2 + $0x3d8] sm:$0xf] }
 0x269   :  { %v7350_v32 = vld [vmem:[#allocation2 + $0xf0] sm:$0xf0] }
 0x26a   :  { %2830 = vmatpush.bf16.msrb.mxu1 %v8053_v45  ;;  %2805 = vmatpush.bf16.msra.mxu3 %v7509_v47  ;;  %v10358_v33 = vld [vmem:[#allocation2 + $0x714] sm:$0xf]  ;;  %v7353_v42 = vor.u32 %v10158_v29, %v7350_v32 }
 0x26b   :  { %2793 = vmatmul.bf16.vlgmr.msra.gmra.mxu2 %v11432_v24  ;;  %v8150_v34 = vld [vmem:[#allocation2 + $0x730] sm:$0xf0] }
 0x26c   :  { %2837 = vmatpush.bf16.msrb.mxu2 %v7481_v48  ;;  %2818 = vmatpush.bf16.msrb.mxu0 %v7765_v53  ;;  %v10222_v16 = vld [vmem:[#allocation2 + $0x2d4] sm:$0xf]  ;;  %v8153_v43 = vor.u32 %v10358_v33, %v8150_v34 }
 0x26d   :  { %2806 = vmatmul.bf16.vlgmr.msra.gmra.mxu3 %v11436_v30  ;;  %v7606_v38 = vld [vmem:[#allocation2 + $0x2f0] sm:$0xf0] }
 0x26e   :  { %2850 = vmatpush.bf16.msrb.mxu3 %v7737_v12  ;;  %2831 = vmatpush.bf16.msrb.mxu1 %v8021_v60  ;;  %v11466_v39 = vld [vmem:[#allocation17] sm:$0xff]  ;;  %v7609_v45 = vor.u32 %v10222_v16, %v7606_v38  ;;  %v2612_v12 = vpop.f32.mrf.mxu0  ;;  %v2625_v55 = vpop.f32.mrf.mxu1 }
 0x26f   :  { %2819 = vmatmul.bf16.vlgmr.msrb.gmra.mxu0 %v11440_v41  ;;  %v10286_v40 = vld [vmem:[#allocation2 + $0x4d4] sm:$0xf]  ;;  %v1281_v48 = vperm.slane %v11466_v39, 0  ;;  %v2586_v59 = vpop.f32.mrf.mxu2  ;;  %v10323_v16 = vld [vmem:[#allocation2 + $0x5f4] sm:$0xf0] }
 0x270   :  { %2863 = vmatpush.bf16.msra.mxu0 %v7993_v57  ;;  %2838 = vmatpush.bf16.msrb.mxu2 %v7449_v63  ;;  %v7862_v6 = vld [vmem:[#allocation2 + $0x4f0] sm:$0xf0]  ;;  %v2599_v1 = vpop.f32.mrf.mxu3 }
 0x271   :  { %2832 = vmatmul.bf16.vlgmr.msrb.gmra.mxu1 %v11445_v44  ;;  %v10150_v23 = vld [vmem:[#allocation2 + $0x94] sm:$0xf]  ;;  %v7865_v49 = vor.u32 %v10286_v40, %v7862_v6  ;;  %v7485_v6 = vor.u32 %v10195_v21, %v7484_v20  ;;  %v7900_v21 = vld [vmem:[#allocation2 + $0x518] sm:$0xf] }
 0x272   :  { %2876 = vmatpush.bf16.msra.mxu1 %v8249_v0  ;;  %2851 = vmatpush.bf16.msrb.mxu3 %v7705_v2  ;;  %v7318_v46 = vld [vmem:[#allocation2 + $0xb0] sm:$0xf0]  ;;  %v2587_v0 = vadd.f32 %v2586_v59, %v1281_v48  ;;  %v8252_v48 = vld [vmem:[#allocation2 + $0x7d8] sm:$0xf] }
 0x273   :  { %v10350_v36 = vld [vmem:[#allocation2 + $0x6d4] sm:$0xf]  ;;  %v7321_v56 = vor.u32 %v10150_v23, %v7318_v46  ;;  %v10187_v23 = vld [vmem:[#allocation2 + $0x1b4] sm:$0xf0] }
 0x274   :  { %2864 = vmatpush.bf16.msra.mxu0 %v7961_v5  ;;  %2839 = vmatpush.bf16.msrb.mxu2 %v7417_v11  ;;  %v8118_v47 = vld [vmem:[#allocation2 + $0x6f0] sm:$0xf0]  ;;  %v2600_v7 = vadd.f32 %v2599_v1, %v2587_v0  ;;  %v8220_v0 = vld [vmem:[#allocation2 + $0x798] sm:$0xf] }
 0x275   :  { %v10214_v50 = vld [vmem:[#allocation2 + $0x294] sm:$0xf]  ;;  %v8121_v57 = vor.u32 %v10350_v36, %v8118_v47  ;;  %v10379_v1 = vld [vmem:[#allocation2 + $0x7b4] sm:$0xf0] }
 0x276   :  { %2877 = vmatpush.bf16.msra.mxu1 %v8217_v13  ;;  %2852 = vmatpush.bf16.msrb.mxu3 %v7673_v15  ;;  %v7574_v51 = vld [vmem:[#allocation2 + $0x2b0] sm:$0xf0]  ;;  %v2613_v18 = vadd.f32 %v2612_v12, %v2600_v7  ;;  %v2614_v25 = vpop.f32.mrf.mxu0  ;;  %v7708_v12 = vld [vmem:[#allocation2 + $0x398] sm:$0xf] }
 0x277   :  { %v10278_v53 = vld [vmem:[#allocation2 + $0x494] sm:$0xf]  ;;  %v7577_v60 = vor.u32 %v10214_v50, %v7574_v51  ;;  %v10307_v7 = vld [vmem:[#allocation2 + $0x574] sm:$0xf0] }
 0x278   :  { %2865 = vmatpush.bf16.msra.mxu0 %v7929_v19  ;;  %2840 = vmatpush.bf16.msrb.mxu2 %v7385_v26  ;;  %v7830_v54 = vld [vmem:[#allocation2 + $0x4b0] sm:$0xf0]  ;;  %v10259_v26 = vld [vmem:[#allocation2 + $0x3f4] sm:$0xf0]  ;;  %v11469_v32 = vadd.f32 %v2625_v55, %v2613_v18  ;;  %v2601_v50 = vpop.f32.mrf.mxu3 }
 0x279   :  { %v7286_v61 = vld [vmem:[#allocation2 + $0x70] sm:$0xf0]  ;;  %v7833_v2 = vor.u32 %v10278_v53, %v7830_v54  ;;  %v7741_v36 = vor.u32 %v10259_v26, %v7740_v22  ;;  %v10251_v53 = vld [vmem:[#allocation2 + $0x3b4] sm:$0xf0] }
 0x27a   :  { %2878 = vmatpush.bf16.msra.mxu1 %v8185_v28  ;;  %2853 = vmatpush.bf16.msrb.mxu3 %v7641_v31  ;;  %v10342_v62 = vld [vmem:[#allocation2 + $0x694] sm:$0xf]  ;;  %v7289_v8 = vor.u32 %v10142_v58, %v7286_v61  ;;  %v2627_v31 = vpop.f32.mrf.mxu1  ;;  %v2995_v46 = vrot.slane %v11469_v32, 4  ;;  %v10179_v61 = vld [vmem:[#allocation2 + $0x174] sm:$0xf0] }
 0x27b   :  { %v8086_v63 = vld [vmem:[#allocation2 + $0x6b0] sm:$0xf0]  ;;  %v7644_v18 = vld [vmem:[#allocation2 + $0x318] sm:$0xf] }
 0x27c   :  { %2866 = vmatpush.bf16.msra.mxu0 %v7897_v35  ;;  %2841 = vmatpush.bf16.msrb.mxu2 %v7353_v42  ;;  %v10206_v37 = vld [vmem:[#allocation2 + $0x254] sm:$0xf]  ;;  %v8089_v9 = vor.u32 %v10342_v62, %v8086_v63  ;;  %v7996_v35 = vld [vmem:[#allocation2 + $0x5d8] sm:$0xf]  ;;  %v2996_v54 = vadd.f32 %v2995_v46, %v11469_v32  ;;  %v7709_v63 = vor.u32 %v10251_v53, %v7708_v12 }
 0x27d   :  { %v7542_v3 = vld [vmem:[#allocation2 + $0x270] sm:$0xf0]  ;;  %v7997_v51 = vor.u32 %v10323_v16, %v7996_v35  ;;  %v10299_v22 = vld [vmem:[#allocation2 + $0x534] sm:$0xf0] }
 0x27e   :  { %2879 = vmatpush.bf16.msra.mxu1 %v8153_v43  ;;  %2854 = vmatpush.bf16.msrb.mxu3 %v7609_v45  ;;  %v10270_v4 = vld [vmem:[#allocation2 + $0x454] sm:$0xf]  ;;  %v7545_v14 = vor.u32 %v10206_v37, %v7542_v3  ;;  %v7452_v43 = vld [vmem:[#allocation2 + $0x198] sm:$0xf]  ;;  %v2588_v45 = vpop.f32.mrf.mxu2  ;;  %v2997_v62 = vrot.slane %v2996_v54, 2  ;;  %v7901_v16 = vor.u32 %v10299_v22, %v7900_v21 }
 0x27f   :  { %v7798_v5 = vld [vmem:[#allocation2 + $0x470] sm:$0xf0]  ;;  %v7453_v58 = vor.u32 %v10187_v23, %v7452_v43  ;;  %v7676_v37 = vld [vmem:[#allocation2 + $0x358] sm:$0xf] }
 0x280   :  { %2867 = vmatpush.bf16.msra.mxu0 %v7865_v49  ;;  %2842 = vmatpush.bf16.msrb.mxu2 %v7321_v56  ;;  %v10134_v10 = vld [vmem:[#allocation2 + $0x14] sm:$0xf]  ;;  %v7801_v19 = vor.u32 %v10270_v4, %v7798_v5  ;;  %v10387_v49 = vld [vmem:[#allocation2 + $0x7f4] sm:$0xf0]  ;;  %v2998_v4 = vadd.f32 %v2997_v62, %v2996_v54 }
 0x281   :  { %v7254_v11 = vld [vmem:[#allocation2 + $0x30] sm:$0xf0]  ;;  %v7964_v56 = vld [vmem:[#allocation2 + $0x598] sm:$0xf]  ;;  %v8253_v59 = vor.u32 %v10387_v49, %v8252_v48 }
 0x282   :  { %2880 = vmatpush.bf16.msra.mxu1 %v8121_v57  ;;  %v10198_v13 = vld [vmem:[#allocation2 + $0x214] sm:$0xf]  ;;  %2855 = vmatpush.bf16.msrb.mxu3 %v7577_v60  ;;  %v7257_v33 = vor.u32 %v10134_v10, %v7254_v11  ;;  %v10315_v57 = vld [vmem:[#allocation2 + $0x5b4] sm:$0xf0] }
 0x283   :  { %v7510_v15 = vld [vmem:[#allocation2 + $0x230] sm:$0xf0]  ;;  %v7420_v60 = vld [vmem:[#allocation2 + $0x158] sm:$0xf] }
 0x284   :  { %v10334_v52 = vld [vmem:[#allocation2 + $0x654] sm:$0xf]  ;;  %2868 = vmatpush.bf16.msra.mxu0 %v7833_v2  ;;  %2843 = vmatpush.bf16.msrb.mxu2 %v7289_v8  ;;  %v7513_v40 = vor.u32 %v10198_v13, %v7510_v15  ;;  %v7965_v2 = vor.u32 %v10315_v57, %v7964_v56  ;;  %v10243_v3 = vld [vmem:[#allocation2 + $0x374] sm:$0xf0]  ;;  %v7421_v8 = vor.u32 %v10179_v61, %v7420_v60  ;;  %v2999_v13 = vrot.slane %v2998_v4, 1 }
 0x285   :  { %v8054_v17 = vld [vmem:[#allocation2 + $0x670] sm:$0xf0]  ;;  %v7932_v5 = vld [vmem:[#allocation2 + $0x558] sm:$0xf] }
 0x286   :  { %v10262_v28 = vld [vmem:[#allocation2 + $0x414] sm:$0xf]  ;;  %2881 = vmatpush.bf16.msra.mxu1 %v8089_v9  ;;  %v8057_v34 = vor.u32 %v10334_v52, %v8054_v17  ;;  %2856 = vmatpush.bf16.msrb.mxu3 %v7545_v14  ;;  %v8221_v9 = vor.u32 %v10379_v1, %v8220_v0  ;;  %v7388_v10 = vld [vmem:[#allocation2 + $0x118] sm:$0xf]  ;;  %v7677_v14 = vor.u32 %v10243_v3, %v7676_v37 }
 0x287   :  { %v7766_v29 = vld [vmem:[#allocation2 + $0x430] sm:$0xf0]  ;;  %v10171_v11 = vld [vmem:[#allocation2 + $0x134] sm:$0xf0]  ;;  %v7933_v17 = vor.u32 %v10307_v7, %v7932_v5  ;;  %v3000_v20 = vadd.f32 %v2999_v13, %v2998_v4 }
 0x288   :  { %v10326_v38 = vld [vmem:[#allocation2 + $0x614] sm:$0xf]  ;;  %2869 = vmatpush.bf16.msra.mxu0 %v7801_v19  ;;  %v7769_v47 = vor.u32 %v10262_v28, %v7766_v29  ;;  %2844 = vmatpush.bf16.msrb.mxu2 %v7257_v33  ;;  %v8188_v15 = vld [vmem:[#allocation2 + $0x758] sm:$0xf]  ;;  %v7389_v25 = vor.u32 %v10171_v11, %v7388_v10 }
 0x289   :  { %v8022_v42 = vld [vmem:[#allocation2 + $0x630] sm:$0xf0]  ;;  %v10371_v52 = vld [vmem:[#allocation2 + $0x774] sm:$0xf0]  ;;  %v3043_v29 = vmul.f32 %v3000_v20, %v11380_v27 }
 0x28a   :  { %2882 = vmatpush.bf16.msra.mxu1 %v8057_v34  ;;  %v8025_v55 = vor.u32 %v10326_v38, %v8022_v42  ;;  %2857 = vmatpush.bf16.msrb.mxu3 %v7513_v40  ;;  %v10235_v19 = vld [vmem:[#allocation2 + $0x334] sm:$0xf0]  ;;  %v8189_v26 = vor.u32 %v10371_v52, %v8188_v15 }
 0x28b   :  { %2845 = vmatmul.bf16.vlgmr.msrb.gmra.mxu2 %v11432_v24  ;;  %v7356_v28 = vld [vmem:[#allocation2 + $0xd8] sm:$0xf]  ;;  %v7645_v31 = vor.u32 %v10235_v19, %v7644_v18 }
 0x28c   :  { %2889 = vmatpush.bf16.msra.mxu2 %v7485_v6  ;;  %2870 = vmatpush.bf16.msra.mxu0 %v7769_v47  ;;  %v10163_v33 = vld [vmem:[#allocation2 + $0xf4] sm:$0xf0]  ;;  %v11479_v6 = vsub.f32 %v11469_v32, %v3043_v29  ;;  %v2664_v54 = vpop.f32.mrf.mxu0 }
 0x28d   :  { %2858 = vmatmul.bf16.vlgmr.msrb.gmra.mxu3 %v11436_v30  ;;  %v8156_v34 = vld [vmem:[#allocation2 + $0x718] sm:$0xf]  ;;  %v7357_v23 = vor.u32 %v10163_v33, %v7356_v28  ;;  %v10255_v33 = vld [vmem:[#allocation2 + $0x3dc] sm:$0xf] }
 0x28e   :  { %2902 = vmatpush.bf16.msra.mxu3 %v7741_v36  ;;  %2883 = vmatpush.bf16.msra.mxu1 %v8025_v55  ;;  %v10363_v35 = vld [vmem:[#allocation2 + $0x734] sm:$0xf0]  ;;  %v3059_v36 = vmul.f32 %v11479_v6, %v11479_v6 }
 0x28f   :  { %2871 = vmatmul.bf16.vlgmr.msra.gmra.mxu0 %v11440_v41  ;;  %v7612_v38 = vld [vmem:[#allocation2 + $0x2d8] sm:$0xf]  ;;  %v8157_v45 = vor.u32 %v10363_v35, %v8156_v34  ;;  %v7742_v34 = vld [vmem:[#allocation2 + $0x3f8] sm:$0xf0] }
 0x290   :  { %2915 = vmatpush.bf16.msrb.mxu0 %v7997_v51  ;;  %2890 = vmatpush.bf16.msra.mxu2 %v7453_v58  ;;  %v10227_v40 = vld [vmem:[#allocation2 + $0x2f4] sm:$0xf0]  ;;  %v1282_v51 = vperm.slane %v11466_v39, 1  ;;  %v3067_v55 = vrot.slane %v3059_v36, 4  ;;  %v2677_v58 = vpop.f32.mrf.mxu1  ;;  %v2651_v4 = vpop.f32.mrf.mxu3 }
 0x291   :  { %2884 = vmatmul.bf16.vlgmr.msra.gmra.mxu1 %v11445_v44  ;;  %v7868_v42 = vld [vmem:[#allocation2 + $0x4d8] sm:$0xf]  ;;  %v7613_v47 = vor.u32 %v10227_v40, %v7612_v38 }
 0x292   :  { %2928 = vmatpush.bf16.msrb.mxu1 %v8253_v59  ;;  %2903 = vmatpush.bf16.msra.mxu3 %v7709_v63  ;;  %v10291_v43 = vld [vmem:[#allocation2 + $0x4f4] sm:$0xf0]  ;;  %v3068_v62 = vadd.f32 %v3067_v55, %v3059_v36  ;;  %v2638_v63 = vpop.f32.mrf.mxu2  ;;  %v7998_v36 = vld [vmem:[#allocation2 + $0x5f8] sm:$0xf0]  ;;  %v7745_v55 = vor.u32 %v10255_v33, %v7742_v34 }
 0x293   :  { %v7324_v46 = vld [vmem:[#allocation2 + $0x98] sm:$0xf]  ;;  %v7869_v32 = vor.u32 %v10291_v43, %v7868_v42  ;;  %v2639_v3 = vadd.f32 %v2638_v63, %v1282_v51  ;;  %v7710_v63 = vld [vmem:[#allocation2 + $0x3b8] sm:$0xf0] }
 0x294   :  { %2916 = vmatpush.bf16.msrb.mxu0 %v7965_v2  ;;  %2891 = vmatpush.bf16.msra.mxu2 %v7421_v8  ;;  %v10155_v48 = vld [vmem:[#allocation2 + $0xb4] sm:$0xf0]  ;;  %v3069_v10 = vrot.slane %v3068_v62, 2  ;;  %v2666_v35 = vpop.f32.mrf.mxu0  ;;  %v10231_v34 = vld [vmem:[#allocation2 + $0x31c] sm:$0xf] }
 0x295   :  { %v8124_v49 = vld [vmem:[#allocation2 + $0x6d8] sm:$0xf]  ;;  %v7325_v59 = vor.u32 %v10155_v48, %v7324_v46  ;;  %v10319_v46 = vld [vmem:[#allocation2 + $0x5dc] sm:$0xf] }
 0x296   :  { %2929 = vmatpush.bf16.msrb.mxu1 %v8221_v9  ;;  %2904 = vmatpush.bf16.msra.mxu3 %v7677_v14  ;;  %v10355_v50 = vld [vmem:[#allocation2 + $0x6f4] sm:$0xf0]  ;;  %v2652_v14 = vadd.f32 %v2651_v4, %v2639_v3  ;;  %v3070_v20 = vadd.f32 %v3069_v10, %v3068_v62  ;;  %v10247_v62 = vld [vmem:[#allocation2 + $0x39c] sm:$0xf] }
 0x297   :  { %v7580_v12 = vld [vmem:[#allocation2 + $0x298] sm:$0xf]  ;;  %v8125_v60 = vor.u32 %v10355_v50, %v8124_v49  ;;  %v7713_v10 = vor.u32 %v10247_v62, %v7710_v63  ;;  %v7646_v35 = vld [vmem:[#allocation2 + $0x338] sm:$0xf0] }
 0x298   :  { %2917 = vmatpush.bf16.msrb.mxu0 %v7933_v17  ;;  %2892 = vmatpush.bf16.msra.mxu2 %v7389_v25  ;;  %v10219_v53 = vld [vmem:[#allocation2 + $0x2b4] sm:$0xf0]  ;;  %v2665_v28 = vadd.f32 %v2664_v54, %v2652_v14  ;;  %v2679_v42 = vpop.f32.mrf.mxu1 }
 0x299   :  { %v7836_v56 = vld [vmem:[#allocation2 + $0x498] sm:$0xf]  ;;  %v7581_v0 = vor.u32 %v10219_v53, %v7580_v12  ;;  %v7454_v12 = vld [vmem:[#allocation2 + $0x1b8] sm:$0xf0] }
 0x29a   :  { %2930 = vmatpush.bf16.msrb.mxu1 %v8189_v26  ;;  %2905 = vmatpush.bf16.msra.mxu3 %v7645_v31  ;;  %v10283_v57 = vld [vmem:[#allocation2 + $0x4b4] sm:$0xf0]  ;;  %v10191_v26 = vld [vmem:[#allocation2 + $0x1dc] sm:$0xf]  ;;  %v11484_v43 = vadd.f32 %v2677_v58, %v2665_v28  ;;  %v2640_v53 = vpop.f32.mrf.mxu2 }
 0x29b   :  { %v7292_v61 = vld [vmem:[#allocation2 + $0x58] sm:$0xf]  ;;  %v7837_v5 = vor.u32 %v10283_v57, %v7836_v56  ;;  %v7486_v31 = vld [vmem:[#allocation2 + $0x1f8] sm:$0xf0] }
 0x29c   :  { %2918 = vmatpush.bf16.msrb.mxu0 %v7901_v16  ;;  %2893 = vmatpush.bf16.msra.mxu2 %v7357_v23  ;;  %v10147_v1 = vld [vmem:[#allocation2 + $0x74] sm:$0xf0]  ;;  %v3071_v16 = vrot.slane %v3070_v20, 1  ;;  %v7489_v50 = vor.u32 %v10191_v26, %v7486_v31  ;;  %v3001_v54 = vrot.slane %v11484_v43, 4  ;;  %v10383_v57 = vld [vmem:[#allocation2 + $0x7dc] sm:$0xf] }
 0x29d   :  { %v8092_v2 = vld [vmem:[#allocation2 + $0x698] sm:$0xf]  ;;  %v7293_v15 = vor.u32 %v10147_v1, %v7292_v61  ;;  %v8254_v58 = vld [vmem:[#allocation2 + $0x7f8] sm:$0xf0]  ;;  %v8001_v61 = vor.u32 %v10319_v46, %v7998_v36 }
 0x29e   :  { %2931 = vmatpush.bf16.msrb.mxu1 %v8157_v45  ;;  %2906 = vmatpush.bf16.msra.mxu3 %v7613_v47  ;;  %v10347_v37 = vld [vmem:[#allocation2 + $0x6b4] sm:$0xf0]  ;;  %v3072_v48 = vadd.f32 %v3071_v16, %v3070_v20  ;;  %v8190_v31 = vld [vmem:[#allocation2 + $0x778] sm:$0xf0] }
 0x29f   :  { %v7548_v7 = vld [vmem:[#allocation2 + $0x258] sm:$0xf]  ;;  %v8093_v52 = vor.u32 %v10347_v37, %v8092_v2  ;;  %v10311_v2 = vld [vmem:[#allocation2 + $0x59c] sm:$0xf] }
 0x2a0   :  { %2919 = vmatpush.bf16.msrb.mxu0 %v7869_v32  ;;  %v10211_v8 = vld [vmem:[#allocation2 + $0x274] sm:$0xf0]  ;;  %2894 = vmatpush.bf16.msra.mxu2 %v7325_v59  ;;  %v10183_v32 = vld [vmem:[#allocation2 + $0x19c] sm:$0xf]  ;;  %v2653_v59 = vpop.f32.mrf.mxu3 }
 0x2a1   :  { %v7804_v9 = vld [vmem:[#allocation2 + $0x458] sm:$0xf]  ;;  %v7549_v21 = vor.u32 %v10211_v8, %v7548_v7  ;;  %v7966_v37 = vld [vmem:[#allocation2 + $0x5b8] sm:$0xf0]  ;;  %v7457_v4 = vor.u32 %v10183_v32, %v7454_v12 }
 0x2a2   :  { %v10275_v11 = vld [vmem:[#allocation2 + $0x474] sm:$0xf0]  ;;  %2932 = vmatpush.bf16.msrb.mxu1 %v8125_v60  ;;  %2907 = vmatpush.bf16.msra.mxu3 %v7581_v0  ;;  %v3115_v60 = vmul.f32 %v3072_v48, %v11380_v27  ;;  %v3002_v0 = vadd.f32 %v3001_v54, %v11484_v43  ;;  %v10175_v7 = vld [vmem:[#allocation2 + $0x15c] sm:$0xf]  ;;  %v7969_v14 = vor.u32 %v10311_v2, %v7966_v37 }
 0x2a3   :  { %v7260_v13 = vld [vmem:[#allocation2 + $0x18] sm:$0xf]  ;;  %v7805_v29 = vor.u32 %v10275_v11, %v7804_v9  ;;  %v7422_v8 = vld [vmem:[#allocation2 + $0x178] sm:$0xf0]  ;;  %v7649_v48 = vor.u32 %v10231_v34, %v7646_v35 }
 0x2a4   :  { %v10139_v17 = vld [vmem:[#allocation2 + $0x34] sm:$0xf0]  ;;  %2920 = vmatpush.bf16.msrb.mxu0 %v7837_v5  ;;  %2895 = vmatpush.bf16.msra.mxu2 %v7293_v15  ;;  %v11489_v3 = vadd.f32 0.8, %v3115_v60  ;;  %v8257_v5 = vor.u32 %v10383_v57, %v8254_v58  ;;  %v3003_v9 = vrot.slane %v3002_v0, 2  ;;  %v7425_v20 = vor.u32 %v10175_v7, %v7422_v8 }
 0x2a5   :  { %v7516_v18 = vld [vmem:[#allocation2 + $0x218] sm:$0xf]  ;;  %v7261_v23 = vor.u32 %v10139_v17, %v7260_v13  ;;  %v10375_v11 = vld [vmem:[#allocation2 + $0x79c] sm:$0xf] }
 0x2a6   :  { %v10203_v19 = vld [vmem:[#allocation2 + $0x234] sm:$0xf0]  ;;  %2933 = vmatpush.bf16.msrb.mxu1 %v8093_v52  ;;  %2908 = vmatpush.bf16.msra.mxu3 %v7549_v21  ;;  %v8222_v13 = vld [vmem:[#allocation2 + $0x7b8] sm:$0xf0]  ;;  %10865 = vrsqrt.f32 %v11489_v3  ;;  %v3004_v17 = vadd.f32 %v3003_v9, %v3002_v0  ;;  %vm3137_vm3 = vweird.f32 %v11489_v3 }
 0x2a7   :  { %v8060_v22 = vld [vmem:[#allocation2 + $0x658] sm:$0xf]  ;;  %v7517_v49 = vor.u32 %v10203_v19, %v7516_v18  ;;  %v10239_v15 = vld [vmem:[#allocation2 + $0x35c] sm:$0xf]  ;;  %v8225_v21 = vor.u32 %v10375_v11, %v8222_v13 }
 0x2a8   :  { %v10339_v25 = vld [vmem:[#allocation2 + $0x674] sm:$0xf0]  ;;  %2921 = vmatpush.bf16.msrb.mxu0 %v7805_v29  ;;  %2896 = vmatpush.bf16.msra.mxu2 %v7261_v23  ;;  %v7678_v52 = vld [vmem:[#allocation2 + $0x378] sm:$0xf0]  ;;  %v3005_v26 = vrot.slane %v3004_v17, 1 }
 0x2a9   :  { %v7772_v38 = vld [vmem:[#allocation2 + $0x418] sm:$0xf]  ;;  %v8061_v45 = vor.u32 %v10339_v25, %v8060_v22  ;;  %v10303_v18 = vld [vmem:[#allocation2 + $0x55c] sm:$0xf]  ;;  %v7681_v28 = vor.u32 %v10239_v15, %v7678_v52 }
 0x2aa   :  { %v10267_v40 = vld [vmem:[#allocation2 + $0x434] sm:$0xf0]  ;;  %2909 = vmatpush.bf16.msra.mxu3 %v7517_v49  ;;  %v7934_v19 = vld [vmem:[#allocation2 + $0x578] sm:$0xf0]  ;;  %v3006_v16 = vadd.f32 %v3005_v26, %v3004_v17 }
 0x2ab   :  { %v8028_v47 = vld [vmem:[#allocation2 + $0x618] sm:$0xf]  ;;  %v7773_v56 = vor.u32 %v10267_v40, %v7772_v38  ;;  %2934 = vmatpush.bf16.msrb.mxu1 %v8061_v45  ;;  %2897 = vmatmul.bf16.vlgmr.msra.gmra.mxu2 %v11432_v24  ;;  %v10167_v22 = vld [vmem:[#allocation2 + $0x11c] sm:$0xf]  ;;  %v7937_v33 = vor.u32 %v10303_v18, %v7934_v19  ;;  %v11512_v19 = vld [vmem:[#allocation20] sm:$0xff] }
 0x2ac   :  { %v10331_v51 = vld [vmem:[#allocation2 + $0x634] sm:$0xf0]  ;;  %2941 = vmatpush.bf16.msrb.mxu2 %v7489_v50  ;;  %v7390_v25 = vld [vmem:[#allocation2 + $0x138] sm:$0xf0]  ;;  %v11496_v42 = vpop.eup %10865  ;;  %v2716_v8 = vpop.f32.mrf.mxu0 }
 0x2ad   :  { %v8029_v1 = vor.u32 %v10331_v51, %v8028_v47  ;;  %2922 = vmatpush.bf16.msrb.mxu0 %v7773_v56  ;;  %2910 = vmatmul.bf16.vlgmr.msra.gmra.mxu3 %v11436_v30  ;;  %v10367_v29 = vld [vmem:[#allocation2 + $0x75c] sm:$0xf]  ;;  %v7393_v23 = vor.u32 %v10167_v22, %v7390_v25  ;;  %v3132_v36 = vmul.f32 %v11496_v42, %v11489_v3  ;;  %vm3138_vm4 = vweird.f32 %v11496_v42 }
 0x2ae   :  { %2954 = vmatpush.bf16.msrb.mxu3 %v7745_v55  ;;  %v10295_v38 = vld [vmem:[#allocation2 + $0x51c] sm:$0xf]  ;;  %v8193_v45 = vor.u32 %v10367_v29, %v8190_v31  ;;  %v3044_v47 = vmul.f32 %v3006_v16, %v11380_v27  ;;  %v2690_v22 = vpop.f32.mrf.mxu2  ;;  %vm3139_vm5 = vmor %vm3137_vm3, %vm3138_vm4 }
 0x2af   :  { %2935 = vmatpush.bf16.msrb.mxu1 %v8029_v1  ;;  %v7902_v40 = vld [vmem:[#allocation2 + $0x538] sm:$0xf0]  ;;  %v3133_v54 = vmul.f32 %v11496_v42, %v3132_v36 }
 0x2b0   :  { %2942 = vmatpush.bf16.msrb.mxu2 %v7457_v4  ;;  %2923 = vmatmul.bf16.vlgmr.msrb.gmra.mxu0 %v11440_v41  ;;  %v10159_v46 = vld [vmem:[#allocation2 + $0xdc] sm:$0xf]  ;;  %v7905_v32 = vor.u32 %v10295_v38, %v7902_v40  ;;  %v11503_v55 = vsub.f32 %v11484_v43, %v3044_v47  ;;  %v1283_v43 = vperm.slane %v11466_v39, 2  ;;  %v3245_v47 = vperm.slane %v11512_v19, 0 }
 0x2b1   :  { %2967 = vmatpush.bf16.msra.mxu0 %v8001_v61  ;;  %v7358_v49 = vld [vmem:[#allocation2 + $0xf8] sm:$0xf0]  ;;  %v3134_v62 = vmul.f32 0.5, %v3133_v54 }
 0x2b2   :  { %2955 = vmatpush.bf16.msrb.mxu3 %v7713_v10  ;;  %2936 = vmatmul.bf16.vlgmr.msrb.gmra.mxu1 %v11445_v44  ;;  %v10359_v50 = vld [vmem:[#allocation2 + $0x71c] sm:$0xf]  ;;  %v7361_v58 = vor.u32 %v10159_v46, %v7358_v49  ;;  %v3060_v63 = vmul.f32 %v11503_v55, %v11503_v55  ;;  %v2691_v31 = vadd.f32 %v2690_v22, %v1283_v43 }
 0x2b3   :  { %2980 = vmatpush.bf16.msra.mxu1 %v8257_v5  ;;  %v8158_v51 = vld [vmem:[#allocation2 + $0x738] sm:$0xf0]  ;;  %v3135_v9 = vsub.f32 1.5, %v3134_v62 }
 0x2b4   :  { %2943 = vmatpush.bf16.msrb.mxu2 %v7425_v20  ;;  %v10223_v12 = vld [vmem:[#allocation2 + $0x2dc] sm:$0xf]  ;;  %v8161_v59 = vor.u32 %v10359_v50, %v8158_v51  ;;  %v3073_v10 = vrot.slane %v3060_v63, 4 }
 0x2b5   :  { %2968 = vmatpush.bf16.msra.mxu0 %v7969_v14  ;;  %v7614_v53 = vld [vmem:[#allocation2 + $0x2f8] sm:$0xf0]  ;;  %v2729_v14 = vpop.f32.mrf.mxu1  ;;  %v3136_v20 = vmul.f32 %v11496_v42, %v3135_v9 }
 0x2b6   :  { %2956 = vmatpush.bf16.msrb.mxu3 %v7681_v28  ;;  %v10287_v56 = vld [vmem:[#allocation2 + $0x4dc] sm:$0xf]  ;;  %v7617_v0 = vor.u32 %v10223_v12, %v7614_v53 }
 0x2b7   :  { %2981 = vmatpush.bf16.msra.mxu1 %v8225_v21  ;;  %v7870_v57 = vld [vmem:[#allocation2 + $0x4f8] sm:$0xf0]  ;;  %v3074_v21 = vadd.f32 %v3073_v10, %v3060_v63  ;;  %v3140_v38 = vsel %vm3139_vm5, %v11496_v42, %v3136_v20 }
 0x2b8   :  { %2944 = vmatpush.bf16.msrb.mxu2 %v7393_v23  ;;  %v10151_v60 = vld [vmem:[#allocation2 + $0x9c] sm:$0xf]  ;;  %v7873_v4 = vor.u32 %v10287_v56, %v7870_v57  ;;  %v3211_v36 = vmul.f32 %v3140_v38, %v11479_v6  ;;  %v2718_v6 = vpop.f32.mrf.mxu0 }
 0x2b9   :  { %2969 = vmatpush.bf16.msra.mxu0 %v7937_v33  ;;  %v7326_v61 = vld [vmem:[#allocation2 + $0xb8] sm:$0xf0]  ;;  %v2703_v33 = vpop.f32.mrf.mxu3  ;;  %v3075_v40 = vrot.slane %v3074_v21, 2 }
 0x2ba   :  { %2957 = vmatpush.bf16.msrb.mxu3 %v7649_v48  ;;  %v10351_v1 = vld [vmem:[#allocation2 + $0x6dc] sm:$0xf]  ;;  %v7329_v15 = vor.u32 %v10151_v60, %v7326_v61  ;;  %v2704_v3 = vadd.f32 %v2703_v33, %v2691_v31 }
 0x2bb   :  { %2982 = vmatpush.bf16.msra.mxu1 %v8193_v45  ;;  %v8126_v2 = vld [vmem:[#allocation2 + $0x6f8] sm:$0xf0]  ;;  %v3076_v51 = vadd.f32 %v3075_v40, %v3074_v21 }
 0x2bc   :  { %v11507_v37 = vld [vmem:[#allocation19] sm:$0xff]  ;;  %2945 = vmatpush.bf16.msrb.mxu2 %v7361_v58  ;;  %v8129_v52 = vor.u32 %v10351_v1, %v8126_v2  ;;  %v2717_v54 = vadd.f32 %v2716_v8, %v2704_v3  ;;  %v2692_v8 = vpop.f32.mrf.mxu2 }
 0x2bd   :  { %2970 = vmatpush.bf16.msra.mxu0 %v7905_v32  ;;  %v10215_v5 = vld [vmem:[#allocation2 + $0x29c] sm:$0xf]  ;;  %v3220_v29 = vperm.slane %v11507_v37, 0  ;;  %v2731_v63 = vpop.f32.mrf.mxu1 }
 0x2be   :  { %v7582_v7 = vld [vmem:[#allocation2 + $0x2b8] sm:$0xf0]  ;;  %2958 = vmatpush.bf16.msrb.mxu3 %v7617_v0  ;;  %v2730_v1 = vadd.f32 %v2729_v14, %v2717_v54 }
 0x2bf   :  { %v10279_v11 = vld [vmem:[#allocation2 + $0x49c] sm:$0xf]  ;;  %2983 = vmatpush.bf16.msra.mxu1 %v8161_v59  ;;  %v7585_v25 = vor.u32 %v10215_v5, %v7582_v7  ;;  %v3236_v42 = vmul.f32 %v3220_v29, %v3211_v36  ;;  %v3077_v59 = vrot.slane %v3076_v51, 1 }
 0x2c0   :  { %v7838_v13 = vld [vmem:[#allocation2 + $0x4b8] sm:$0xf0]  ;;  %2946 = vmatpush.bf16.msrb.mxu2 %v7329_v15  ;;  %v3007_v10 = vrot.slane %v2730_v1, 4 }
 0x2c1   :  { %v10143_v17 = vld [vmem:[#allocation2 + $0x5c] sm:$0xf]  ;;  %2971 = vmatpush.bf16.msra.mxu0 %v7873_v4  ;;  %v7841_v34 = vor.u32 %v10279_v11, %v7838_v13  ;;  %v3261_v0 = vadd.f32 %v3245_v47, %v3236_v42  ;;  %v3078_v43 = vadd.f32 %v3077_v59, %v3076_v51  ;;  %v2705_v13 = vpop.f32.mrf.mxu3 }
 0x2c2   :  { %v7294_v18 = vld [vmem:[#allocation2 + $0x78] sm:$0xf0]  ;;  %2959 = vmatpush.bf16.msrb.mxu3 %v7585_v25  ;;  %v3008_v14 = vadd.f32 %v3007_v10, %v2730_v1 }
 0x2c3   :  { %v10343_v26 = vld [vmem:[#allocation2 + $0x69c] sm:$0xf]  ;;  %v7297_v23 = vor.u32 %v10143_v17, %v7294_v18  ;;  %2984 = vmatpush.bf16.msra.mxu1 %v8129_v52  ;;  %vm3269_vm6 = vcmp.gt.f32.partialorder %v3261_v0, 0.0  ;;  %v3277_v9 = vmul.f32 0.2, %v3261_v0  ;;  %v3116_v15 = vmul.f32 %v3078_v43, %v11380_v27 }
 0x2c4   :  { %v8094_v28 = vld [vmem:[#allocation2 + $0x6b8] sm:$0xf0]  ;;  %v3009_v20 = vrot.slane %v3008_v14, 2 }
 0x2c5   :  { %v10207_v35 = vld [vmem:[#allocation2 + $0x25c] sm:$0xf]  ;;  %v8097_v48 = vor.u32 %v10343_v26, %v8094_v28  ;;  %2972 = vmatpush.bf16.msra.mxu0 %v7841_v34  ;;  %2947 = vmatpush.bf16.msrb.mxu2 %v7297_v23  ;;  %v11524_v52 = vsel %vm3269_vm6, %v3261_v0, %v3277_v9  ;;  %v3124_v18 = vadd.f32 0.8, %v3116_v15  ;;  %v1285_v15 = vperm.slane %v11466_v39, 4 }
 0x2c6   :  { %v7550_v16 = vld [vmem:[#allocation2 + $0x278] sm:$0xf0]  ;;  %v3010_v21 = vadd.f32 %v3009_v20, %v3008_v14 }
 0x2c7   :  { %v10271_v45 = vld [vmem:[#allocation2 + $0x45c] sm:$0xf]  ;;  %v7553_v32 = vor.u32 %v10207_v35, %v7550_v16  ;;  %2985 = vmatpush.bf16.msra.mxu1 %v8097_v48  ;;  %10867 = vrsqrt.f32 %v3124_v18  ;;  %vm3147_vm7 = vweird.f32 %v3124_v18 }
 0x2c8   :  { %v7806_v46 = vld [vmem:[#allocation2 + $0x478] sm:$0xf0]  ;;  %v3011_v22 = vrot.slane %v3010_v21, 1 }
 0x2c9   :  { %v10135_v49 = vld [vmem:[#allocation2 + $0x1c] sm:$0xf]  ;;  %v7809_v56 = vor.u32 %v10271_v45, %v7806_v46  ;;  %2960 = vmatpush.bf16.msrb.mxu3 %v7553_v32  ;;  %v3221_v45 = vperm.slane %v11507_v37, 1 }
 0x2ca   :  { %v7262_v50 = vld [vmem:[#allocation2 + $0x38] sm:$0xf0]  ;;  %v3012_v25 = vadd.f32 %v3011_v22, %v3010_v21 }
 0x2cb   :  { %v10335_v12 = vld [vmem:[#allocation2 + $0x65c] sm:$0xf]  ;;  %v7265_v60 = vor.u32 %v10135_v49, %v7262_v50  ;;  %2973 = vmatpush.bf16.msra.mxu0 %v7809_v56  ;;  %v3246_v49 = vperm.slane %v11512_v19, 1 }
 0x2cc   :  { %v8062_v53 = vld [vmem:[#allocation2 + $0x678] sm:$0xf0]  ;;  %v3045_v29 = vmul.f32 %v3012_v25, %v11380_v27  ;;  %v2768_v35 = vpop.f32.mrf.mxu0 }
 0x2cd   :  { %v10199_v57 = vld [vmem:[#allocation2 + $0x21c] sm:$0xf]  ;;  %v8065_v2 = vor.u32 %v10335_v12, %v8062_v53  ;;  %2948 = vmatpush.bf16.msrb.mxu2 %v7265_v60  ;;  %v10868_v26 = vpop.eup %10867 }
 0x2ce   :  { %v7518_v58 = vld [vmem:[#allocation2 + $0x238] sm:$0xf0]  ;;  %v3142_v28 = vmul.f32 %v10868_v26, %v3124_v18  ;;  %v11531_v33 = vsub.f32 %v2730_v1, %v3045_v29  ;;  %vm3148_vm8 = vweird.f32 %v10868_v26  ;;  %v2742_v23 = vpop.f32.mrf.mxu2 }
 0x2cf   :  { %v10263_v61 = vld [vmem:[#allocation2 + $0x41c] sm:$0xf]  ;;  %v7521_v4 = vor.u32 %v10199_v57, %v7518_v58  ;;  %2986 = vmatpush.bf16.msra.mxu1 %v8065_v2  ;;  %vm3149_vm9 = vmor %vm3147_vm7, %vm3148_vm8 }
 0x2d0   :  { %v7774_v62 = vld [vmem:[#allocation2 + $0x438] sm:$0xf0]  ;;  %2949 = vmatmul.bf16.vlgmr.msrb.gmra.mxu2 %v11432_v24  ;;  %v3143_v31 = vmul.f32 %v10868_v26, %v3142_v28  ;;  %v3061_v24 = vmul.f32 %v11531_v33, %v11531_v33  ;;  %v2755_v36 = vpop.f32.mrf.mxu3 }
 0x2d1   :  { %v10327_v5 = vld [vmem:[#allocation2 + $0x61c] sm:$0xf]  ;;  %v7777_v11 = vor.u32 %v10263_v61, %v7774_v62  ;;  %2961 = vmatpush.bf16.msrb.mxu3 %v7521_v4 }
 0x2d2   :  { %v8030_v7 = vld [vmem:[#allocation2 + $0x638] sm:$0xf0]  ;;  %v3144_v34 = vmul.f32 0.5, %v3143_v31 }
 0x2d3   :  { %v8033_v17 = vor.u32 %v10327_v5, %v8030_v7  ;;  %2974 = vmatpush.bf16.msra.mxu0 %v7777_v11 }
 0x2d4   :  { %2962 = vmatmul.bf16.vlgmr.msrb.gmra.mxu3 %v11436_v30  ;;  %v1284_v30 = vperm.slane %v11466_v39, 3  ;;  %v3145_v16 = vsub.f32 1.5, %v3144_v34  ;;  %v2770_v53 = vpop.f32.mrf.mxu0  ;;  %v3247_v39 = vperm.slane %v11512_v19, 2 }
 0x2d5   :  { %2987 = vmatpush.bf16.msra.mxu1 %v8033_v17 }
 0x2d6   :  { %2975 = vmatmul.bf16.vlgmr.msra.gmra.mxu0 %v11440_v41  ;;  %v3079_v41 = vrot.slane %v3061_v24, 4  ;;  %v3146_v38 = vmul.f32 %v10868_v26, %v3145_v16  ;;  %v2743_v46 = vadd.f32 %v2742_v23, %v1284_v30  ;;  %v2744_v6 = vpop.f32.mrf.mxu2 }
 0x2d8   :  { %2988 = vmatmul.bf16.vlgmr.msra.gmra.mxu1 %v11445_v44  ;;  %v2781_v44 = vpop.f32.mrf.mxu1  ;;  %v3080_v40 = vadd.f32 %v3079_v41, %v3061_v24  ;;  %v3150_v47 = vsel %vm3149_vm9, %v10868_v26, %v3146_v38  ;;  %v2756_v50 = vadd.f32 %v2755_v36, %v2743_v46  ;;  %v2757_v61 = vpop.f32.mrf.mxu3  ;;  %v3222_v26 = vperm.slane %v11507_v37, 2 }
 0x2d9   :  { %v3212_v48 = vmul.f32 %v3150_v47, %v11503_v55  ;;  %v11559_v61 = vld [vmem:[#allocation17] sm:$0xff] }
 0x2da   :  { %v3081_v3 = vrot.slane %v3080_v40, 2  ;;  %v2769_v12 = vadd.f32 %v2768_v35, %v2756_v50 }
 0x2db   :  { %v3237_v32 = vmul.f32 %v3221_v45, %v3212_v48 }
 0x2dc   :  { %v3082_v51 = vadd.f32 %v3081_v3, %v3080_v40  ;;  %v2782_v57 = vadd.f32 %v2781_v44, %v2769_v12 }
 0x2dd   :  { %v3262_v56 = vadd.f32 %v3246_v49, %v3237_v32 }
 0x2de   :  { %v3083_v42 = vrot.slane %v3082_v51, 1  ;;  %v3013_v60 = vrot.slane %v2782_v57, 4 }
 0x2df   :  { %vm3270_vm10 = vcmp.gt.f32.partialorder %v3262_v56, 0.0  ;;  %v3278_v59 = vmul.f32 0.2, %v3262_v56 }
 0x2e0   :  { %v2783_v54 = vpop.f32.mrf.mxu1  ;;  %v3084_v58 = vadd.f32 %v3083_v42, %v3082_v51  ;;  %v3014_v63 = vadd.f32 %v3013_v60, %v2782_v57 }
 0x2e1   :  { %v11540_v55 = vsel %vm3270_vm10, %v3262_v56, %v3278_v59 }
 0x2e2   :  { %v3117_v62 = vmul.f32 %v3084_v58, %v11380_v27  ;;  %v3015_v1 = vrot.slane %v3014_v63, 2 }
 0x2e4   :  { %v3125_v0 = vadd.f32 0.8, %v3117_v62  ;;  %v3016_v2 = vadd.f32 %v3015_v1, %v3014_v63  ;;  %v1286_v62 = vperm.slane %v11559_v61, 5 }
 0x2e6   :  { %10869 = vrsqrt.f32 %v3125_v0  ;;  %v3017_v43 = vrot.slane %v3016_v2, 1  ;;  %vm3157_vm11 = vweird.f32 %v3125_v0 }
 0x2e8   :  { %v3018_v4 = vadd.f32 %v3017_v43, %v3016_v2 }
 0x2ea   :  { %v3046_v8 = vmul.f32 %v3018_v4, %v11380_v27 }
 0x2ec   :  { %v10870_v5 = vpop.eup %10869  ;;  %v11543_v10 = vsub.f32 %v2782_v57, %v3046_v8  ;;  %v2820_v14 = vpop.f32.mrf.mxu0 }
 0x2ed   :  { %v3152_v7 = vmul.f32 %v10870_v5, %v3125_v0  ;;  %vm3158_vm12 = vweird.f32 %v10870_v5 }
 0x2ee   :  { %v3062_v13 = vmul.f32 %v11543_v10, %v11543_v10  ;;  %v2833_v20 = vpop.f32.mrf.mxu1  ;;  %v2794_v25 = vpop.f32.mrf.mxu2  ;;  %vm3159_vm13 = vmor %vm3157_vm11, %vm3158_vm12 }
 0x2ef   :  { %v3153_v9 = vmul.f32 %v10870_v5, %v3152_v7  ;;  %v2795_v28 = vadd.f32 %v2794_v25, %v1285_v15  ;;  %v3223_v7 = vperm.slane %v11507_v37, 3 }
 0x2f0   :  { %v3085_v18 = vrot.slane %v3062_v13, 4  ;;  %v2807_v29 = vpop.f32.mrf.mxu3 }
 0x2f1   :  { %v3154_v11 = vmul.f32 0.5, %v3153_v9  ;;  %v2808_v30 = vadd.f32 %v2807_v29, %v2795_v28 }
 0x2f2   :  { %v3086_v22 = vadd.f32 %v3085_v18, %v3062_v13 }
 0x2f3   :  { %v3155_v17 = vsub.f32 1.5, %v3154_v11  ;;  %v2821_v41 = vadd.f32 %v2820_v14, %v2808_v30  ;;  %v3248_v14 = vperm.slane %v11512_v19, 3 }
 0x2f4   :  { %v3087_v34 = vrot.slane %v3086_v22, 2  ;;  %v2822_v44 = vpop.f32.mrf.mxu0 }
 0x2f5   :  { %v3156_v21 = vmul.f32 %v10870_v5, %v3155_v17  ;;  %v2834_v45 = vadd.f32 %v2833_v20, %v2821_v41 }
 0x2f6   :  { %v3088_v35 = vadd.f32 %v3087_v34, %v3086_v22  ;;  %v2835_v40 = vpop.f32.mrf.mxu1  ;;  %v2796_v36 = vpop.f32.mrf.mxu2 }
 0x2f7   :  { %v3160_v31 = vsel %vm3159_vm13, %v10870_v5, %v3156_v21  ;;  %v3019_v3 = vrot.slane %v2834_v45, 4 }
 0x2f8   :  { %v3213_v24 = vmul.f32 %v3160_v31, %v11531_v33  ;;  %v3089_v38 = vrot.slane %v3088_v35, 1  ;;  %v2809_v48 = vpop.f32.mrf.mxu3 }
 0x2f9   :  { %v3020_v50 = vadd.f32 %v3019_v3, %v2834_v45 }
 0x2fa   :  { %v3238_v16 = vmul.f32 %v3222_v26, %v3213_v24  ;;  %v3090_v46 = vadd.f32 %v3089_v38, %v3088_v35 }
 0x2fb   :  { %v3021_v32 = vrot.slane %v3020_v50, 2 }
 0x2fc   :  { %v3263_v23 = vadd.f32 %v3247_v39, %v3238_v16  ;;  %v3118_v49 = vmul.f32 %v3090_v46, %v11380_v27 }
 0x2fd   :  { %v3022_v12 = vadd.f32 %v3021_v32, %v3020_v50  ;;  %v1287_v50 = vperm.slane %v11559_v61, 6 }
 0x2fe   :  { %vm3271_vm14 = vcmp.gt.f32.partialorder %v3263_v23, 0.0  ;;  %v3279_v47 = vmul.f32 0.2, %v3263_v23  ;;  %v3126_v51 = vadd.f32 0.8, %v3118_v49 }
 0x2ff   :  { %v3023_v53 = vrot.slane %v3022_v12, 1 }
 0x300   :  { %v11552_v33 = vsel %vm3271_vm14, %v3263_v23, %v3279_v47  ;;  %10871 = vrsqrt.f32 %v3126_v51  ;;  %vm3167_vm15 = vweird.f32 %v3126_v51 }
 0x301   :  { %v3024_v42 = vadd.f32 %v3023_v53, %v3022_v12 }
 0x303   :  { %v3047_v57 = vmul.f32 %v3024_v42, %v11380_v27 }
 0x305   :  { %v11555_v6 = vsub.f32 %v2834_v45, %v3047_v57  ;;  %v3224_v57 = vperm.slane %v11507_v37, 4 }
 0x306   :  { %v10872_v54 = vpop.eup %10871 }
 0x307   :  { %v3162_v56 = vmul.f32 %v10872_v54, %v3126_v51  ;;  %v3063_v60 = vmul.f32 %v11555_v6, %v11555_v6  ;;  %vm3168_vm0 = vweird.f32 %v10872_v54 }
 0x308   :  { %vm3169_vm1 = vmor %vm3167_vm15, %vm3168_vm0 }
 0x309   :  { %v3163_v58 = vmul.f32 %v10872_v54, %v3162_v56  ;;  %v3091_v1 = vrot.slane %v3063_v60, 4 }
 0x30b   :  { %v3164_v59 = vmul.f32 0.5, %v3163_v58  ;;  %v3092_v4 = vadd.f32 %v3091_v1, %v3063_v60 }
 0x30c   :  { %v2872_v63 = vpop.f32.mrf.mxu0 }
 0x30d   :  { %v3165_v0 = vsub.f32 1.5, %v3164_v59  ;;  %v3093_v13 = vrot.slane %v3092_v4, 2 }
 0x30e   :  { %v2885_v2 = vpop.f32.mrf.mxu1  ;;  %v2846_v5 = vpop.f32.mrf.mxu2 }
 0x30f   :  { %v3166_v43 = vmul.f32 %v10872_v54, %v3165_v0  ;;  %v2847_v8 = vadd.f32 %v2846_v5, %v1286_v62  ;;  %v3094_v18 = vadd.f32 %v3093_v13, %v3092_v4  ;;  %v3249_v0 = vperm.slane %v11512_v19, 4 }
 0x310   :  { %v2859_v9 = vpop.f32.mrf.mxu3 }
 0x311   :  { %v3170_v11 = vsel %vm3169_vm1, %v10872_v54, %v3166_v43  ;;  %v2860_v17 = vadd.f32 %v2859_v9, %v2847_v8  ;;  %v3095_v25 = vrot.slane %v3094_v18, 1 }
 0x312   :  { %v3214_v15 = vmul.f32 %v3170_v11, %v11543_v10 }
 0x313   :  { %v2873_v21 = vadd.f32 %v2872_v63, %v2860_v17  ;;  %v3096_v31 = vadd.f32 %v3095_v25, %v3094_v18 }
 0x314   :  { %v3239_v20 = vmul.f32 %v3223_v7, %v3214_v15  ;;  %v2874_v22 = vpop.f32.mrf.mxu0 }
 0x315   :  { %v2886_v29 = vadd.f32 %v2885_v2, %v2873_v21  ;;  %v3119_v35 = vmul.f32 %v3096_v31, %v11380_v27 }
 0x316   :  { %v2887_v26 = vpop.f32.mrf.mxu1  ;;  %v3264_v28 = vadd.f32 %v3248_v14, %v3239_v20  ;;  %v2848_v34 = vpop.f32.mrf.mxu2 }
 0x317   :  { %v3025_v39 = vrot.slane %v2886_v29, 4  ;;  %v3127_v41 = vadd.f32 0.8, %v3119_v35 }
 0x318   :  { %vm3272_vm2 = vcmp.gt.f32.partialorder %v3264_v28, 0.0  ;;  %v3280_v24 = vmul.f32 0.2, %v3264_v28  ;;  %v2861_v30 = vpop.f32.mrf.mxu3 }
 0x319   :  { %v3026_v16 = vadd.f32 %v3025_v39, %v2886_v29  ;;  %10873 = vrsqrt.f32 %v3127_v41  ;;  %vm3177_vm3 = vweird.f32 %v3127_v41 }
 0x31a   :  { %v11566_v10 = vsel %vm3272_vm2, %v3264_v28, %v3280_v24 }
 0x31b   :  { %v3027_v44 = vrot.slane %v3026_v16, 2 }
 0x31d   :  { %v3028_v38 = vadd.f32 %v3027_v44, %v3026_v16  ;;  %v1288_v44 = vperm.slane %v11559_v61, 7 }
 0x31f   :  { %v3029_v40 = vrot.slane %v3028_v38, 1  ;;  %v10874_v45 = vpop.eup %10873 }
 0x320   :  { %v3172_v46 = vmul.f32 %v10874_v45, %v3127_v41  ;;  %vm3178_vm4 = vweird.f32 %v10874_v45 }
 0x321   :  { %v3030_v23 = vadd.f32 %v3029_v40, %v3028_v38  ;;  %vm3179_vm5 = vmor %vm3177_vm3, %vm3178_vm4 }
 0x322   :  { %v3173_v47 = vmul.f32 %v10874_v45, %v3172_v46 }
 0x323   :  { %v3048_v36 = vmul.f32 %v3030_v23, %v11380_v27 }
 0x324   :  { %v3174_v48 = vmul.f32 0.5, %v3173_v47  ;;  %v3225_v47 = vperm.slane %v11507_v37, 5 }
 0x325   :  { %v11569_v3 = vsub.f32 %v2886_v29, %v3048_v36 }
 0x326   :  { %v3175_v32 = vsub.f32 1.5, %v3174_v48 }
 0x327   :  { %v3064_v49 = vmul.f32 %v11569_v3, %v11569_v3 }
 0x328   :  { %v3176_v42 = vmul.f32 %v10874_v45, %v3175_v32 }
 0x329   :  { %v3097_v12 = vrot.slane %v3064_v49, 4 }
 0x32a   :  { %v3180_v60 = vsel %vm3179_vm5, %v10874_v45, %v3176_v42 }
 0x32b   :  { %v3098_v54 = vadd.f32 %v3097_v12, %v3064_v49  ;;  %v3215_v63 = vmul.f32 %v3180_v60, %v11555_v6  ;;  %v3250_v12 = vperm.slane %v11512_v19, 5 }
 0x32d   :  { %v2924_v51 = vpop.f32.mrf.mxu0  ;;  %v3099_v62 = vrot.slane %v3098_v54, 2  ;;  %v3240_v43 = vmul.f32 %v3224_v57, %v3215_v63 }
 0x32e   :  { %v2898_v56 = vpop.f32.mrf.mxu2 }
 0x32f   :  { %v2937_v53 = vpop.f32.mrf.mxu1  ;;  %v2899_v58 = vadd.f32 %v2898_v56, %v1287_v50  ;;  %v3100_v2 = vadd.f32 %v3099_v62, %v3098_v54  ;;  %v3265_v9 = vadd.f32 %v3249_v0, %v3240_v43 }
 0x330   :  { %v2911_v59 = vpop.f32.mrf.mxu3 }
 0x331   :  { %v2912_v1 = vadd.f32 %v2911_v59, %v2899_v58  ;;  %v3101_v7 = vrot.slane %v3100_v2, 1  ;;  %vm3273_vm6 = vcmp.gt.f32.partialorder %v3265_v9, 0.0  ;;  %v3281_v14 = vmul.f32 0.2, %v3265_v9 }
 0x333   :  { %v2925_v4 = vadd.f32 %v2924_v51, %v2912_v1  ;;  %v3102_v13 = vadd.f32 %v3101_v7, %v3100_v2  ;;  %v11578_v6 = vsel %vm3273_vm6, %v3265_v9, %v3281_v14 }
 0x335   :  { %v2926_v5 = vpop.f32.mrf.mxu0  ;;  %v2938_v11 = vadd.f32 %v2937_v53, %v2925_v4  ;;  %v3120_v20 = vmul.f32 %v3102_v13, %v11380_v27 }
 0x336   :  { %v2900_v15 = vpop.f32.mrf.mxu2 }
 0x337   :  { %v2939_v8 = vpop.f32.mrf.mxu1  ;;  %v3031_v17 = vrot.slane %v2938_v11, 4  ;;  %v3128_v22 = vadd.f32 0.8, %v3120_v20 }
 0x338   :  { %v2913_v18 = vpop.f32.mrf.mxu3 }
 0x339   :  { %v3032_v21 = vadd.f32 %v3031_v17, %v2938_v11  ;;  %10875 = vrsqrt.f32 %v3128_v22  ;;  %vm3187_vm7 = vweird.f32 %v3128_v22 }
 0x33b   :  { %v3033_v25 = vrot.slane %v3032_v21, 2 }
 0x33d   :  { %v3034_v26 = vadd.f32 %v3033_v25, %v3032_v21 }
 0x33f   :  { %v3035_v28 = vrot.slane %v3034_v26, 1  ;;  %v10876_v31 = vpop.eup %10875 }
 0x340   :  { %v3182_v34 = vmul.f32 %v10876_v31, %v3128_v22  ;;  %vm3188_vm8 = vweird.f32 %v10876_v31 }
 0x341   :  { %v3036_v29 = vadd.f32 %v3035_v28, %v3034_v26  ;;  %vm3189_vm9 = vmor %vm3187_vm7, %vm3188_vm8 }
 0x342   :  { %v3183_v39 = vmul.f32 %v10876_v31, %v3182_v34 }
 0x343   :  { %v3049_v24 = vmul.f32 %v3036_v29, %v11380_v27  ;;  %v3226_v29 = vperm.slane %v11507_v37, 6 }
 0x344   :  { %v3184_v35 = vmul.f32 0.5, %v3183_v39  ;;  %v3251_v39 = vperm.slane %v11512_v19, 6 }
 0x345   :  { %v3057_v30 = vsub.f32 %v2938_v11, %v3049_v24 }
 0x346   :  { %v3185_v38 = vsub.f32 1.5, %v3184_v35 }
 0x347   :  { %v3065_v16 = vmul.f32 %v3057_v30, %v3057_v30 }
 0x348   :  { %v3186_v45 = vmul.f32 %v10876_v31, %v3185_v38 }
 0x349   :  { %v3103_v40 = vrot.slane %v3065_v16, 4 }
 0x34a   :  { %v3190_v50 = vsel %vm3189_vm9, %v10876_v31, %v3186_v45 }
 0x34b   :  { %v3104_v46 = vadd.f32 %v3103_v40, %v3065_v16  ;;  %v3216_v32 = vmul.f32 %v3190_v50, %v11569_v3 }
 0x34d   :  { %v3105_v51 = vrot.slane %v3104_v46, 2  ;;  %v3241_v54 = vmul.f32 %v3225_v47, %v3216_v32 }
 0x34f   :  { %v3106_v53 = vadd.f32 %v3105_v51, %v3104_v46  ;;  %v3266_v59 = vadd.f32 %v3250_v12, %v3241_v54  ;;  %v3227_v51 = vperm.slane %v11507_v37, 7 }
 0x351   :  { %v3107_v57 = vrot.slane %v3106_v53, 1  ;;  %vm3274_vm10 = vcmp.gt.f32.partialorder %v3266_v59, 0.0  ;;  %v3282_v0 = vmul.f32 0.2, %v3266_v59 }
 0x353   :  { %v2976_v41 = vpop.f32.mrf.mxu0  ;;  %v2950_v36 = vpop.f32.mrf.mxu2  ;;  %v3108_v62 = vadd.f32 %v3107_v57, %v3106_v53  ;;  %v11586_v3 = vsel %vm3274_vm10, %v3266_v59, %v3282_v0 }
 0x354   :  { %v2951_v48 = vadd.f32 %v2950_v36, %v1288_v44 }
 0x355   :  { %v2989_v23 = vpop.f32.mrf.mxu1  ;;  %v3121_v43 = vmul.f32 %v3108_v62, %v11380_v27 }
 0x357   :  { %v2963_v49 = vpop.f32.mrf.mxu3  ;;  %v3129_v5 = vadd.f32 0.8, %v3121_v43 }
 0x358   :  { %v2964_v61 = vadd.f32 %v2963_v49, %v2951_v48 }
 0x359   :  { %10877 = vrsqrt.f32 %v3129_v5  ;;  %vm3197_vm12 = vweird.f32 %v3129_v5 }
 0x35a   :  { %v2977_v56 = vadd.f32 %v2976_v41, %v2964_v61  ;;  %v3252_v61 = vperm.slane %v11512_v19, 7 }
 0x35b   :  { %v2978_v42 = vpop.f32.mrf.mxu0  ;;  %v2952_v63 = vpop.f32.mrf.mxu2 }
 0x35c   :  { %v2990_v60 = vadd.f32 %v2989_v23, %v2977_v56 }
 0x35d   :  { %v2991_v58 = vpop.f32.mrf.mxu1 }
 0x35e   :  { %v3037_v1 = vrot.slane %v2990_v60, 4 }
 0x35f   :  { %v2965_v2 = vpop.f32.mrf.mxu3  ;;  %v10878_v13 = vpop.eup %10877 }
 0x360   :  { %v3038_v4 = vadd.f32 %v3037_v1, %v2990_v60  ;;  %v3192_v15 = vmul.f32 %v10878_v13, %v3129_v5  ;;  %vm3198_vm11 = vweird.f32 %v10878_v13 }
 0x361   :  { %vm3199_vm13 = vmor %vm3197_vm12, %vm3198_vm11 }
 0x362   :  { %v3039_v7 = vrot.slane %v3038_v4, 2  ;;  %v3193_v17 = vmul.f32 %v10878_v13, %v3192_v15 }
 0x364   :  { %v3040_v8 = vadd.f32 %v3039_v7, %v3038_v4  ;;  %v3194_v20 = vmul.f32 0.5, %v3193_v17 }
 0x366   :  { %v3041_v9 = vrot.slane %v3040_v8, 1  ;;  %v3195_v22 = vsub.f32 1.5, %v3194_v20 }
 0x368   :  { %v3042_v11 = vadd.f32 %v3041_v9, %v3040_v8  ;;  %v3196_v26 = vmul.f32 %v10878_v13, %v3195_v22 }
 0x36a   :  { %v3050_v14 = vmul.f32 %v3042_v11, %v11380_v27  ;;  %v3200_v31 = vsel %vm3199_vm13, %v10878_v13, %v3196_v26 }
 0x36b   :  { %v3217_v24 = vmul.f32 %v3200_v31, %v3057_v30 }
 0x36c   :  { %v3058_v18 = vsub.f32 %v2990_v60, %v3050_v14 }
 0x36d   :  { %v3242_v16 = vmul.f32 %v3226_v29, %v3217_v24 }
 0x36e   :  { %v3066_v21 = vmul.f32 %v3058_v18, %v3058_v18 }
 0x36f   :  { %v3267_v44 = vadd.f32 %v3251_v39, %v3242_v16 }
 0x370   :  { %v3109_v25 = vrot.slane %v3066_v21, 4 }
 0x371   :  { %vm3275_vm14 = vcmp.gt.f32.partialorder %v3267_v44, 0.0  ;;  %v3283_v40 = vmul.f32 0.2, %v3267_v44 }
 0x372   :  { %v3110_v28 = vadd.f32 %v3109_v25, %v3066_v21 }
 0x373   :  { %v11592_v45 = vsel %vm3275_vm14, %v3267_v44, %v3283_v40 }
 0x374   :  { %v3111_v34 = vrot.slane %v3110_v28, 2 }
 0x376   :  { %v3112_v35 = vadd.f32 %v3111_v34, %v3110_v28 }
 0x378   :  { %v3113_v41 = vrot.slane %v3112_v35, 1 }
 0x37a   :  { %v3114_v38 = vadd.f32 %v3113_v41, %v3112_v35 }
 0x37c   :  { %v3122_v23 = vmul.f32 %v3114_v38, %v11380_v27 }
 0x37e   :  { %v3130_v46 = vadd.f32 0.8, %v3122_v23 }
 0x380   :  { %10879 = vrsqrt.f32 %v3130_v46  ;;  %vm3207_vm0 = vweird.f32 %v3130_v46 }
 0x386   :  { %v10880_v36 = vpop.eup %10879 }
 0x387   :  { %v3202_v47 = vmul.f32 %v10880_v36, %v3130_v46  ;;  %vm3208_vm15 = vweird.f32 %v10880_v36 }
 0x388   :  { %vm3209_vm1 = vmor %vm3207_vm0, %vm3208_vm15 }
 0x389   :  { %v3203_v48 = vmul.f32 %v10880_v36, %v3202_v47 }
 0x38b   :  { %v3204_v49 = vmul.f32 0.5, %v3203_v48 }
 0x38d   :  { %v3205_v30 = vsub.f32 1.5, %v3204_v49 }
 0x38f   :  { %v3206_v50 = vmul.f32 %v10880_v36, %v3205_v30 }
 0x391   :  { %v3210_v32 = vsel %vm3209_vm1, %v10880_v36, %v3206_v50 }
 0x392   :  { %v3218_v12 = vmul.f32 %v3210_v32, %v3058_v18 }
 0x394   :  { %v3243_v27 = vmul.f32 %v3227_v51, %v3218_v12 }
 0x396   :  { %v3268_v53 = vadd.f32 %v3252_v61, %v3243_v27 }
 0x398   :  { %vm3276_vm2 = vcmp.gt.f32.partialorder %v3268_v53, 0.0  ;;  %v3284_v42 = vmul.f32 0.2, %v3268_v53 }
 0x39a   :  { %v11596_v54 = vsel %vm3276_vm2, %v3268_v53, %v3284_v42 }
 0x39b   :  { %11248 = dma.done.wait [#allocation4 + $0x1], 57344 }
 0x39c   :  { %11249 = vsyncadd [#allocation4 + $0x1], 4294909952  ;;  %v8456_v56 = vld [vmem:[#allocation3 + $0x188] sm:$0xf]  ;;  %v10440_v57 = vld [vmem:[#allocation3 + $0x1a0] sm:$0xf0] }
 0x39d   :  { %v8680_v58 = vld [vmem:[#allocation3 + $0x348] sm:$0xf]  ;;  %v8457_v59 = vor.u32 %v10440_v57, %v8456_v56  ;;  %v10496_v60 = vld [vmem:[#allocation3 + $0x360] sm:$0xf0]  ;;  %v8428_v1 = vld [vmem:[#allocation3 + $0x150] sm:$0xf] }
 0x39e   :  { %v8904_v62 = vld [vmem:[#allocation3 + $0x508] sm:$0xf]  ;;  %v10552_v63 = vld [vmem:[#allocation3 + $0x520] sm:$0xf0]  ;;  %v8681_v37 = vor.u32 %v10496_v60, %v8680_v58  ;;  %v10433_v2 = vld [vmem:[#allocation3 + $0x168] sm:$0xf0] }
 0x39f   :  { %v8905_v0 = vor.u32 %v10552_v63, %v8904_v62  ;;  %v8652_v19 = vld [vmem:[#allocation3 + $0x310] sm:$0xf]  ;;  %6137 = vmatpush.bf16.msra.mxu2 %v8457_v59  ;;  %v8429_v43 = vor.u32 %v10433_v2, %v8428_v1  ;;  %v10489_v4 = vld [vmem:[#allocation3 + $0x328] sm:$0xf0]  ;;  %v9128_v5 = vld [vmem:[#allocation3 + $0x6c8] sm:$0xf] }
 0x3a0   :  { %v10608_v7 = vld [vmem:[#allocation3 + $0x6e0] sm:$0xf0]  ;;  %6150 = vmatpush.bf16.msra.mxu3 %v8681_v37  ;;  %v8653_v8 = vor.u32 %v10489_v4, %v8652_v19  ;;  %v8876_v11 = vld [vmem:[#allocation3 + $0x4d0] sm:$0xf]  ;;  %v10545_v13 = vld [vmem:[#allocation3 + $0x4e8] sm:$0xf0] }
 0x3a1   :  { %6163 = vmatpush.bf16.msrb.mxu0 %v8905_v0  ;;  %v9129_v9 = vor.u32 %v10608_v7, %v9128_v5  ;;  %v8400_v15 = vld [vmem:[#allocation3 + $0x118] sm:$0xf]  ;;  %v8877_v14 = vor.u32 %v10545_v13, %v8876_v11  ;;  %v10426_v17 = vld [vmem:[#allocation3 + $0x130] sm:$0xf0]  ;;  %v9100_v21 = vld [vmem:[#allocation3 + $0x690] sm:$0xf] }
 0x3a2   :  { %v8624_v18 = vld [vmem:[#allocation3 + $0x2d8] sm:$0xf]  ;;  %v10482_v20 = vld [vmem:[#allocation3 + $0x2f0] sm:$0xf0]  ;;  %v10601_v22 = vld [vmem:[#allocation3 + $0x6a8] sm:$0xf0]  ;;  %v8401_v26 = vor.u32 %v10426_v17, %v8400_v15 }
 0x3a3   :  { %6176 = vmatpush.bf16.msrb.mxu1 %v9129_v9  ;;  %v8848_v25 = vld [vmem:[#allocation3 + $0x498] sm:$0xf]  ;;  %6138 = vmatpush.bf16.msra.mxu2 %v8429_v43  ;;  %v9101_v28 = vor.u32 %v10601_v22, %v9100_v21  ;;  %v10538_v29 = vld [vmem:[#allocation3 + $0x4b0] sm:$0xf0]  ;;  %v8372_v31 = vld [vmem:[#allocation3 + $0xe0] sm:$0xf]  ;;  %v8625_v24 = vor.u32 %v10482_v20, %v8624_v18 }
 0x3a4   :  { %v10419_v34 = vld [vmem:[#allocation3 + $0xf8] sm:$0xf0]  ;;  %6151 = vmatpush.bf16.msra.mxu3 %v8653_v8  ;;  %v8849_v39 = vor.u32 %v10538_v29, %v8848_v25  ;;  %v8596_v35 = vld [vmem:[#allocation3 + $0x2a0] sm:$0xf]  ;;  %v9072_v41 = vld [vmem:[#allocation3 + $0x658] sm:$0xf] }
 0x3a5   :  { %6164 = vmatpush.bf16.msrb.mxu0 %v8877_v14  ;;  %v10475_v16 = vld [vmem:[#allocation3 + $0x2b8] sm:$0xf0]  ;;  %v10594_v44 = vld [vmem:[#allocation3 + $0x670] sm:$0xf0]  ;;  %v8820_v38 = vld [vmem:[#allocation3 + $0x460] sm:$0xf]  ;;  %v8373_v46 = vor.u32 %v10419_v34, %v8372_v31 }
 0x3a6   :  { %v10531_v40 = vld [vmem:[#allocation3 + $0x478] sm:$0xf0]  ;;  %v9073_v23 = vor.u32 %v10594_v44, %v9072_v41  ;;  %v9044_v36 = vld [vmem:[#allocation3 + $0x620] sm:$0xf]  ;;  %v8597_v48 = vor.u32 %v10475_v16, %v8596_v35  ;;  %v8344_v30 = vld [vmem:[#allocation3 + $0xa8] sm:$0xf] }
 0x3a7   :  { %6177 = vmatpush.bf16.msrb.mxu1 %v9101_v28  ;;  %6139 = vmatpush.bf16.msra.mxu2 %v8401_v26  ;;  %v10587_v47 = vld [vmem:[#allocation3 + $0x638] sm:$0xf0]  ;;  %v8821_v49 = vor.u32 %v10531_v40, %v8820_v38  ;;  %v10412_v50 = vld [vmem:[#allocation3 + $0xc0] sm:$0xf0]  ;;  %v8568_v51 = vld [vmem:[#allocation3 + $0x268] sm:$0xf] }
 0x3a8   :  { %6152 = vmatpush.bf16.msra.mxu3 %v8625_v24  ;;  %v10468_v32 = vld [vmem:[#allocation3 + $0x280] sm:$0xf0]  ;;  %v8792_v12 = vld [vmem:[#allocation3 + $0x428] sm:$0xf]  ;;  %v9045_v27 = vor.u32 %v10587_v47, %v9044_v36  ;;  %v8345_v53 = vor.u32 %v10412_v50, %v8344_v30  ;;  %v8316_v59 = vld [vmem:[#allocation3 + $0x70] sm:$0xf] }
 0x3a9   :  { %6165 = vmatpush.bf16.msrb.mxu0 %v8849_v39  ;;  %v10524_v61 = vld [vmem:[#allocation3 + $0x440] sm:$0xf0]  ;;  %v9016_v42 = vld [vmem:[#allocation3 + $0x5e8] sm:$0xf]  ;;  %v8569_v57 = vor.u32 %v10468_v32, %v8568_v51  ;;  %v10405_v60 = vld [vmem:[#allocation3 + $0x88] sm:$0xf0] }
 0x3aa   :  { %v10580_v56 = vld [vmem:[#allocation3 + $0x600] sm:$0xf0]  ;;  %v8793_v58 = vor.u32 %v10524_v61, %v8792_v12  ;;  %v8540_v62 = vld [vmem:[#allocation3 + $0x230] sm:$0xf]  ;;  %v10461_v63 = vld [vmem:[#allocation3 + $0x248] sm:$0xf0]  ;;  %v8317_v2 = vor.u32 %v10405_v60, %v8316_v59 }
 0x3ab   :  { %6178 = vmatpush.bf16.msrb.mxu1 %v9073_v23  ;;  %6140 = vmatpush.bf16.msra.mxu2 %v8373_v46  ;;  %v8764_v37 = vld [vmem:[#allocation3 + $0x3f0] sm:$0xf]  ;;  %v10517_v0 = vld [vmem:[#allocation3 + $0x408] sm:$0xf0]  ;;  %v9017_v1 = vor.u32 %v10580_v56, %v9016_v42  ;;  %v8541_v4 = vor.u32 %v10461_v63, %v8540_v62  ;;  %v8288_v7 = vld [vmem:[#allocation3 + $0x38] sm:$0xf]  ;;  %v11604_v63 = vpack.c.bf16 %v11540_v55, %v11540_v55 }
 0x3ac   :  { %6153 = vmatpush.bf16.msra.mxu3 %v8597_v48  ;;  %v8988_v19 = vld [vmem:[#allocation3 + $0x5b0] sm:$0xf]  ;;  %v10573_v43 = vld [vmem:[#allocation3 + $0x5c8] sm:$0xf0]  ;;  %v8765_v5 = vor.u32 %v10517_v0, %v8764_v37  ;;  %v10398_v8 = vld [vmem:[#allocation3 + $0x50] sm:$0xf0] }
 0x3ad   :  { %6166 = vmatpush.bf16.msrb.mxu0 %v8821_v49  ;;  %v8512_v9 = vld [vmem:[#allocation3 + $0x1f8] sm:$0xf]  ;;  %v10454_v11 = vld [vmem:[#allocation3 + $0x210] sm:$0xf0]  ;;  %v8989_v14 = vor.u32 %v10573_v43, %v8988_v19  ;;  %v8260_v17 = vld [vmem:[#allocation3] sm:$0xf]  ;;  %v8289_v18 = vor.u32 %v10398_v8, %v8288_v7 }
 0x3ae   :  { %v8736_v13 = vld [vmem:[#allocation3 + $0x3b8] sm:$0xf]  ;;  %v10510_v15 = vld [vmem:[#allocation3 + $0x3d0] sm:$0xf0]  ;;  %v10391_v20 = vld [vmem:[#allocation3 + $0x18] sm:$0xf0]  ;;  %v8513_v25 = vor.u32 %v10454_v11, %v8512_v9 }
 0x3af   :  { %6179 = vmatpush.bf16.msrb.mxu1 %v9045_v27  ;;  %6141 = vmatpush.bf16.msra.mxu2 %v8345_v53  ;;  %v8960_v21 = vld [vmem:[#allocation3 + $0x578] sm:$0xf]  ;;  %v10566_v22 = vld [vmem:[#allocation3 + $0x590] sm:$0xf0]  ;;  %v8737_v26 = vor.u32 %v10510_v15, %v8736_v13  ;;  %v8484_v28 = vld [vmem:[#allocation3 + $0x1c0] sm:$0xf]  ;;  %v8261_v38 = vor.u32 %v10391_v20, %v8260_v17 }
 0x3b0   :  { %6154 = vmatpush.bf16.msra.mxu3 %v8569_v57  ;;  %v10447_v29 = vld [vmem:[#allocation3 + $0x1d8] sm:$0xf0]  ;;  %v9352_v31 = vld [vmem:[#allocation3 + $0x888] sm:$0xf]  ;;  %v10664_v34 = vld [vmem:[#allocation3 + $0x8a0] sm:$0xf0]  ;;  %v8961_v35 = vor.u32 %v10566_v22, %v8960_v21 }
 0x3b1   :  { %6167 = vmatpush.bf16.msrb.mxu0 %v8793_v58  ;;  %v9576_v24 = vld [vmem:[#allocation3 + $0xa48] sm:$0xf]  ;;  %v10720_v39 = vld [vmem:[#allocation3 + $0xa60] sm:$0xf0]  ;;  %v8708_v16 = vld [vmem:[#allocation3 + $0x380] sm:$0xf]  ;;  %v8485_v36 = vor.u32 %v10447_v29, %v8484_v28  ;;  %v9353_v47 = vor.u32 %v10664_v34, %v9352_v31  ;;  %v11600_v58 = vpack.c.bf16 %v11524_v52, %v11524_v52 }
 0x3b2   :  { %v10503_v41 = vld [vmem:[#allocation3 + $0x398] sm:$0xf0]  ;;  %v9800_v44 = vld [vmem:[#allocation3 + $0xc08] sm:$0xf]  ;;  %v10776_v40 = vld [vmem:[#allocation3 + $0xc20] sm:$0xf0]  ;;  %v9577_v30 = vor.u32 %v10720_v39, %v9576_v24 }
 0x3b3   :  { %6180 = vmatpush.bf16.msrb.mxu1 %v9017_v1  ;;  %6142 = vmatpush.bf16.msra.mxu2 %v8317_v2  ;;  %v8932_v23 = vld [vmem:[#allocation3 + $0x540] sm:$0xf]  ;;  %v10559_v46 = vld [vmem:[#allocation3 + $0x558] sm:$0xf0]  ;;  %v10024_v48 = vld [vmem:[#allocation3 + $0xdc8] sm:$0xf]  ;;  %v8709_v50 = vor.u32 %v10503_v41, %v8708_v16  ;;  %v9801_v12 = vor.u32 %v10776_v40, %v9800_v44  ;;  %v11608_v2 = vpack.c.bf16 %v11552_v33, %v11552_v33 }
 0x3b4   :  { %6155 = vmatpush.bf16.msra.mxu3 %v8541_v4  ;;  %v10832_v49 = vld [vmem:[#allocation3 + $0xde0] sm:$0xf0]  ;;  %v9324_v51 = vld [vmem:[#allocation3 + $0x850] sm:$0xf]  ;;  %v10657_v32 = vld [vmem:[#allocation3 + $0x868] sm:$0xf0]  ;;  %v8933_v61 = vor.u32 %v10559_v46, %v8932_v23  ;;  %v11612_v4 = vpack.c.bf16 %v11566_v10, %v11566_v10 }
 0x3b5   :  { %6168 = vmatpush.bf16.msrb.mxu0 %v8765_v5  ;;  %v9548_v27 = vld [vmem:[#allocation3 + $0xa10] sm:$0xf]  ;;  %v10713_v53 = vld [vmem:[#allocation3 + $0xa28] sm:$0xf0]  ;;  %v10025_v42 = vor.u32 %v10832_v49, %v10024_v48  ;;  %v9325_v59 = vor.u32 %v10657_v32, %v9324_v51  ;;  %v9296_v0 = vld [vmem:[#allocation3 + $0x818] sm:$0xf] }
 0x3b6   :  { %v9772_v56 = vld [vmem:[#allocation3 + $0xbd0] sm:$0xf]  ;;  %v10769_v57 = vld [vmem:[#allocation3 + $0xbe8] sm:$0xf0]  ;;  %v9549_v37 = vor.u32 %v10713_v53, %v9548_v27  ;;  %v10650_v1 = vld [vmem:[#allocation3 + $0x830] sm:$0xf0] }
 0x3b7   :  { %6181 = vmatpush.bf16.msrb.mxu1 %v8989_v14  ;;  %6143 = vmatpush.bf16.msra.mxu2 %v8289_v18  ;;  %v9996_v60 = vld [vmem:[#allocation3 + $0xd90] sm:$0xf]  ;;  %v10825_v62 = vld [vmem:[#allocation3 + $0xda8] sm:$0xf0]  ;;  %v9773_v52 = vor.u32 %v10769_v57, %v9772_v56  ;;  %v9520_v19 = vld [vmem:[#allocation3 + $0x9d8] sm:$0xf]  ;;  %v9297_v8 = vor.u32 %v10650_v1, %v9296_v0 }
 0x3b8   :  { %6156 = vmatpush.bf16.msra.mxu3 %v8513_v25  ;;  %v10706_v43 = vld [vmem:[#allocation3 + $0x9f0] sm:$0xf0]  ;;  %v9997_v55 = vor.u32 %v10825_v62, %v9996_v60  ;;  %v9744_v5 = vld [vmem:[#allocation3 + $0xb98] sm:$0xf]  ;;  %v9268_v13 = vld [vmem:[#allocation3 + $0x7e0] sm:$0xf] }
 0x3b9   :  { %6169 = vmatpush.bf16.msrb.mxu0 %v8737_v26  ;;  %v10762_v7 = vld [vmem:[#allocation3 + $0xbb0] sm:$0xf0]  ;;  %v9968_v9 = vld [vmem:[#allocation3 + $0xd58] sm:$0xf]  ;;  %v9521_v11 = vor.u32 %v10706_v43, %v9520_v19  ;;  %v10643_v15 = vld [vmem:[#allocation3 + $0x7f8] sm:$0xf0] }
 0x3ba   :  { %v10818_v33 = vld [vmem:[#allocation3 + $0xd70] sm:$0xf0]  ;;  %v9745_v10 = vor.u32 %v10762_v7, %v9744_v5  ;;  %v9492_v14 = vld [vmem:[#allocation3 + $0x9a0] sm:$0xf]  ;;  %v10699_v17 = vld [vmem:[#allocation3 + $0x9b8] sm:$0xf0]  ;;  %v9269_v22 = vor.u32 %v10643_v15, %v9268_v13 }
 0x3bb   :  { %6182 = vmatpush.bf16.msrb.mxu1 %v8961_v35  ;;  %6144 = vmatpush.bf16.msra.mxu2 %v8261_v38  ;;  %v9969_v18 = vor.u32 %v10818_v33, %v9968_v9  ;;  %v9716_v20 = vld [vmem:[#allocation3 + $0xb60] sm:$0xf]  ;;  %v10755_v21 = vld [vmem:[#allocation3 + $0xb78] sm:$0xf0]  ;;  %v9493_v28 = vor.u32 %v10699_v17, %v9492_v14  ;;  %v9240_v29 = vld [vmem:[#allocation3 + $0x7a8] sm:$0xf] }
 0x3bc   :  { %6157 = vmatpush.bf16.msra.mxu3 %v8485_v36  ;;  %v9940_v25 = vld [vmem:[#allocation3 + $0xd20] sm:$0xf]  ;;  %v10811_v26 = vld [vmem:[#allocation3 + $0xd38] sm:$0xf0]  ;;  %v10636_v31 = vld [vmem:[#allocation3 + $0x7c0] sm:$0xf0]  ;;  %v9717_v34 = vor.u32 %v10755_v21, %v9716_v20 }
 0x3bd   :  { %6170 = vmatpush.bf16.msrb.mxu0 %v8709_v50  ;;  %v9464_v24 = vld [vmem:[#allocation3 + $0x968] sm:$0xf]  ;;  %v10692_v39 = vld [vmem:[#allocation3 + $0x980] sm:$0xf0]  ;;  %v9941_v35 = vor.u32 %v10811_v26, %v9940_v25  ;;  %v9241_v44 = vor.u32 %v10636_v31, %v9240_v29  ;;  %v9212_v46 = vld [vmem:[#allocation3 + $0x770] sm:$0xf] }
 0x3be   :  { %6145 = vmatmul.bf16.vlgmr.msra.gmra.mxu2 %v11600_v58  ;;  %v9688_v16 = vld [vmem:[#allocation3 + $0xb28] sm:$0xf]  ;;  %v10748_v41 = vld [vmem:[#allocation3 + $0xb40] sm:$0xf0]  ;;  %v9465_v23 = vor.u32 %v10692_v39, %v9464_v24  ;;  %v10629_v36 = vld [vmem:[#allocation3 + $0x788] sm:$0xf0] }
 0x3bf   :  { %6189 = vmatpush.bf16.msrb.mxu2 %v9353_v47  ;;  %6183 = vmatpush.bf16.msrb.mxu1 %v8933_v61  ;;  %v9912_v38 = vld [vmem:[#allocation3 + $0xce8] sm:$0xf]  ;;  %v10804_v40 = vld [vmem:[#allocation3 + $0xd00] sm:$0xf0]  ;;  %v9689_v47 = vor.u32 %v10748_v41, %v9688_v16  ;;  %v9436_v48 = vld [vmem:[#allocation3 + $0x930] sm:$0xf]  ;;  %v9213_v32 = vor.u32 %v10629_v36, %v9212_v46  ;;  %v11620_v46 = vpack.c.bf16 %v11578_v6, %v11578_v6 }
 0x3c0   :  { %6202 = vmatpush.bf16.msrb.mxu3 %v9577_v30  ;;  %6171 = vmatmul.bf16.vlgmr.msrb.gmra.mxu0 %v11608_v2  ;;  %v10685_v49 = vld [vmem:[#allocation3 + $0x948] sm:$0xf0]  ;;  %v9913_v30 = vor.u32 %v10804_v40, %v9912_v38  ;;  %v9660_v50 = vld [vmem:[#allocation3 + $0xaf0] sm:$0xf]  ;;  %v9184_v53 = vld [vmem:[#allocation3 + $0x738] sm:$0xf] }
 0x3c1   :  { %6215 = vmatpush.bf16.msra.mxu0 %v9801_v12  ;;  %6158 = vmatmul.bf16.vlgmr.msra.gmra.mxu3 %v11604_v63  ;;  %v10741_v51 = vld [vmem:[#allocation3 + $0xb08] sm:$0xf0]  ;;  %v9884_v12 = vld [vmem:[#allocation3 + $0xcb0] sm:$0xf]  ;;  %v9437_v27 = vor.u32 %v10685_v49, %v9436_v48  ;;  %v9408_v57 = vld [vmem:[#allocation3 + $0x8f8] sm:$0xf]  ;;  %v11624_v49 = vpack.c.bf16 %v11586_v3, %v11586_v3 }
 0x3c2   :  { %6184 = vmatmul.bf16.vlgmr.msrb.gmra.mxu1 %v11612_v4  ;;  %v10797_v61 = vld [vmem:[#allocation3 + $0xcc8] sm:$0xf0]  ;;  %v9661_v56 = vor.u32 %v10741_v51, %v9660_v50  ;;  %v9632_v62 = vld [vmem:[#allocation3 + $0xab8] sm:$0xf]  ;;  %v9156_v0 = vld [vmem:[#allocation3 + $0x700] sm:$0xf] }
 0x3c3   :  { %6228 = vmatpush.bf16.msra.mxu1 %v10025_v42  ;;  %6190 = vmatpush.bf16.msrb.mxu2 %v9325_v59  ;;  %v10622_v42 = vld [vmem:[#allocation3 + $0x750] sm:$0xf0]  ;;  %v9885_v60 = vor.u32 %v10797_v61, %v9884_v12  ;;  %v9856_v19 = vld [vmem:[#allocation3 + $0xc78] sm:$0xf]  ;;  %v9380_v5 = vld [vmem:[#allocation3 + $0x8c0] sm:$0xf] }
 0x3c4   :  { %6203 = vmatpush.bf16.msrb.mxu3 %v9549_v37  ;;  %v10678_v59 = vld [vmem:[#allocation3 + $0x910] sm:$0xf0]  ;;  %v9185_v1 = vor.u32 %v10622_v42, %v9184_v53  ;;  %v10671_v7 = vld [vmem:[#allocation3 + $0x8d8] sm:$0xf0]  ;;  %v8458_v33 = vld [vmem:[#allocation3 + $0x1a4] sm:$0xf0] }
 0x3c5   :  { %6216 = vmatpush.bf16.msra.mxu0 %v9773_v52  ;;  %v10734_v37 = vld [vmem:[#allocation3 + $0xad0] sm:$0xf0]  ;;  %v10615_v52 = vld [vmem:[#allocation3 + $0x718] sm:$0xf0]  ;;  %v8682_v13 = vld [vmem:[#allocation3 + $0x364] sm:$0xf0]  ;;  %v9381_v25 = vor.u32 %v10671_v7, %v9380_v5 }
 0x3c6   :  { %v10790_v43 = vld [vmem:[#allocation3 + $0xc90] sm:$0xf0]  ;;  %v9633_v9 = vor.u32 %v10734_v37, %v9632_v62  ;;  %v10727_v14 = vld [vmem:[#allocation3 + $0xa98] sm:$0xf0]  ;;  %v10549_v17 = vld [vmem:[#allocation3 + $0x50c] sm:$0xf] }
 0x3c7   :  { %6229 = vmatpush.bf16.msra.mxu1 %v9997_v55  ;;  %6191 = vmatpush.bf16.msrb.mxu2 %v9297_v8  ;;  %v9409_v55 = vor.u32 %v10678_v59, %v9408_v57  ;;  %v10437_v8 = vld [vmem:[#allocation3 + $0x18c] sm:$0xf]  ;;  %v9857_v15 = vor.u32 %v10790_v43, %v9856_v19  ;;  %v8906_v20 = vld [vmem:[#allocation3 + $0x524] sm:$0xf0]  ;;  %v9828_v21 = vld [vmem:[#allocation3 + $0xc40] sm:$0xf] }
 0x3c8   :  { %6204 = vmatpush.bf16.msrb.mxu3 %v9521_v11  ;;  %v10493_v11 = vld [vmem:[#allocation3 + $0x34c] sm:$0xf]  ;;  %v8461_v26 = vor.u32 %v10437_v8, %v8458_v33  ;;  %v9130_v29 = vld [vmem:[#allocation3 + $0x6e4] sm:$0xf0]  ;;  %v10430_v24 = vld [vmem:[#allocation3 + $0x154] sm:$0xf] }
 0x3c9   :  { %6217 = vmatpush.bf16.msra.mxu0 %v9745_v10  ;;  %v9604_v10 = vld [vmem:[#allocation3 + $0xa80] sm:$0xf]  ;;  %v8685_v31 = vor.u32 %v10493_v11, %v8682_v13  ;;  %v8430_v39 = vld [vmem:[#allocation3 + $0x16c] sm:$0xf0]  ;;  %v10486_v41 = vld [vmem:[#allocation3 + $0x314] sm:$0xf] }
 0x3ca   :  { %v10542_v40 = vld [vmem:[#allocation3 + $0x4d4] sm:$0xf]  ;;  %v8433_v36 = vor.u32 %v10430_v24, %v8430_v39  ;;  %v9102_v48 = vld [vmem:[#allocation3 + $0x6ac] sm:$0xf0]  ;;  %v10423_v50 = vld [vmem:[#allocation3 + $0x11c] sm:$0xf] }
 0x3cb   :  { %6230 = vmatpush.bf16.msra.mxu1 %v9969_v18  ;;  %6192 = vmatpush.bf16.msrb.mxu2 %v9269_v22  ;;  %v9157_v18 = vor.u32 %v10615_v52, %v9156_v0  ;;  %v10783_v22 = vld [vmem:[#allocation3 + $0xc58] sm:$0xf0]  ;;  %v8402_v51 = vld [vmem:[#allocation3 + $0x134] sm:$0xf0]  ;;  %v8374_v62 = vld [vmem:[#allocation3 + $0xfc] sm:$0xf0] }
 0x3cc   :  { %6205 = vmatpush.bf16.msrb.mxu3 %v9493_v28  ;;  %v10605_v28 = vld [vmem:[#allocation3 + $0x6cc] sm:$0xf]  ;;  %v9829_v16 = vor.u32 %v10783_v22, %v9828_v21  ;;  %v10479_v12 = vld [vmem:[#allocation3 + $0x2dc] sm:$0xf]  ;;  %v8626_v61 = vld [vmem:[#allocation3 + $0x2f4] sm:$0xf0] }
 0x3cd   :  { %6218 = vmatpush.bf16.msra.mxu0 %v9717_v34  ;;  %v9605_v34 = vor.u32 %v10727_v14, %v9604_v10  ;;  %v9133_v38 = vor.u32 %v10605_v28, %v9130_v29  ;;  %v10535_v53 = vld [vmem:[#allocation3 + $0x49c] sm:$0xf]  ;;  %v8850_v42 = vld [vmem:[#allocation3 + $0x4b4] sm:$0xf0]  ;;  %v8629_v59 = vor.u32 %v10479_v12, %v8626_v61  ;;  %v10472_v37 = vld [vmem:[#allocation3 + $0x2a4] sm:$0xf] }
 0x3ce   :  { %v9074_v57 = vld [vmem:[#allocation3 + $0x674] sm:$0xf0]  ;;  %v8598_v0 = vld [vmem:[#allocation3 + $0x2bc] sm:$0xf0]  ;;  %v10528_v52 = vld [vmem:[#allocation3 + $0x464] sm:$0xf] }
 0x3cf   :  { %6231 = vmatpush.bf16.msra.mxu1 %v9941_v35  ;;  %6193 = vmatpush.bf16.msrb.mxu2 %v9241_v44  ;;  %v8909_v35 = vor.u32 %v10549_v17, %v8906_v20  ;;  %v8654_v44 = vld [vmem:[#allocation3 + $0x32c] sm:$0xf0]  ;;  %v8822_v19 = vld [vmem:[#allocation3 + $0x47c] sm:$0xf0]  ;;  %v8601_v7 = vor.u32 %v10472_v37, %v8598_v0  ;;  %v10409_v8 = vld [vmem:[#allocation3 + $0xac] sm:$0xf] }
 0x3d0   :  { %6206 = vmatpush.bf16.msrb.mxu3 %v9465_v23  ;;  %v8878_v23 = vld [vmem:[#allocation3 + $0x4ec] sm:$0xf0]  ;;  %v9046_v5 = vld [vmem:[#allocation3 + $0x63c] sm:$0xf0]  ;;  %v8825_v33 = vor.u32 %v10528_v52, %v8822_v19  ;;  %v10465_v11 = vld [vmem:[#allocation3 + $0x26c] sm:$0xf] }
 0x3d1   :  { %6219 = vmatpush.bf16.msra.mxu0 %v9689_v47  ;;  %v10598_v47 = vld [vmem:[#allocation3 + $0x694] sm:$0xf]  ;;  %v8881_v6 = vor.u32 %v10542_v40, %v8878_v23  ;;  %v8570_v13 = vld [vmem:[#allocation3 + $0x284] sm:$0xf0]  ;;  %v10521_v10 = vld [vmem:[#allocation3 + $0x42c] sm:$0xf] }
 0x3d2   :  { %v9105_v3 = vor.u32 %v10598_v47, %v9102_v48  ;;  %v8794_v14 = vld [vmem:[#allocation3 + $0x444] sm:$0xf0]  ;;  %v8573_v21 = vor.u32 %v10465_v11, %v8570_v13  ;;  %v10402_v22 = vld [vmem:[#allocation3 + $0x74] sm:$0xf]  ;;  %v8542_v29 = vld [vmem:[#allocation3 + $0x24c] sm:$0xf0] }
 0x3d3   :  { %6232 = vmatpush.bf16.msra.mxu1 %v9913_v30  ;;  %6194 = vmatpush.bf16.msrb.mxu2 %v9213_v32  ;;  %v8657_v30 = vor.u32 %v10486_v41, %v8654_v44  ;;  %v11628_v32 = vpack.c.bf16 %v11592_v45, %v11592_v45  ;;  %v10591_v45 = vld [vmem:[#allocation3 + $0x65c] sm:$0xf]  ;;  %v9018_v20 = vld [vmem:[#allocation3 + $0x604] sm:$0xf0]  ;;  %v10458_v28 = vld [vmem:[#allocation3 + $0x234] sm:$0xf] }
 0x3d4   :  { %6207 = vmatpush.bf16.msrb.mxu3 %v9437_v27  ;;  %v11632_v27 = vpack.c.bf16 %v11596_v54, %v11596_v54  ;;  %v8853_v54 = vor.u32 %v10535_v53, %v8850_v42  ;;  %v8766_v24 = vld [vmem:[#allocation3 + $0x40c] sm:$0xf0]  ;;  %v8545_v41 = vor.u32 %v10458_v28, %v8542_v29  ;;  %v10395_v44 = vld [vmem:[#allocation3 + $0x3c] sm:$0xf]  ;;  %v8962_v61 = vld [vmem:[#allocation3 + $0x594] sm:$0xf0] }
 0x3d5   :  { %6220 = vmatpush.bf16.msra.mxu0 %v9661_v56  ;;  %v8405_v56 = vor.u32 %v10423_v50, %v8402_v51  ;;  %v10451_v23 = vld [vmem:[#allocation3 + $0x1fc] sm:$0xf]  ;;  %v10388_v50 = vld [vmem:[#allocation3 + $0x4] sm:$0xf]  ;;  %v8486_v42 = vld [vmem:[#allocation3 + $0x1dc] sm:$0xf0] }
 0x3d6   :  { %v10507_v48 = vld [vmem:[#allocation3 + $0x3bc] sm:$0xf]  ;;  %v10444_v53 = vld [vmem:[#allocation3 + $0x1c4] sm:$0xf]  ;;  %v8710_v37 = vld [vmem:[#allocation3 + $0x39c] sm:$0xf0] }
 0x3d7   :  { %6233 = vmatpush.bf16.msra.mxu1 %v9885_v60  ;;  %6195 = vmatpush.bf16.msrb.mxu2 %v9185_v1  ;;  %v10416_v60 = vld [vmem:[#allocation3 + $0xe4] sm:$0xf]  ;;  %v9077_v1 = vor.u32 %v10591_v45, %v9074_v57  ;;  %v10563_v12 = vld [vmem:[#allocation3 + $0x57c] sm:$0xf]  ;;  %v9354_v57 = vld [vmem:[#allocation3 + $0x8a4] sm:$0xf0] }
 0x3d8   :  { %6208 = vmatpush.bf16.msrb.mxu3 %v9409_v55  ;;  %v8377_v43 = vor.u32 %v10416_v60, %v8374_v62  ;;  %v10584_v55 = vld [vmem:[#allocation3 + $0x624] sm:$0xf]  ;;  %v9578_v60 = vld [vmem:[#allocation3 + $0xa64] sm:$0xf0]  ;;  %v8965_v62 = vor.u32 %v10563_v12, %v8962_v61  ;;  %v10773_v0 = vld [vmem:[#allocation3 + $0xc0c] sm:$0xf] }
 0x3d9   :  { %6221 = vmatpush.bf16.msra.mxu0 %v9633_v9  ;;  %v8346_v9 = vld [vmem:[#allocation3 + $0xc4] sm:$0xf0]  ;;  %v10556_v19 = vld [vmem:[#allocation3 + $0x544] sm:$0xf]  ;;  %v10654_v11 = vld [vmem:[#allocation3 + $0x854] sm:$0xf] }
 0x3da   :  { %v8349_v17 = vor.u32 %v10409_v8, %v8346_v9  ;;  %v9802_v52 = vld [vmem:[#allocation3 + $0xc24] sm:$0xf0]  ;;  %v9326_v13 = vld [vmem:[#allocation3 + $0x86c] sm:$0xf0]  ;;  %v10647_v29 = vld [vmem:[#allocation3 + $0x81c] sm:$0xf] }
 0x3db   :  { %6234 = vmatpush.bf16.msra.mxu1 %v9857_v15  ;;  %6196 = vmatpush.bf16.msrb.mxu2 %v9157_v18  ;;  %v9049_v15 = vor.u32 %v10584_v55, %v9046_v5  ;;  %v10577_v18 = vld [vmem:[#allocation3 + $0x5ec] sm:$0xf]  ;;  %v8489_v55 = vor.u32 %v10444_v53, %v8486_v42  ;;  %v10026_v8 = vld [vmem:[#allocation3 + $0xde4] sm:$0xf0]  ;;  %v9718_v12 = vld [vmem:[#allocation3 + $0xb7c] sm:$0xf0] }
 0x3dc   :  { %6209 = vmatpush.bf16.msrb.mxu3 %v9381_v25  ;;  %v8318_v25 = vld [vmem:[#allocation3 + $0x8c] sm:$0xf0]  ;;  %v9942_v53 = vld [vmem:[#allocation3 + $0xd3c] sm:$0xf0]  ;;  %s11270_s7 = smov [#allocation23]   ;;  %s6886_s3 = sshll.u32 %s11769_s13, 4  ;;  %s6887_s3 = int_to_ptr.hbm [resolvable:$true] %s6886_s3 }
 0x3dd   :  { %6222 = vmatpush.bf16.msra.mxu0 %v9605_v34  ;;  %v10514_v34 = vld [vmem:[#allocation3 + $0x3f4] sm:$0xf]  ;;  %v8321_v39 = vor.u32 %v10402_v22, %v8318_v25  ;;  %v9329_v22 = vor.u32 %v10654_v11, %v9326_v13  ;;  %v9662_v11 = vld [vmem:[#allocation3 + $0xb0c] sm:$0xf0]  ;;  %s6884_s11 = sshll.u32 %s11270_s7, 4  ;;  %s6885_s11 = int_to_ptr.vmem [resolvable:$true] %s6884_s11 }
 0x3de   :  { %6197 = vmatmul.bf16.vlgmr.msrb.gmra.mxu2 %v11620_v46  ;;  %v8769_v40 = vor.u32 %v10514_v34, %v8766_v24  ;;  %v10822_v25 = vld [vmem:[#allocation3 + $0xd94] sm:$0xf]  ;;  %v10703_v24 = vld [vmem:[#allocation3 + $0x9dc] sm:$0xf] }
 0x3df   :  { %6241 = vmatpush.bf16.msra.mxu2 %v8461_v26  ;;  %6235 = vmatpush.bf16.msra.mxu1 %v9829_v16  ;;  %v8797_v26 = vor.u32 %v10521_v10, %v8794_v14  ;;  %v8990_v16 = vld [vmem:[#allocation3 + $0x5cc] sm:$0xf0]  ;;  %v10710_v14 = vld [vmem:[#allocation3 + $0xa14] sm:$0xf] }
 0x3e0   :  { %6254 = vmatpush.bf16.msra.mxu3 %v8685_v31  ;;  %6223 = vmatmul.bf16.vlgmr.msra.gmra.mxu0 %v11628_v32  ;;  %v9021_v31 = vor.u32 %v10577_v18, %v9018_v20  ;;  %v10766_v20 = vld [vmem:[#allocation3 + $0xbd4] sm:$0xf] }
 0x3e1   :  { %6267 = vmatpush.bf16.msrb.mxu0 %v8909_v35  ;;  %6210 = vmatmul.bf16.vlgmr.msrb.gmra.mxu3 %v11624_v49  ;;  %v10570_v35 = vld [vmem:[#allocation3 + $0x5b4] sm:$0xf] }
 0x3e2   :  { %6236 = vmatmul.bf16.vlgmr.msra.gmra.mxu1 %v11632_v27  ;;  %v8993_v47 = vor.u32 %v10570_v35, %v8990_v16  ;;  %v10759_v16 = vld [vmem:[#allocation3 + $0xb9c] sm:$0xf] }
 0x3e3   :  { %6280 = vmatpush.bf16.msrb.mxu1 %v9133_v38  ;;  %6242 = vmatpush.bf16.msra.mxu2 %v8433_v36  ;;  %v8290_v38 = vld [vmem:[#allocation3 + $0x54] sm:$0xf0] }
 0x3e4   :  { %6255 = vmatpush.bf16.msra.mxu3 %v8657_v30  ;;  %v8514_v36 = vld [vmem:[#allocation3 + $0x214] sm:$0xf0]  ;;  %v8293_v51 = vor.u32 %v10395_v44, %v8290_v38  ;;  %v10815_v38 = vld [vmem:[#allocation3 + $0xd5c] sm:$0xf] }
 0x3e5   :  { %6268 = vmatpush.bf16.msrb.mxu0 %v8881_v6  ;;  %v8738_v30 = vld [vmem:[#allocation3 + $0x3d4] sm:$0xf0]  ;;  %v8262_v6 = vld [vmem:[#allocation3 + $0x1c] sm:$0xf0] }
 0x3e6   :  { %v8741_v45 = vor.u32 %v10507_v48, %v8738_v30  ;;  %v10696_v30 = vld [vmem:[#allocation3 + $0x9a4] sm:$0xf] }
 0x3e7   :  { %6281 = vmatpush.bf16.msrb.mxu1 %v9105_v3  ;;  %6243 = vmatpush.bf16.msra.mxu2 %v8405_v56  ;;  %v8517_v3 = vor.u32 %v10451_v23, %v8514_v36  ;;  %v10661_v56 = vld [vmem:[#allocation3 + $0x88c] sm:$0xf]  ;;  %v10640_v36 = vld [vmem:[#allocation3 + $0x7e4] sm:$0xf] }
 0x3e8   :  { %6256 = vmatpush.bf16.msra.mxu3 %v8629_v59  ;;  %v10717_v59 = vld [vmem:[#allocation3 + $0xa4c] sm:$0xf]  ;;  %v9357_v5 = vor.u32 %v10661_v56, %v9354_v57 }
 0x3e9   :  { %6269 = vmatpush.bf16.msrb.mxu0 %v8853_v54  ;;  %v10500_v54 = vld [vmem:[#allocation3 + $0x384] sm:$0xf]  ;;  %v9581_v9 = vor.u32 %v10717_v59, %v9578_v60  ;;  %v10633_v56 = vld [vmem:[#allocation3 + $0x7ac] sm:$0xf]  ;;  %v9466_v60 = vld [vmem:[#allocation3 + $0x984] sm:$0xf0] }
 0x3ea   :  { %v10689_v59 = vld [vmem:[#allocation3 + $0x96c] sm:$0xf] }
 0x3eb   :  { %6282 = vmatpush.bf16.msrb.mxu1 %v9077_v1  ;;  %6244 = vmatpush.bf16.msra.mxu2 %v8377_v43  ;;  %v8265_v1 = vor.u32 %v10388_v50, %v8262_v6  ;;  %v8934_v43 = vld [vmem:[#allocation3 + $0x55c] sm:$0xf0]  ;;  %v10752_v6 = vld [vmem:[#allocation3 + $0xb64] sm:$0xf] }
 0x3ec   :  { %6257 = vmatpush.bf16.msra.mxu3 %v8601_v7  ;;  %v10829_v7 = vld [vmem:[#allocation3 + $0xdcc] sm:$0xf]  ;;  %v8937_v10 = vor.u32 %v10556_v19, %v8934_v43  ;;  %v9494_v50 = vld [vmem:[#allocation3 + $0x9bc] sm:$0xf0]  ;;  %v9721_v57 = vor.u32 %v10752_v6, %v9718_v12  ;;  %v9469_v19 = vor.u32 %v10689_v59, %v9466_v60  ;;  %v10626_v43 = vld [vmem:[#allocation3 + $0x774] sm:$0xf] }
 0x3ed   :  { %6270 = vmatpush.bf16.msrb.mxu0 %v8825_v33  ;;  %v8713_v33 = vor.u32 %v10500_v54, %v8710_v37  ;;  %v10029_v18 = vor.u32 %v10829_v7, %v10026_v8  ;;  %v9497_v42 = vor.u32 %v10696_v30, %v9494_v50  ;;  %v10745_v54 = vld [vmem:[#allocation3 + $0xb2c] sm:$0xf]  ;;  %v9690_v37 = vld [vmem:[#allocation3 + $0xb44] sm:$0xf0]  ;;  %v10682_v7 = vld [vmem:[#allocation3 + $0x934] sm:$0xf] }
 0x3ee   :  { %v9438_v8 = vld [vmem:[#allocation3 + $0x94c] sm:$0xf0]  ;;  %v9606_v30 = vld [vmem:[#allocation3 + $0xa9c] sm:$0xf0]  ;;  %v10553_v6 = vld [vmem:[#allocation3 + $0x528] sm:$0xf0] }
 0x3ef   :  { %6283 = vmatpush.bf16.msrb.mxu1 %v9049_v15  ;;  %6245 = vmatpush.bf16.msra.mxu2 %v8349_v17  ;;  %v9805_v15 = vor.u32 %v10773_v0, %v9802_v52  ;;  %v9550_v17 = vld [vmem:[#allocation3 + $0xa2c] sm:$0xf0]  ;;  %v9914_v52 = vld [vmem:[#allocation3 + $0xd04] sm:$0xf0]  ;;  %v10780_v12 = vld [vmem:[#allocation3 + $0xc44] sm:$0xf] }
 0x3f0   :  { %6258 = vmatpush.bf16.msra.mxu3 %v8573_v21  ;;  %v9774_v21 = vld [vmem:[#allocation3 + $0xbec] sm:$0xf0]  ;;  %v9553_v28 = vor.u32 %v10710_v14, %v9550_v17  ;;  %v9441_v14 = vor.u32 %v10682_v7, %v9438_v8  ;;  %v10619_v17 = vld [vmem:[#allocation3 + $0x73c] sm:$0xf]  ;;  %v8436_v59 = vld [vmem:[#allocation3 + $0x158] sm:$0xf] }
 0x3f1   :  { %6271 = vmatpush.bf16.msrb.mxu0 %v8797_v26  ;;  %v9998_v26 = vld [vmem:[#allocation3 + $0xdac] sm:$0xf0]  ;;  %v9777_v34 = vor.u32 %v10766_v20, %v9774_v21  ;;  %v10675_v21 = vld [vmem:[#allocation3 + $0x8fc] sm:$0xf]  ;;  %v10434_v60 = vld [vmem:[#allocation3 + $0x170] sm:$0xf0] }
 0x3f2   :  { %v10001_v35 = vor.u32 %v10822_v25, %v9998_v26  ;;  %v10731_v26 = vld [vmem:[#allocation3 + $0xabc] sm:$0xf]  ;;  %v8912_v50 = vld [vmem:[#allocation3 + $0x510] sm:$0xf]  ;;  %v8408_v8 = vld [vmem:[#allocation3 + $0x120] sm:$0xf] }
 0x3f3   :  { %6284 = vmatpush.bf16.msrb.mxu1 %v9021_v31  ;;  %6246 = vmatpush.bf16.msra.mxu2 %v8321_v39  ;;  %v9298_v31 = vld [vmem:[#allocation3 + $0x834] sm:$0xf0] }
 0x3f4   :  { %6259 = vmatpush.bf16.msra.mxu3 %v8545_v41  ;;  %v9522_v39 = vld [vmem:[#allocation3 + $0x9f4] sm:$0xf0]  ;;  %v9301_v44 = vor.u32 %v10647_v29, %v9298_v31  ;;  %v10612_v29 = vld [vmem:[#allocation3 + $0x704] sm:$0xf] }
 0x3f5   :  { %6272 = vmatpush.bf16.msrb.mxu0 %v8769_v40  ;;  %v9746_v41 = vld [vmem:[#allocation3 + $0xbb4] sm:$0xf0]  ;;  %v9525_v23 = vor.u32 %v10703_v24, %v9522_v39  ;;  %v10787_v24 = vld [vmem:[#allocation3 + $0xc7c] sm:$0xf] }
 0x3f6   :  { %v9970_v40 = vld [vmem:[#allocation3 + $0xd74] sm:$0xf0]  ;;  %v9749_v48 = vor.u32 %v10759_v16, %v9746_v41  ;;  %v10668_v16 = vld [vmem:[#allocation3 + $0x8c4] sm:$0xf]  ;;  %v9382_v41 = vld [vmem:[#allocation3 + $0x8dc] sm:$0xf0] }
 0x3f7   :  { %6285 = vmatpush.bf16.msrb.mxu1 %v8993_v47  ;;  %6247 = vmatpush.bf16.msra.mxu2 %v8293_v51  ;;  %v9270_v47 = vld [vmem:[#allocation3 + $0x7fc] sm:$0xf0]  ;;  %v9973_v51 = vor.u32 %v10815_v38, %v9970_v40  ;;  %v9858_v39 = vld [vmem:[#allocation3 + $0xc94] sm:$0xf0]  ;;  %v10441_v40 = vld [vmem:[#allocation3 + $0x1a8] sm:$0xf0] }
 0x3f8   :  { %6260 = vmatpush.bf16.msra.mxu3 %v8517_v3  ;;  %v9273_v61 = vor.u32 %v10640_v36, %v9270_v47  ;;  %v10808_v3 = vld [vmem:[#allocation3 + $0xd24] sm:$0xf]  ;;  %v10497_v36 = vld [vmem:[#allocation3 + $0x368] sm:$0xf0]  ;;  %v9861_v47 = vor.u32 %v10787_v24, %v9858_v39 }
 0x3f9   :  { %6273 = vmatpush.bf16.msrb.mxu0 %v8741_v45  ;;  %v9242_v45 = vld [vmem:[#allocation3 + $0x7c4] sm:$0xf0]  ;;  %v10532_v24 = vld [vmem:[#allocation3 + $0x480] sm:$0xf0] }
 0x3fa   :  { %v9245_v0 = vor.u32 %v10633_v56, %v9242_v45  ;;  %v10609_v56 = vld [vmem:[#allocation3 + $0x6e8] sm:$0xf0] }
 0x3fb   :  { %6286 = vmatpush.bf16.msrb.mxu1 %v8965_v62  ;;  %6248 = vmatpush.bf16.msra.mxu2 %v8265_v1  ;;  %v9945_v62 = vor.u32 %v10808_v3, %v9942_v53  ;;  %v10801_v1 = vld [vmem:[#allocation3 + $0xcec] sm:$0xf]  ;;  %v9385_v3 = vor.u32 %v10668_v16, %v9382_v41  ;;  %v10588_v16 = vld [vmem:[#allocation3 + $0x640] sm:$0xf0] }
 0x3fc   :  { %6261 = vmatpush.bf16.msra.mxu3 %v8489_v55  ;;  %v9214_v55 = vld [vmem:[#allocation3 + $0x78c] sm:$0xf0] }
 0x3fd   :  { %6274 = vmatpush.bf16.msrb.mxu0 %v8713_v33  ;;  %v10738_v33 = vld [vmem:[#allocation3 + $0xaf4] sm:$0xf]  ;;  %v9217_v13 = vor.u32 %v10626_v43, %v9214_v55  ;;  %v8437_v43 = vor.u32 %v10434_v60, %v8436_v59  ;;  %v9108_v55 = vld [vmem:[#allocation3 + $0x698] sm:$0xf] }
 0x3fe   :  { %6249 = vmatmul.bf16.vlgmr.msra.gmra.mxu2 %v11600_v58  ;;  %v9665_v20 = vor.u32 %v10738_v33, %v9662_v11  ;;  %v8632_v11 = vld [vmem:[#allocation3 + $0x2e0] sm:$0xf]  ;;  %v10518_v59 = vld [vmem:[#allocation3 + $0x410] sm:$0xf0] }
 0x3ff   :  { %6293 = vmatpush.bf16.msrb.mxu2 %v9357_v5  ;;  %6287 = vmatpush.bf16.msrb.mxu1 %v8937_v10  ;;  %v9693_v5 = vor.u32 %v10745_v54, %v9690_v37  ;;  %v9886_v10 = vld [vmem:[#allocation3 + $0xccc] sm:$0xf0]  ;;  %v8660_v37 = vld [vmem:[#allocation3 + $0x318] sm:$0xf] }
 0x400   :  { %6306 = vmatpush.bf16.msrb.mxu3 %v9581_v9  ;;  %6275 = vmatmul.bf16.vlgmr.msrb.gmra.mxu0 %v11608_v2  ;;  %v9917_v9 = vor.u32 %v10801_v1, %v9914_v52  ;;  %v8884_v52 = vld [vmem:[#allocation3 + $0x4d8] sm:$0xf] }
 0x401   :  { %6319 = vmatpush.bf16.msra.mxu0 %v9805_v15  ;;  %6262 = vmatmul.bf16.vlgmr.msra.gmra.mxu3 %v11604_v63  ;;  %v10794_v15 = vld [vmem:[#allocation3 + $0xcb4] sm:$0xf] }
 0x402   :  { %6288 = vmatmul.bf16.vlgmr.msrb.gmra.mxu1 %v11612_v4  ;;  %v9889_v25 = vor.u32 %v10794_v15, %v9886_v10  ;;  %v8856_v10 = vld [vmem:[#allocation3 + $0x4a0] sm:$0xf] }
 0x403   :  { %6332 = vmatpush.bf16.msra.mxu1 %v10029_v18  ;;  %6294 = vmatpush.bf16.msrb.mxu2 %v9329_v22  ;;  %v9186_v18 = vld [vmem:[#allocation3 + $0x754] sm:$0xf0] }
 0x404   :  { %6307 = vmatpush.bf16.msrb.mxu3 %v9553_v28  ;;  %v9410_v22 = vld [vmem:[#allocation3 + $0x914] sm:$0xf0]  ;;  %v9189_v31 = vor.u32 %v10619_v17, %v9186_v18  ;;  %v9080_v18 = vld [vmem:[#allocation3 + $0x660] sm:$0xf] }
 0x405   :  { %6320 = vmatpush.bf16.msra.mxu0 %v9777_v34  ;;  %v9634_v28 = vld [vmem:[#allocation3 + $0xad4] sm:$0xf0]  ;;  %v9158_v34 = vld [vmem:[#allocation3 + $0x71c] sm:$0xf0] }
 0x406   :  { %v9637_v38 = vor.u32 %v10731_v26, %v9634_v28  ;;  %v8604_v28 = vld [vmem:[#allocation3 + $0x2a8] sm:$0xf] }
 0x407   :  { %6333 = vmatpush.bf16.msra.mxu1 %v10001_v35  ;;  %6295 = vmatpush.bf16.msrb.mxu2 %v9301_v44  ;;  %v9413_v35 = vor.u32 %v10675_v21, %v9410_v22  ;;  %v8464_v44 = vld [vmem:[#allocation3 + $0x190] sm:$0xf]  ;;  %v8380_v22 = vld [vmem:[#allocation3 + $0xe8] sm:$0xf] }
 0x408   :  { %6308 = vmatpush.bf16.msrb.mxu3 %v9525_v23  ;;  %v8688_v23 = vld [vmem:[#allocation3 + $0x350] sm:$0xf]  ;;  %v8465_v53 = vor.u32 %v10441_v40, %v8464_v44 }
 0x409   :  { %6321 = vmatpush.bf16.msra.mxu0 %v9749_v48  ;;  %v10724_v48 = vld [vmem:[#allocation3 + $0xa84] sm:$0xf]  ;;  %v8689_v45 = vor.u32 %v10497_v36, %v8688_v23  ;;  %v8352_v44 = vld [vmem:[#allocation3 + $0xb0] sm:$0xf]  ;;  %v10469_v36 = vld [vmem:[#allocation3 + $0x288] sm:$0xf0] }
 0x40a   :  { %v8576_v23 = vld [vmem:[#allocation3 + $0x270] sm:$0xf] }
 0x40b   :  { %6334 = vmatpush.bf16.msra.mxu1 %v9973_v51  ;;  %6296 = vmatpush.bf16.msrb.mxu2 %v9273_v61  ;;  %v9161_v51 = vor.u32 %v10612_v29, %v9158_v34  ;;  %v9830_v61 = vld [vmem:[#allocation3 + $0xc5c] sm:$0xf0]  ;;  %v10476_v29 = vld [vmem:[#allocation3 + $0x2c0] sm:$0xf0]  ;;  %v8828_v34 = vld [vmem:[#allocation3 + $0x468] sm:$0xf] }
 0x40c   :  { %6309 = vmatpush.bf16.msrb.mxu3 %v9497_v42  ;;  %v9136_v42 = vld [vmem:[#allocation3 + $0x6d0] sm:$0xf]  ;;  %v9833_v54 = vor.u32 %v10780_v12, %v9830_v61  ;;  %v8605_v41 = vor.u32 %v10476_v29, %v8604_v28  ;;  %v8829_v40 = vor.u32 %v10532_v24, %v8828_v34  ;;  %v8577_v12 = vor.u32 %v10469_v36, %v8576_v23  ;;  %v8324_v61 = vld [vmem:[#allocation3 + $0x78] sm:$0xf]  ;;  %v10504_v28 = vld [vmem:[#allocation3 + $0x3a0] sm:$0xf0] }
 0x40d   :  { %6322 = vmatpush.bf16.msra.mxu0 %v9721_v57  ;;  %v9609_v57 = vor.u32 %v10724_v48, %v9606_v30  ;;  %v9137_v1 = vor.u32 %v10609_v56, %v9136_v42  ;;  %v8800_v48 = vld [vmem:[#allocation3 + $0x430] sm:$0xf]  ;;  %v10525_v30 = vld [vmem:[#allocation3 + $0x448] sm:$0xf0]  ;;  %v8548_v42 = vld [vmem:[#allocation3 + $0x238] sm:$0xf] }
 0x40e   :  { %v10462_v56 = vld [vmem:[#allocation3 + $0x250] sm:$0xf0]  ;;  %v9808_v29 = vld [vmem:[#allocation3 + $0xc10] sm:$0xf]  ;;  %v10777_v34 = vld [vmem:[#allocation3 + $0xc28] sm:$0xf0] }
 0x40f   :  { %6335 = vmatpush.bf16.msra.mxu1 %v9945_v62  ;;  %6297 = vmatpush.bf16.msrb.mxu2 %v9245_v0  ;;  %v8913_v62 = vor.u32 %v10553_v6, %v8912_v50  ;;  %v10490_v0 = vld [vmem:[#allocation3 + $0x330] sm:$0xf0]  ;;  %v10581_v6 = vld [vmem:[#allocation3 + $0x608] sm:$0xf0]  ;;  %v8940_v24 = vld [vmem:[#allocation3 + $0x548] sm:$0xf] }
 0x410   :  { %6310 = vmatpush.bf16.msrb.mxu3 %v9469_v19  ;;  %v10546_v19 = vld [vmem:[#allocation3 + $0x4f0] sm:$0xf0]  ;;  %v8661_v7 = vor.u32 %v10490_v0, %v8660_v37  ;;  %v8549_v37 = vor.u32 %v10462_v56, %v8548_v42  ;;  %v8296_v0 = vld [vmem:[#allocation3 + $0x40] sm:$0xf]  ;;  %v9332_v23 = vld [vmem:[#allocation3 + $0x858] sm:$0xf] }
 0x411   :  { %6323 = vmatpush.bf16.msra.mxu0 %v9693_v5  ;;  %v10602_v5 = vld [vmem:[#allocation3 + $0x6b0] sm:$0xf0]  ;;  %v8885_v33 = vor.u32 %v10546_v19, %v8884_v52  ;;  %v8520_v19 = vld [vmem:[#allocation3 + $0x200] sm:$0xf] }
 0x412   :  { %v9109_v15 = vor.u32 %v10602_v5, %v9108_v55  ;;  %v8744_v5 = vld [vmem:[#allocation3 + $0x3c0] sm:$0xf]  ;;  %v10658_v36 = vld [vmem:[#allocation3 + $0x870] sm:$0xf0] }
 0x413   :  { %6336 = vmatpush.bf16.msra.mxu1 %v9917_v9  ;;  %6298 = vmatpush.bf16.msrb.mxu2 %v9217_v13  ;;  %v10427_v9 = vld [vmem:[#allocation3 + $0x138] sm:$0xf0]  ;;  %v9304_v56 = vld [vmem:[#allocation3 + $0x820] sm:$0xf] }
 0x414   :  { %6311 = vmatpush.bf16.msrb.mxu3 %v9441_v14  ;;  %v10483_v13 = vld [vmem:[#allocation3 + $0x2f8] sm:$0xf0]  ;;  %v8409_v17 = vor.u32 %v10427_v9, %v8408_v8  ;;  %v8268_v8 = vld [vmem:[#allocation3 + $0x8] sm:$0xf] }
 0x415   :  { %6324 = vmatpush.bf16.msra.mxu0 %v9665_v20  ;;  %v10539_v14 = vld [vmem:[#allocation3 + $0x4b8] sm:$0xf0]  ;;  %v8633_v21 = vor.u32 %v10483_v13, %v8632_v11  ;;  %v8968_v11 = vld [vmem:[#allocation3 + $0x580] sm:$0xf] }
 0x416   :  { %v10595_v20 = vld [vmem:[#allocation3 + $0x678] sm:$0xf0]  ;;  %v8857_v26 = vor.u32 %v10539_v14, %v8856_v10  ;;  %v8492_v10 = vld [vmem:[#allocation3 + $0x1c8] sm:$0xf]  ;;  %v10448_v14 = vld [vmem:[#allocation3 + $0x1e0] sm:$0xf0] }
 0x417   :  { %6337 = vmatpush.bf16.msra.mxu1 %v9889_v25  ;;  %6299 = vmatpush.bf16.msrb.mxu2 %v9189_v31  ;;  %v10420_v25 = vld [vmem:[#allocation3 + $0x100] sm:$0xf0]  ;;  %v9081_v31 = vor.u32 %v10595_v20, %v9080_v18  ;;  %v10567_v13 = vld [vmem:[#allocation3 + $0x598] sm:$0xf0]  ;;  %v10665_v20 = vld [vmem:[#allocation3 + $0x8a8] sm:$0xf0] }
 0x418   :  { %6312 = vmatpush.bf16.msrb.mxu3 %v9413_v35  ;;  %v8381_v39 = vor.u32 %v10420_v25, %v8380_v22  ;;  %v9052_v35 = vld [vmem:[#allocation3 + $0x628] sm:$0xf]  ;;  %v10721_v22 = vld [vmem:[#allocation3 + $0xa68] sm:$0xf0]  ;;  %v8969_v25 = vor.u32 %v10567_v13, %v8968_v11  ;;  %v10756_v11 = vld [vmem:[#allocation3 + $0xb80] sm:$0xf0] }
 0x419   :  { %6325 = vmatpush.bf16.msra.mxu0 %v9637_v38  ;;  %v10413_v38 = vld [vmem:[#allocation3 + $0xc8] sm:$0xf0] }
 0x41a   :  { %v8353_v50 = vor.u32 %v10413_v38, %v8352_v44  ;;  %v10833_v44 = vld [vmem:[#allocation3 + $0xde8] sm:$0xf0] }
 0x41b   :  { %6338 = vmatpush.bf16.msra.mxu1 %v9861_v47  ;;  %6300 = vmatpush.bf16.msrb.mxu2 %v9161_v51  ;;  %v9053_v47 = vor.u32 %v10588_v16, %v9052_v35  ;;  %v9024_v51 = vld [vmem:[#allocation3 + $0x5f0] sm:$0xf]  ;;  %v8493_v35 = vor.u32 %v10448_v14, %v8492_v10  ;;  %v10812_v10 = vld [vmem:[#allocation3 + $0xd40] sm:$0xf0] }
 0x41c   :  { %6313 = vmatpush.bf16.msrb.mxu3 %v9385_v3  ;;  %v10406_v3 = vld [vmem:[#allocation3 + $0x90] sm:$0xf0] }
 0x41d   :  { %6326 = vmatpush.bf16.msra.mxu0 %v9609_v57  ;;  %v8772_v57 = vld [vmem:[#allocation3 + $0x3f8] sm:$0xf]  ;;  %v8325_v60 = vor.u32 %v10406_v3, %v8324_v61  ;;  %v9333_v61 = vor.u32 %v10658_v36, %v9332_v23  ;;  %v10742_v36 = vld [vmem:[#allocation3 + $0xb10] sm:$0xf0] }
 0x41e   :  { %6301 = vmatmul.bf16.vlgmr.msrb.gmra.mxu2 %v11620_v46  ;;  %v8773_v52 = vor.u32 %v10518_v59, %v8772_v57  ;;  %v10004_v3 = vld [vmem:[#allocation3 + $0xd98] sm:$0xf]  ;;  %v9528_v59 = vld [vmem:[#allocation3 + $0x9e0] sm:$0xf] }
 0x41f   :  { %6345 = vmatpush.bf16.msra.mxu2 %v8465_v53  ;;  %6339 = vmatpush.bf16.msra.mxu1 %v9833_v54  ;;  %v8801_v53 = vor.u32 %v10525_v30, %v8800_v48  ;;  %v10574_v54 = vld [vmem:[#allocation3 + $0x5d0] sm:$0xf0]  ;;  %v9556_v30 = vld [vmem:[#allocation3 + $0xa18] sm:$0xf] }
 0x420   :  { %6358 = vmatpush.bf16.msra.mxu3 %v8689_v45  ;;  %6327 = vmatmul.bf16.vlgmr.msra.gmra.mxu0 %v11628_v32  ;;  %v9025_v45 = vor.u32 %v10581_v6, %v9024_v51  ;;  %v9780_v6 = vld [vmem:[#allocation3 + $0xbd8] sm:$0xf] }
 0x421   :  { %6371 = vmatpush.bf16.msrb.mxu0 %v8913_v62  ;;  %6314 = vmatmul.bf16.vlgmr.msrb.gmra.mxu3 %v11624_v49  ;;  %v8996_v62 = vld [vmem:[#allocation3 + $0x5b8] sm:$0xf] }
 0x422   :  { %6340 = vmatmul.bf16.vlgmr.msra.gmra.mxu1 %v11632_v27  ;;  %v8997_v55 = vor.u32 %v10574_v54, %v8996_v62  ;;  %v9752_v54 = vld [vmem:[#allocation3 + $0xba0] sm:$0xf]  ;;  %v9668_v23 = vld [vmem:[#allocation3 + $0xaf8] sm:$0xf] }
 0x423   :  { %6384 = vmatpush.bf16.msrb.mxu1 %v9137_v1  ;;  %6346 = vmatpush.bf16.msra.mxu2 %v8437_v43  ;;  %v10399_v1 = vld [vmem:[#allocation3 + $0x58] sm:$0xf0] }
 0x424   :  { %6359 = vmatpush.bf16.msra.mxu3 %v8661_v7  ;;  %v10455_v43 = vld [vmem:[#allocation3 + $0x218] sm:$0xf0]  ;;  %v8297_v9 = vor.u32 %v10399_v1, %v8296_v0  ;;  %v9976_v1 = vld [vmem:[#allocation3 + $0xd60] sm:$0xf] }
 0x425   :  { %6372 = vmatpush.bf16.msrb.mxu0 %v8885_v33  ;;  %v10511_v7 = vld [vmem:[#allocation3 + $0x3d8] sm:$0xf0]  ;;  %v10392_v33 = vld [vmem:[#allocation3 + $0x20] sm:$0xf0] }
 0x426   :  { %v8745_v18 = vor.u32 %v10511_v7, %v8744_v5  ;;  %v9500_v7 = vld [vmem:[#allocation3 + $0x9a8] sm:$0xf] }
 0x427   :  { %6385 = vmatpush.bf16.msrb.mxu1 %v9109_v15  ;;  %6347 = vmatpush.bf16.msra.mxu2 %v8409_v17  ;;  %v8521_v15 = vor.u32 %v10455_v43, %v8520_v19  ;;  %v9360_v17 = vld [vmem:[#allocation3 + $0x890] sm:$0xf]  ;;  %v9276_v43 = vld [vmem:[#allocation3 + $0x7e8] sm:$0xf] }
 0x428   :  { %6360 = vmatpush.bf16.msra.mxu3 %v8633_v21  ;;  %v9584_v21 = vld [vmem:[#allocation3 + $0xa50] sm:$0xf]  ;;  %v9361_v16 = vor.u32 %v10665_v20, %v9360_v17 }
 0x429   :  { %6373 = vmatpush.bf16.msrb.mxu0 %v8857_v26  ;;  %v8716_v26 = vld [vmem:[#allocation3 + $0x388] sm:$0xf]  ;;  %v9585_v38 = vor.u32 %v10721_v22, %v9584_v21  ;;  %v9248_v17 = vld [vmem:[#allocation3 + $0x7b0] sm:$0xf]  ;;  %v10693_v22 = vld [vmem:[#allocation3 + $0x988] sm:$0xf0] }
 0x42a   :  { %v9472_v21 = vld [vmem:[#allocation3 + $0x970] sm:$0xf] }
 0x42b   :  { %6386 = vmatpush.bf16.msrb.mxu1 %v9081_v31  ;;  %6348 = vmatpush.bf16.msra.mxu2 %v8381_v39  ;;  %v8269_v31 = vor.u32 %v10392_v33, %v8268_v8  ;;  %v10560_v39 = vld [vmem:[#allocation3 + $0x560] sm:$0xf0]  ;;  %v9724_v33 = vld [vmem:[#allocation3 + $0xb68] sm:$0xf] }
 0x42c   :  { %6361 = vmatpush.bf16.msra.mxu3 %v8605_v41  ;;  %v10032_v41 = vld [vmem:[#allocation3 + $0xdd0] sm:$0xf]  ;;  %v8941_v48 = vor.u32 %v10560_v39, %v8940_v24  ;;  %v10700_v8 = vld [vmem:[#allocation3 + $0x9c0] sm:$0xf0]  ;;  %v9725_v20 = vor.u32 %v10756_v11, %v9724_v33  ;;  %v9473_v24 = vor.u32 %v10693_v22, %v9472_v21  ;;  %v9220_v39 = vld [vmem:[#allocation3 + $0x778] sm:$0xf] }
 0x42d   :  { %6374 = vmatpush.bf16.msrb.mxu0 %v8829_v40  ;;  %v8717_v40 = vor.u32 %v10504_v28, %v8716_v26  ;;  %v10033_v51 = vor.u32 %v10833_v44, %v10032_v41  ;;  %v9501_v14 = vor.u32 %v10700_v8, %v9500_v7  ;;  %v9696_v26 = vld [vmem:[#allocation3 + $0xb30] sm:$0xf]  ;;  %v10749_v28 = vld [vmem:[#allocation3 + $0xb48] sm:$0xf0]  ;;  %v9444_v41 = vld [vmem:[#allocation3 + $0x938] sm:$0xf] }
 0x42e   :  { %v10686_v44 = vld [vmem:[#allocation3 + $0x950] sm:$0xf0]  ;;  %v8690_v8 = vld [vmem:[#allocation3 + $0x36c] sm:$0xf0]  ;;  %v9612_v11 = vld [vmem:[#allocation3 + $0xa88] sm:$0xf] }
 0x42f   :  { %6387 = vmatpush.bf16.msrb.mxu1 %v9053_v47  ;;  %6349 = vmatpush.bf16.msra.mxu2 %v8353_v50  ;;  %v9809_v47 = vor.u32 %v10777_v34, %v9808_v29  ;;  %v10714_v50 = vld [vmem:[#allocation3 + $0xa30] sm:$0xf0]  ;;  %v10805_v34 = vld [vmem:[#allocation3 + $0xd08] sm:$0xf0] }
 0x430   :  { %6362 = vmatpush.bf16.msra.mxu3 %v8577_v12  ;;  %v10770_v12 = vld [vmem:[#allocation3 + $0xbf0] sm:$0xf0]  ;;  %v9557_v42 = vor.u32 %v10714_v50, %v9556_v30  ;;  %v9892_v30 = vld [vmem:[#allocation3 + $0xcb8] sm:$0xf] }
 0x431   :  { %6375 = vmatpush.bf16.msrb.mxu0 %v8801_v53  ;;  %v10826_v53 = vld [vmem:[#allocation3 + $0xdb0] sm:$0xf0]  ;;  %v9781_v57 = vor.u32 %v10770_v12, %v9780_v6  ;;  %v9192_v6 = vld [vmem:[#allocation3 + $0x740] sm:$0xf]  ;;  %v10623_v12 = vld [vmem:[#allocation3 + $0x758] sm:$0xf0] }
 0x432   :  { %v10005_v62 = vor.u32 %v10826_v53, %v10004_v3  ;;  %v10798_v50 = vld [vmem:[#allocation3 + $0xcd0] sm:$0xf0]  ;;  %v9416_v3 = vld [vmem:[#allocation3 + $0x900] sm:$0xf]  ;;  %v10679_v53 = vld [vmem:[#allocation3 + $0x918] sm:$0xf0] }
 0x433   :  { %6388 = vmatpush.bf16.msrb.mxu1 %v9025_v45  ;;  %6350 = vmatpush.bf16.msra.mxu2 %v8325_v60  ;;  %v10651_v45 = vld [vmem:[#allocation3 + $0x838] sm:$0xf0]  ;;  %v10494_v7 = vld [vmem:[#allocation3 + $0x354] sm:$0xf] }
 0x434   :  { %6363 = vmatpush.bf16.msra.mxu3 %v8549_v37  ;;  %v10707_v60 = vld [vmem:[#allocation3 + $0x9f8] sm:$0xf0]  ;;  %v9305_v0 = vor.u32 %v10651_v45, %v9304_v56  ;;  %v9893_v56 = vor.u32 %v10798_v50, %v9892_v30  ;;  %v9640_v45 = vld [vmem:[#allocation3 + $0xac0] sm:$0xf] }
 0x435   :  { %6376 = vmatpush.bf16.msrb.mxu0 %v8773_v52  ;;  %v10763_v37 = vld [vmem:[#allocation3 + $0xbb8] sm:$0xf0]  ;;  %v9529_v19 = vor.u32 %v10707_v60, %v9528_v59  ;;  %v9164_v59 = vld [vmem:[#allocation3 + $0x708] sm:$0xf] }
 0x436   :  { %v10819_v52 = vld [vmem:[#allocation3 + $0xd78] sm:$0xf0]  ;;  %v9753_v5 = vor.u32 %v10763_v37, %v9752_v54  ;;  %v10616_v54 = vld [vmem:[#allocation3 + $0x720] sm:$0xf0]  ;;  %v9864_v37 = vld [vmem:[#allocation3 + $0xc80] sm:$0xf] }
 0x437   :  { %6389 = vmatpush.bf16.msrb.mxu1 %v8997_v55  ;;  %6351 = vmatpush.bf16.msra.mxu2 %v8297_v9  ;;  %v10644_v55 = vld [vmem:[#allocation3 + $0x800] sm:$0xf0]  ;;  %v9977_v9 = vor.u32 %v10819_v52, %v9976_v1  ;;  %v9417_v1 = vor.u32 %v10679_v53, %v9416_v3  ;;  %v9388_v52 = vld [vmem:[#allocation3 + $0x8c8] sm:$0xf]  ;;  %v8410_v3 = vld [vmem:[#allocation3 + $0x13c] sm:$0xf0] }
 0x438   :  { %6364 = vmatpush.bf16.msra.mxu3 %v8521_v15  ;;  %v9277_v13 = vor.u32 %v10644_v55, %v9276_v43  ;;  %v9948_v15 = vld [vmem:[#allocation3 + $0xd28] sm:$0xf]  ;;  %v10438_v43 = vld [vmem:[#allocation3 + $0x194] sm:$0xf] }
 0x439   :  { %6377 = vmatpush.bf16.msrb.mxu0 %v8745_v18  ;;  %v10637_v18 = vld [vmem:[#allocation3 + $0x7c8] sm:$0xf0] }
 0x43a   :  { %v9249_v29 = vor.u32 %v10637_v18, %v9248_v17  ;;  %v8914_v17 = vld [vmem:[#allocation3 + $0x52c] sm:$0xf0]  ;;  %v9836_v18 = vld [vmem:[#allocation3 + $0xc48] sm:$0xf] }
 0x43b   :  { %6390 = vmatpush.bf16.msrb.mxu1 %v8969_v25  ;;  %6352 = vmatpush.bf16.msra.mxu2 %v8269_v31  ;;  %v9949_v25 = vor.u32 %v10812_v10, %v9948_v15  ;;  %v9920_v31 = vld [vmem:[#allocation3 + $0xcf0] sm:$0xf]  ;;  %v10550_v15 = vld [vmem:[#allocation3 + $0x514] sm:$0xf] }
 0x43c   :  { %6365 = vmatpush.bf16.msra.mxu3 %v8493_v35  ;;  %v10630_v35 = vld [vmem:[#allocation3 + $0x790] sm:$0xf0] }
 0x43d   :  { %6378 = vmatpush.bf16.msrb.mxu0 %v8717_v40  ;;  %v9921_v40 = vor.u32 %v10805_v34, %v9920_v31  ;;  %v10431_v34 = vld [vmem:[#allocation3 + $0x15c] sm:$0xf] }
 0x43e   :  { %6353 = vmatmul.bf16.vlgmr.msra.gmra.mxu2 %v11600_v58 }
 0x43f   :  { %6397 = vmatpush.bf16.msrb.mxu2 %v9361_v16  ;;  %6391 = vmatpush.bf16.msrb.mxu1 %v8941_v48  ;;  %v9697_v16 = vor.u32 %v10749_v28, %v9696_v26  ;;  %v9221_v48 = vor.u32 %v10630_v35, %v9220_v39  ;;  %v9138_v26 = vld [vmem:[#allocation3 + $0x6ec] sm:$0xf0]  ;;  %v8917_v35 = vor.u32 %v10550_v15, %v8914_v17  ;;  %v9054_v15 = vld [vmem:[#allocation3 + $0x644] sm:$0xf0] }
 0x440   :  { %6410 = vmatpush.bf16.msrb.mxu3 %v9585_v38  ;;  %6379 = vmatmul.bf16.vlgmr.msrb.gmra.mxu0 %v11608_v2  ;;  %v11650_v38 = vpop.f32.mrf.mxu0  ;;  %v11658_v28 = vld [vmem:[#allocation22] sm:$0xff] }
 0x441   :  { %6423 = vmatpush.bf16.msra.mxu0 %v9809_v47  ;;  %6366 = vmatmul.bf16.vlgmr.msra.gmra.mxu3 %v11604_v63  ;;  %v11652_v47 = vpop.f32.mrf.mxu1  ;;  %v3819_v30 = vperm.slane %v11658_v28, 0  ;;  %v8354_v17 = vld [vmem:[#allocation3 + $0xcc] sm:$0xf0] }
 0x442   :  { %6392 = vmatmul.bf16.vlgmr.msrb.gmra.mxu1 %v11612_v4 }
 0x443   :  { %6436 = vmatpush.bf16.msra.mxu1 %v10033_v51  ;;  %6398 = vmatpush.bf16.msrb.mxu2 %v9333_v61  ;;  %v9445_v51 = vor.u32 %v10686_v44, %v9444_v41  ;;  %v9669_v61 = vor.u32 %v10742_v36, %v9668_v23  ;;  %v10487_v41 = vld [vmem:[#allocation3 + $0x31c] sm:$0xf]  ;;  %v8662_v44 = vld [vmem:[#allocation3 + $0x334] sm:$0xf0] }
 0x444   :  { %6411 = vmatpush.bf16.msrb.mxu3 %v9557_v42  ;;  %v11654_v42 = vpop.f32.mrf.mxu2  ;;  %v11656_v60 = vpop.f32.mrf.mxu3  ;;  %v10543_v36 = vld [vmem:[#allocation3 + $0x4dc] sm:$0xf] }
 0x445   :  { %6424 = vmatpush.bf16.msra.mxu0 %v9781_v57  ;;  %v10735_v57 = vld [vmem:[#allocation3 + $0xad8] sm:$0xf0] }
 0x446   :  { %v9641_v55 = vor.u32 %v10735_v57, %v9640_v45  ;;  %v8634_v45 = vld [vmem:[#allocation3 + $0x2fc] sm:$0xf0]  ;;  %v6147_v57 = vadd.f32 %v11654_v42, %v3819_v30  ;;  %v10473_v42 = vld [vmem:[#allocation3 + $0x2ac] sm:$0xf] }
 0x447   :  { %6437 = vmatpush.bf16.msra.mxu1 %v10005_v62  ;;  %6399 = vmatpush.bf16.msrb.mxu2 %v9305_v0  ;;  %v9193_v62 = vor.u32 %v10623_v12, %v9192_v6  ;;  %v10791_v0 = vld [vmem:[#allocation3 + $0xc98] sm:$0xf0]  ;;  %v9110_v6 = vld [vmem:[#allocation3 + $0x6b4] sm:$0xf0]  ;;  %v8665_v12 = vor.u32 %v10487_v41, %v8662_v44 }
 0x448   :  { %6412 = vmatpush.bf16.msrb.mxu3 %v9529_v19  ;;  %v10672_v19 = vld [vmem:[#allocation3 + $0x8e0] sm:$0xf0]  ;;  %v9865_v33 = vor.u32 %v10791_v0, %v9864_v37  ;;  %v10459_v41 = vld [vmem:[#allocation3 + $0x23c] sm:$0xf]  ;;  %v8550_v44 = vld [vmem:[#allocation3 + $0x254] sm:$0xf0] }
 0x449   :  { %6425 = vmatpush.bf16.msra.mxu0 %v9753_v5  ;;  %v8466_v5 = vld [vmem:[#allocation3 + $0x1ac] sm:$0xf0]  ;;  %v6187_v10 = vpop.f32.mrf.mxu1  ;;  %v9389_v21 = vor.u32 %v10672_v19, %v9388_v52  ;;  %v10592_v0 = vld [vmem:[#allocation3 + $0x664] sm:$0xf]  ;;  %v10417_v19 = vld [vmem:[#allocation3 + $0xec] sm:$0xf] }
 0x44a   :  { %v8469_v22 = vor.u32 %v10438_v43, %v8466_v5  ;;  %v8382_v43 = vld [vmem:[#allocation3 + $0x104] sm:$0xf0] }
 0x44b   :  { %6438 = vmatpush.bf16.msra.mxu1 %v9977_v9  ;;  %6400 = vmatpush.bf16.msrb.mxu2 %v9277_v13  ;;  %v6174_v9 = vpop.f32.mrf.mxu0  ;;  %v10728_v13 = vld [vmem:[#allocation3 + $0xaa0] sm:$0xf0]  ;;  %v8606_v5 = vld [vmem:[#allocation3 + $0x2c4] sm:$0xf0] }
 0x44c   :  { %6413 = vmatpush.bf16.msrb.mxu3 %v9501_v14  ;;  %v9165_v14 = vor.u32 %v10616_v54, %v9164_v59  ;;  %v9613_v31 = vor.u32 %v10728_v13, %v9612_v11  ;;  %v6148_v39 = vpop.f32.mrf.mxu2  ;;  %v8858_v54 = vld [vmem:[#allocation3 + $0x4bc] sm:$0xf0]  ;;  %v10529_v9 = vld [vmem:[#allocation3 + $0x46c] sm:$0xf]  ;;  %v8385_v11 = vor.u32 %v10417_v19, %v8382_v43  ;;  %v8609_v10 = vor.u32 %v10473_v42, %v8606_v5  ;;  %v10564_v19 = vld [vmem:[#allocation3 + $0x584] sm:$0xf] }
 0x44d   :  { %6426 = vmatpush.bf16.msra.mxu0 %v9725_v20  ;;  %v10784_v20 = vld [vmem:[#allocation3 + $0xc60] sm:$0xf0]  ;;  %v10585_v13 = vld [vmem:[#allocation3 + $0x62c] sm:$0xf]  ;;  %v10403_v39 = vld [vmem:[#allocation3 + $0x7c] sm:$0xf] }
 0x44e   :  { %v8970_v43 = vld [vmem:[#allocation3 + $0x59c] sm:$0xf0]  ;;  %v10445_v5 = vld [vmem:[#allocation3 + $0x1cc] sm:$0xf] }
 0x44f   :  { %6439 = vmatpush.bf16.msra.mxu1 %v9949_v25  ;;  %6401 = vmatpush.bf16.msrb.mxu2 %v9249_v29  ;;  %v10606_v25 = vld [vmem:[#allocation3 + $0x6d4] sm:$0xf]  ;;  %v8693_v29 = vor.u32 %v10494_v7, %v8690_v8  ;;  %v6160_v7 = vadd.f32 %v11656_v60, %v6147_v57  ;;  %v8522_v57 = vld [vmem:[#allocation3 + $0x21c] sm:$0xf0] }
 0x450   :  { %6414 = vmatpush.bf16.msrb.mxu3 %v9473_v24  ;;  %v8438_v24 = vld [vmem:[#allocation3 + $0x174] sm:$0xf0]  ;;  %v9141_v23 = vor.u32 %v10606_v25, %v9138_v26  ;;  %v9057_v25 = vor.u32 %v10585_v13, %v9054_v15  ;;  %v10522_v60 = vld [vmem:[#allocation3 + $0x434] sm:$0xf]  ;;  %v8802_v26 = vld [vmem:[#allocation3 + $0x44c] sm:$0xf0] }
 0x451   :  { %6427 = vmatpush.bf16.msra.mxu0 %v9697_v16  ;;  %v9837_v16 = vor.u32 %v10784_v20, %v9836_v18  ;;  %v8441_v50 = vor.u32 %v10431_v34, %v8438_v24  ;;  %v10466_v20 = vld [vmem:[#allocation3 + $0x274] sm:$0xf]  ;;  %v9026_v34 = vld [vmem:[#allocation3 + $0x60c] sm:$0xf0] }
 0x452   :  { %v9586_v13 = vld [vmem:[#allocation3 + $0xa6c] sm:$0xf0] }
 0x453   :  { %6440 = vmatpush.bf16.msra.mxu1 %v9921_v40  ;;  %6402 = vmatpush.bf16.msrb.mxu2 %v9221_v48  ;;  %v6161_v40 = vpop.f32.mrf.mxu3  ;;  %v8886_v48 = vld [vmem:[#allocation3 + $0x4f4] sm:$0xf0] }
 0x454   :  { %6415 = vmatpush.bf16.msrb.mxu3 %v9445_v51  ;;  %v10599_v51 = vld [vmem:[#allocation3 + $0x69c] sm:$0xf]  ;;  %v8889_v53 = vor.u32 %v10543_v36, %v8886_v48  ;;  %v8774_v48 = vld [vmem:[#allocation3 + $0x414] sm:$0xf0] }
 0x455   :  { %6428 = vmatpush.bf16.msra.mxu0 %v9669_v61  ;;  %v10424_v61 = vld [vmem:[#allocation3 + $0x124] sm:$0xf]  ;;  %v9113_v59 = vor.u32 %v10599_v51, %v9110_v6  ;;  %v10515_v36 = vld [vmem:[#allocation3 + $0x3fc] sm:$0xf]  ;;  %v8998_v6 = vld [vmem:[#allocation3 + $0x5d4] sm:$0xf0] }
 0x456   :  { %v8413_v37 = vor.u32 %v10424_v61, %v8410_v3  ;;  %v10571_v51 = vld [vmem:[#allocation3 + $0x5bc] sm:$0xf]  ;;  %v10396_v61 = vld [vmem:[#allocation3 + $0x44] sm:$0xf]  ;;  %v8298_v3 = vld [vmem:[#allocation3 + $0x5c] sm:$0xf0] }
 0x457   :  { %6441 = vmatpush.bf16.msra.mxu1 %v9893_v56  ;;  %6403 = vmatpush.bf16.msrb.mxu2 %v9193_v62  ;;  %v10480_v56 = vld [vmem:[#allocation3 + $0x2e4] sm:$0xf] }
 0x458   :  { %6416 = vmatpush.bf16.msrb.mxu3 %v9417_v1  ;;  %v10536_v62 = vld [vmem:[#allocation3 + $0x4a4] sm:$0xf]  ;;  %v9082_v1 = vld [vmem:[#allocation3 + $0x67c] sm:$0xf0]  ;;  %v8637_v52 = vor.u32 %v10480_v56, %v8634_v45 }
 0x459   :  { %6429 = vmatpush.bf16.msra.mxu0 %v9641_v55  ;;  %v8861_v55 = vor.u32 %v10536_v62, %v8858_v54  ;;  %v9085_v8 = vor.u32 %v10592_v0, %v9082_v1  ;;  %v10452_v45 = vld [vmem:[#allocation3 + $0x204] sm:$0xf]  ;;  %v10389_v0 = vld [vmem:[#allocation3 + $0xc] sm:$0xf]  ;;  %v8301_v1 = vor.u32 %v10396_v61, %v8298_v3  ;;  %v10823_v61 = vld [vmem:[#allocation3 + $0xd9c] sm:$0xf] }
 0x45a   :  { %v10508_v54 = vld [vmem:[#allocation3 + $0x3c4] sm:$0xf]  ;;  %v10006_v3 = vld [vmem:[#allocation3 + $0xdb4] sm:$0xf0] }
 0x45b   :  { %6442 = vmatpush.bf16.msra.mxu1 %v9865_v33  ;;  %6404 = vmatpush.bf16.msrb.mxu2 %v9165_v14  ;;  %v8830_v33 = vld [vmem:[#allocation3 + $0x484] sm:$0xf0]  ;;  %v10410_v14 = vld [vmem:[#allocation3 + $0xb4] sm:$0xf] }
 0x45c   :  { %6417 = vmatpush.bf16.msrb.mxu3 %v9389_v21  ;;  %v8833_v18 = vor.u32 %v10529_v9, %v8830_v33  ;;  %v8578_v21 = vld [vmem:[#allocation3 + $0x28c] sm:$0xf0] }
 0x45d   :  { %6430 = vmatpush.bf16.msra.mxu0 %v9613_v31  ;;  %v10578_v31 = vld [vmem:[#allocation3 + $0x5f4] sm:$0xf]  ;;  %v8581_v24 = vor.u32 %v10466_v20, %v8578_v21  ;;  %v6224_v40 = vpop.f32.mrf.mxu0  ;;  %v9362_v33 = vld [vmem:[#allocation3 + $0x8ac] sm:$0xf0] }
 0x45e   :  { %6405 = vmatmul.bf16.vlgmr.msrb.gmra.mxu2 %v11620_v46  ;;  %v10774_v20 = vld [vmem:[#allocation3 + $0xc14] sm:$0xf] }
 0x45f   :  { %6449 = vmatpush.bf16.msra.mxu2 %v8469_v22  ;;  %6443 = vmatpush.bf16.msra.mxu1 %v9837_v16  ;;  %v6173_v22 = vadd.f32 %v11650_v38, %v6160_v7  ;;  %v8805_v16 = vor.u32 %v10522_v60, %v8802_v26  ;;  %v9029_v38 = vor.u32 %v10578_v31, %v9026_v34  ;;  %v6237_v30 = vpop.f32.mrf.mxu1  ;;  %v8494_v7 = vld [vmem:[#allocation3 + $0x1e4] sm:$0xf0]  ;;  %v10557_v60 = vld [vmem:[#allocation3 + $0x54c] sm:$0xf] }
 0x460   :  { %6462 = vmatpush.bf16.msra.mxu3 %v8693_v29  ;;  %6431 = vmatmul.bf16.vlgmr.msra.gmra.mxu0 %v11628_v32  ;;  %v8357_v29 = vor.u32 %v10410_v14, %v8354_v17  ;;  %v8973_v14 = vor.u32 %v10564_v19, %v8970_v43  ;;  %v10501_v17 = vld [vmem:[#allocation3 + $0x38c] sm:$0xf]  ;;  %v8942_v26 = vld [vmem:[#allocation3 + $0x564] sm:$0xf0]  ;;  %v9978_v19 = vld [vmem:[#allocation3 + $0xd7c] sm:$0xf0] }
 0x461   :  { %6475 = vmatpush.bf16.msrb.mxu0 %v8917_v35  ;;  %6418 = vmatmul.bf16.vlgmr.msrb.gmra.mxu3 %v11624_v49  ;;  %v8326_v35 = vld [vmem:[#allocation3 + $0x94] sm:$0xf0]  ;;  %v6198_v56 = vpop.f32.mrf.mxu2 }
 0x462   :  { %6444 = vmatmul.bf16.vlgmr.msra.gmra.mxu1 %v11632_v27 }
 0x463   :  { %6488 = vmatpush.bf16.msrb.mxu1 %v9141_v23  ;;  %6450 = vmatpush.bf16.msra.mxu2 %v8441_v50  ;;  %v6186_v23 = vadd.f32 %v11652_v47, %v6173_v22  ;;  %v8329_v50 = vor.u32 %v10403_v39, %v8326_v35  ;;  %v10034_v39 = vld [vmem:[#allocation3 + $0xdec] sm:$0xf0] }
 0x464   :  { %6463 = vmatpush.bf16.msra.mxu3 %v8665_v12  ;;  %v8553_v12 = vor.u32 %v10459_v41, %v8550_v44  ;;  %v6211_v62 = vpop.f32.mrf.mxu3  ;;  %v10655_v41 = vld [vmem:[#allocation3 + $0x85c] sm:$0xf]  ;;  %v9334_v44 = vld [vmem:[#allocation3 + $0x874] sm:$0xf0] }
 0x465   :  { %6476 = vmatpush.bf16.msrb.mxu0 %v8889_v53  ;;  %v8777_v53 = vor.u32 %v10515_v36, %v8774_v48  ;;  %v6199_v47 = vadd.f32 %v6198_v56, %v6186_v23  ;;  %v6226_v15 = vpop.f32.mrf.mxu0  ;;  %v10711_v36 = vld [vmem:[#allocation3 + $0xa1c] sm:$0xf]  ;;  %v9558_v48 = vld [vmem:[#allocation3 + $0xa34] sm:$0xf0]  ;;  %v10648_v56 = vld [vmem:[#allocation3 + $0x824] sm:$0xf] }
 0x466   :  { %v10809_v15 = vld [vmem:[#allocation3 + $0xd2c] sm:$0xf] }
 0x467   :  { %6489 = vmatpush.bf16.msrb.mxu1 %v9113_v59  ;;  %6451 = vmatpush.bf16.msra.mxu2 %v8413_v37  ;;  %v9001_v59 = vor.u32 %v10571_v51, %v8998_v6  ;;  %v8746_v37 = vld [vmem:[#allocation3 + $0x3dc] sm:$0xf0]  ;;  %v6212_v42 = vadd.f32 %v6211_v62, %v6199_v47  ;;  %v6239_v21 = vpop.f32.mrf.mxu1  ;;  %v10767_v6 = vld [vmem:[#allocation3 + $0xbdc] sm:$0xf]  ;;  %v10704_v47 = vld [vmem:[#allocation3 + $0x9e4] sm:$0xf]  ;;  %v10009_v62 = vor.u32 %v10823_v61, %v10006_v3 }
 0x468   :  { %6464 = vmatpush.bf16.msra.mxu3 %v8637_v52  ;;  %v8270_v52 = vld [vmem:[#allocation3 + $0x24] sm:$0xf0]  ;;  %v8749_v9 = vor.u32 %v10508_v54, %v8746_v37  ;;  %v10760_v54 = vld [vmem:[#allocation3 + $0xba4] sm:$0xf]  ;;  %v9754_v37 = vld [vmem:[#allocation3 + $0xbbc] sm:$0xf0] }
 0x469   :  { %6477 = vmatpush.bf16.msrb.mxu0 %v8861_v55  ;;  %v8525_v55 = vor.u32 %v10452_v45, %v8522_v57  ;;  %v8273_v22 = vor.u32 %v10389_v0, %v8270_v52  ;;  %v9306_v45 = vld [vmem:[#allocation3 + $0x83c] sm:$0xf0]  ;;  %v10816_v52 = vld [vmem:[#allocation3 + $0xd64] sm:$0xf]  ;;  %v10690_v21 = vld [vmem:[#allocation3 + $0x974] sm:$0xf] }
 0x46a   :  { %v9194_v61 = vld [vmem:[#allocation3 + $0x75c] sm:$0xf0] }
 0x46b   :  { %6490 = vmatpush.bf16.msrb.mxu1 %v9085_v8  ;;  %6452 = vmatpush.bf16.msra.mxu2 %v8385_v11  ;;  %v10662_v8 = vld [vmem:[#allocation3 + $0x894] sm:$0xf] }
 0x46c   :  { %6465 = vmatpush.bf16.msra.mxu3 %v8609_v10  ;;  %v10718_v11 = vld [vmem:[#allocation3 + $0xa54] sm:$0xf]  ;;  %v6225_v10 = vadd.f32 %v6224_v40, %v6212_v42  ;;  %v9365_v34 = vor.u32 %v10662_v8, %v9362_v33  ;;  %v6200_v40 = vpop.f32.mrf.mxu2  ;;  %v9278_v42 = vld [vmem:[#allocation3 + $0x804] sm:$0xf0]  ;;  %v10753_v33 = vld [vmem:[#allocation3 + $0xb6c] sm:$0xf] }
 0x46d   :  { %6478 = vmatpush.bf16.msrb.mxu0 %v8833_v18  ;;  %v8718_v18 = vld [vmem:[#allocation3 + $0x3a4] sm:$0xf0]  ;;  %v9589_v35 = vor.u32 %v10718_v11, %v9586_v13 }
 0x46e   :  { %v6238_v31 = vadd.f32 %v6237_v30, %v6225_v10  ;;  %v9782_v30 = vld [vmem:[#allocation3 + $0xbf4] sm:$0xf0]  ;;  %v9502_v8 = vld [vmem:[#allocation3 + $0x9c4] sm:$0xf0] }
 0x46f   :  { %6491 = vmatpush.bf16.msrb.mxu1 %v9057_v25  ;;  %6453 = vmatpush.bf16.msra.mxu2 %v8357_v29  ;;  %v9810_v25 = vld [vmem:[#allocation3 + $0xc2c] sm:$0xf0]  ;;  %v8497_v29 = vor.u32 %v10445_v5, %v8494_v7  ;;  %v9785_v57 = vor.u32 %v10767_v6, %v9782_v30  ;;  %v9757_v5 = vor.u32 %v10760_v54, %v9754_v37  ;;  %v10697_v7 = vld [vmem:[#allocation3 + $0x9ac] sm:$0xf]  ;;  %v9726_v11 = vld [vmem:[#allocation3 + $0xb84] sm:$0xf0] }
 0x470   :  { %6466 = vmatpush.bf16.msra.mxu3 %v8581_v24  ;;  %v10830_v24 = vld [vmem:[#allocation3 + $0xdd4] sm:$0xf]  ;;  %10882 = vtanh.f32 %v6238_v31  ;;  %v9813_v23 = vor.u32 %v10774_v20, %v9810_v25  ;;  %v9950_v10 = vld [vmem:[#allocation3 + $0xd44] sm:$0xf0]  ;;  %v9729_v20 = vor.u32 %v10753_v33, %v9726_v11  ;;  %v9894_v6 = vld [vmem:[#allocation3 + $0xcd4] sm:$0xf0] }
 0x471   :  { %6479 = vmatpush.bf16.msrb.mxu0 %v8805_v16  ;;  %v8721_v16 = vor.u32 %v10501_v17, %v8718_v18  ;;  %v10037_v51 = vor.u32 %v10830_v24, %v10034_v39  ;;  %v10634_v17 = vld [vmem:[#allocation3 + $0x7b4] sm:$0xf]  ;;  %v9250_v18 = vld [vmem:[#allocation3 + $0x7cc] sm:$0xf0]  ;;  %v9953_v25 = vor.u32 %v10809_v15, %v9950_v10  ;;  %v10627_v39 = vld [vmem:[#allocation3 + $0x77c] sm:$0xf] }
 0x472   :  { %v10802_v31 = vld [vmem:[#allocation3 + $0xcf4] sm:$0xf]  ;;  %v9614_v15 = vld [vmem:[#allocation3 + $0xaa4] sm:$0xf0]  ;;  %v8920_v10 = vld [vmem:[#allocation3 + $0x518] sm:$0xf] }
 0x473   :  { %6492 = vmatpush.bf16.msrb.mxu1 %v9029_v38  ;;  %6454 = vmatpush.bf16.msra.mxu2 %v8329_v50  ;;  %v8945_v38 = vor.u32 %v10557_v60, %v8942_v26  ;;  %v6213_v50 = vpop.f32.mrf.mxu3  ;;  %v10746_v60 = vld [vmem:[#allocation3 + $0xb34] sm:$0xf]  ;;  %v9698_v26 = vld [vmem:[#allocation3 + $0xb4c] sm:$0xf0] }
 0x474   :  { %6467 = vmatpush.bf16.msra.mxu3 %v8553_v12  ;;  %v9337_v12 = vor.u32 %v10655_v41, %v9334_v44  ;;  %v10683_v41 = vld [vmem:[#allocation3 + $0x93c] sm:$0xf]  ;;  %v9446_v44 = vld [vmem:[#allocation3 + $0x954] sm:$0xf0] }
 0x475   :  { %6480 = vmatpush.bf16.msrb.mxu0 %v8777_v53  ;;  %v9561_v53 = vor.u32 %v10711_v36, %v9558_v48  ;;  %v9670_v36 = vld [vmem:[#allocation3 + $0xb14] sm:$0xf0]  ;;  %v9449_v30 = vor.u32 %v10683_v41, %v9446_v44  ;;  %v8668_v41 = vld [vmem:[#allocation3 + $0x320] sm:$0xf]  ;;  %v10491_v44 = vld [vmem:[#allocation3 + $0x338] sm:$0xf0] }
 0x476   :  { %v10883_v0 = vpop.eup %10882 }
 0x477   :  { %6493 = vmatpush.bf16.msrb.mxu1 %v9001_v59  ;;  %6455 = vmatpush.bf16.msra.mxu2 %v8301_v1  ;;  %v9530_v59 = vld [vmem:[#allocation3 + $0x9fc] sm:$0xf0]  ;;  %v9309_v1 = vor.u32 %v10648_v56, %v9306_v45  ;;  %6872 = vst [vmem:[#allocation23] sm:$0xff] %v10883_v0  ;;  %v9166_v0 = vld [vmem:[#allocation3 + $0x724] sm:$0xf0] }
 0x478   :  { %6468 = vmatpush.bf16.msra.mxu3 %v8525_v55  ;;  %v9533_v43 = vor.u32 %v10704_v47, %v9530_v59  ;;  %v10641_v55 = vld [vmem:[#allocation3 + $0x7ec] sm:$0xf]  ;;  %v9418_v56 = vld [vmem:[#allocation3 + $0x91c] sm:$0xf0]  ;;  %v10732_v47 = vld [vmem:[#allocation3 + $0xac4] sm:$0xf] }
 0x479   :  { %6481 = vmatpush.bf16.msrb.mxu0 %v8749_v9  ;;  %v9981_v9 = vor.u32 %v10816_v52, %v9978_v19  ;;  %v9281_v13 = vor.u32 %v10641_v55, %v9278_v42  ;;  %v9642_v59 = vld [vmem:[#allocation3 + $0xadc] sm:$0xf0]  ;;  %v9390_v55 = vld [vmem:[#allocation3 + $0x8e4] sm:$0xf0]  ;;  %v8472_v42 = vld [vmem:[#allocation3 + $0x198] sm:$0xf] }
 0x47a   :  { %v9866_v52 = vld [vmem:[#allocation3 + $0xc9c] sm:$0xf0] }
 0x47b   :  { %6494 = vmatpush.bf16.msrb.mxu1 %v8973_v14  ;;  %6456 = vmatpush.bf16.msra.mxu2 %v8273_v22  ;;  %v9505_v14 = vor.u32 %v10697_v7, %v9502_v8  ;;  %v9474_v22 = vld [vmem:[#allocation3 + $0x98c] sm:$0xf0]  ;;  %v10442_v7 = vld [vmem:[#allocation3 + $0x1b0] sm:$0xf0]  ;;  %v8696_v8 = vld [vmem:[#allocation3 + $0x358] sm:$0xf] }
 0x47c   :  { %6469 = vmatpush.bf16.msra.mxu3 %v8497_v29  ;;  %v9253_v29 = vor.u32 %v10634_v17, %v9250_v18  ;;  %v9477_v24 = vor.u32 %v10690_v21, %v9474_v22  ;;  %v10554_v18 = vld [vmem:[#allocation3 + $0x530] sm:$0xf0]  ;;  %v9838_v21 = vld [vmem:[#allocation3 + $0xc64] sm:$0xf0] }
 0x47d   :  { %6482 = vmatpush.bf16.msrb.mxu0 %v8721_v16  ;;  %v9701_v16 = vor.u32 %v10746_v60, %v9698_v26  ;;  %v11673_v40 = vpop.f32.mrf.mxu0  ;;  %v9144_v60 = vld [vmem:[#allocation3 + $0x6d8] sm:$0xf]  ;;  %v10610_v26 = vld [vmem:[#allocation3 + $0x6f0] sm:$0xf0] }
 0x47e   :  { %6457 = vmatmul.bf16.vlgmr.msra.gmra.mxu2 %v11600_v58 }
 0x47f   :  { %6501 = vmatpush.bf16.msrb.mxu2 %v9365_v34  ;;  %6495 = vmatpush.bf16.msrb.mxu1 %v8945_v38  ;;  %v9922_v34 = vld [vmem:[#allocation3 + $0xd0c] sm:$0xf0]  ;;  %v10739_v38 = vld [vmem:[#allocation3 + $0xafc] sm:$0xf]  ;;  %v11675_v48 = vpop.f32.mrf.mxu1 }
 0x480   :  { %6514 = vmatpush.bf16.msrb.mxu3 %v9589_v35  ;;  %6483 = vmatmul.bf16.vlgmr.msrb.gmra.mxu0 %v11608_v2  ;;  %v9222_v35 = vld [vmem:[#allocation3 + $0x794] sm:$0xf0]  ;;  %v9673_v3 = vor.u32 %v10739_v38, %v9670_v36  ;;  %v9145_v38 = vor.u32 %v10610_v26, %v9144_v60  ;;  %v8892_v36 = vld [vmem:[#allocation3 + $0x4e0] sm:$0xf]  ;;  %v10526_v60 = vld [vmem:[#allocation3 + $0x450] sm:$0xf0] }
 0x481   :  { %6527 = vmatpush.bf16.msra.mxu0 %v9813_v23  ;;  %6470 = vmatmul.bf16.vlgmr.msra.gmra.mxu3 %v11604_v63  ;;  %v9925_v23 = vor.u32 %v10802_v31, %v9922_v34  ;;  %v9225_v50 = vor.u32 %v10627_v39, %v9222_v35  ;;  %v11677_v45 = vpop.f32.mrf.mxu2  ;;  %v8444_v34 = vld [vmem:[#allocation3 + $0x160] sm:$0xf]  ;;  %v8921_v35 = vor.u32 %v10554_v18, %v8920_v10 }
 0x482   :  { %6496 = vmatmul.bf16.vlgmr.msrb.gmra.mxu1 %v11612_v4 }
 0x483   :  { %6540 = vmatpush.bf16.msra.mxu1 %v10037_v51  ;;  %6502 = vmatpush.bf16.msrb.mxu2 %v9337_v12  ;;  %v10795_v51 = vld [vmem:[#allocation3 + $0xcbc] sm:$0xf]  ;;  %v10620_v12 = vld [vmem:[#allocation3 + $0x744] sm:$0xf] }
 0x484   :  { %6515 = vmatpush.bf16.msrb.mxu3 %v9561_v53  ;;  %v10676_v53 = vld [vmem:[#allocation3 + $0x904] sm:$0xf]  ;;  %v11679_v54 = vpop.f32.mrf.mxu3  ;;  %v9197_v37 = vor.u32 %v10620_v12, %v9194_v61  ;;  %v10603_v12 = vld [vmem:[#allocation3 + $0x6b8] sm:$0xf0]  ;;  %v8669_v61 = vor.u32 %v10491_v44, %v8668_v41 }
 0x485   :  { %6528 = vmatpush.bf16.msra.mxu0 %v9785_v57  ;;  %v9897_v57 = vor.u32 %v10795_v51, %v9894_v6  ;;  %v9421_v19 = vor.u32 %v10676_v53, %v9418_v56  ;;  %v6278_v33 = vpop.f32.mrf.mxu0  ;;  %v3820_v51 = vperm.slane %v11658_v28, 1  ;;  %v10428_v53 = vld [vmem:[#allocation3 + $0x140] sm:$0xf0]  ;;  %v10463_v41 = vld [vmem:[#allocation3 + $0x258] sm:$0xf0] }
 0x486   :  { %v10533_v33 = vld [vmem:[#allocation3 + $0x488] sm:$0xf0] }
 0x487   :  { %6541 = vmatpush.bf16.msra.mxu1 %v10009_v62  ;;  %6503 = vmatpush.bf16.msrb.mxu2 %v9309_v1  ;;  %v10613_v62 = vld [vmem:[#allocation3 + $0x70c] sm:$0xf]  ;;  %v10788_v1 = vld [vmem:[#allocation3 + $0xc84] sm:$0xf] }
 0x488   :  { %6516 = vmatpush.bf16.msrb.mxu3 %v9533_v43  ;;  %v10669_v43 = vld [vmem:[#allocation3 + $0x8cc] sm:$0xf]  ;;  %v9869_v11 = vor.u32 %v10788_v1, %v9866_v52  ;;  %v9169_v17 = vor.u32 %v10613_v62, %v9166_v0  ;;  %v8864_v62 = vld [vmem:[#allocation3 + $0x4a8] sm:$0xf]  ;;  %v10596_v52 = vld [vmem:[#allocation3 + $0x680] sm:$0xf0] }
 0x489   :  { %6529 = vmatpush.bf16.msra.mxu0 %v9757_v5  ;;  %v9645_v5 = vor.u32 %v10732_v47, %v9642_v59  ;;  %v9393_v22 = vor.u32 %v10669_v43, %v9390_v55  ;;  %v6252_v39 = vpop.f32.mrf.mxu2  ;;  %v10484_v47 = vld [vmem:[#allocation3 + $0x300] sm:$0xf0]  ;;  %v6251_v59 = vadd.f32 %v11677_v45, %v3820_v51  ;;  %v9088_v1 = vld [vmem:[#allocation3 + $0x668] sm:$0xf]  ;;  %v8388_v43 = vld [vmem:[#allocation3 + $0xf0] sm:$0xf] }
 0x48a   :  { %v10421_v55 = vld [vmem:[#allocation3 + $0x108] sm:$0xf0]  ;;  %v8612_v45 = vld [vmem:[#allocation3 + $0x2b0] sm:$0xf]  ;;  %v10407_v39 = vld [vmem:[#allocation3 + $0x98] sm:$0xf0] }
 0x48b   :  { %6542 = vmatpush.bf16.msra.mxu1 %v9981_v9  ;;  %6504 = vmatpush.bf16.msrb.mxu2 %v9281_v13  ;;  %v10498_v9 = vld [vmem:[#allocation3 + $0x370] sm:$0xf0]  ;;  %v10725_v13 = vld [vmem:[#allocation3 + $0xa8c] sm:$0xf] }
 0x48c   :  { %6517 = vmatpush.bf16.msrb.mxu3 %v9505_v14  ;;  %v6291_v14 = vpop.f32.mrf.mxu1  ;;  %v9617_v31 = vor.u32 %v10725_v13, %v9614_v15  ;;  %v9060_v13 = vld [vmem:[#allocation3 + $0x630] sm:$0xf]  ;;  %v10589_v15 = vld [vmem:[#allocation3 + $0x648] sm:$0xf0] }
 0x48d   :  { %6530 = vmatpush.bf16.msra.mxu0 %v9729_v20  ;;  %v10781_v20 = vld [vmem:[#allocation3 + $0xc4c] sm:$0xf]  ;;  %v8360_v14 = vld [vmem:[#allocation3 + $0xb8] sm:$0xf] }
 0x48f   :  { %6543 = vmatpush.bf16.msra.mxu1 %v9953_v25  ;;  %6505 = vmatpush.bf16.msrb.mxu2 %v9253_v29  ;;  %v8473_v25 = vor.u32 %v10442_v7, %v8472_v42  ;;  %v8697_v29 = vor.u32 %v10498_v9, %v8696_v8  ;;  %v6264_v7 = vadd.f32 %v11679_v54, %v6251_v59  ;;  %v8836_v9 = vld [vmem:[#allocation3 + $0x470] sm:$0xf]  ;;  %v8808_v54 = vld [vmem:[#allocation3 + $0x438] sm:$0xf] }
 0x490   :  { %6518 = vmatpush.bf16.msrb.mxu3 %v9477_v24  ;;  %v10435_v24 = vld [vmem:[#allocation3 + $0x178] sm:$0xf0]  ;;  %v9089_v8 = vor.u32 %v10596_v52, %v9088_v1  ;;  %v8837_v18 = vor.u32 %v10533_v33, %v8836_v9  ;;  %v10393_v52 = vld [vmem:[#allocation3 + $0x28] sm:$0xf0]  ;;  %v10666_v9 = vld [vmem:[#allocation3 + $0x8b0] sm:$0xf0] }
 0x491   :  { %6531 = vmatpush.bf16.msra.mxu0 %v9701_v16  ;;  %v9841_v16 = vor.u32 %v10781_v20, %v9838_v21  ;;  %v8445_v6 = vor.u32 %v10435_v24, %v8444_v34  ;;  %v8584_v20 = vld [vmem:[#allocation3 + $0x278] sm:$0xf]  ;;  %v10470_v21 = vld [vmem:[#allocation3 + $0x290] sm:$0xf0]  ;;  %v8332_v24 = vld [vmem:[#allocation3 + $0x80] sm:$0xf] }
 0x492   :  { %v8585_v34 = vor.u32 %v10470_v21, %v8584_v20  ;;  %v8333_v51 = vor.u32 %v10407_v39, %v8332_v24  ;;  %v9592_v33 = vld [vmem:[#allocation3 + $0xa58] sm:$0xf] }
 0x493   :  { %6544 = vmatpush.bf16.msra.mxu1 %v9925_v23  ;;  %6506 = vmatpush.bf16.msrb.mxu2 %v9225_v50  ;;  %v6265_v23 = vpop.f32.mrf.mxu3  ;;  %v10547_v50 = vld [vmem:[#allocation3 + $0x4f8] sm:$0xf0] }
 0x494   :  { %6519 = vmatpush.bf16.msrb.mxu3 %v9449_v30  ;;  %v9116_v30 = vld [vmem:[#allocation3 + $0x6a0] sm:$0xf]  ;;  %v8893_v56 = vor.u32 %v10547_v50, %v8892_v36  ;;  %v10519_v36 = vld [vmem:[#allocation3 + $0x418] sm:$0xf0] }
 0x495   :  { %6532 = vmatpush.bf16.msra.mxu0 %v9673_v3  ;;  %v8416_v3 = vld [vmem:[#allocation3 + $0x128] sm:$0xf]  ;;  %v9117_v28 = vor.u32 %v10603_v12, %v9116_v30  ;;  %v10575_v30 = vld [vmem:[#allocation3 + $0x5d8] sm:$0xf0] }
 0x496   :  { %v8417_v0 = vor.u32 %v10428_v53, %v8416_v3  ;;  %v10400_v3 = vld [vmem:[#allocation3 + $0x60] sm:$0xf0] }
 0x497   :  { %6545 = vmatpush.bf16.msra.mxu1 %v9897_v57  ;;  %6507 = vmatpush.bf16.msrb.mxu2 %v9197_v37  ;;  %v8640_v57 = vld [vmem:[#allocation3 + $0x2e8] sm:$0xf]  ;;  %v10540_v37 = vld [vmem:[#allocation3 + $0x4c0] sm:$0xf0] }
 0x498   :  { %6520 = vmatpush.bf16.msrb.mxu3 %v9421_v19  ;;  %v8641_v19 = vor.u32 %v10484_v47, %v8640_v57  ;;  %v8865_v42 = vor.u32 %v10540_v37, %v8864_v62  ;;  %v8528_v57 = vld [vmem:[#allocation3 + $0x208] sm:$0xf]  ;;  %v10456_v47 = vld [vmem:[#allocation3 + $0x220] sm:$0xf0] }
 0x499   :  { %6533 = vmatpush.bf16.msra.mxu0 %v9645_v5  ;;  %v10477_v5 = vld [vmem:[#allocation3 + $0x2c8] sm:$0xf0]  ;;  %v8752_v62 = vld [vmem:[#allocation3 + $0x3c8] sm:$0xf]  ;;  %v10512_v37 = vld [vmem:[#allocation3 + $0x3e0] sm:$0xf0] }
 0x49a   :  { %v8613_v10 = vor.u32 %v10477_v5, %v8612_v45  ;;  %v8500_v45 = vld [vmem:[#allocation3 + $0x1d0] sm:$0xf]  ;;  %v10449_v5 = vld [vmem:[#allocation3 + $0x1e8] sm:$0xf0] }
 0x49b   :  { %6546 = vmatpush.bf16.msra.mxu1 %v9869_v11  ;;  %6508 = vmatpush.bf16.msrb.mxu2 %v9169_v17  ;;  %v8389_v11 = vor.u32 %v10421_v55, %v8388_v43  ;;  %v10414_v17 = vld [vmem:[#allocation3 + $0xd0] sm:$0xf0]  ;;  %v10568_v43 = vld [vmem:[#allocation3 + $0x5a0] sm:$0xf0]  ;;  %v8529_v55 = vor.u32 %v10456_v47, %v8528_v57  ;;  %v9536_v47 = vld [vmem:[#allocation3 + $0x9e8] sm:$0xf] }
 0x49c   :  { %6521 = vmatpush.bf16.msrb.mxu3 %v9393_v22  ;;  %v6277_v22 = vadd.f32 %v11673_v40, %v6264_v7  ;;  %v8361_v26 = vor.u32 %v10414_v17, %v8360_v14  ;;  %v9368_v7 = vld [vmem:[#allocation3 + $0x898] sm:$0xf]  ;;  %v8724_v14 = vld [vmem:[#allocation3 + $0x390] sm:$0xf]  ;;  %v10505_v17 = vld [vmem:[#allocation3 + $0x3a8] sm:$0xf0] }
 0x49d   :  { %6534 = vmatpush.bf16.msra.mxu0 %v9617_v31  ;;  %v10582_v31 = vld [vmem:[#allocation3 + $0x610] sm:$0xf0]  ;;  %v6328_v44 = vpop.f32.mrf.mxu0  ;;  %v8725_v39 = vor.u32 %v10505_v17, %v8724_v14 }
 0x49e   :  { %6509 = vmatmul.bf16.vlgmr.msrb.gmra.mxu2 %v11620_v46  ;;  %v6290_v23 = vadd.f32 %v11675_v48, %v6277_v22  ;;  %v10778_v22 = vld [vmem:[#allocation3 + $0xc30] sm:$0xf0] }
 0x49f   :  { %6553 = vmatpush.bf16.msra.mxu2 %v8473_v25  ;;  %6547 = vmatpush.bf16.msra.mxu1 %v9841_v16  ;;  %v9061_v25 = vor.u32 %v10589_v15, %v9060_v13  ;;  %v8556_v16 = vld [vmem:[#allocation3 + $0x240] sm:$0xf]  ;;  %v6341_v50 = vpop.f32.mrf.mxu1  ;;  %v10638_v14 = vld [vmem:[#allocation3 + $0x7d0] sm:$0xf0] }
 0x4a0   :  { %6566 = vmatpush.bf16.msra.mxu3 %v8697_v29  ;;  %6535 = vmatmul.bf16.vlgmr.msra.gmra.mxu0 %v11628_v32  ;;  %v9032_v29 = vld [vmem:[#allocation3 + $0x5f8] sm:$0xf]  ;;  %v8557_v12 = vor.u32 %v10463_v41, %v8556_v16  ;;  %v10659_v16 = vld [vmem:[#allocation3 + $0x878] sm:$0xf0] }
 0x4a1   :  { %6579 = vmatpush.bf16.msrb.mxu0 %v8921_v35  ;;  %6522 = vmatmul.bf16.vlgmr.msrb.gmra.mxu3 %v11624_v49  ;;  %v8809_v35 = vor.u32 %v10526_v60, %v8808_v54  ;;  %v9033_v40 = vor.u32 %v10582_v31, %v9032_v29  ;;  %v10561_v54 = vld [vmem:[#allocation3 + $0x568] sm:$0xf0]  ;;  %v8501_v60 = vor.u32 %v10449_v5, %v8500_v45  ;;  %v10040_v31 = vld [vmem:[#allocation3 + $0xdd8] sm:$0xf]  ;;  %v9508_v45 = vld [vmem:[#allocation3 + $0x9b0] sm:$0xf] }
 0x4a2   :  { %6548 = vmatmul.bf16.vlgmr.msra.gmra.mxu1 %v11632_v27  ;;  %v9369_v29 = vor.u32 %v10666_v9, %v9368_v7  ;;  %v10701_v5 = vld [vmem:[#allocation3 + $0x9c8] sm:$0xf0] }
 0x4a3   :  { %6592 = vmatpush.bf16.msrb.mxu1 %v9145_v38  ;;  %6554 = vmatpush.bf16.msra.mxu2 %v8445_v6  ;;  %v8780_v38 = vld [vmem:[#allocation3 + $0x400] sm:$0xf]  ;;  %v10757_v9 = vld [vmem:[#allocation3 + $0xb88] sm:$0xf0] }
 0x4a4   :  { %6567 = vmatpush.bf16.msra.mxu3 %v8669_v61  ;;  %v9004_v6 = vld [vmem:[#allocation3 + $0x5c0] sm:$0xf]  ;;  %v8304_v61 = vld [vmem:[#allocation3 + $0x48] sm:$0xf]  ;;  %v8781_v53 = vor.u32 %v10519_v36, %v8780_v38  ;;  %v10715_v38 = vld [vmem:[#allocation3 + $0xa38] sm:$0xf0] }
 0x4a5   :  { %6580 = vmatpush.bf16.msrb.mxu0 %v8893_v56  ;;  %v6302_v56 = vpop.f32.mrf.mxu2  ;;  %v9005_v59 = vor.u32 %v10575_v30, %v9004_v6  ;;  %v8305_v1 = vor.u32 %v10400_v3, %v8304_v61  ;;  %v6330_v13 = vpop.f32.mrf.mxu0  ;;  %v9788_v6 = vld [vmem:[#allocation3 + $0xbe0] sm:$0xf]  ;;  %v10827_v61 = vld [vmem:[#allocation3 + $0xdb8] sm:$0xf0] }
 0x4a6   :  { %v6303_v48 = vadd.f32 %v6302_v56, %v6290_v23  ;;  %v10652_v56 = vld [vmem:[#allocation3 + $0x840] sm:$0xf0]  ;;  %v10813_v13 = vld [vmem:[#allocation3 + $0xd48] sm:$0xf0] }
 0x4a7   :  { %6593 = vmatpush.bf16.msrb.mxu1 %v9117_v28  ;;  %6555 = vmatpush.bf16.msra.mxu2 %v8417_v0  ;;  %v6315_v28 = vpop.f32.mrf.mxu3  ;;  %v8276_v0 = vld [vmem:[#allocation3 + $0x10] sm:$0xf]  ;;  %v6343_v20 = vpop.f32.mrf.mxu1 }
 0x4a8   :  { %6568 = vmatpush.bf16.msra.mxu3 %v8641_v19  ;;  %v8976_v19 = vld [vmem:[#allocation3 + $0x588] sm:$0xf]  ;;  %v8277_v21 = vor.u32 %v10393_v52, %v8276_v0  ;;  %v10820_v52 = vld [vmem:[#allocation3 + $0xd80] sm:$0xf0]  ;;  %v10694_v20 = vld [vmem:[#allocation3 + $0x990] sm:$0xf0] }
 0x4a9   :  { %6581 = vmatpush.bf16.msrb.mxu0 %v8865_v42  ;;  %v6316_v42 = vadd.f32 %v6315_v28, %v6303_v48  ;;  %v10708_v48 = vld [vmem:[#allocation3 + $0xa00] sm:$0xf0]  ;;  %v9760_v28 = vld [vmem:[#allocation3 + $0xba8] sm:$0xf] }
 0x4ab   :  { %6594 = vmatpush.bf16.msrb.mxu1 %v9089_v8  ;;  %6556 = vmatpush.bf16.msra.mxu2 %v8389_v11  ;;  %v8753_v8 = vor.u32 %v10512_v37, %v8752_v62  ;;  %v10722_v11 = vld [vmem:[#allocation3 + $0xa70] sm:$0xf0]  ;;  %v6329_v15 = vadd.f32 %v6328_v44, %v6316_v42  ;;  %v10764_v62 = vld [vmem:[#allocation3 + $0xbc0] sm:$0xf0] }
 0x4ac   :  { %6569 = vmatpush.bf16.msra.mxu3 %v8613_v10  ;;  %v8977_v10 = vor.u32 %v10568_v43, %v8976_v19  ;;  %v9593_v24 = vor.u32 %v10722_v11, %v9592_v33  ;;  %v9537_v19 = vor.u32 %v10708_v48, %v9536_v47  ;;  %v9284_v43 = vld [vmem:[#allocation3 + $0x7f0] sm:$0xf]  ;;  %v9761_v42 = vor.u32 %v10764_v62, %v9760_v28  ;;  %v10736_v47 = vld [vmem:[#allocation3 + $0xae0] sm:$0xf0]  ;;  %v10617_v62 = vld [vmem:[#allocation3 + $0x728] sm:$0xf0] }
 0x4ad   :  { %6582 = vmatpush.bf16.msrb.mxu0 %v8837_v18  ;;  %v9816_v18 = vld [vmem:[#allocation3 + $0xc18] sm:$0xf]  ;;  %v6304_v41 = vpop.f32.mrf.mxu2  ;;  %v9956_v11 = vld [vmem:[#allocation3 + $0xd30] sm:$0xf] }
 0x4ae   :  { %v9817_v44 = vor.u32 %v10778_v22, %v9816_v18  ;;  %v9480_v18 = vld [vmem:[#allocation3 + $0x978] sm:$0xf]  ;;  %v9172_v48 = vld [vmem:[#allocation3 + $0x710] sm:$0xf] }
 0x4af   :  { %6595 = vmatpush.bf16.msrb.mxu1 %v9061_v25  ;;  %6557 = vmatpush.bf16.msra.mxu2 %v8361_v26  ;;  %v8948_v25 = vld [vmem:[#allocation3 + $0x550] sm:$0xf]  ;;  %v6342_v26 = vadd.f32 %v6341_v50, %v6329_v15  ;;  %v6317_v36 = vpop.f32.mrf.mxu3  ;;  %v10771_v50 = vld [vmem:[#allocation3 + $0xbf8] sm:$0xf0]  ;;  %v9509_v15 = vor.u32 %v10701_v5, %v9508_v45  ;;  %v9704_v22 = vld [vmem:[#allocation3 + $0xb38] sm:$0xf] }
 0x4b0   :  { %6570 = vmatpush.bf16.msra.mxu3 %v8585_v34  ;;  %v10834_v34 = vld [vmem:[#allocation3 + $0xdf0] sm:$0xf0]  ;;  %v8949_v23 = vor.u32 %v10561_v54, %v8948_v25  ;;  %v9789_v57 = vor.u32 %v10771_v50, %v9788_v6  ;;  %v9900_v36 = vld [vmem:[#allocation3 + $0xcc0] sm:$0xf]  ;;  %v9200_v50 = vld [vmem:[#allocation3 + $0x748] sm:$0xf] }
 0x4b1   :  { %6583 = vmatpush.bf16.msrb.mxu0 %v8809_v35  ;;  %v9340_v35 = vld [vmem:[#allocation3 + $0x860] sm:$0xf]  ;;  %10884 = vtanh.f32 %v6342_v26  ;;  %v10750_v25 = vld [vmem:[#allocation3 + $0xb50] sm:$0xf0]  ;;  %v10495_v45 = vld [vmem:[#allocation3 + $0x35c] sm:$0xf] }
 0x4b2   :  { %v9341_v30 = vor.u32 %v10659_v16, %v9340_v35  ;;  %v10806_v26 = vld [vmem:[#allocation3 + $0xd10] sm:$0xf0]  ;;  %v10687_v35 = vld [vmem:[#allocation3 + $0x958] sm:$0xf0]  ;;  %v8698_v5 = vld [vmem:[#allocation3 + $0x374] sm:$0xf0] }
 0x4b3   :  { %6596 = vmatpush.bf16.msrb.mxu1 %v9033_v40  ;;  %6558 = vmatpush.bf16.msra.mxu2 %v8333_v51  ;;  %v9564_v40 = vld [vmem:[#allocation3 + $0xa20] sm:$0xf]  ;;  %v10041_v51 = vor.u32 %v10834_v34, %v10040_v31  ;;  %v10631_v34 = vld [vmem:[#allocation3 + $0x798] sm:$0xf0] }
 0x4b4   :  { %6571 = vmatpush.bf16.msra.mxu3 %v8557_v12  ;;  %v10012_v12 = vld [vmem:[#allocation3 + $0xda0] sm:$0xf]  ;;  %v9565_v3 = vor.u32 %v10715_v38, %v9564_v40 }
 0x4b5   :  { %6584 = vmatpush.bf16.msrb.mxu0 %v8781_v53  ;;  %v9312_v53 = vld [vmem:[#allocation3 + $0x828] sm:$0xf]  ;;  %v9228_v31 = vld [vmem:[#allocation3 + $0x780] sm:$0xf] }
 0x4b6   :  { %v9313_v0 = vor.u32 %v10652_v56, %v9312_v53  ;;  %v9229_v38 = vor.u32 %v10631_v34, %v9228_v31 }
 0x4b7   :  { %6597 = vmatpush.bf16.msrb.mxu1 %v9005_v59  ;;  %6559 = vmatpush.bf16.msra.mxu2 %v8305_v1  ;;  %v10013_v59 = vor.u32 %v10827_v61, %v10012_v12  ;;  %v10885_v37 = vpop.eup %10884  ;;  %v9984_v1 = vld [vmem:[#allocation3 + $0xd68] sm:$0xf] }
 0x4b8   :  { %6572 = vmatpush.bf16.msra.mxu3 %v8529_v55  ;;  %6873 = vst [vmem:[#allocation23 + $0x8] sm:$0xff] %v10885_v37  ;;  %v10645_v55 = vld [vmem:[#allocation3 + $0x808] sm:$0xf0]  ;;  %v9985_v7 = vor.u32 %v10820_v52, %v9984_v1  ;;  %v9424_v61 = vld [vmem:[#allocation3 + $0x908] sm:$0xf] }
 0x4b9   :  { %6585 = vmatpush.bf16.msrb.mxu0 %v8753_v8  ;;  %v9732_v8 = vld [vmem:[#allocation3 + $0xb70] sm:$0xf]  ;;  %v9285_v33 = vor.u32 %v10645_v55, %v9284_v43  ;;  %v9872_v37 = vld [vmem:[#allocation3 + $0xc88] sm:$0xf]  ;;  %v10439_v43 = vld [vmem:[#allocation3 + $0x19c] sm:$0xf] }
 0x4ba   :  { %v9733_v17 = vor.u32 %v10757_v9, %v9732_v8  ;;  %v9396_v52 = vld [vmem:[#allocation3 + $0x8d0] sm:$0xf] }
 0x4bb   :  { %6598 = vmatpush.bf16.msrb.mxu1 %v8977_v10  ;;  %6560 = vmatpush.bf16.msra.mxu2 %v8277_v21  ;;  %v9256_v10 = vld [vmem:[#allocation3 + $0x7b8] sm:$0xf]  ;;  %v9957_v21 = vor.u32 %v10813_v13, %v9956_v11  ;;  %v9620_v9 = vld [vmem:[#allocation3 + $0xa90] sm:$0xf]  ;;  %v10551_v11 = vld [vmem:[#allocation3 + $0x51c] sm:$0xf] }
 0x4bc   :  { %6573 = vmatpush.bf16.msra.mxu3 %v8501_v60  ;;  %v9257_v54 = vor.u32 %v10638_v14, %v9256_v10  ;;  %v9928_v60 = vld [vmem:[#allocation3 + $0xcf8] sm:$0xf]  ;;  %v9844_v14 = vld [vmem:[#allocation3 + $0xc50] sm:$0xf] }
 0x4bd   :  { %6586 = vmatpush.bf16.msrb.mxu0 %v8725_v39  ;;  %v9452_v39 = vld [vmem:[#allocation3 + $0x940] sm:$0xf]  ;;  %v11694_v16 = vpop.f32.mrf.mxu0  ;;  %v9929_v41 = vor.u32 %v10806_v26, %v9928_v60  ;;  %v8922_v10 = vld [vmem:[#allocation3 + $0x534] sm:$0xf0]  ;;  %v10432_v60 = vld [vmem:[#allocation3 + $0x164] sm:$0xf] }
 0x4be   :  { %6561 = vmatmul.bf16.vlgmr.msra.gmra.mxu2 %v11600_v58  ;;  %v9453_v6 = vor.u32 %v10687_v35, %v9452_v39  ;;  %v8446_v26 = vld [vmem:[#allocation3 + $0x17c] sm:$0xf0]  ;;  %v8925_v31 = vor.u32 %v10551_v11, %v8922_v10  ;;  %v9062_v11 = vld [vmem:[#allocation3 + $0x64c] sm:$0xf0]  ;;  %v8362_v10 = vld [vmem:[#allocation3 + $0xd4] sm:$0xf0] }
 0x4bf   :  { %6605 = vmatpush.bf16.msrb.mxu2 %v9369_v29  ;;  %6599 = vmatpush.bf16.msrb.mxu1 %v8949_v23  ;;  %v9481_v29 = vor.u32 %v10694_v20, %v9480_v18  ;;  %v10743_v23 = vld [vmem:[#allocation3 + $0xb18] sm:$0xf0]  ;;  %v11696_v40 = vpop.f32.mrf.mxu1  ;;  %v8670_v39 = vld [vmem:[#allocation3 + $0x33c] sm:$0xf0] }
 0x4c0   :  { %6618 = vmatpush.bf16.msrb.mxu3 %v9593_v24  ;;  %6587 = vmatmul.bf16.vlgmr.msrb.gmra.mxu0 %v11608_v2  ;;  %v9705_v24 = vor.u32 %v10750_v25, %v9704_v22  ;;  %v9146_v22 = vld [vmem:[#allocation3 + $0x6f4] sm:$0xf0]  ;;  %v8701_v25 = vor.u32 %v10495_v45, %v8698_v5 }
 0x4c1   :  { %6631 = vmatpush.bf16.msra.mxu0 %v9817_v44  ;;  %6574 = vmatmul.bf16.vlgmr.msra.gmra.mxu3 %v11604_v63  ;;  %v9676_v44 = vld [vmem:[#allocation3 + $0xb00] sm:$0xf]  ;;  %v11698_v53 = vpop.f32.mrf.mxu2 }
 0x4c2   :  { %6600 = vmatmul.bf16.vlgmr.msrb.gmra.mxu1 %v11612_v4  ;;  %v9677_v12 = vor.u32 %v10743_v23, %v9676_v44  ;;  %v10544_v44 = vld [vmem:[#allocation3 + $0x4e4] sm:$0xf]  ;;  %v8894_v23 = vld [vmem:[#allocation3 + $0x4fc] sm:$0xf0] }
 0x4c3   :  { %6644 = vmatpush.bf16.msra.mxu1 %v10041_v51  ;;  %6606 = vmatpush.bf16.msrb.mxu2 %v9341_v30  ;;  %v10799_v51 = vld [vmem:[#allocation3 + $0xcd8] sm:$0xf0]  ;;  %v10624_v30 = vld [vmem:[#allocation3 + $0x760] sm:$0xf0] }
 0x4c4   :  { %6619 = vmatpush.bf16.msrb.mxu3 %v9565_v3  ;;  %v10680_v3 = vld [vmem:[#allocation3 + $0x920] sm:$0xf0]  ;;  %v9901_v56 = vor.u32 %v10799_v51, %v9900_v36  ;;  %v9201_v28 = vor.u32 %v10624_v30, %v9200_v50  ;;  %v8449_v51 = vor.u32 %v10432_v60, %v8446_v26  ;;  %v9118_v50 = vld [vmem:[#allocation3 + $0x6bc] sm:$0xf0]  ;;  %v9034_v60 = vld [vmem:[#allocation3 + $0x614] sm:$0xf0] }
 0x4c5   :  { %6632 = vmatpush.bf16.msra.mxu0 %v9789_v57  ;;  %v9648_v57 = vld [vmem:[#allocation3 + $0xac8] sm:$0xf]  ;;  %v9425_v1 = vor.u32 %v10680_v3, %v9424_v61  ;;  %v8897_v3 = vor.u32 %v10544_v44, %v8894_v23  ;;  %v10516_v44 = vld [vmem:[#allocation3 + $0x404] sm:$0xf]  ;;  %v8782_v23 = vld [vmem:[#allocation3 + $0x41c] sm:$0xf0] }
 0x4c6   :  { %v9649_v55 = vor.u32 %v10736_v47, %v9648_v57  ;;  %v8418_v61 = vld [vmem:[#allocation3 + $0x144] sm:$0xf0] }
 0x4c7   :  { %6645 = vmatpush.bf16.msra.mxu1 %v10013_v59  ;;  %6607 = vmatpush.bf16.msrb.mxu2 %v9313_v0  ;;  %v11700_v59 = vpop.f32.mrf.mxu3  ;;  %v10792_v0 = vld [vmem:[#allocation3 + $0xca0] sm:$0xf0]  ;;  %v6395_v13 = vpop.f32.mrf.mxu1  ;;  %v8642_v57 = vld [vmem:[#allocation3 + $0x304] sm:$0xf0] }
 0x4c8   :  { %6620 = vmatpush.bf16.msrb.mxu3 %v9537_v19  ;;  %v10673_v19 = vld [vmem:[#allocation3 + $0x8e8] sm:$0xf0]  ;;  %v9873_v8 = vor.u32 %v10792_v0, %v9872_v37 }
 0x4c9   :  { %6633 = vmatpush.bf16.msra.mxu0 %v9761_v42  ;;  %v8474_v42 = vld [vmem:[#allocation3 + $0x1b4] sm:$0xf0]  ;;  %v9397_v18 = vor.u32 %v10673_v19, %v9396_v52  ;;  %v10593_v0 = vld [vmem:[#allocation3 + $0x66c] sm:$0xf]  ;;  %v10418_v19 = vld [vmem:[#allocation3 + $0xf4] sm:$0xf] }
 0x4ca   :  { %v8477_v20 = vor.u32 %v10439_v43, %v8474_v42  ;;  %v8390_v43 = vld [vmem:[#allocation3 + $0x10c] sm:$0xf0] }
 0x4cb   :  { %6646 = vmatpush.bf16.msra.mxu1 %v9985_v7  ;;  %6608 = vmatpush.bf16.msrb.mxu2 %v9285_v33  ;;  %v6382_v7 = vpop.f32.mrf.mxu0  ;;  %v10729_v33 = vld [vmem:[#allocation3 + $0xaa8] sm:$0xf0]  ;;  %v8614_v42 = vld [vmem:[#allocation3 + $0x2cc] sm:$0xf0] }
 0x4cc   :  { %6621 = vmatpush.bf16.msrb.mxu3 %v9509_v15  ;;  %v9173_v15 = vor.u32 %v10617_v62, %v9172_v48  ;;  %v8866_v62 = vld [vmem:[#allocation3 + $0x4c4] sm:$0xf0]  ;;  %v10530_v7 = vld [vmem:[#allocation3 + $0x474] sm:$0xf] }
 0x4cd   :  { %6634 = vmatpush.bf16.msra.mxu0 %v9733_v17  ;;  %v10785_v17 = vld [vmem:[#allocation3 + $0xc68] sm:$0xf0] }
 0x4ce   :  { %v9845_v34 = vor.u32 %v10785_v17, %v9844_v14  ;;  %v10467_v17 = vld [vmem:[#allocation3 + $0x27c] sm:$0xf] }
 0x4cf   :  { %6647 = vmatpush.bf16.msra.mxu1 %v9957_v21  ;;  %6609 = vmatpush.bf16.msrb.mxu2 %v9257_v54  ;;  %v10607_v21 = vld [vmem:[#allocation3 + $0x6dc] sm:$0xf]  ;;  %v9621_v54 = vor.u32 %v10729_v33, %v9620_v9  ;;  %v6369_v35 = vpop.f32.mrf.mxu3  ;;  %v8393_v9 = vor.u32 %v10418_v19, %v8390_v43  ;;  %v10586_v33 = vld [vmem:[#allocation3 + $0x634] sm:$0xf]  ;;  %v10565_v19 = vld [vmem:[#allocation3 + $0x58c] sm:$0xf] }
 0x4d0   :  { %6622 = vmatpush.bf16.msrb.mxu3 %v9481_v29  ;;  %v6356_v29 = vpop.f32.mrf.mxu2  ;;  %v8978_v43 = vld [vmem:[#allocation3 + $0x5a4] sm:$0xf0] }
 0x4d1   :  { %6635 = vmatpush.bf16.msra.mxu0 %v9705_v24  ;;  %v10488_v24 = vld [vmem:[#allocation3 + $0x324] sm:$0xf] }
 0x4d2   :  { %v8673_v30 = vor.u32 %v10488_v24, %v8670_v39  ;;  %v10404_v29 = vld [vmem:[#allocation3 + $0x84] sm:$0xf]  ;;  %v8558_v39 = vld [vmem:[#allocation3 + $0x25c] sm:$0xf0] }
 0x4d3   :  { %6648 = vmatpush.bf16.msra.mxu1 %v9929_v41  ;;  %6610 = vmatpush.bf16.msrb.mxu2 %v9229_v38  ;;  %v9149_v41 = vor.u32 %v10607_v21, %v9146_v22  ;;  %v11702_v38 = vld [vmem:[#allocation22] sm:$0xff]  ;;  %v9065_v21 = vor.u32 %v10586_v33, %v9062_v11  ;;  %v8810_v22 = vld [vmem:[#allocation3 + $0x454] sm:$0xf0]  ;;  %v10460_v24 = vld [vmem:[#allocation3 + $0x244] sm:$0xf] }
 0x4d4   :  { %6623 = vmatpush.bf16.msrb.mxu3 %v9453_v6  ;;  %v3821_v36 = vperm.slane %v11702_v38, 2  ;;  %v10600_v6 = vld [vmem:[#allocation3 + $0x6a4] sm:$0xf]  ;;  %v9594_v33 = vld [vmem:[#allocation3 + $0xa74] sm:$0xf0] }
 0x4d5   :  { %6636 = vmatpush.bf16.msra.mxu0 %v9677_v12  ;;  %v10425_v12 = vld [vmem:[#allocation3 + $0x12c] sm:$0xf]  ;;  %v9121_v48 = vor.u32 %v10600_v6, %v9118_v50  ;;  %v10572_v6 = vld [vmem:[#allocation3 + $0x5c4] sm:$0xf]  ;;  %v9006_v50 = vld [vmem:[#allocation3 + $0x5dc] sm:$0xf0] }
 0x4d6   :  { %v6355_v47 = vadd.f32 %v11698_v53, %v3821_v36  ;;  %v8421_v37 = vor.u32 %v10425_v12, %v8418_v61  ;;  %v10474_v53 = vld [vmem:[#allocation3 + $0x2b4] sm:$0xf]  ;;  %v10397_v12 = vld [vmem:[#allocation3 + $0x4c] sm:$0xf]  ;;  %v8306_v61 = vld [vmem:[#allocation3 + $0x64] sm:$0xf0] }
 0x4d7   :  { %6649 = vmatpush.bf16.msra.mxu1 %v9901_v56  ;;  %6611 = vmatpush.bf16.msrb.mxu2 %v9201_v28  ;;  %v10481_v56 = vld [vmem:[#allocation3 + $0x2ec] sm:$0xf]  ;;  %v8617_v13 = vor.u32 %v10474_v53, %v8614_v42  ;;  %v10446_v42 = vld [vmem:[#allocation3 + $0x1d4] sm:$0xf] }
 0x4d8   :  { %6624 = vmatpush.bf16.msrb.mxu3 %v9425_v1  ;;  %v10537_v28 = vld [vmem:[#allocation3 + $0x4ac] sm:$0xf]  ;;  %v9090_v1 = vld [vmem:[#allocation3 + $0x684] sm:$0xf0]  ;;  %v8645_v52 = vor.u32 %v10481_v56, %v8642_v57  ;;  %v6368_v45 = vadd.f32 %v11700_v59, %v6355_v47  ;;  %v10523_v59 = vld [vmem:[#allocation3 + $0x43c] sm:$0xf] }
 0x4d9   :  { %6637 = vmatpush.bf16.msra.mxu0 %v9649_v55  ;;  %v8869_v55 = vor.u32 %v10537_v28, %v8866_v62  ;;  %v9093_v5 = vor.u32 %v10593_v0, %v9090_v1  ;;  %v10453_v57 = vld [vmem:[#allocation3 + $0x20c] sm:$0xf]  ;;  %v8530_v47 = vld [vmem:[#allocation3 + $0x224] sm:$0xf0]  ;;  %v10390_v0 = vld [vmem:[#allocation3 + $0x14] sm:$0xf]  ;;  %v8309_v1 = vor.u32 %v10397_v12, %v8306_v61 }
 0x4da   :  { %v10509_v62 = vld [vmem:[#allocation3 + $0x3cc] sm:$0xf]  ;;  %v10824_v12 = vld [vmem:[#allocation3 + $0xda4] sm:$0xf]  ;;  %v10014_v61 = vld [vmem:[#allocation3 + $0xdbc] sm:$0xf0] }
 0x4db   :  { %6650 = vmatpush.bf16.msra.mxu1 %v9873_v8  ;;  %6612 = vmatpush.bf16.msrb.mxu2 %v9173_v15  ;;  %v8838_v8 = vld [vmem:[#allocation3 + $0x48c] sm:$0xf0]  ;;  %v10411_v15 = vld [vmem:[#allocation3 + $0xbc] sm:$0xf] }
 0x4dc   :  { %6625 = vmatpush.bf16.msrb.mxu3 %v9397_v18  ;;  %v8841_v14 = vor.u32 %v10530_v7, %v8838_v8  ;;  %v8586_v18 = vld [vmem:[#allocation3 + $0x294] sm:$0xf0] }
 0x4dd   :  { %6638 = vmatpush.bf16.msra.mxu0 %v9621_v54  ;;  %v10579_v54 = vld [vmem:[#allocation3 + $0x5fc] sm:$0xf]  ;;  %v8589_v26 = vor.u32 %v10467_v17, %v8586_v18  ;;  %v6432_v35 = vpop.f32.mrf.mxu0  ;;  %v9370_v8 = vld [vmem:[#allocation3 + $0x8b4] sm:$0xf0] }
 0x4de   :  { %6613 = vmatmul.bf16.vlgmr.msrb.gmra.mxu2 %v11620_v46  ;;  %v10775_v17 = vld [vmem:[#allocation3 + $0xc1c] sm:$0xf] }
 0x4df   :  { %6657 = vmatpush.bf16.msra.mxu2 %v8477_v20  ;;  %6651 = vmatpush.bf16.msra.mxu1 %v9845_v34  ;;  %v6381_v20 = vadd.f32 %v11694_v16, %v6368_v45  ;;  %v8813_v34 = vor.u32 %v10523_v59, %v8810_v22  ;;  %v9037_v16 = vor.u32 %v10579_v54, %v9034_v60  ;;  %v6445_v36 = vpop.f32.mrf.mxu1  ;;  %v8502_v45 = vld [vmem:[#allocation3 + $0x1ec] sm:$0xf0]  ;;  %v10558_v59 = vld [vmem:[#allocation3 + $0x554] sm:$0xf] }
 0x4e0   :  { %6670 = vmatpush.bf16.msra.mxu3 %v8701_v25  ;;  %6639 = vmatmul.bf16.vlgmr.msra.gmra.mxu0 %v11628_v32  ;;  %v8365_v25 = vor.u32 %v10411_v15, %v8362_v10  ;;  %v8981_v15 = vor.u32 %v10565_v19, %v8978_v43  ;;  %v10502_v10 = vld [vmem:[#allocation3 + $0x394] sm:$0xf]  ;;  %v8950_v22 = vld [vmem:[#allocation3 + $0x56c] sm:$0xf0]  ;;  %v9986_v19 = vld [vmem:[#allocation3 + $0xd84] sm:$0xf0] }
 0x4e1   :  { %6683 = vmatpush.bf16.msrb.mxu0 %v8925_v31  ;;  %6626 = vmatmul.bf16.vlgmr.msrb.gmra.mxu3 %v11624_v49  ;;  %v8334_v31 = vld [vmem:[#allocation3 + $0x9c] sm:$0xf0]  ;;  %v6406_v56 = vpop.f32.mrf.mxu2 }
 0x4e2   :  { %6652 = vmatmul.bf16.vlgmr.msra.gmra.mxu1 %v11632_v27 }
 0x4e3   :  { %6696 = vmatpush.bf16.msrb.mxu1 %v9149_v41  ;;  %6658 = vmatpush.bf16.msra.mxu2 %v8449_v51  ;;  %v6394_v41 = vadd.f32 %v11696_v40, %v6381_v20  ;;  %v8337_v51 = vor.u32 %v10404_v29, %v8334_v31  ;;  %v10042_v29 = vld [vmem:[#allocation3 + $0xdf4] sm:$0xf0] }
 0x4e4   :  { %6671 = vmatpush.bf16.msra.mxu3 %v8673_v30  ;;  %v8561_v30 = vor.u32 %v10460_v24, %v8558_v39  ;;  %v6419_v28 = vpop.f32.mrf.mxu3  ;;  %v10656_v24 = vld [vmem:[#allocation3 + $0x864] sm:$0xf]  ;;  %v9342_v39 = vld [vmem:[#allocation3 + $0x87c] sm:$0xf0] }
 0x4e5   :  { %6684 = vmatpush.bf16.msrb.mxu0 %v8897_v3  ;;  %v8785_v3 = vor.u32 %v10516_v44, %v8782_v23  ;;  %v6407_v40 = vadd.f32 %v6406_v56, %v6394_v41  ;;  %v6434_v11 = vpop.f32.mrf.mxu0  ;;  %v10712_v44 = vld [vmem:[#allocation3 + $0xa24] sm:$0xf]  ;;  %v9566_v23 = vld [vmem:[#allocation3 + $0xa3c] sm:$0xf0]  ;;  %v10649_v56 = vld [vmem:[#allocation3 + $0x82c] sm:$0xf] }
 0x4e6   :  { %v10810_v11 = vld [vmem:[#allocation3 + $0xd34] sm:$0xf] }
 0x4e7   :  { %6697 = vmatpush.bf16.msrb.mxu1 %v9121_v48  ;;  %6659 = vmatpush.bf16.msra.mxu2 %v8421_v37  ;;  %v9009_v48 = vor.u32 %v10572_v6, %v9006_v50  ;;  %v8754_v37 = vld [vmem:[#allocation3 + $0x3e4] sm:$0xf0]  ;;  %v6420_v53 = vadd.f32 %v6419_v28, %v6407_v40  ;;  %v6447_v18 = vpop.f32.mrf.mxu1  ;;  %v10768_v50 = vld [vmem:[#allocation3 + $0xbe4] sm:$0xf]  ;;  %v10705_v40 = vld [vmem:[#allocation3 + $0x9ec] sm:$0xf]  ;;  %v10017_v28 = vor.u32 %v10824_v12, %v10014_v61 }
 0x4e8   :  { %6672 = vmatpush.bf16.msra.mxu3 %v8645_v52  ;;  %v8278_v52 = vld [vmem:[#allocation3 + $0x2c] sm:$0xf0]  ;;  %v8757_v7 = vor.u32 %v10509_v62, %v8754_v37  ;;  %v10761_v62 = vld [vmem:[#allocation3 + $0xbac] sm:$0xf]  ;;  %v9762_v37 = vld [vmem:[#allocation3 + $0xbc4] sm:$0xf0] }
 0x4e9   :  { %6685 = vmatpush.bf16.msrb.mxu0 %v8869_v55  ;;  %v8533_v55 = vor.u32 %v10453_v57, %v8530_v47  ;;  %v8281_v20 = vor.u32 %v10390_v0, %v8278_v52  ;;  %v9314_v57 = vld [vmem:[#allocation3 + $0x844] sm:$0xf0]  ;;  %v10817_v52 = vld [vmem:[#allocation3 + $0xd6c] sm:$0xf]  ;;  %v10691_v18 = vld [vmem:[#allocation3 + $0x97c] sm:$0xf] }
 0x4ea   :  { %v9202_v12 = vld [vmem:[#allocation3 + $0x764] sm:$0xf0] }
 0x4eb   :  { %6698 = vmatpush.bf16.msrb.mxu1 %v9093_v5  ;;  %6660 = vmatpush.bf16.msra.mxu2 %v8393_v9  ;;  %v10663_v5 = vld [vmem:[#allocation3 + $0x89c] sm:$0xf] }
 0x4ec   :  { %6673 = vmatpush.bf16.msra.mxu3 %v8617_v13  ;;  %v10719_v9 = vld [vmem:[#allocation3 + $0xa5c] sm:$0xf]  ;;  %v6433_v13 = vadd.f32 %v6432_v35, %v6420_v53  ;;  %v9373_v60 = vor.u32 %v10663_v5, %v9370_v8  ;;  %v6408_v35 = vpop.f32.mrf.mxu2  ;;  %v9286_v53 = vld [vmem:[#allocation3 + $0x80c] sm:$0xf0]  ;;  %v10754_v8 = vld [vmem:[#allocation3 + $0xb74] sm:$0xf] }
 0x4ed   :  { %6686 = vmatpush.bf16.msrb.mxu0 %v8841_v14  ;;  %v8726_v14 = vld [vmem:[#allocation3 + $0x3ac] sm:$0xf0]  ;;  %v9597_v31 = vor.u32 %v10719_v9, %v9594_v33 }
 0x4ee   :  { %v6446_v54 = vadd.f32 %v6445_v36, %v6433_v13  ;;  %v9790_v36 = vld [vmem:[#allocation3 + $0xbfc] sm:$0xf0]  ;;  %v9510_v5 = vld [vmem:[#allocation3 + $0x9cc] sm:$0xf0] }
 0x4ef   :  { %6699 = vmatpush.bf16.msrb.mxu1 %v9065_v21  ;;  %6661 = vmatpush.bf16.msra.mxu2 %v8365_v25  ;;  %v9818_v21 = vld [vmem:[#allocation3 + $0xc34] sm:$0xf0]  ;;  %v8505_v25 = vor.u32 %v10446_v42, %v8502_v45  ;;  %v9793_v47 = vor.u32 %v10768_v50, %v9790_v36  ;;  %v9765_v42 = vor.u32 %v10761_v62, %v9762_v37  ;;  %v10698_v45 = vld [vmem:[#allocation3 + $0x9b4] sm:$0xf]  ;;  %v9734_v9 = vld [vmem:[#allocation3 + $0xb8c] sm:$0xf0] }
 0x4f0   :  { %6674 = vmatpush.bf16.msra.mxu3 %v8589_v26  ;;  %v10831_v26 = vld [vmem:[#allocation3 + $0xddc] sm:$0xf]  ;;  %10886 = vtanh.f32 %v6446_v54  ;;  %v9821_v41 = vor.u32 %v10775_v17, %v9818_v21  ;;  %v9958_v13 = vld [vmem:[#allocation3 + $0xd4c] sm:$0xf0]  ;;  %v9737_v17 = vor.u32 %v10754_v8, %v9734_v9  ;;  %v9902_v50 = vld [vmem:[#allocation3 + $0xcdc] sm:$0xf0] }
 0x4f1   :  { %6687 = vmatpush.bf16.msrb.mxu0 %v8813_v34  ;;  %v8729_v34 = vor.u32 %v10502_v10, %v8726_v14  ;;  %v10045_v6 = vor.u32 %v10831_v26, %v10042_v29  ;;  %v10635_v10 = vld [vmem:[#allocation3 + $0x7bc] sm:$0xf]  ;;  %v9258_v14 = vld [vmem:[#allocation3 + $0x7d4] sm:$0xf0]  ;;  %v9961_v21 = vor.u32 %v10810_v11, %v9958_v13  ;;  %v10628_v29 = vld [vmem:[#allocation3 + $0x784] sm:$0xf] }
 0x4f2   :  { %v10803_v54 = vld [vmem:[#allocation3 + $0xcfc] sm:$0xf]  ;;  %v9622_v11 = vld [vmem:[#allocation3 + $0xaac] sm:$0xf0]  ;;  %v8928_v13 = vld [vmem:[#allocation3 + $0x520] sm:$0xf] }
 0x4f3   :  { %6700 = vmatpush.bf16.msrb.mxu1 %v9037_v16  ;;  %6662 = vmatpush.bf16.msra.mxu2 %v8337_v51  ;;  %v8953_v16 = vor.u32 %v10558_v59, %v8950_v22  ;;  %v6421_v51 = vpop.f32.mrf.mxu3  ;;  %v10747_v59 = vld [vmem:[#allocation3 + $0xb3c] sm:$0xf]  ;;  %v9706_v22 = vld [vmem:[#allocation3 + $0xb54] sm:$0xf0] }
 0x4f4   :  { %6675 = vmatpush.bf16.msra.mxu3 %v8561_v30  ;;  %v9345_v30 = vor.u32 %v10656_v24, %v9342_v39  ;;  %v10684_v24 = vld [vmem:[#allocation3 + $0x944] sm:$0xf]  ;;  %v9454_v39 = vld [vmem:[#allocation3 + $0x95c] sm:$0xf0] }
 0x4f5   :  { %6688 = vmatpush.bf16.msrb.mxu0 %v8785_v3  ;;  %v9569_v3 = vor.u32 %v10712_v44, %v9566_v23  ;;  %v9678_v44 = vld [vmem:[#allocation3 + $0xb1c] sm:$0xf0]  ;;  %v9457_v36 = vor.u32 %v10684_v24, %v9454_v39  ;;  %v8676_v24 = vld [vmem:[#allocation3 + $0x328] sm:$0xf]  ;;  %v10492_v39 = vld [vmem:[#allocation3 + $0x340] sm:$0xf0] }
 0x4f6   :  { %v10887_v0 = vpop.eup %10886 }
 0x4f7   :  { %6701 = vmatpush.bf16.msrb.mxu1 %v9009_v48  ;;  %6663 = vmatpush.bf16.msra.mxu2 %v8309_v1  ;;  %v9538_v48 = vld [vmem:[#allocation3 + $0xa04] sm:$0xf0]  ;;  %v9317_v1 = vor.u32 %v10649_v56, %v9314_v57  ;;  %6874 = vst [vmem:[#allocation23 + $0x10] sm:$0xff] %v10887_v0  ;;  %v9174_v0 = vld [vmem:[#allocation3 + $0x72c] sm:$0xf0] }
 0x4f8   :  { %6676 = vmatpush.bf16.msra.mxu3 %v8533_v55  ;;  %v9541_v43 = vor.u32 %v10705_v40, %v9538_v48  ;;  %v10642_v55 = vld [vmem:[#allocation3 + $0x7f4] sm:$0xf]  ;;  %v9426_v56 = vld [vmem:[#allocation3 + $0x924] sm:$0xf0]  ;;  %v10733_v40 = vld [vmem:[#allocation3 + $0xacc] sm:$0xf] }
 0x4f9   :  { %6689 = vmatpush.bf16.msrb.mxu0 %v8757_v7  ;;  %v9989_v7 = vor.u32 %v10817_v52, %v9986_v19  ;;  %v9289_v33 = vor.u32 %v10642_v55, %v9286_v53  ;;  %v9650_v48 = vld [vmem:[#allocation3 + $0xae4] sm:$0xf0]  ;;  %v9398_v55 = vld [vmem:[#allocation3 + $0x8ec] sm:$0xf0]  ;;  %v8480_v53 = vld [vmem:[#allocation3 + $0x1a0] sm:$0xf] }
 0x4fa   :  { %v9874_v52 = vld [vmem:[#allocation3 + $0xca4] sm:$0xf0] }
 0x4fb   :  { %6702 = vmatpush.bf16.msrb.mxu1 %v8981_v15  ;;  %6664 = vmatpush.bf16.msra.mxu2 %v8281_v20  ;;  %v9513_v15 = vor.u32 %v10698_v45, %v9510_v5  ;;  %v9482_v20 = vld [vmem:[#allocation3 + $0x994] sm:$0xf0]  ;;  %v10443_v45 = vld [vmem:[#allocation3 + $0x1b8] sm:$0xf0]  ;;  %v8704_v5 = vld [vmem:[#allocation3 + $0x360] sm:$0xf] }
 0x4fc   :  { %6677 = vmatpush.bf16.msra.mxu3 %v8505_v25  ;;  %v9261_v25 = vor.u32 %v10635_v10, %v9258_v14  ;;  %v9485_v26 = vor.u32 %v10691_v18, %v9482_v20  ;;  %v10555_v14 = vld [vmem:[#allocation3 + $0x538] sm:$0xf0]  ;;  %v9846_v18 = vld [vmem:[#allocation3 + $0xc6c] sm:$0xf0] }
 0x4fd   :  { %6690 = vmatpush.bf16.msrb.mxu0 %v8729_v34  ;;  %v9709_v34 = vor.u32 %v10747_v59, %v9706_v22  ;;  %v11717_v35 = vpop.f32.mrf.mxu0  ;;  %v9152_v59 = vld [vmem:[#allocation3 + $0x6e0] sm:$0xf]  ;;  %v10611_v22 = vld [vmem:[#allocation3 + $0x6f8] sm:$0xf0] }
 0x4fe   :  { %6665 = vmatmul.bf16.vlgmr.msra.gmra.mxu2 %v11600_v58 }
 0x4ff   :  { %6709 = vmatpush.bf16.msrb.mxu2 %v9373_v60  ;;  %6703 = vmatpush.bf16.msrb.mxu1 %v8953_v16  ;;  %v9930_v60 = vld [vmem:[#allocation3 + $0xd14] sm:$0xf0]  ;;  %v10740_v16 = vld [vmem:[#allocation3 + $0xb04] sm:$0xf]  ;;  %v11719_v23 = vpop.f32.mrf.mxu1 }
 0x500   :  { %6722 = vmatpush.bf16.msrb.mxu3 %v9597_v31  ;;  %6691 = vmatmul.bf16.vlgmr.msrb.gmra.mxu0 %v11608_v2  ;;  %v9230_v31 = vld [vmem:[#allocation3 + $0x79c] sm:$0xf0]  ;;  %v9681_v61 = vor.u32 %v10740_v16, %v9678_v44  ;;  %v9153_v16 = vor.u32 %v10611_v22, %v9152_v59  ;;  %v8900_v44 = vld [vmem:[#allocation3 + $0x4e8] sm:$0xf]  ;;  %v10527_v59 = vld [vmem:[#allocation3 + $0x458] sm:$0xf0] }
 0x501   :  { %6735 = vmatpush.bf16.msra.mxu0 %v9821_v41  ;;  %6678 = vmatmul.bf16.vlgmr.msra.gmra.mxu3 %v11604_v63  ;;  %v9933_v41 = vor.u32 %v10803_v54, %v9930_v60  ;;  %v9233_v51 = vor.u32 %v10628_v29, %v9230_v31  ;;  %v11721_v57 = vpop.f32.mrf.mxu2  ;;  %v8452_v60 = vld [vmem:[#allocation3 + $0x168] sm:$0xf]  ;;  %v8929_v31 = vor.u32 %v10555_v14, %v8928_v13 }
 0x502   :  { %6704 = vmatmul.bf16.vlgmr.msrb.gmra.mxu1 %v11612_v4 }
 0x503   :  { %6748 = vmatpush.bf16.msra.mxu1 %v10045_v6  ;;  %6710 = vmatpush.bf16.msrb.mxu2 %v9345_v30  ;;  %v10796_v6 = vld [vmem:[#allocation3 + $0xcc4] sm:$0xf]  ;;  %v10621_v30 = vld [vmem:[#allocation3 + $0x74c] sm:$0xf] }
 0x504   :  { %6723 = vmatpush.bf16.msrb.mxu3 %v9569_v3  ;;  %v10677_v3 = vld [vmem:[#allocation3 + $0x90c] sm:$0xf]  ;;  %v11723_v62 = vpop.f32.mrf.mxu3  ;;  %v9205_v37 = vor.u32 %v10621_v30, %v9202_v12  ;;  %v10604_v30 = vld [vmem:[#allocation3 + $0x6c0] sm:$0xf0]  ;;  %v8677_v12 = vor.u32 %v10492_v39, %v8676_v24 }
 0x505   :  { %6736 = vmatpush.bf16.msra.mxu0 %v9793_v47  ;;  %v9905_v47 = vor.u32 %v10796_v6, %v9902_v50  ;;  %v9429_v19 = vor.u32 %v10677_v3, %v9426_v56  ;;  %v6486_v8 = vpop.f32.mrf.mxu0  ;;  %v3822_v6 = vperm.slane %v11702_v38, 3  ;;  %v10429_v3 = vld [vmem:[#allocation3 + $0x148] sm:$0xf0]  ;;  %v10464_v24 = vld [vmem:[#allocation3 + $0x260] sm:$0xf0] }
 0x506   :  { %v10534_v8 = vld [vmem:[#allocation3 + $0x490] sm:$0xf0] }
 0x507   :  { %6749 = vmatpush.bf16.msra.mxu1 %v10017_v28  ;;  %6711 = vmatpush.bf16.msrb.mxu2 %v9317_v1  ;;  %v10614_v28 = vld [vmem:[#allocation3 + $0x714] sm:$0xf]  ;;  %v10789_v1 = vld [vmem:[#allocation3 + $0xc8c] sm:$0xf] }
 0x508   :  { %6724 = vmatpush.bf16.msrb.mxu3 %v9541_v43  ;;  %v10670_v43 = vld [vmem:[#allocation3 + $0x8d4] sm:$0xf]  ;;  %v9877_v9 = vor.u32 %v10789_v1, %v9874_v52  ;;  %v9177_v10 = vor.u32 %v10614_v28, %v9174_v0  ;;  %v8872_v28 = vld [vmem:[#allocation3 + $0x4b0] sm:$0xf]  ;;  %v10597_v52 = vld [vmem:[#allocation3 + $0x688] sm:$0xf0] }
 0x509   :  { %6737 = vmatpush.bf16.msra.mxu0 %v9765_v42  ;;  %v9653_v42 = vor.u32 %v10733_v40, %v9650_v48  ;;  %v9401_v20 = vor.u32 %v10670_v43, %v9398_v55  ;;  %v6460_v29 = vpop.f32.mrf.mxu2  ;;  %v10485_v40 = vld [vmem:[#allocation3 + $0x308] sm:$0xf0]  ;;  %v6459_v48 = vadd.f32 %v11721_v57, %v3822_v6  ;;  %v9096_v1 = vld [vmem:[#allocation3 + $0x670] sm:$0xf]  ;;  %v8396_v43 = vld [vmem:[#allocation3 + $0xf8] sm:$0xf] }
 0x50a   :  { %v10422_v55 = vld [vmem:[#allocation3 + $0x110] sm:$0xf0]  ;;  %v8620_v57 = vld [vmem:[#allocation3 + $0x2b8] sm:$0xf]  ;;  %v10408_v29 = vld [vmem:[#allocation3 + $0xa0] sm:$0xf0] }
 0x50b   :  { %6750 = vmatpush.bf16.msra.mxu1 %v9989_v7  ;;  %6712 = vmatpush.bf16.msrb.mxu2 %v9289_v33  ;;  %v10499_v7 = vld [vmem:[#allocation3 + $0x378] sm:$0xf0]  ;;  %v10726_v33 = vld [vmem:[#allocation3 + $0xa94] sm:$0xf] }
 0x50c   :  { %6725 = vmatpush.bf16.msrb.mxu3 %v9513_v15  ;;  %v6499_v15 = vpop.f32.mrf.mxu1  ;;  %v9625_v54 = vor.u32 %v10726_v33, %v9622_v11  ;;  %v9068_v33 = vld [vmem:[#allocation3 + $0x638] sm:$0xf]  ;;  %v10590_v11 = vld [vmem:[#allocation3 + $0x650] sm:$0xf0] }
 0x50d   :  { %6738 = vmatpush.bf16.msra.mxu0 %v9737_v17  ;;  %v10782_v17 = vld [vmem:[#allocation3 + $0xc54] sm:$0xf]  ;;  %v8368_v15 = vld [vmem:[#allocation3 + $0xc0] sm:$0xf] }
 0x50f   :  { %6751 = vmatpush.bf16.msra.mxu1 %v9961_v21  ;;  %6713 = vmatpush.bf16.msrb.mxu2 %v9261_v25  ;;  %v8481_v21 = vor.u32 %v10443_v45, %v8480_v53  ;;  %v8705_v25 = vor.u32 %v10499_v7, %v8704_v5  ;;  %v6472_v45 = vadd.f32 %v11723_v62, %v6459_v48  ;;  %v8844_v7 = vld [vmem:[#allocation3 + $0x478] sm:$0xf]  ;;  %v8816_v62 = vld [vmem:[#allocation3 + $0x440] sm:$0xf] }
 0x510   :  { %6726 = vmatpush.bf16.msrb.mxu3 %v9485_v26  ;;  %v10436_v26 = vld [vmem:[#allocation3 + $0x180] sm:$0xf0]  ;;  %v9097_v5 = vor.u32 %v10597_v52, %v9096_v1  ;;  %v8845_v14 = vor.u32 %v10534_v8, %v8844_v7  ;;  %v10394_v52 = vld [vmem:[#allocation3 + $0x30] sm:$0xf0]  ;;  %v10667_v7 = vld [vmem:[#allocation3 + $0x8b8] sm:$0xf0] }
 0x511   :  { %6739 = vmatpush.bf16.msra.mxu0 %v9709_v34  ;;  %v9849_v34 = vor.u32 %v10782_v17, %v9846_v18  ;;  %v8453_v50 = vor.u32 %v10436_v26, %v8452_v60  ;;  %v8592_v17 = vld [vmem:[#allocation3 + $0x280] sm:$0xf]  ;;  %v10471_v18 = vld [vmem:[#allocation3 + $0x298] sm:$0xf0]  ;;  %v8340_v26 = vld [vmem:[#allocation3 + $0x88] sm:$0xf] }
 0x512   :  { %v8593_v60 = vor.u32 %v10471_v18, %v8592_v17  ;;  %v8341_v6 = vor.u32 %v10408_v29, %v8340_v26  ;;  %v9600_v8 = vld [vmem:[#allocation3 + $0xa60] sm:$0xf] }
 0x513   :  { %6752 = vmatpush.bf16.msra.mxu1 %v9933_v41  ;;  %6714 = vmatpush.bf16.msrb.mxu2 %v9233_v51  ;;  %v6473_v41 = vpop.f32.mrf.mxu3  ;;  %v10548_v51 = vld [vmem:[#allocation3 + $0x500] sm:$0xf0] }
 0x514   :  { %6727 = vmatpush.bf16.msrb.mxu3 %v9457_v36  ;;  %v9124_v36 = vld [vmem:[#allocation3 + $0x6a8] sm:$0xf]  ;;  %v8901_v56 = vor.u32 %v10548_v51, %v8900_v44  ;;  %v10520_v44 = vld [vmem:[#allocation3 + $0x420] sm:$0xf0] }
 0x515   :  { %6740 = vmatpush.bf16.msra.mxu0 %v9681_v61  ;;  %v8424_v61 = vld [vmem:[#allocation3 + $0x130] sm:$0xf]  ;;  %v9125_v38 = vor.u32 %v10604_v30, %v9124_v36  ;;  %v10576_v36 = vld [vmem:[#allocation3 + $0x5e0] sm:$0xf0] }
 0x516   :  { %v8425_v0 = vor.u32 %v10429_v3, %v8424_v61  ;;  %v10401_v61 = vld [vmem:[#allocation3 + $0x68] sm:$0xf0] }
 0x517   :  { %6753 = vmatpush.bf16.msra.mxu1 %v9905_v47  ;;  %6715 = vmatpush.bf16.msrb.mxu2 %v9205_v37  ;;  %v8648_v47 = vld [vmem:[#allocation3 + $0x2f0] sm:$0xf]  ;;  %v10541_v37 = vld [vmem:[#allocation3 + $0x4c8] sm:$0xf0] }
 0x518   :  { %6728 = vmatpush.bf16.msrb.mxu3 %v9429_v19  ;;  %v8649_v19 = vor.u32 %v10485_v40, %v8648_v47  ;;  %v8873_v53 = vor.u32 %v10541_v37, %v8872_v28  ;;  %v8536_v47 = vld [vmem:[#allocation3 + $0x210] sm:$0xf]  ;;  %v10457_v40 = vld [vmem:[#allocation3 + $0x228] sm:$0xf0] }
 0x519   :  { %6741 = vmatpush.bf16.msra.mxu0 %v9653_v42  ;;  %v10478_v42 = vld [vmem:[#allocation3 + $0x2d0] sm:$0xf0]  ;;  %v8760_v28 = vld [vmem:[#allocation3 + $0x3d0] sm:$0xf]  ;;  %v10513_v37 = vld [vmem:[#allocation3 + $0x3e8] sm:$0xf0] }
 0x51a   :  { %v8621_v13 = vor.u32 %v10478_v42, %v8620_v57  ;;  %v8508_v57 = vld [vmem:[#allocation3 + $0x1d8] sm:$0xf]  ;;  %v10450_v42 = vld [vmem:[#allocation3 + $0x1f0] sm:$0xf0] }
 0x51b   :  { %6754 = vmatpush.bf16.msra.mxu1 %v9877_v9  ;;  %6716 = vmatpush.bf16.msrb.mxu2 %v9177_v10  ;;  %v8397_v9 = vor.u32 %v10422_v55, %v8396_v43  ;;  %v10415_v10 = vld [vmem:[#allocation3 + $0xd8] sm:$0xf0]  ;;  %v10569_v43 = vld [vmem:[#allocation3 + $0x5a8] sm:$0xf0]  ;;  %v8537_v55 = vor.u32 %v10457_v40, %v8536_v47  ;;  %v9544_v40 = vld [vmem:[#allocation3 + $0x9f0] sm:$0xf] }
 0x51c   :  { %6729 = vmatpush.bf16.msrb.mxu3 %v9401_v20  ;;  %v6485_v20 = vadd.f32 %v11717_v35, %v6472_v45  ;;  %v8369_v22 = vor.u32 %v10415_v10, %v8368_v15  ;;  %v9376_v45 = vld [vmem:[#allocation3 + $0x8a0] sm:$0xf]  ;;  %v8732_v15 = vld [vmem:[#allocation3 + $0x398] sm:$0xf]  ;;  %v10506_v10 = vld [vmem:[#allocation3 + $0x3b0] sm:$0xf0] }
 0x51d   :  { %6742 = vmatpush.bf16.msra.mxu0 %v9625_v54  ;;  %v10583_v54 = vld [vmem:[#allocation3 + $0x618] sm:$0xf0]  ;;  %v6536_v39 = vpop.f32.mrf.mxu0  ;;  %v8733_v29 = vor.u32 %v10506_v10, %v8732_v15 }
 0x51e   :  { %6717 = vmatmul.bf16.vlgmr.msrb.gmra.mxu2 %v11620_v46  ;;  %v6498_v41 = vadd.f32 %v11719_v23, %v6485_v20  ;;  %v10779_v20 = vld [vmem:[#allocation3 + $0xc38] sm:$0xf0] }
 0x51f   :  { %6761 = vmatpush.bf16.msra.mxu2 %v8481_v21  ;;  %6755 = vmatpush.bf16.msra.mxu1 %v9849_v34  ;;  %v9069_v21 = vor.u32 %v10590_v11, %v9068_v33  ;;  %v8564_v34 = vld [vmem:[#allocation3 + $0x248] sm:$0xf]  ;;  %v6549_v51 = vpop.f32.mrf.mxu1  ;;  %v10695_v15 = vld [vmem:[#allocation3 + $0x998] sm:$0xf0] }
 0x520   :  { %6774 = vmatpush.bf16.msra.mxu3 %v8705_v25  ;;  %6743 = vmatmul.bf16.vlgmr.msra.gmra.mxu0 %v11628_v32  ;;  %v9040_v25 = vld [vmem:[#allocation3 + $0x600] sm:$0xf]  ;;  %v8565_v30 = vor.u32 %v10464_v24, %v8564_v34  ;;  %v10660_v34 = vld [vmem:[#allocation3 + $0x880] sm:$0xf0] }
 0x521   :  { %6787 = vmatpush.bf16.msrb.mxu0 %v8929_v31  ;;  %6730 = vmatmul.bf16.vlgmr.msrb.gmra.mxu3 %v11624_v49  ;;  %v8817_v31 = vor.u32 %v10527_v59, %v8816_v62  ;;  %v9041_v35 = vor.u32 %v10583_v54, %v9040_v25  ;;  %v10562_v62 = vld [vmem:[#allocation3 + $0x570] sm:$0xf0]  ;;  %v8509_v59 = vor.u32 %v10450_v42, %v8508_v57  ;;  %v10048_v54 = vld [vmem:[#allocation3 + $0xde0] sm:$0xf] }
 0x522   :  { %6756 = vmatmul.bf16.vlgmr.msra.gmra.mxu1 %v11632_v27  ;;  %v9377_v25 = vor.u32 %v10667_v7, %v9376_v45  ;;  %v10702_v57 = vld [vmem:[#allocation3 + $0x9d0] sm:$0xf0]  ;;  %v9740_v45 = vld [vmem:[#allocation3 + $0xb78] sm:$0xf] }
 0x523   :  { %6800 = vmatpush.bf16.msrb.mxu1 %v9153_v16  ;;  %6762 = vmatpush.bf16.msra.mxu2 %v8453_v50  ;;  %v8788_v16 = vld [vmem:[#allocation3 + $0x408] sm:$0xf]  ;;  %v9964_v7 = vld [vmem:[#allocation3 + $0xd38] sm:$0xf] }
 0x524   :  { %6775 = vmatpush.bf16.msra.mxu3 %v8677_v12  ;;  %v9012_v50 = vld [vmem:[#allocation3 + $0x5c8] sm:$0xf]  ;;  %v8312_v12 = vld [vmem:[#allocation3 + $0x50] sm:$0xf]  ;;  %v8789_v3 = vor.u32 %v10520_v44, %v8788_v16  ;;  %v10716_v16 = vld [vmem:[#allocation3 + $0xa40] sm:$0xf0] }
 0x525   :  { %6788 = vmatpush.bf16.msrb.mxu0 %v8901_v56  ;;  %v6510_v56 = vpop.f32.mrf.mxu2  ;;  %v9013_v48 = vor.u32 %v10576_v36, %v9012_v50  ;;  %v8313_v1 = vor.u32 %v10401_v61, %v8312_v12  ;;  %v6538_v33 = vpop.f32.mrf.mxu0  ;;  %v9796_v50 = vld [vmem:[#allocation3 + $0xbe8] sm:$0xf]  ;;  %v10828_v12 = vld [vmem:[#allocation3 + $0xdc0] sm:$0xf0] }
 0x526   :  { %v6511_v23 = vadd.f32 %v6510_v56, %v6498_v41  ;;  %v10653_v56 = vld [vmem:[#allocation3 + $0x848] sm:$0xf0]  ;;  %v9264_v33 = vld [vmem:[#allocation3 + $0x7c0] sm:$0xf] }
 0x527   :  { %6801 = vmatpush.bf16.msrb.mxu1 %v9125_v38  ;;  %6763 = vmatpush.bf16.msra.mxu2 %v8425_v0  ;;  %v6523_v38 = vpop.f32.mrf.mxu3  ;;  %v8284_v0 = vld [vmem:[#allocation3 + $0x18] sm:$0xf]  ;;  %v6551_v17 = vpop.f32.mrf.mxu1 }
 0x528   :  { %6776 = vmatpush.bf16.msra.mxu3 %v8649_v19  ;;  %v8984_v19 = vld [vmem:[#allocation3 + $0x590] sm:$0xf]  ;;  %v8285_v18 = vor.u32 %v10394_v52, %v8284_v0  ;;  %v10821_v52 = vld [vmem:[#allocation3 + $0xd88] sm:$0xf0] }
 0x529   :  { %6789 = vmatpush.bf16.msrb.mxu0 %v8873_v53  ;;  %v6524_v53 = vadd.f32 %v6523_v38, %v6511_v23  ;;  %v10709_v23 = vld [vmem:[#allocation3 + $0xa08] sm:$0xf0]  ;;  %v9768_v38 = vld [vmem:[#allocation3 + $0xbb0] sm:$0xf] }
 0x52b   :  { %6802 = vmatpush.bf16.msrb.mxu1 %v9097_v5  ;;  %6764 = vmatpush.bf16.msra.mxu2 %v8397_v9  ;;  %v8761_v5 = vor.u32 %v10513_v37, %v8760_v28  ;;  %v10723_v9 = vld [vmem:[#allocation3 + $0xa78] sm:$0xf0]  ;;  %v6537_v11 = vadd.f32 %v6536_v39, %v6524_v53  ;;  %v10765_v28 = vld [vmem:[#allocation3 + $0xbc8] sm:$0xf0] }
 0x52c   :  { %6777 = vmatpush.bf16.msra.mxu3 %v8621_v13  ;;  %v8985_v13 = vor.u32 %v10569_v43, %v8984_v19  ;;  %v9601_v26 = vor.u32 %v10723_v9, %v9600_v8  ;;  %v9545_v19 = vor.u32 %v10709_v23, %v9544_v40  ;;  %v9292_v43 = vld [vmem:[#allocation3 + $0x7f8] sm:$0xf]  ;;  %v9769_v53 = vor.u32 %v10765_v28, %v9768_v38  ;;  %v10814_v8 = vld [vmem:[#allocation3 + $0xd50] sm:$0xf0]  ;;  %v10793_v40 = vld [vmem:[#allocation3 + $0xca8] sm:$0xf0] }
 0x52d   :  { %6790 = vmatpush.bf16.msrb.mxu0 %v8845_v14  ;;  %v9824_v14 = vld [vmem:[#allocation3 + $0xc20] sm:$0xf]  ;;  %v6512_v24 = vpop.f32.mrf.mxu2  ;;  %v9965_v10 = vor.u32 %v10814_v8, %v9964_v7  ;;  %v10618_v38 = vld [vmem:[#allocation3 + $0x730] sm:$0xf0]  ;;  %v11742_v8 = vld [vmem:[#allocation22] sm:$0xff] }
 0x52e   :  { %v9825_v39 = vor.u32 %v10779_v20, %v9824_v14  ;;  %v9712_v14 = vld [vmem:[#allocation3 + $0xb40] sm:$0xf]  ;;  %v10807_v20 = vld [vmem:[#allocation3 + $0xd18] sm:$0xf0] }
 0x52f   :  { %6803 = vmatpush.bf16.msrb.mxu1 %v9069_v21  ;;  %6765 = vmatpush.bf16.msra.mxu2 %v8369_v22  ;;  %v8956_v21 = vld [vmem:[#allocation3 + $0x558] sm:$0xf]  ;;  %v6550_v22 = vadd.f32 %v6549_v51, %v6537_v11  ;;  %v6525_v44 = vpop.f32.mrf.mxu3  ;;  %v10772_v51 = vld [vmem:[#allocation3 + $0xc00] sm:$0xf0]  ;;  %v10639_v11 = vld [vmem:[#allocation3 + $0x7d8] sm:$0xf0] }
 0x530   :  { %6778 = vmatpush.bf16.msra.mxu3 %v8593_v60  ;;  %v10835_v60 = vld [vmem:[#allocation3 + $0xdf8] sm:$0xf0]  ;;  %v8957_v41 = vor.u32 %v10562_v62, %v8956_v21  ;;  %v9797_v47 = vor.u32 %v10772_v51, %v9796_v50  ;;  %v9265_v17 = vor.u32 %v10639_v11, %v9264_v33  ;;  %v9236_v62 = vld [vmem:[#allocation3 + $0x788] sm:$0xf]  ;;  %v10625_v44 = vld [vmem:[#allocation3 + $0x768] sm:$0xf0] }
 0x531   :  { %6791 = vmatpush.bf16.msrb.mxu0 %v8817_v31  ;;  %v9348_v31 = vld [vmem:[#allocation3 + $0x868] sm:$0xf]  ;;  %10888 = vtanh.f32 %v6550_v22  ;;  %v9432_v50 = vld [vmem:[#allocation3 + $0x910] sm:$0xf]  ;;  %v10681_v51 = vld [vmem:[#allocation3 + $0x928] sm:$0xf0] }
 0x532   :  { %v9349_v36 = vor.u32 %v10660_v34, %v9348_v31  ;;  %v10744_v31 = vld [vmem:[#allocation3 + $0xb20] sm:$0xf0]  ;;  %v9433_v23 = vor.u32 %v10681_v51, %v9432_v50 }
 0x533   :  { %6804 = vmatpush.bf16.msrb.mxu1 %v9041_v35  ;;  %6766 = vmatpush.bf16.msra.mxu2 %v8341_v6  ;;  %v9572_v35 = vld [vmem:[#allocation3 + $0xa28] sm:$0xf]  ;;  %v10049_v6 = vor.u32 %v10835_v60, %v10048_v54  ;;  %v10688_v54 = vld [vmem:[#allocation3 + $0x960] sm:$0xf0] }
 0x534   :  { %6779 = vmatpush.bf16.msra.mxu3 %v8565_v30  ;;  %v10020_v30 = vld [vmem:[#allocation3 + $0xda8] sm:$0xf]  ;;  %v9573_v61 = vor.u32 %v10716_v16, %v9572_v35  ;;  %v9208_v16 = vld [vmem:[#allocation3 + $0x750] sm:$0xf] }
 0x535   :  { %6792 = vmatpush.bf16.msrb.mxu0 %v8789_v3  ;;  %v9320_v3 = vld [vmem:[#allocation3 + $0x830] sm:$0xf] }
 0x536   :  { %v9321_v0 = vor.u32 %v10653_v56, %v9320_v3  ;;  %v9209_v56 = vor.u32 %v10625_v44, %v9208_v16 }
 0x537   :  { %6805 = vmatpush.bf16.msrb.mxu1 %v9013_v48  ;;  %6767 = vmatpush.bf16.msra.mxu2 %v8313_v1  ;;  %v10021_v48 = vor.u32 %v10828_v12, %v10020_v30  ;;  %v10889_v37 = vpop.eup %10888  ;;  %v9992_v1 = vld [vmem:[#allocation3 + $0xd70] sm:$0xf] }
 0x538   :  { %6780 = vmatpush.bf16.msra.mxu3 %v8537_v55  ;;  %6875 = vst [vmem:[#allocation23 + $0x18] sm:$0xff] %v10889_v37  ;;  %v10646_v55 = vld [vmem:[#allocation3 + $0x810] sm:$0xf0]  ;;  %v9993_v42 = vor.u32 %v10821_v52, %v9992_v1  ;;  %v9656_v12 = vld [vmem:[#allocation3 + $0xad0] sm:$0xf] }
 0x539   :  { %6793 = vmatpush.bf16.msrb.mxu0 %v8761_v5  ;;  %v10758_v5 = vld [vmem:[#allocation3 + $0xb90] sm:$0xf0]  ;;  %v9404_v37 = vld [vmem:[#allocation3 + $0x8d8] sm:$0xf] }
 0x53b   :  { %6806 = vmatpush.bf16.msrb.mxu1 %v8985_v13  ;;  %6768 = vmatpush.bf16.msra.mxu2 %v8285_v18  ;;  %v9488_v13 = vld [vmem:[#allocation3 + $0x980] sm:$0xf] }
 0x53c   :  { %6781 = vmatpush.bf16.msra.mxu3 %v8509_v59  ;;  %v9936_v18 = vld [vmem:[#allocation3 + $0xd00] sm:$0xf]  ;;  %v9489_v21 = vor.u32 %v10695_v15, %v9488_v13  ;;  %v10632_v59 = vld [vmem:[#allocation3 + $0x7a0] sm:$0xf0] }
 0x53d   :  { %6794 = vmatpush.bf16.msrb.mxu0 %v8733_v29  ;;  %v11738_v60 = vpop.f32.mrf.mxu0  ;;  %v9684_v29 = vld [vmem:[#allocation3 + $0xb08] sm:$0xf]  ;;  %v9237_v24 = vor.u32 %v10632_v59, %v9236_v62 }
 0x53e   :  { %6769 = vmatmul.bf16.vlgmr.msra.gmra.mxu2 %v11600_v58  ;;  %v9516_v58 = vld [vmem:[#allocation3 + $0x9b8] sm:$0xf] }
 0x53f   :  { %6813 = vmatpush.bf16.msrb.mxu2 %v9377_v25  ;;  %6807 = vmatpush.bf16.msrb.mxu1 %v8957_v41  ;;  %v9517_v9 = vor.u32 %v10702_v57, %v9516_v58  ;;  %v9460_v25 = vld [vmem:[#allocation3 + $0x948] sm:$0xf]  ;;  %v11740_v34 = vpop.f32.mrf.mxu1  ;;  %v10800_v41 = vld [vmem:[#allocation3 + $0xce0] sm:$0xf0]  ;;  %v9852_v58 = vld [vmem:[#allocation3 + $0xc58] sm:$0xf] }
 0x540   :  { %6826 = vmatpush.bf16.msrb.mxu3 %v9601_v26  ;;  %6795 = vmatmul.bf16.vlgmr.msrb.gmra.mxu0 %v11608_v2  ;;  %v9741_v2 = vor.u32 %v10758_v5, %v9740_v45  ;;  %v9937_v26 = vor.u32 %v10807_v20, %v9936_v18  ;;  %v9461_v35 = vor.u32 %v10688_v54, %v9460_v25  ;;  %v10786_v57 = vld [vmem:[#allocation3 + $0xc70] sm:$0xf0] }
 0x541   :  { %6839 = vmatpush.bf16.msra.mxu0 %v9825_v39  ;;  %6782 = vmatmul.bf16.vlgmr.msra.gmra.mxu3 %v11604_v63  ;;  %v9293_v63 = vor.u32 %v10646_v55, %v9292_v43  ;;  %v9908_v39 = vld [vmem:[#allocation3 + $0xcc8] sm:$0xf]  ;;  %v10730_v43 = vld [vmem:[#allocation3 + $0xab0] sm:$0xf0] }
 0x542   :  { %6808 = vmatmul.bf16.vlgmr.msrb.gmra.mxu1 %v11612_v4  ;;  %v10751_v4 = vld [vmem:[#allocation3 + $0xb58] sm:$0xf0]  ;;  %v9909_v30 = vor.u32 %v10800_v41, %v9908_v39 }
 0x543   :  { %6852 = vmatpush.bf16.msra.mxu1 %v10049_v6  ;;  %6814 = vmatpush.bf16.msrb.mxu2 %v9349_v36  ;;  %v9713_v22 = vor.u32 %v10751_v4, %v9712_v14  ;;  %v9685_v6 = vor.u32 %v10744_v31, %v9684_v29  ;;  %v6562_v36 = vpop.f32.mrf.mxu2 }
 0x544   :  { %6827 = vmatpush.bf16.msrb.mxu3 %v9573_v61  ;;  %v10737_v61 = vld [vmem:[#allocation3 + $0xae8] sm:$0xf0]  ;;  %v6575_v3 = vpop.f32.mrf.mxu3 }
 0x545   :  { %6840 = vmatpush.bf16.msra.mxu0 %v9797_v47  ;;  %v9880_v47 = vld [vmem:[#allocation3 + $0xc90] sm:$0xf]  ;;  %v9657_v28 = vor.u32 %v10737_v61, %v9656_v12  ;;  %v6590_v1 = vpop.f32.mrf.mxu0 }
 0x546   :  { %v9881_v52 = vor.u32 %v10793_v40, %v9880_v47 }
 0x547   :  { %6853 = vmatpush.bf16.msra.mxu1 %v10021_v48  ;;  %6815 = vmatpush.bf16.msrb.mxu2 %v9321_v0  ;;  %v9180_v48 = vld [vmem:[#allocation3 + $0x718] sm:$0xf]  ;;  %v10674_v0 = vld [vmem:[#allocation3 + $0x8f0] sm:$0xf0]  ;;  %v6603_v55 = vpop.f32.mrf.mxu1 }
 0x548   :  { %6828 = vmatpush.bf16.msrb.mxu3 %v9545_v19  ;;  %v9628_v19 = vld [vmem:[#allocation3 + $0xa98] sm:$0xf] }
 0x549   :  { %6841 = vmatpush.bf16.msra.mxu0 %v9769_v53  ;;  %v9181_v53 = vor.u32 %v10618_v38, %v9180_v48  ;;  %v9629_v45 = vor.u32 %v10730_v43, %v9628_v19  ;;  %v3825_v19 = vperm.slane %v11742_v8, 6 }
 0x54b   :  { %6854 = vmatpush.bf16.msra.mxu1 %v9993_v42  ;;  %6816 = vmatpush.bf16.msrb.mxu2 %v9293_v63  ;;  %v9405_v42 = vor.u32 %v10674_v0, %v9404_v37  ;;  %v6564_v5 = vpop.f32.mrf.mxu2  ;;  %v9853_v63 = vor.u32 %v10786_v57, %v9852_v58 }
 0x54c   :  { %6829 = vmatpush.bf16.msrb.mxu3 %v9517_v9  ;;  %v6577_v7 = vpop.f32.mrf.mxu3  ;;  %v3823_v9 = vperm.slane %v11742_v8, 4 }
 0x54d   :  { %6842 = vmatpush.bf16.msra.mxu0 %v9741_v2 }
 0x54e   :  { %v6563_v33 = vadd.f32 %v6562_v36, %v3823_v9 }
 0x54f   :  { %6855 = vmatpush.bf16.msra.mxu1 %v9965_v10  ;;  %6817 = vmatpush.bf16.msrb.mxu2 %v9265_v17 }
 0x550   :  { %6830 = vmatpush.bf16.msrb.mxu3 %v9489_v21  ;;  %v6576_v11 = vadd.f32 %v6575_v3, %v6563_v33 }
 0x551   :  { %6843 = vmatpush.bf16.msra.mxu0 %v9713_v22 }
 0x552   :  { %v6589_v2 = vadd.f32 %v11738_v60, %v6576_v11 }
 0x553   :  { %6856 = vmatpush.bf16.msra.mxu1 %v9937_v26  ;;  %6818 = vmatpush.bf16.msrb.mxu2 %v9237_v24 }
 0x554   :  { %6831 = vmatpush.bf16.msrb.mxu3 %v9461_v35  ;;  %v6602_v15 = vadd.f32 %v11740_v34, %v6589_v2  ;;  %v3824_v34 = vperm.slane %v11742_v8, 5 }
 0x555   :  { %6844 = vmatpush.bf16.msra.mxu0 %v9685_v6 }
 0x557   :  { %6857 = vmatpush.bf16.msra.mxu1 %v9909_v30  ;;  %6819 = vmatpush.bf16.msrb.mxu2 %v9209_v56 }
 0x558   :  { %6832 = vmatpush.bf16.msrb.mxu3 %v9433_v23 }
 0x559   :  { %6845 = vmatpush.bf16.msra.mxu0 %v9657_v28 }
 0x55b   :  { %6858 = vmatpush.bf16.msra.mxu1 %v9881_v52  ;;  %6820 = vmatpush.bf16.msrb.mxu2 %v9181_v53 }
 0x55c   :  { %6833 = vmatpush.bf16.msrb.mxu3 %v9405_v42 }
 0x55d   :  { %6846 = vmatpush.bf16.msra.mxu0 %v9629_v45  ;;  %v6640_v13 = vpop.f32.mrf.mxu0 }
 0x55e   :  { %6821 = vmatmul.bf16.vlgmr.msrb.gmra.mxu2 %v11620_v46 }
 0x55f   :  { %6859 = vmatpush.bf16.msra.mxu1 %v9853_v63  ;;  %6834 = vmatmul.bf16.vlgmr.msrb.gmra.mxu3 %v11624_v49  ;;  %v6653_v10 = vpop.f32.mrf.mxu1 }
 0x560   :  { %6847 = vmatmul.bf16.vlgmr.msra.gmra.mxu0 %v11628_v32 }
 0x561   :  { %v6614_v14 = vpop.f32.mrf.mxu2 }
 0x562   :  { %6860 = vmatmul.bf16.vlgmr.msra.gmra.mxu1 %v11632_v27  ;;  %v6615_v4 = vadd.f32 %v6614_v14, %v6602_v15 }
 0x564   :  { %v6627_v17 = vpop.f32.mrf.mxu3 }
 0x565   :  { %v6628_v18 = vadd.f32 %v6627_v17, %v6615_v4  ;;  %v6642_v46 = vpop.f32.mrf.mxu0 }
 0x567   :  { %v6641_v20 = vadd.f32 %v6640_v13, %v6628_v18  ;;  %v6655_v21 = vpop.f32.mrf.mxu1 }
 0x569   :  { %v6654_v49 = vadd.f32 %v6653_v10, %v6641_v20  ;;  %v6616_v62 = vpop.f32.mrf.mxu2 }
 0x56b   :  { %10890 = vtanh.f32 %v6654_v49 }
 0x56c   :  { %v6629_v32 = vpop.f32.mrf.mxu3 }
 0x571   :  { %v10891_v59 = vpop.eup %10890 }
 0x572   :  { %6876 = vst [vmem:[#allocation23 + $0x20] sm:$0xff] %v10891_v59 }
 0x57d   :  { %v6692_v27 = vpop.f32.mrf.mxu0 }
 0x57f   :  { %v6705_v22 = vpop.f32.mrf.mxu1 }
 0x581   :  { %v6666_v25 = vpop.f32.mrf.mxu2 }
 0x582   :  { %v6667_v24 = vadd.f32 %v6666_v25, %v3824_v34 }
 0x584   :  { %v6679_v54 = vpop.f32.mrf.mxu3 }
 0x585   :  { %v6694_v60 = vpop.f32.mrf.mxu0  ;;  %v6680_v39 = vadd.f32 %v6679_v54, %v6667_v24 }
 0x587   :  { %v6707_v26 = vpop.f32.mrf.mxu1  ;;  %v6693_v41 = vadd.f32 %v6692_v27, %v6680_v39 }
 0x589   :  { %v6668_v29 = vpop.f32.mrf.mxu2  ;;  %v6706_v16 = vadd.f32 %v6705_v22, %v6693_v41 }
 0x58c   :  { %v6681_v31 = vpop.f32.mrf.mxu3 }
 0x59d   :  { %v6744_v35 = vpop.f32.mrf.mxu0 }
 0x59f   :  { %v6757_v44 = vpop.f32.mrf.mxu1 }
 0x5a1   :  { %v6718_v6 = vpop.f32.mrf.mxu2 }
 0x5a2   :  { %v6719_v50 = vadd.f32 %v6718_v6, %v6706_v16 }
 0x5a4   :  { %v6731_v51 = vpop.f32.mrf.mxu3 }
 0x5a5   :  { %v6732_v36 = vadd.f32 %v6731_v51, %v6719_v50  ;;  %v6746_v30 = vpop.f32.mrf.mxu0 }
 0x5a7   :  { %v6745_v12 = vadd.f32 %v6744_v35, %v6732_v36  ;;  %v6759_v61 = vpop.f32.mrf.mxu1 }
 0x5a9   :  { %v6758_v3 = vadd.f32 %v6757_v44, %v6745_v12  ;;  %v6720_v56 = vpop.f32.mrf.mxu2 }
 0x5ab   :  { %10892 = vtanh.f32 %v6758_v3 }
 0x5ac   :  { %v6733_v47 = vpop.f32.mrf.mxu3 }
 0x5b1   :  { %v10893_v40 = vpop.eup %10892 }
 0x5b2   :  { %6877 = vst [vmem:[#allocation23 + $0x28] sm:$0xff] %v10893_v40 }
 0x5bd   :  { %v6796_v23 = vpop.f32.mrf.mxu0 }
 0x5bf   :  { %v6809_v48 = vpop.f32.mrf.mxu1 }
 0x5c1   :  { %v6770_v38 = vpop.f32.mrf.mxu2 }
 0x5c2   :  { %v6771_v43 = vadd.f32 %v6770_v38, %v3825_v19 }
 0x5c4   :  { %v6783_v28 = vpop.f32.mrf.mxu3 }
 0x5c5   :  { %v6798_v37 = vpop.f32.mrf.mxu0  ;;  %v6784_v55 = vadd.f32 %v6783_v28, %v6771_v43 }
 0x5c7   :  { %v6811_v0 = vpop.f32.mrf.mxu1  ;;  %v6797_v53 = vadd.f32 %v6796_v23, %v6784_v55 }
 0x5c9   :  { %v6772_v1 = vpop.f32.mrf.mxu2  ;;  %v6810_v42 = vadd.f32 %v6809_v48, %v6797_v53 }
 0x5cc   :  { %v6785_v52 = vpop.f32.mrf.mxu3 }
 0x5dd   :  { %v6848_v58 = vpop.f32.mrf.mxu0 }
 0x5df   :  { %v6861_v57 = vpop.f32.mrf.mxu1 }
 0x5e1   :  { %v6822_v45 = vpop.f32.mrf.mxu2 }
 0x5e2   :  { %v6823_v5 = vadd.f32 %v6822_v45, %v6810_v42  ;;  %v6835_v63 = vpop.f32.mrf.mxu3 }
 0x5e4   :  { %v6836_v7 = vadd.f32 %v6835_v63, %v6823_v5 }
 0x5e5   :  { %v6850_v9 = vpop.f32.mrf.mxu0 }
 0x5e6   :  { %v6849_v33 = vadd.f32 %v6848_v58, %v6836_v7 }
 0x5e7   :  { %v6863_v11 = vpop.f32.mrf.mxu1 }
 0x5e8   :  { %v6862_v2 = vadd.f32 %v6861_v57, %v6849_v33 }
 0x5e9   :  { %v6824_v13 = vpop.f32.mrf.mxu2 }
 0x5ea   :  { %10894 = vtanh.f32 %v6862_v2  ;;  %v6837_v15 = vpop.f32.mrf.mxu3 }
 0x5f0   :  { %v10895_v8 = vpop.eup %10894 }
 0x5f1   :  { %6878 = vst [vmem:[#allocation23 + $0x30] sm:$0xff] %v10895_v8 }
 0x5f2   :  { %6889 = dma.vmem_to_hbm [thread:$0]  %s6885_s11, 896, %s6887_s3, [#allocation7]  }
 0x5f3   :  { %11250 = dma.done.wait [#allocation7], 896  }
 0x5f4   :  { %11251 = vsyncadd [#allocation7], 4294966400 }
 0x5f5   :  { %6894 = vsyncpa [#allocation6], 1 }
 0x5f6   :  { %6895 = vsyncpa [#allocation9], 1 }
 0x5f7   :  { %6896 = vsyncpa [#allocation12], 1 }
 0x5f8   :  { %6897 = vsyncpa [#allocation15], 1 }
 0x5f9   :  { %6898 = vsyncpa [#allocation18], 1 }
 0x5fa   :  { %6899 = vsyncpa [#allocation21], 1 }
 0x5fb   :  { %6900 = vsyncpa [#allocation7], 1 }
 0x5fc   :  { %6901 = vsyncmov [#allocation4] }
 0x5ff   :  { %s6902_s28 = vpop.sfrf %6901 }
 0x600   :  { %p10050_p0 = scmp.ne.s32.totalorder %s6902_s28, 0 }
 0x602   :  { %6906 = shalt.err (%p10050_p0)  }
 0x603   :  { %6908 = vsyncmov [#allocation4 + $0x1] }
 0x606   :  { %s6909_s13 = vpop.sfrf %6908 }
 0x607   :  { %p10051_p1 = scmp.ne.s32.totalorder %s6909_s13, 0 }
 0x609   :  { %6913 = shalt.err (%p10051_p1)  }

</bundles_post_ra>
